<compile_context>
chip_gen: v7x
topology: tpu7x:2x2x1
jax: 0.10.0
libtpu: 0.0.40
codegen_flags: <defaults>
</compile_context>

<pallas_src>
import functools

import jax
import jax.numpy as jnp
import numpy as np
from jax.experimental import pallas as pl
from jax.experimental.pallas import tpu as pltpu

HIDDEN = 128
FF = 512
NHEAD = 4
HEAD_DIM = HIDDEN // NHEAD   # 32
NUM_LAYERS = 2
EPS = 1e-5                   # nn.LayerNorm default eps


# ----------------------------- kernel helpers ------------------------------

def _linear(x, w, b):
    # Cast the activation to the weight dtype (bf16 weights -> bf16 MXU) but
    # always accumulate in f32; bias and downstream math stay f32.
    return jnp.dot(x.astype(w.dtype), w, preferred_element_type=jnp.float32) + b


def _layer_norm(x, gamma, beta, ones_ln):
    # MXU-based statistics: x @ (ones/128) gives the row mean broadcast across
    # all 128 lanes; same for the variance of (x - mu).  Keeps the XLU/VPU
    # slots free (these are the likely bottleneck at such tiny matmul shapes).
    mu = jnp.dot(x, ones_ln, preferred_element_type=jnp.float32)
    d = x - mu
    var = jnp.dot(d * d, ones_ln, preferred_element_type=jnp.float32)
    return d * jax.lax.rsqrt(var + EPS) * gamma + beta


# --------------------------------- kernel ----------------------------------

def _applicant_kernel(*refs, approx_recip):
    cat_ref, text_ref = refs[0], refs[1]
    out_ref = refs[-1]
    p = [r[...] for r in refs[2:-1]]

    tb = cat_ref.shape[0]

    head_bd = p[0]   # (128,128) block-diag, pre-scaled 1/sqrt(head_dim), matmul dtype
    ones_ln = p[1]   # (128,128) f32, all entries 1/128 (LayerNorm statistics)

    # input projections (different weights / input dims per branch)
    wc, bc, wb, bb = p[2:6]
    x0 = jax.nn.relu(_linear(cat_ref[...], wc, bc))    # (tb, 128) categorical
    x1 = jax.nn.relu(_linear(text_ref[...], wb, bb))   # (tb, 128) text
    # stacked sequence tile: rows [0,tb) = position 0, rows [tb,2tb) = pos 1
    x = jnp.concatenate([x0, x1], axis=0)              # (2tb, 128)

    # 2 x TransformerEncoderLayer (post-norm, relu FFN, dropout = identity)
    for l in range(NUM_LAYERS):
        off = 6 + l * 12
        (wqkv, bqkv, wo, bo, w1, b1, w2, b2, g1, be1, g2, be2) = p[off:off + 12]

        qkv = _linear(x, wqkv, bqkv)                   # one N=384 matmul
        q = qkv[:, 0 * HIDDEN:1 * HIDDEN]              # 128-aligned lane slices
        k = qkv[:, 1 * HIDDEN:2 * HIDDEN]
        v = qkv[:, 2 * HIDDEN:3 * HIDDEN]

        # "other sequence position" via XLU sublane rotate (half swap of 2tb)
        k_sw = pltpu.roll(k, shift=tb, axis=0)
        v_sw = pltpu.roll(v, shift=tb, axis=0)

        # per-head scores via the MXU; head_bd broadcasts each head's score
        # across its 32 lanes.  bf16 on the fast path (head_bd dtype).
        s_same = jnp.dot((q * k).astype(head_bd.dtype), head_bd,
                         preferred_element_type=jnp.float32)
        s_cross = jnp.dot((q * k_sw).astype(head_bd.dtype), head_bd,
                          preferred_element_type=jnp.float32)

        # softmax over the 2 keys; reciprocal routed to the EUP when approx
        m = jnp.maximum(s_same, s_cross)
        e_same = jnp.exp(s_same - m)
        e_cross = jnp.exp(s_cross - m)
        w_same = e_same * pl.reciprocal(e_same + e_cross, approx=approx_recip)

        att = v_sw + w_same * (v - v_sw)               # 1-multiply mix
        a = _linear(att, wo, bo)                       # single 128x128 out-proj

        x = _layer_norm(x + a, g1, be1, ones_ln)
        f = _linear(jax.nn.relu(_linear(x, w1, b1)), w2, b2)
        x = _layer_norm(x + f, g2, be2, ones_ln)

    # pooled = cat([transformed[0], transformed[1]], dim=1)  -> (tb, 256)
    pooled = jnp.concatenate([x[:tb, :], x[tb:, :]], axis=-1)

    # fused score/stage heads; output is one lane-dense (tb, 128) slab.
    off = 6 + NUM_LAYERS * 12
    hw1, hb1, hw2, hb2, hw3, hb3 = p[off:off + 6]
    h = jax.nn.relu(_linear(pooled, hw1, hb1))         # (tb, 256) [score|stage]
    h = jax.nn.relu(_linear(h, hw2, hb2))              # (tb, 128) [s64 | t64]
    out_ref[...] = _linear(h, hw3, hb3)                # (tb, 128) padded slab


# ---------------------- parameter fusion (do ONCE) ---------------------------

def prepare_kernel_params(params, num_classes, matmul_dtype=jnp.float32):
    """Fuse / pad / cast the raw parameter list into kernel form.

    Call once at model setup (not per forward) -- these small concat/pad/cast
    ops would otherwise sit on the launch path of every call.
    """
    p = list(params)
    out = []

    def cast_w(w):
        return w.astype(matmul_dtype)

    # constant (128,128) block-diagonal "same head" matrix, pre-scaled
    r = np.arange(HIDDEN) // HEAD_DIM
    head_bd = (r[:, None] == r[None, :]).astype(np.float32) / np.sqrt(HEAD_DIM)
    out.append(jnp.asarray(head_bd, dtype=matmul_dtype))
    # constant all-ones/128 matrix for MXU LayerNorm statistics (kept f32)
    out.append(jnp.full((HIDDEN, HIDDEN), 1.0 / HIDDEN, jnp.float32))

    # input projections (categorical_fc, bert_fc); biases stay f32
    out += [cast_w(p[0]), p[1], cast_w(p[2]), p[3]]

    # encoder layers: fuse q/k/v into one (128,384) weight + (1,384) bias
    for l in range(NUM_LAYERS):
        off = 4 + l * 16
        (wq, bq, wk, bk, wv, bv, wo, bo,
         w1, b1, w2, b2, g1, be1, g2, be2) = p[off:off + 16]
        wqkv = jnp.concatenate([wq, wk, wv], axis=1)    # (128, 384)
        bqkv = jnp.concatenate([bq, bk, bv], axis=1)    # (1, 384)
        out += [cast_w(wqkv), bqkv, cast_w(wo), bo,
                cast_w(w1), b1, cast_w(w2), b2, g1, be1, g2, be2]

    # score / stage heads fused lane-wise / block-diagonally
    off = 4 + NUM_LAYERS * 16
    sw1, sb1, sw2, sb2, sw3, sb3 = p[off:off + 6]
    tw1, tb1, tw2, tb2, tw3, tb3 = p[off + 6:off + 12]

    # layer 1: lane-concat -> one (256,256) matmul
    hw1 = jnp.concatenate([sw1, tw1], axis=1)
    hb1 = jnp.concatenate([sb1, tb1], axis=1)
    # layer 2: block-diagonal -> one (256,128) matmul, lanes [0,64)=score
    z = jnp.zeros((HIDDEN, 64), jnp.float32)
    hw2 = jnp.concatenate([jnp.concatenate([sw2, z], axis=1),
                           jnp.concatenate([z, tw2], axis=1)], axis=0)
    hb2 = jnp.concatenate([sb2, tb2], axis=1)
    # layer 3: block-diagonal, padded to a lane-dense (128,128)/(1,128) output
    hw3 = jnp.zeros((HIDDEN, HIDDEN), jnp.float32)
    hw3 = hw3.at[:64, 0:1].set(sw3)
    hw3 = hw3.at[64:, 1:1 + num_classes].set(tw3)
    hb3 = jnp.zeros((1, HIDDEN), jnp.float32)
    hb3 = hb3.at[:, 0:1].set(sb3)
    hb3 = hb3.at[:, 1:1 + num_classes].set(tb3)
    out += [cast_w(hw1), hb1, cast_w(hw2), hb2, cast_w(hw3), hb3]

    return [jax.device_put(w) for w in out]


# -------------------------------- wrapper -----------------------------------

def _pick_tb(B, max_tb=1024, min_steps=2):
    """Multiple-of-8 divisor of B, <= max_tb, preferring >= min_steps grid steps.

    Per-step overhead is ~0.35us, so prefer large (512-1024 row) tiles on
    v5e/v6e.  When targeting v7x pass min_steps=4 (>= 2 steps per TensorCore)
    so the large text DMA overlaps compute on both cores.
    """
    if B % 8 != 0:
        return B
    cands = [t for t in range(8, min(B, max_tb) + 1, 8) if B % t == 0]
    if not cands:
        return B
    stepped = [t for t in cands if B // t >= min_steps]
    return max(stepped) if stepped else max(cands)


def _vmem_limit_bytes(tb, cat, text, kparams, weights_single_buffered):
    """Demand-based VMEM limit, capped at 40 MiB so it stays v7x-safe."""
    in_tile = tb * cat.shape[1] * cat.dtype.itemsize \
        + tb * text.shape[1] * text.dtype.itemsize
    out_tile = tb * HIDDEN * 4
    tiles = 2 * (in_tile + out_tile)                       # double-buffered
    wbytes = sum(int(np.prod(w.shape)) * w.dtype.itemsize for w in kparams)
    wbytes *= 1 if weights_single_buffered else 2
    scratch = 2 * tb * 4096 + (8 << 20)                    # intermediates + slack
    return int(min(max(tiles + wbytes + scratch, 16 << 20), 40 << 20))


def applicant_transformer_pallas(cat, text, kparams, num_classes, tb=None,
                                 approx_recip=True, min_steps=2, max_tb=1024,
                                 single_buffer_weights=True):
    """Forward pass.  `kparams` must come from prepare_kernel_params()."""
    assert num_classes <= HIDDEN - 1
    B, dc = cat.shape
    dbert = text.shape[1]
    tb = _pick_tb(B, max_tb=max_tb, min_steps=min_steps) if tb is None else tb
    assert B % tb == 0 and (tb % 8 == 0 or tb == B)
    grid = (B // tb,)

    def build_call(buffer_weights_once):
        in_specs = [
            pl.BlockSpec((tb, dc), lambda i: (i, 0)),
            pl.BlockSpec((tb, dbert), lambda i: (i, 0)),
        ]
        for w in kparams:
            if buffer_weights_once:
                # Constant blocks don't need double buffering: halve their VMEM.
                in_specs.append(pl.BlockSpec(w.shape, lambda i: (0, 0),
                                             pipeline_mode=pl.Buffered(1)))
            else:
                in_specs.append(pl.BlockSpec(w.shape, lambda i: (0, 0)))
        return pl.pallas_call(
            functools.partial(_applicant_kernel, approx_recip=approx_recip),
            out_shape=jax.ShapeDtypeStruct((B, HIDDEN), jnp.float32),
            grid_spec=pltpu.PrefetchScalarGridSpec(
                num_scalar_prefetch=0,
                grid=grid,
                in_specs=in_specs,
                out_specs=pl.BlockSpec((tb, HIDDEN), lambda i: (i, 0))),
            compiler_params=pltpu.CompilerParams(
                dimension_semantics=("parallel",),
                vmem_limit_bytes=_vmem_limit_bytes(
                    tb, cat, text, kparams, buffer_weights_once)))

    if single_buffer_weights:
        try:
            out = build_call(True)(cat, text, *kparams)
        except Exception:
            # pipeline_mode=pl.Buffered(1) support varies across JAX versions;
            # fall back to default double-buffering (genuine errors re-raise).
            out = build_call(False)(cat, text, *kparams)
    else:
        out = build_call(False)(cat, text, *kparams)

    # lane-dense output slab: score in lane 0, stage logits in lanes 1..C
    return out[:, 0:1], out[:, 1:1 + num_classes]


# --------------------------- deterministic params ---------------------------

def init_params(key, cat_dim, bert_dim, num_classes):
    params = []

    def nxt():
        nonlocal key
        key, sub = jax.random.split(key)
        return sub

    def lin(din, dout):
        w = jax.random.normal(nxt(), (din, dout), jnp.float32) / np.sqrt(din)
        b = jax.random.normal(nxt(), (1, dout), jnp.float32) * 0.01
        return [w, b]

    params += lin(cat_dim, HIDDEN)      # categorical_fc
    params += lin(bert_dim, HIDDEN)     # bert_fc
    for _ in range(NUM_LAYERS):
        params += lin(HIDDEN, HIDDEN)   # wq, bq
        params += lin(HIDDEN, HIDDEN)   # wk, bk
        params += lin(HIDDEN, HIDDEN)   # wv, bv
        params += lin(HIDDEN, HIDDEN)   # out_proj
        params += lin(HIDDEN, FF)       # linear1
        params += lin(FF, HIDDEN)       # linear2
        params += [jnp.ones((1, HIDDEN), jnp.float32),   # norm1 gamma
                   jnp.zeros((1, HIDDEN), jnp.float32),  # norm1 beta
                   jnp.ones((1, HIDDEN), jnp.float32),   # norm2 gamma
                   jnp.zeros((1, HIDDEN), jnp.float32)]  # norm2 beta
    params += lin(256, 128) + lin(128, 64) + lin(64, 1)            # score head
    params += lin(256, 128) + lin(128, 64) + lin(64, num_classes)  # stage head
    return params


# -------------------------- pure-JAX reference ------------------------------

def reference(cat, text, params, num_classes):
    p = params
    x0 = jax.nn.relu(cat @ p[0] + p[1])
    x1 = jax.nn.relu(text @ p[2] + p[3])
    x = jnp.stack([x0, x1], axis=0)                     # (2, B, 128)

    def ln(y, g, b):
        mu = y.mean(-1, keepdims=True)
        var = ((y - mu) ** 2).mean(-1, keepdims=True)
        return (y - mu) / jnp.sqrt(var + EPS) * g + b

    for l in range(NUM_LAYERS):
        off = 4 + l * 16
        (wq, bq, wk, bk, wv, bv, wo, bo,
         w1, b1, w2, b2, g1, be1, g2, be2) = p[off:off + 16]
        S, B, _ = x.shape
        q = (x @ wq + bq).reshape(S, B, NHEAD, HEAD_DIM)
        k = (x @ wk + bk).reshape(S, B, NHEAD, HEAD_DIM)
        v = (x @ wv + bv).reshape(S, B, NHEAD, HEAD_DIM)
        scores = jnp.einsum('sbhd,tbhd->bhst', q, k) / (HEAD_DIM ** 0.5)
        probs = jax.nn.softmax(scores, axis=-1)
        attn = jnp.einsum('bhst,tbhd->sbhd', probs, v).reshape(S, B, HIDDEN)
        attn = attn @ wo + bo
        x = ln(x + attn, g1, be1)
        ff = jax.nn.relu(x @ w1 + b1) @ w2 + b2
        x = ln(x + ff, g2, be2)

    pooled = jnp.concatenate([x[0], x[1]], axis=-1)
    off = 4 + NUM_LAYERS * 16
    sw1, sb1, sw2, sb2, sw3, sb3 = p[off:off + 6]
    tw1, tb1, tw2, tb2, tw3, tb3 = p[off + 6:off + 12]
    h = jax.nn.relu(pooled @ sw1 + sb1)
    h = jax.nn.relu(h @ sw2 + sb2)
    score = h @ sw3 + sb3
    g = jax.nn.relu(pooled @ tw1 + tb1)
    g = jax.nn.relu(g @ tw2 + tb2)
    stage = g @ tw3 + tb3
    return score, stage


# ----------------------------------- main ------------------------------------

if __name__ == "__main__":
    # TODO(synk): dropout (p=0.1 / p=0.2) is an inference-mode identity here.
    B, CAT_DIM, BERT_DIM, NUM_CLASSES = 8, 16, 768, 5

    key = jax.random.PRNGKey(0)
    k1, k2, k3 = jax.random.split(key, 3)
    cat = jax.random.normal(k1, (B, CAT_DIM), jnp.float32)
    text = jax.random.normal(k2, (B, BERT_DIM), jnp.float32)
    params = init_params(k3, CAT_DIM, BERT_DIM, NUM_CLASSES)

    ref_score, ref_stage = reference(cat, text, params, NUM_CLASSES)

    # exact path (f32 weights, exact reciprocal) -> tight numeric check
    kparams_f32 = prepare_kernel_params(params, NUM_CLASSES, jnp.float32)
    score, stage = applicant_transformer_pallas(
        cat, text, kparams_f32, NUM_CLASSES, approx_recip=False)
    jax.block_until_ready((score, stage))
    assert score.shape == (B, 1) and stage.shape == (B, NUM_CLASSES)
    np.testing.assert_allclose(np.asarray(score), np.asarray(ref_score),
                               rtol=2e-4, atol=2e-4)
    np.testing.assert_allclose(np.asarray(stage), np.asarray(ref_stage),
                               rtol=2e-4, atol=2e-4)

    # fast path: bf16 weights + bf16 score matmuls + EUP approx reciprocal.
    # Inputs stay f32 (no wrapper-side cast / extra HBM round trip); the
    # in-kernel .astype(w.dtype) still gives bf16 MXU matmuls.
    kparams_bf16 = prepare_kernel_params(params, NUM_CLASSES, jnp.bfloat16)
    score_bf, stage_bf = applicant_transformer_pallas(
        cat, text, kparams_bf16, NUM_CLASSES, approx_recip=True)
    jax.block_until_ready((score_bf, stage_bf))
    np.testing.assert_allclose(np.asarray(score_bf), np.asarray(ref_score),
                               rtol=5e-2, atol=5e-2)
    np.testing.assert_allclose(np.asarray(stage_bf), np.asarray(ref_stage),
                               rtol=5e-2, atol=5e-2)

    print("KERNEL_OK")
</pallas_src>

<mosaic_0001>
module attributes {stable_mosaic.version = 11 : i64} {
  func.func @_applicant_kernel(%arg0: i32, %arg1: memref<8x16xf32, #tpu.memory_space<vmem>>, %arg2: memref<8x768xf32, #tpu.memory_space<vmem>>, %arg3: memref<128x128xf32, #tpu.memory_space<vmem>>, %arg4: memref<128x128xf32, #tpu.memory_space<vmem>>, %arg5: memref<16x128xf32, #tpu.memory_space<vmem>>, %arg6: memref<1x128xf32, #tpu.memory_space<vmem>>, %arg7: memref<768x128xf32, #tpu.memory_space<vmem>>, %arg8: memref<1x128xf32, #tpu.memory_space<vmem>>, %arg9: memref<128x384xf32, #tpu.memory_space<vmem>>, %arg10: memref<1x384xf32, #tpu.memory_space<vmem>>, %arg11: memref<128x128xf32, #tpu.memory_space<vmem>>, %arg12: memref<1x128xf32, #tpu.memory_space<vmem>>, %arg13: memref<128x512xf32, #tpu.memory_space<vmem>>, %arg14: memref<1x512xf32, #tpu.memory_space<vmem>>, %arg15: memref<512x128xf32, #tpu.memory_space<vmem>>, %arg16: memref<1x128xf32, #tpu.memory_space<vmem>>, %arg17: memref<1x128xf32, #tpu.memory_space<vmem>>, %arg18: memref<1x128xf32, #tpu.memory_space<vmem>>, %arg19: memref<1x128xf32, #tpu.memory_space<vmem>>, %arg20: memref<1x128xf32, #tpu.memory_space<vmem>>, %arg21: memref<128x384xf32, #tpu.memory_space<vmem>>, %arg22: memref<1x384xf32, #tpu.memory_space<vmem>>, %arg23: memref<128x128xf32, #tpu.memory_space<vmem>>, %arg24: memref<1x128xf32, #tpu.memory_space<vmem>>, %arg25: memref<128x512xf32, #tpu.memory_space<vmem>>, %arg26: memref<1x512xf32, #tpu.memory_space<vmem>>, %arg27: memref<512x128xf32, #tpu.memory_space<vmem>>, %arg28: memref<1x128xf32, #tpu.memory_space<vmem>>, %arg29: memref<1x128xf32, #tpu.memory_space<vmem>>, %arg30: memref<1x128xf32, #tpu.memory_space<vmem>>, %arg31: memref<1x128xf32, #tpu.memory_space<vmem>>, %arg32: memref<1x128xf32, #tpu.memory_space<vmem>>, %arg33: memref<256x256xf32, #tpu.memory_space<vmem>>, %arg34: memref<1x256xf32, #tpu.memory_space<vmem>>, %arg35: memref<256x128xf32, #tpu.memory_space<vmem>>, %arg36: memref<1x128xf32, #tpu.memory_space<vmem>>, %arg37: memref<128x128xf32, #tpu.memory_space<vmem>>, %arg38: memref<1x128xf32, #tpu.memory_space<vmem>>, %arg39: memref<8x128xf32, #tpu.memory_space<vmem>>) attributes {dimension_semantics = [#tpu.dimension_semantics<parallel>], iteration_bounds = array<i64: 1>, scalar_prefetch = 0 : i64, scratch_operands = 0 : i64, tpu.core_type = #tpu.core_type<tc>, window_params = [{transform_indices = @transform_0, window_bounds = array<i64: 8, 16>}, {transform_indices = @transform_1, window_bounds = array<i64: 8, 768>}, {pipeline_mode = #tpu.pipeline_mode<synchronous>, transform_indices = @transform_2, window_bounds = array<i64: 128, 128>}, {pipeline_mode = #tpu.pipeline_mode<synchronous>, transform_indices = @transform_3, window_bounds = array<i64: 128, 128>}, {pipeline_mode = #tpu.pipeline_mode<synchronous>, transform_indices = @transform_4, window_bounds = array<i64: 16, 128>}, {pipeline_mode = #tpu.pipeline_mode<synchronous>, transform_indices = @transform_5, window_bounds = array<i64: 1, 128>}, {pipeline_mode = #tpu.pipeline_mode<synchronous>, transform_indices = @transform_6, window_bounds = array<i64: 768, 128>}, {pipeline_mode = #tpu.pipeline_mode<synchronous>, transform_indices = @transform_7, window_bounds = array<i64: 1, 128>}, {pipeline_mode = #tpu.pipeline_mode<synchronous>, transform_indices = @transform_8, window_bounds = array<i64: 128, 384>}, {pipeline_mode = #tpu.pipeline_mode<synchronous>, transform_indices = @transform_9, window_bounds = array<i64: 1, 384>}, {pipeline_mode = #tpu.pipeline_mode<synchronous>, transform_indices = @transform_10, window_bounds = array<i64: 128, 128>}, {pipeline_mode = #tpu.pipeline_mode<synchronous>, transform_indices = @transform_11, window_bounds = array<i64: 1, 128>}, {pipeline_mode = #tpu.pipeline_mode<synchronous>, transform_indices = @transform_12, window_bounds = array<i64: 128, 512>}, {pipeline_mode = #tpu.pipeline_mode<synchronous>, transform_indices = @transform_13, window_bounds = array<i64: 1, 512>}, {pipeline_mode = #tpu.pipeline_mode<synchronous>, transform_indices = @transform_14, window_bounds = array<i64: 512, 128>}, {pipeline_mode = #tpu.pipeline_mode<synchronous>, transform_indices = @transform_15, window_bounds = array<i64: 1, 128>}, {pipeline_mode = #tpu.pipeline_mode<synchronous>, transform_indices = @transform_16, window_bounds = array<i64: 1, 128>}, {pipeline_mode = #tpu.pipeline_mode<synchronous>, transform_indices = @transform_17, window_bounds = array<i64: 1, 128>}, {pipeline_mode = #tpu.pipeline_mode<synchronous>, transform_indices = @transform_18, window_bounds = array<i64: 1, 128>}, {pipeline_mode = #tpu.pipeline_mode<synchronous>, transform_indices = @transform_19, window_bounds = array<i64: 1, 128>}, {pipeline_mode = #tpu.pipeline_mode<synchronous>, transform_indices = @transform_20, window_bounds = array<i64: 128, 384>}, {pipeline_mode = #tpu.pipeline_mode<synchronous>, transform_indices = @transform_21, window_bounds = array<i64: 1, 384>}, {pipeline_mode = #tpu.pipeline_mode<synchronous>, transform_indices = @transform_22, window_bounds = array<i64: 128, 128>}, {pipeline_mode = #tpu.pipeline_mode<synchronous>, transform_indices = @transform_23, window_bounds = array<i64: 1, 128>}, {pipeline_mode = #tpu.pipeline_mode<synchronous>, transform_indices = @transform_24, window_bounds = array<i64: 128, 512>}, {pipeline_mode = #tpu.pipeline_mode<synchronous>, transform_indices = @transform_25, window_bounds = array<i64: 1, 512>}, {pipeline_mode = #tpu.pipeline_mode<synchronous>, transform_indices = @transform_26, window_bounds = array<i64: 512, 128>}, {pipeline_mode = #tpu.pipeline_mode<synchronous>, transform_indices = @transform_27, window_bounds = array<i64: 1, 128>}, {pipeline_mode = #tpu.pipeline_mode<synchronous>, transform_indices = @transform_28, window_bounds = array<i64: 1, 128>}, {pipeline_mode = #tpu.pipeline_mode<synchronous>, transform_indices = @transform_29, window_bounds = array<i64: 1, 128>}, {pipeline_mode = #tpu.pipeline_mode<synchronous>, transform_indices = @transform_30, window_bounds = array<i64: 1, 128>}, {pipeline_mode = #tpu.pipeline_mode<synchronous>, transform_indices = @transform_31, window_bounds = array<i64: 1, 128>}, {pipeline_mode = #tpu.pipeline_mode<synchronous>, transform_indices = @transform_32, window_bounds = array<i64: 256, 256>}, {pipeline_mode = #tpu.pipeline_mode<synchronous>, transform_indices = @transform_33, window_bounds = array<i64: 1, 256>}, {pipeline_mode = #tpu.pipeline_mode<synchronous>, transform_indices = @transform_34, window_bounds = array<i64: 256, 128>}, {pipeline_mode = #tpu.pipeline_mode<synchronous>, transform_indices = @transform_35, window_bounds = array<i64: 1, 128>}, {pipeline_mode = #tpu.pipeline_mode<synchronous>, transform_indices = @transform_36, window_bounds = array<i64: 128, 128>}, {pipeline_mode = #tpu.pipeline_mode<synchronous>, transform_indices = @transform_37, window_bounds = array<i64: 1, 128>}, {transform_indices = @transform_38, window_bounds = array<i64: 8, 128>}]} {
    %c0 = arith.constant 0 : index
    %c0_0 = arith.constant 0 : index
    %0 = vector.load %arg3[%c0, %c0_0] : memref<128x128xf32, #tpu.memory_space<vmem>>, vector<128x128xf32>
    %c0_1 = arith.constant 0 : index
    %c0_2 = arith.constant 0 : index
    %1 = vector.load %arg4[%c0_1, %c0_2] : memref<128x128xf32, #tpu.memory_space<vmem>>, vector<128x128xf32>
    %c0_3 = arith.constant 0 : index
    %c0_4 = arith.constant 0 : index
    %2 = vector.load %arg5[%c0_3, %c0_4] : memref<16x128xf32, #tpu.memory_space<vmem>>, vector<16x128xf32>
    %c0_5 = arith.constant 0 : index
    %c0_6 = arith.constant 0 : index
    %3 = vector.load %arg6[%c0_5, %c0_6] : memref<1x128xf32, #tpu.memory_space<vmem>>, vector<1x128xf32>
    %c0_7 = arith.constant 0 : index
    %c0_8 = arith.constant 0 : index
    %4 = vector.load %arg7[%c0_7, %c0_8] : memref<768x128xf32, #tpu.memory_space<vmem>>, vector<768x128xf32>
    %c0_9 = arith.constant 0 : index
    %c0_10 = arith.constant 0 : index
    %5 = vector.load %arg8[%c0_9, %c0_10] : memref<1x128xf32, #tpu.memory_space<vmem>>, vector<1x128xf32>
    %c0_11 = arith.constant 0 : index
    %c0_12 = arith.constant 0 : index
    %6 = vector.load %arg9[%c0_11, %c0_12] : memref<128x384xf32, #tpu.memory_space<vmem>>, vector<128x384xf32>
    %c0_13 = arith.constant 0 : index
    %c0_14 = arith.constant 0 : index
    %7 = vector.load %arg10[%c0_13, %c0_14] : memref<1x384xf32, #tpu.memory_space<vmem>>, vector<1x384xf32>
    %c0_15 = arith.constant 0 : index
    %c0_16 = arith.constant 0 : index
    %8 = vector.load %arg11[%c0_15, %c0_16] : memref<128x128xf32, #tpu.memory_space<vmem>>, vector<128x128xf32>
    %c0_17 = arith.constant 0 : index
    %c0_18 = arith.constant 0 : index
    %9 = vector.load %arg12[%c0_17, %c0_18] : memref<1x128xf32, #tpu.memory_space<vmem>>, vector<1x128xf32>
    %c0_19 = arith.constant 0 : index
    %c0_20 = arith.constant 0 : index
    %10 = vector.load %arg13[%c0_19, %c0_20] : memref<128x512xf32, #tpu.memory_space<vmem>>, vector<128x512xf32>
    %c0_21 = arith.constant 0 : index
    %c0_22 = arith.constant 0 : index
    %11 = vector.load %arg14[%c0_21, %c0_22] : memref<1x512xf32, #tpu.memory_space<vmem>>, vector<1x512xf32>
    %c0_23 = arith.constant 0 : index
    %c0_24 = arith.constant 0 : index
    %12 = vector.load %arg15[%c0_23, %c0_24] : memref<512x128xf32, #tpu.memory_space<vmem>>, vector<512x128xf32>
    %c0_25 = arith.constant 0 : index
    %c0_26 = arith.constant 0 : index
    %13 = vector.load %arg16[%c0_25, %c0_26] : memref<1x128xf32, #tpu.memory_space<vmem>>, vector<1x128xf32>
    %c0_27 = arith.constant 0 : index
    %c0_28 = arith.constant 0 : index
    %14 = vector.load %arg17[%c0_27, %c0_28] : memref<1x128xf32, #tpu.memory_space<vmem>>, vector<1x128xf32>
    %c0_29 = arith.constant 0 : index
    %c0_30 = arith.constant 0 : index
    %15 = vector.load %arg18[%c0_29, %c0_30] : memref<1x128xf32, #tpu.memory_space<vmem>>, vector<1x128xf32>
    %c0_31 = arith.constant 0 : index
    %c0_32 = arith.constant 0 : index
    %16 = vector.load %arg19[%c0_31, %c0_32] : memref<1x128xf32, #tpu.memory_space<vmem>>, vector<1x128xf32>
    %c0_33 = arith.constant 0 : index
    %c0_34 = arith.constant 0 : index
    %17 = vector.load %arg20[%c0_33, %c0_34] : memref<1x128xf32, #tpu.memory_space<vmem>>, vector<1x128xf32>
    %c0_35 = arith.constant 0 : index
    %c0_36 = arith.constant 0 : index
    %18 = vector.load %arg21[%c0_35, %c0_36] : memref<128x384xf32, #tpu.memory_space<vmem>>, vector<128x384xf32>
    %c0_37 = arith.constant 0 : index
    %c0_38 = arith.constant 0 : index
    %19 = vector.load %arg22[%c0_37, %c0_38] : memref<1x384xf32, #tpu.memory_space<vmem>>, vector<1x384xf32>
    %c0_39 = arith.constant 0 : index
    %c0_40 = arith.constant 0 : index
    %20 = vector.load %arg23[%c0_39, %c0_40] : memref<128x128xf32, #tpu.memory_space<vmem>>, vector<128x128xf32>
    %c0_41 = arith.constant 0 : index
    %c0_42 = arith.constant 0 : index
    %21 = vector.load %arg24[%c0_41, %c0_42] : memref<1x128xf32, #tpu.memory_space<vmem>>, vector<1x128xf32>
    %c0_43 = arith.constant 0 : index
    %c0_44 = arith.constant 0 : index
    %22 = vector.load %arg25[%c0_43, %c0_44] : memref<128x512xf32, #tpu.memory_space<vmem>>, vector<128x512xf32>
    %c0_45 = arith.constant 0 : index
    %c0_46 = arith.constant 0 : index
    %23 = vector.load %arg26[%c0_45, %c0_46] : memref<1x512xf32, #tpu.memory_space<vmem>>, vector<1x512xf32>
    %c0_47 = arith.constant 0 : index
    %c0_48 = arith.constant 0 : index
    %24 = vector.load %arg27[%c0_47, %c0_48] : memref<512x128xf32, #tpu.memory_space<vmem>>, vector<512x128xf32>
    %c0_49 = arith.constant 0 : index
    %c0_50 = arith.constant 0 : index
    %25 = vector.load %arg28[%c0_49, %c0_50] : memref<1x128xf32, #tpu.memory_space<vmem>>, vector<1x128xf32>
    %c0_51 = arith.constant 0 : index
    %c0_52 = arith.constant 0 : index
    %26 = vector.load %arg29[%c0_51, %c0_52] : memref<1x128xf32, #tpu.memory_space<vmem>>, vector<1x128xf32>
    %c0_53 = arith.constant 0 : index
    %c0_54 = arith.constant 0 : index
    %27 = vector.load %arg30[%c0_53, %c0_54] : memref<1x128xf32, #tpu.memory_space<vmem>>, vector<1x128xf32>
    %c0_55 = arith.constant 0 : index
    %c0_56 = arith.constant 0 : index
    %28 = vector.load %arg31[%c0_55, %c0_56] : memref<1x128xf32, #tpu.memory_space<vmem>>, vector<1x128xf32>
    %c0_57 = arith.constant 0 : index
    %c0_58 = arith.constant 0 : index
    %29 = vector.load %arg32[%c0_57, %c0_58] : memref<1x128xf32, #tpu.memory_space<vmem>>, vector<1x128xf32>
    %c0_59 = arith.constant 0 : index
    %c0_60 = arith.constant 0 : index
    %30 = vector.load %arg33[%c0_59, %c0_60] : memref<256x256xf32, #tpu.memory_space<vmem>>, vector<256x256xf32>
    %c0_61 = arith.constant 0 : index
    %c0_62 = arith.constant 0 : index
    %31 = vector.load %arg34[%c0_61, %c0_62] : memref<1x256xf32, #tpu.memory_space<vmem>>, vector<1x256xf32>
    %c0_63 = arith.constant 0 : index
    %c0_64 = arith.constant 0 : index
    %32 = vector.load %arg35[%c0_63, %c0_64] : memref<256x128xf32, #tpu.memory_space<vmem>>, vector<256x128xf32>
    %c0_65 = arith.constant 0 : index
    %c0_66 = arith.constant 0 : index
    %33 = vector.load %arg36[%c0_65, %c0_66] : memref<1x128xf32, #tpu.memory_space<vmem>>, vector<1x128xf32>
    %c0_67 = arith.constant 0 : index
    %c0_68 = arith.constant 0 : index
    %34 = vector.load %arg37[%c0_67, %c0_68] : memref<128x128xf32, #tpu.memory_space<vmem>>, vector<128x128xf32>
    %c0_69 = arith.constant 0 : index
    %c0_70 = arith.constant 0 : index
    %35 = vector.load %arg38[%c0_69, %c0_70] : memref<1x128xf32, #tpu.memory_space<vmem>>, vector<1x128xf32>
    %c0_71 = arith.constant 0 : index
    %c0_72 = arith.constant 0 : index
    %36 = vector.load %arg1[%c0_71, %c0_72] : memref<8x16xf32, #tpu.memory_space<vmem>>, vector<8x16xf32>
    %cst = arith.constant dense<0.000000e+00> : vector<8x128xf32>
    %37 = tpu.matmul %36, %2, %cst {dimension_numbers = #tpu.dot_dimension_numbers<[1], [0], [0], [1], [0, 0, 1, 1], [], []>} : vector<8x16xf32>, vector<16x128xf32>, vector<8x128xf32> -> vector<8x128xf32>
    %38 = vector.broadcast %3 : vector<1x128xf32> to vector<8x128xf32>
    %39 = arith.addf %37, %38 : vector<8x128xf32>
    %cst_73 = arith.constant 0.000000e+00 : f32
    %40 = vector.broadcast %cst_73 : f32 to vector<8x128xf32>
    %41 = arith.maximumf %39, %40 : vector<8x128xf32>
    %c0_74 = arith.constant 0 : index
    %c0_75 = arith.constant 0 : index
    %42 = vector.load %arg2[%c0_74, %c0_75] : memref<8x768xf32, #tpu.memory_space<vmem>>, vector<8x768xf32>
    %cst_76 = arith.constant dense<0.000000e+00> : vector<8x128xf32>
    %43 = tpu.matmul %42, %4, %cst_76 {dimension_numbers = #tpu.dot_dimension_numbers<[1], [0], [0], [1], [0, 0, 1, 1], [], []>} : vector<8x768xf32>, vector<768x128xf32>, vector<8x128xf32> -> vector<8x128xf32>
    %44 = vector.broadcast %5 : vector<1x128xf32> to vector<8x128xf32>
    %45 = arith.addf %43, %44 : vector<8x128xf32>
    %cst_77 = arith.constant 0.000000e+00 : f32
    %46 = vector.broadcast %cst_77 : f32 to vector<8x128xf32>
    %47 = arith.maximumf %45, %46 : vector<8x128xf32>
    %48 = tpu.concatenate %41, %47 in 0 : vector<8x128xf32>, vector<8x128xf32> -> vector<16x128xf32>
    %cst_78 = arith.constant dense<0.000000e+00> : vector<16x384xf32>
    %49 = tpu.matmul %48, %6, %cst_78 {dimension_numbers = #tpu.dot_dimension_numbers<[1], [0], [0], [1], [0, 0, 1, 1], [], []>} : vector<16x128xf32>, vector<128x384xf32>, vector<16x384xf32> -> vector<16x384xf32>
    %50 = vector.broadcast %7 : vector<1x384xf32> to vector<16x384xf32>
    %51 = arith.addf %49, %50 : vector<16x384xf32>
    %52 = vector.extract_strided_slice %51 {offsets = [0, 0], sizes = [16, 128], strides = [1, 1]} : vector<16x384xf32> to vector<16x128xf32>
    %53 = vector.extract_strided_slice %51 {offsets = [0, 128], sizes = [16, 128], strides = [1, 1]} : vector<16x384xf32> to vector<16x128xf32>
    %54 = vector.extract_strided_slice %51 {offsets = [0, 256], sizes = [16, 128], strides = [1, 1]} : vector<16x384xf32> to vector<16x128xf32>
    %c8_i32 = arith.constant 8 : i32
    %55 = tpu.dynamic_rotate %53 by %c8_i32 dim 0 : vector<16x128xf32>, i32 -> vector<16x128xf32>
    %c8_i32_79 = arith.constant 8 : i32
    %56 = tpu.dynamic_rotate %54 by %c8_i32_79 dim 0 : vector<16x128xf32>, i32 -> vector<16x128xf32>
    %57 = arith.mulf %52, %53 : vector<16x128xf32>
    %cst_80 = arith.constant dense<0.000000e+00> : vector<16x128xf32>
    %58 = tpu.matmul %57, %0, %cst_80 {dimension_numbers = #tpu.dot_dimension_numbers<[1], [0], [0], [1], [0, 0, 1, 1], [], []>} : vector<16x128xf32>, vector<128x128xf32>, vector<16x128xf32> -> vector<16x128xf32>
    %59 = arith.mulf %52, %55 : vector<16x128xf32>
    %cst_81 = arith.constant dense<0.000000e+00> : vector<16x128xf32>
    %60 = tpu.matmul %59, %0, %cst_81 {dimension_numbers = #tpu.dot_dimension_numbers<[1], [0], [0], [1], [0, 0, 1, 1], [], []>} : vector<16x128xf32>, vector<128x128xf32>, vector<16x128xf32> -> vector<16x128xf32>
    %61 = arith.maximumf %58, %60 : vector<16x128xf32>
    %62 = arith.subf %58, %61 : vector<16x128xf32>
    %63 = math.exp %62 : vector<16x128xf32>
    %64 = arith.subf %60, %61 : vector<16x128xf32>
    %65 = math.exp %64 : vector<16x128xf32>
    %66 = arith.addf %63, %65 : vector<16x128xf32>
    %67 = tpu.reciprocal %66 : vector<16x128xf32> -> vector<16x128xf32>
    %68 = arith.mulf %63, %67 : vector<16x128xf32>
    %69 = arith.subf %54, %56 : vector<16x128xf32>
    %70 = arith.mulf %68, %69 : vector<16x128xf32>
    %71 = arith.addf %56, %70 : vector<16x128xf32>
    %cst_82 = arith.constant dense<0.000000e+00> : vector<16x128xf32>
    %72 = tpu.matmul %71, %8, %cst_82 {dimension_numbers = #tpu.dot_dimension_numbers<[1], [0], [0], [1], [0, 0, 1, 1], [], []>} : vector<16x128xf32>, vector<128x128xf32>, vector<16x128xf32> -> vector<16x128xf32>
    %73 = vector.broadcast %9 : vector<1x128xf32> to vector<16x128xf32>
    %74 = arith.addf %72, %73 : vector<16x128xf32>
    %75 = arith.addf %48, %74 : vector<16x128xf32>
    %cst_83 = arith.constant dense<0.000000e+00> : vector<16x128xf32>
    %76 = tpu.matmul %75, %1, %cst_83 {dimension_numbers = #tpu.dot_dimension_numbers<[1], [0], [0], [1], [0, 0, 1, 1], [], []>} : vector<16x128xf32>, vector<128x128xf32>, vector<16x128xf32> -> vector<16x128xf32>
    %77 = arith.subf %75, %76 : vector<16x128xf32>
    %78 = arith.mulf %77, %77 : vector<16x128xf32>
    %cst_84 = arith.constant dense<0.000000e+00> : vector<16x128xf32>
    %79 = tpu.matmul %78, %1, %cst_84 {dimension_numbers = #tpu.dot_dimension_numbers<[1], [0], [0], [1], [0, 0, 1, 1], [], []>} : vector<16x128xf32>, vector<128x128xf32>, vector<16x128xf32> -> vector<16x128xf32>
    %cst_85 = arith.constant 9.99999974E-6 : f32
    %80 = vector.broadcast %cst_85 : f32 to vector<16x128xf32>
    %81 = arith.addf %79, %80 : vector<16x128xf32>
    %82 = math.rsqrt %81 : vector<16x128xf32>
    %83 = arith.mulf %77, %82 : vector<16x128xf32>
    %84 = vector.broadcast %14 : vector<1x128xf32> to vector<16x128xf32>
    %85 = arith.mulf %83, %84 : vector<16x128xf32>
    %86 = vector.broadcast %15 : vector<1x128xf32> to vector<16x128xf32>
    %87 = arith.addf %85, %86 : vector<16x128xf32>
    %cst_86 = arith.constant dense<0.000000e+00> : vector<16x512xf32>
    %88 = tpu.matmul %87, %10, %cst_86 {dimension_numbers = #tpu.dot_dimension_numbers<[1], [0], [0], [1], [0, 0, 1, 1], [], []>} : vector<16x128xf32>, vector<128x512xf32>, vector<16x512xf32> -> vector<16x512xf32>
    %89 = vector.broadcast %11 : vector<1x512xf32> to vector<16x512xf32>
    %90 = arith.addf %88, %89 : vector<16x512xf32>
    %cst_87 = arith.constant 0.000000e+00 : f32
    %91 = vector.broadcast %cst_87 : f32 to vector<16x512xf32>
    %92 = arith.maximumf %90, %91 : vector<16x512xf32>
    %cst_88 = arith.constant dense<0.000000e+00> : vector<16x128xf32>
    %93 = tpu.matmul %92, %12, %cst_88 {dimension_numbers = #tpu.dot_dimension_numbers<[1], [0], [0], [1], [0, 0, 1, 1], [], []>} : vector<16x512xf32>, vector<512x128xf32>, vector<16x128xf32> -> vector<16x128xf32>
    %94 = vector.broadcast %13 : vector<1x128xf32> to vector<16x128xf32>
    %95 = arith.addf %93, %94 : vector<16x128xf32>
    %96 = arith.addf %87, %95 : vector<16x128xf32>
    %cst_89 = arith.constant dense<0.000000e+00> : vector<16x128xf32>
    %97 = tpu.matmul %96, %1, %cst_89 {dimension_numbers = #tpu.dot_dimension_numbers<[1], [0], [0], [1], [0, 0, 1, 1], [], []>} : vector<16x128xf32>, vector<128x128xf32>, vector<16x128xf32> -> vector<16x128xf32>
    %98 = arith.subf %96, %97 : vector<16x128xf32>
    %99 = arith.mulf %98, %98 : vector<16x128xf32>
    %cst_90 = arith.constant dense<0.000000e+00> : vector<16x128xf32>
    %100 = tpu.matmul %99, %1, %cst_90 {dimension_numbers = #tpu.dot_dimension_numbers<[1], [0], [0], [1], [0, 0, 1, 1], [], []>} : vector<16x128xf32>, vector<128x128xf32>, vector<16x128xf32> -> vector<16x128xf32>
    %cst_91 = arith.constant 9.99999974E-6 : f32
    %101 = vector.broadcast %cst_91 : f32 to vector<16x128xf32>
    %102 = arith.addf %100, %101 : vector<16x128xf32>
    %103 = math.rsqrt %102 : vector<16x128xf32>
    %104 = arith.mulf %98, %103 : vector<16x128xf32>
    %105 = vector.broadcast %16 : vector<1x128xf32> to vector<16x128xf32>
    %106 = arith.mulf %104, %105 : vector<16x128xf32>
    %107 = vector.broadcast %17 : vector<1x128xf32> to vector<16x128xf32>
    %108 = arith.addf %106, %107 : vector<16x128xf32>
    %cst_92 = arith.constant dense<0.000000e+00> : vector<16x384xf32>
    %109 = tpu.matmul %108, %18, %cst_92 {dimension_numbers = #tpu.dot_dimension_numbers<[1], [0], [0], [1], [0, 0, 1, 1], [], []>} : vector<16x128xf32>, vector<128x384xf32>, vector<16x384xf32> -> vector<16x384xf32>
    %110 = vector.broadcast %19 : vector<1x384xf32> to vector<16x384xf32>
    %111 = arith.addf %109, %110 : vector<16x384xf32>
    %112 = vector.extract_strided_slice %111 {offsets = [0, 0], sizes = [16, 128], strides = [1, 1]} : vector<16x384xf32> to vector<16x128xf32>
    %113 = vector.extract_strided_slice %111 {offsets = [0, 128], sizes = [16, 128], strides = [1, 1]} : vector<16x384xf32> to vector<16x128xf32>
    %114 = vector.extract_strided_slice %111 {offsets = [0, 256], sizes = [16, 128], strides = [1, 1]} : vector<16x384xf32> to vector<16x128xf32>
    %c8_i32_93 = arith.constant 8 : i32
    %115 = tpu.dynamic_rotate %113 by %c8_i32_93 dim 0 : vector<16x128xf32>, i32 -> vector<16x128xf32>
    %c8_i32_94 = arith.constant 8 : i32
    %116 = tpu.dynamic_rotate %114 by %c8_i32_94 dim 0 : vector<16x128xf32>, i32 -> vector<16x128xf32>
    %117 = arith.mulf %112, %113 : vector<16x128xf32>
    %cst_95 = arith.constant dense<0.000000e+00> : vector<16x128xf32>
    %118 = tpu.matmul %117, %0, %cst_95 {dimension_numbers = #tpu.dot_dimension_numbers<[1], [0], [0], [1], [0, 0, 1, 1], [], []>} : vector<16x128xf32>, vector<128x128xf32>, vector<16x128xf32> -> vector<16x128xf32>
    %119 = arith.mulf %112, %115 : vector<16x128xf32>
    %cst_96 = arith.constant dense<0.000000e+00> : vector<16x128xf32>
    %120 = tpu.matmul %119, %0, %cst_96 {dimension_numbers = #tpu.dot_dimension_numbers<[1], [0], [0], [1], [0, 0, 1, 1], [], []>} : vector<16x128xf32>, vector<128x128xf32>, vector<16x128xf32> -> vector<16x128xf32>
    %121 = arith.maximumf %118, %120 : vector<16x128xf32>
    %122 = arith.subf %118, %121 : vector<16x128xf32>
    %123 = math.exp %122 : vector<16x128xf32>
    %124 = arith.subf %120, %121 : vector<16x128xf32>
    %125 = math.exp %124 : vector<16x128xf32>
    %126 = arith.addf %123, %125 : vector<16x128xf32>
    %127 = tpu.reciprocal %126 : vector<16x128xf32> -> vector<16x128xf32>
    %128 = arith.mulf %123, %127 : vector<16x128xf32>
    %129 = arith.subf %114, %116 : vector<16x128xf32>
    %130 = arith.mulf %128, %129 : vector<16x128xf32>
    %131 = arith.addf %116, %130 : vector<16x128xf32>
    %cst_97 = arith.constant dense<0.000000e+00> : vector<16x128xf32>
    %132 = tpu.matmul %131, %20, %cst_97 {dimension_numbers = #tpu.dot_dimension_numbers<[1], [0], [0], [1], [0, 0, 1, 1], [], []>} : vector<16x128xf32>, vector<128x128xf32>, vector<16x128xf32> -> vector<16x128xf32>
    %133 = vector.broadcast %21 : vector<1x128xf32> to vector<16x128xf32>
    %134 = arith.addf %132, %133 : vector<16x128xf32>
    %135 = arith.addf %108, %134 : vector<16x128xf32>
    %cst_98 = arith.constant dense<0.000000e+00> : vector<16x128xf32>
    %136 = tpu.matmul %135, %1, %cst_98 {dimension_numbers = #tpu.dot_dimension_numbers<[1], [0], [0], [1], [0, 0, 1, 1], [], []>} : vector<16x128xf32>, vector<128x128xf32>, vector<16x128xf32> -> vector<16x128xf32>
    %137 = arith.subf %135, %136 : vector<16x128xf32>
    %138 = arith.mulf %137, %137 : vector<16x128xf32>
    %cst_99 = arith.constant dense<0.000000e+00> : vector<16x128xf32>
    %139 = tpu.matmul %138, %1, %cst_99 {dimension_numbers = #tpu.dot_dimension_numbers<[1], [0], [0], [1], [0, 0, 1, 1], [], []>} : vector<16x128xf32>, vector<128x128xf32>, vector<16x128xf32> -> vector<16x128xf32>
    %cst_100 = arith.constant 9.99999974E-6 : f32
    %140 = vector.broadcast %cst_100 : f32 to vector<16x128xf32>
    %141 = arith.addf %139, %140 : vector<16x128xf32>
    %142 = math.rsqrt %141 : vector<16x128xf32>
    %143 = arith.mulf %137, %142 : vector<16x128xf32>
    %144 = vector.broadcast %26 : vector<1x128xf32> to vector<16x128xf32>
    %145 = arith.mulf %143, %144 : vector<16x128xf32>
    %146 = vector.broadcast %27 : vector<1x128xf32> to vector<16x128xf32>
    %147 = arith.addf %145, %146 : vector<16x128xf32>
    %cst_101 = arith.constant dense<0.000000e+00> : vector<16x512xf32>
    %148 = tpu.matmul %147, %22, %cst_101 {dimension_numbers = #tpu.dot_dimension_numbers<[1], [0], [0], [1], [0, 0, 1, 1], [], []>} : vector<16x128xf32>, vector<128x512xf32>, vector<16x512xf32> -> vector<16x512xf32>
    %149 = vector.broadcast %23 : vector<1x512xf32> to vector<16x512xf32>
    %150 = arith.addf %148, %149 : vector<16x512xf32>
    %cst_102 = arith.constant 0.000000e+00 : f32
    %151 = vector.broadcast %cst_102 : f32 to vector<16x512xf32>
    %152 = arith.maximumf %150, %151 : vector<16x512xf32>
    %cst_103 = arith.constant dense<0.000000e+00> : vector<16x128xf32>
    %153 = tpu.matmul %152, %24, %cst_103 {dimension_numbers = #tpu.dot_dimension_numbers<[1], [0], [0], [1], [0, 0, 1, 1], [], []>} : vector<16x512xf32>, vector<512x128xf32>, vector<16x128xf32> -> vector<16x128xf32>
    %154 = vector.broadcast %25 : vector<1x128xf32> to vector<16x128xf32>
    %155 = arith.addf %153, %154 : vector<16x128xf32>
    %156 = arith.addf %147, %155 : vector<16x128xf32>
    %cst_104 = arith.constant dense<0.000000e+00> : vector<16x128xf32>
    %157 = tpu.matmul %156, %1, %cst_104 {dimension_numbers = #tpu.dot_dimension_numbers<[1], [0], [0], [1], [0, 0, 1, 1], [], []>} : vector<16x128xf32>, vector<128x128xf32>, vector<16x128xf32> -> vector<16x128xf32>
    %158 = arith.subf %156, %157 : vector<16x128xf32>
    %159 = arith.mulf %158, %158 : vector<16x128xf32>
    %cst_105 = arith.constant dense<0.000000e+00> : vector<16x128xf32>
    %160 = tpu.matmul %159, %1, %cst_105 {dimension_numbers = #tpu.dot_dimension_numbers<[1], [0], [0], [1], [0, 0, 1, 1], [], []>} : vector<16x128xf32>, vector<128x128xf32>, vector<16x128xf32> -> vector<16x128xf32>
    %cst_106 = arith.constant 9.99999974E-6 : f32
    %161 = vector.broadcast %cst_106 : f32 to vector<16x128xf32>
    %162 = arith.addf %160, %161 : vector<16x128xf32>
    %163 = math.rsqrt %162 : vector<16x128xf32>
    %164 = arith.mulf %158, %163 : vector<16x128xf32>
    %165 = vector.broadcast %28 : vector<1x128xf32> to vector<16x128xf32>
    %166 = arith.mulf %164, %165 : vector<16x128xf32>
    %167 = vector.broadcast %29 : vector<1x128xf32> to vector<16x128xf32>
    %168 = arith.addf %166, %167 : vector<16x128xf32>
    %169 = vector.extract_strided_slice %168 {offsets = [0, 0], sizes = [8, 128], strides = [1, 1]} : vector<16x128xf32> to vector<8x128xf32>
    %170 = vector.extract_strided_slice %168 {offsets = [8, 0], sizes = [8, 128], strides = [1, 1]} : vector<16x128xf32> to vector<8x128xf32>
    %171 = tpu.concatenate %169, %170 in 1 : vector<8x128xf32>, vector<8x128xf32> -> vector<8x256xf32>
    %cst_107 = arith.constant dense<0.000000e+00> : vector<8x256xf32>
    %172 = tpu.matmul %171, %30, %cst_107 {dimension_numbers = #tpu.dot_dimension_numbers<[1], [0], [0], [1], [0, 0, 1, 1], [], []>} : vector<8x256xf32>, vector<256x256xf32>, vector<8x256xf32> -> vector<8x256xf32>
    %173 = vector.broadcast %31 : vector<1x256xf32> to vector<8x256xf32>
    %174 = arith.addf %172, %173 : vector<8x256xf32>
    %cst_108 = arith.constant 0.000000e+00 : f32
    %175 = vector.broadcast %cst_108 : f32 to vector<8x256xf32>
    %176 = arith.maximumf %174, %175 : vector<8x256xf32>
    %cst_109 = arith.constant dense<0.000000e+00> : vector<8x128xf32>
    %177 = tpu.matmul %176, %32, %cst_109 {dimension_numbers = #tpu.dot_dimension_numbers<[1], [0], [0], [1], [0, 0, 1, 1], [], []>} : vector<8x256xf32>, vector<256x128xf32>, vector<8x128xf32> -> vector<8x128xf32>
    %178 = vector.broadcast %33 : vector<1x128xf32> to vector<8x128xf32>
    %179 = arith.addf %177, %178 : vector<8x128xf32>
    %cst_110 = arith.constant 0.000000e+00 : f32
    %180 = vector.broadcast %cst_110 : f32 to vector<8x128xf32>
    %181 = arith.maximumf %179, %180 : vector<8x128xf32>
    %cst_111 = arith.constant dense<0.000000e+00> : vector<8x128xf32>
    %182 = tpu.matmul %181, %34, %cst_111 {dimension_numbers = #tpu.dot_dimension_numbers<[1], [0], [0], [1], [0, 0, 1, 1], [], []>} : vector<8x128xf32>, vector<128x128xf32>, vector<8x128xf32> -> vector<8x128xf32>
    %183 = vector.broadcast %35 : vector<1x128xf32> to vector<8x128xf32>
    %184 = arith.addf %182, %183 : vector<8x128xf32>
    %c0_112 = arith.constant 0 : index
    %c0_113 = arith.constant 0 : index
    %185 = vector.load %arg39[%c0_112, %c0_113] : memref<8x128xf32, #tpu.memory_space<vmem>>, vector<8x128xf32>
    tpu.vector_store %arg39[%c0_112, %c0_113], %184 {strides = array<i32>} : memref<8x128xf32, #tpu.memory_space<vmem>>, vector<8x128xf32>,
    return
  }
  func.func @transform_0(%arg0: i32) -> (i32, i32) {
    %c0_i32 = arith.constant 0 : i32
    %c0_i32_0 = arith.constant 0 : i32
    return %arg0, %c0_i32 : i32, i32
  }
  func.func @transform_1(%arg0: i32) -> (i32, i32) {
    %c0_i32 = arith.constant 0 : i32
    %c0_i32_0 = arith.constant 0 : i32
    return %arg0, %c0_i32 : i32, i32
  }
  func.func @transform_2(%arg0: i32) -> (i32, i32) {
    %c0_i32 = arith.constant 0 : i32
    %c0_i32_0 = arith.constant 0 : i32
    %c0_i32_1 = arith.constant 0 : i32
    return %c0_i32, %c0_i32_0 : i32, i32
  }
  func.func @transform_3(%arg0: i32) -> (i32, i32) {
    %c0_i32 = arith.constant 0 : i32
    %c0_i32_0 = arith.constant 0 : i32
    %c0_i32_1 = arith.constant 0 : i32
    return %c0_i32, %c0_i32_0 : i32, i32
  }
  func.func @transform_4(%arg0: i32) -> (i32, i32) {
    %c0_i32 = arith.constant 0 : i32
    %c0_i32_0 = arith.constant 0 : i32
    %c0_i32_1 = arith.constant 0 : i32
    return %c0_i32, %c0_i32_0 : i32, i32
  }
  func.func @transform_5(%arg0: i32) -> (i32, i32) {
    %c0_i32 = arith.constant 0 : i32
    %c0_i32_0 = arith.constant 0 : i32
    %c0_i32_1 = arith.constant 0 : i32
    return %c0_i32, %c0_i32_0 : i32, i32
  }
  func.func @transform_6(%arg0: i32) -> (i32, i32) {
    %c0_i32 = arith.constant 0 : i32
    %c0_i32_0 = arith.constant 0 : i32
    %c0_i32_1 = arith.constant 0 : i32
    return %c0_i32, %c0_i32_0 : i32, i32
  }
  func.func @transform_7(%arg0: i32) -> (i32, i32) {
    %c0_i32 = arith.constant 0 : i32
    %c0_i32_0 = arith.constant 0 : i32
    %c0_i32_1 = arith.constant 0 : i32
    return %c0_i32, %c0_i32_0 : i32, i32
  }
  func.func @transform_8(%arg0: i32) -> (i32, i32) {
    %c0_i32 = arith.constant 0 : i32
    %c0_i32_0 = arith.constant 0 : i32
    %c0_i32_1 = arith.constant 0 : i32
    return %c0_i32, %c0_i32_0 : i32, i32
  }
  func.func @transform_9(%arg0: i32) -> (i32, i32) {
    %c0_i32 = arith.constant 0 : i32
    %c0_i32_0 = arith.constant 0 : i32
    %c0_i32_1 = arith.constant 0 : i32
    return %c0_i32, %c0_i32_0 : i32, i32
  }
  func.func @transform_10(%arg0: i32) -> (i32, i32) {
    %c0_i32 = arith.constant 0 : i32
    %c0_i32_0 = arith.constant 0 : i32
    %c0_i32_1 = arith.constant 0 : i32
    return %c0_i32, %c0_i32_0 : i32, i32
  }
  func.func @transform_11(%arg0: i32) -> (i32, i32) {
    %c0_i32 = arith.constant 0 : i32
    %c0_i32_0 = arith.constant 0 : i32
    %c0_i32_1 = arith.constant 0 : i32
    return %c0_i32, %c0_i32_0 : i32, i32
  }
  func.func @transform_12(%arg0: i32) -> (i32, i32) {
    %c0_i32 = arith.constant 0 : i32
    %c0_i32_0 = arith.constant 0 : i32
    %c0_i32_1 = arith.constant 0 : i32
    return %c0_i32, %c0_i32_0 : i32, i32
  }
  func.func @transform_13(%arg0: i32) -> (i32, i32) {
    %c0_i32 = arith.constant 0 : i32
    %c0_i32_0 = arith.constant 0 : i32
    %c0_i32_1 = arith.constant 0 : i32
    return %c0_i32, %c0_i32_0 : i32, i32
  }
  func.func @transform_14(%arg0: i32) -> (i32, i32) {
    %c0_i32 = arith.constant 0 : i32
    %c0_i32_0 = arith.constant 0 : i32
    %c0_i32_1 = arith.constant 0 : i32
    return %c0_i32, %c0_i32_0 : i32, i32
  }
  func.func @transform_15(%arg0: i32) -> (i32, i32) {
    %c0_i32 = arith.constant 0 : i32
    %c0_i32_0 = arith.constant 0 : i32
    %c0_i32_1 = arith.constant 0 : i32
    return %c0_i32, %c0_i32_0 : i32, i32
  }
  func.func @transform_16(%arg0: i32) -> (i32, i32) {
    %c0_i32 = arith.constant 0 : i32
    %c0_i32_0 = arith.constant 0 : i32
    %c0_i32_1 = arith.constant 0 : i32
    return %c0_i32, %c0_i32_0 : i32, i32
  }
  func.func @transform_17(%arg0: i32) -> (i32, i32) {
    %c0_i32 = arith.constant 0 : i32
    %c0_i32_0 = arith.constant 0 : i32
    %c0_i32_1 = arith.constant 0 : i32
    return %c0_i32, %c0_i32_0 : i32, i32
  }
  func.func @transform_18(%arg0: i32) -> (i32, i32) {
    %c0_i32 = arith.constant 0 : i32
    %c0_i32_0 = arith.constant 0 : i32
    %c0_i32_1 = arith.constant 0 : i32
    return %c0_i32, %c0_i32_0 : i32, i32
  }
  func.func @transform_19(%arg0: i32) -> (i32, i32) {
    %c0_i32 = arith.constant 0 : i32
    %c0_i32_0 = arith.constant 0 : i32
    %c0_i32_1 = arith.constant 0 : i32
    return %c0_i32, %c0_i32_0 : i32, i32
  }
  func.func @transform_20(%arg0: i32) -> (i32, i32) {
    %c0_i32 = arith.constant 0 : i32
    %c0_i32_0 = arith.constant 0 : i32
    %c0_i32_1 = arith.constant 0 : i32
    return %c0_i32, %c0_i32_0 : i32, i32
  }
  func.func @transform_21(%arg0: i32) -> (i32, i32) {
    %c0_i32 = arith.constant 0 : i32
    %c0_i32_0 = arith.constant 0 : i32
    %c0_i32_1 = arith.constant 0 : i32
    return %c0_i32, %c0_i32_0 : i32, i32
  }
  func.func @transform_22(%arg0: i32) -> (i32, i32) {
    %c0_i32 = arith.constant 0 : i32
    %c0_i32_0 = arith.constant 0 : i32
    %c0_i32_1 = arith.constant 0 : i32
    return %c0_i32, %c0_i32_0 : i32, i32
  }
  func.func @transform_23(%arg0: i32) -> (i32, i32) {
    %c0_i32 = arith.constant 0 : i32
    %c0_i32_0 = arith.constant 0 : i32
    %c0_i32_1 = arith.constant 0 : i32
    return %c0_i32, %c0_i32_0 : i32, i32
  }
  func.func @transform_24(%arg0: i32) -> (i32, i32) {
    %c0_i32 = arith.constant 0 : i32
    %c0_i32_0 = arith.constant 0 : i32
    %c0_i32_1 = arith.constant 0 : i32
    return %c0_i32, %c0_i32_0 : i32, i32
  }
  func.func @transform_25(%arg0: i32) -> (i32, i32) {
    %c0_i32 = arith.constant 0 : i32
    %c0_i32_0 = arith.constant 0 : i32
    %c0_i32_1 = arith.constant 0 : i32
    return %c0_i32, %c0_i32_0 : i32, i32
  }
  func.func @transform_26(%arg0: i32) -> (i32, i32) {
    %c0_i32 = arith.constant 0 : i32
    %c0_i32_0 = arith.constant 0 : i32
    %c0_i32_1 = arith.constant 0 : i32
    return %c0_i32, %c0_i32_0 : i32, i32
  }
  func.func @transform_27(%arg0: i32) -> (i32, i32) {
    %c0_i32 = arith.constant 0 : i32
    %c0_i32_0 = arith.constant 0 : i32
    %c0_i32_1 = arith.constant 0 : i32
    return %c0_i32, %c0_i32_0 : i32, i32
  }
  func.func @transform_28(%arg0: i32) -> (i32, i32) {
    %c0_i32 = arith.constant 0 : i32
    %c0_i32_0 = arith.constant 0 : i32
    %c0_i32_1 = arith.constant 0 : i32
    return %c0_i32, %c0_i32_0 : i32, i32
  }
  func.func @transform_29(%arg0: i32) -> (i32, i32) {
    %c0_i32 = arith.constant 0 : i32
    %c0_i32_0 = arith.constant 0 : i32
    %c0_i32_1 = arith.constant 0 : i32
    return %c0_i32, %c0_i32_0 : i32, i32
  }
  func.func @transform_30(%arg0: i32) -> (i32, i32) {
    %c0_i32 = arith.constant 0 : i32
    %c0_i32_0 = arith.constant 0 : i32
    %c0_i32_1 = arith.constant 0 : i32
    return %c0_i32, %c0_i32_0 : i32, i32
  }
  func.func @transform_31(%arg0: i32) -> (i32, i32) {
    %c0_i32 = arith.constant 0 : i32
    %c0_i32_0 = arith.constant 0 : i32
    %c0_i32_1 = arith.constant 0 : i32
    return %c0_i32, %c0_i32_0 : i32, i32
  }
  func.func @transform_32(%arg0: i32) -> (i32, i32) {
    %c0_i32 = arith.constant 0 : i32
    %c0_i32_0 = arith.constant 0 : i32
    %c0_i32_1 = arith.constant 0 : i32
    return %c0_i32, %c0_i32_0 : i32, i32
  }
  func.func @transform_33(%arg0: i32) -> (i32, i32) {
    %c0_i32 = arith.constant 0 : i32
    %c0_i32_0 = arith.constant 0 : i32
    %c0_i32_1 = arith.constant 0 : i32
    return %c0_i32, %c0_i32_0 : i32, i32
  }
  func.func @transform_34(%arg0: i32) -> (i32, i32) {
    %c0_i32 = arith.constant 0 : i32
    %c0_i32_0 = arith.constant 0 : i32
    %c0_i32_1 = arith.constant 0 : i32
    return %c0_i32, %c0_i32_0 : i32, i32
  }
  func.func @transform_35(%arg0: i32) -> (i32, i32) {
    %c0_i32 = arith.constant 0 : i32
    %c0_i32_0 = arith.constant 0 : i32
    %c0_i32_1 = arith.constant 0 : i32
    return %c0_i32, %c0_i32_0 : i32, i32
  }
  func.func @transform_36(%arg0: i32) -> (i32, i32) {
    %c0_i32 = arith.constant 0 : i32
    %c0_i32_0 = arith.constant 0 : i32
    %c0_i32_1 = arith.constant 0 : i32
    return %c0_i32, %c0_i32_0 : i32, i32
  }
  func.func @transform_37(%arg0: i32) -> (i32, i32) {
    %c0_i32 = arith.constant 0 : i32
    %c0_i32_0 = arith.constant 0 : i32
    %c0_i32_1 = arith.constant 0 : i32
    return %c0_i32, %c0_i32_0 : i32, i32
  }
  func.func @transform_38(%arg0: i32) -> (i32, i32) {
    %c0_i32 = arith.constant 0 : i32
    %c0_i32_0 = arith.constant 0 : i32
    return %arg0, %c0_i32 : i32, i32
  }
}

module attributes {stable_mosaic.version = 11 : i64} {
  func.func @_applicant_kernel(%arg0: i32, %arg1: memref<8x16xf32, #tpu.memory_space<vmem>>, %arg2: memref<8x768xf32, #tpu.memory_space<vmem>>, %arg3: memref<128x128xf32, #tpu.memory_space<vmem>>, %arg4: memref<128x128xf32, #tpu.memory_space<vmem>>, %arg5: memref<16x128xf32, #tpu.memory_space<vmem>>, %arg6: memref<1x128xf32, #tpu.memory_space<vmem>>, %arg7: memref<768x128xf32, #tpu.memory_space<vmem>>, %arg8: memref<1x128xf32, #tpu.memory_space<vmem>>, %arg9: memref<128x384xf32, #tpu.memory_space<vmem>>, %arg10: memref<1x384xf32, #tpu.memory_space<vmem>>, %arg11: memref<128x128xf32, #tpu.memory_space<vmem>>, %arg12: memref<1x128xf32, #tpu.memory_space<vmem>>, %arg13: memref<128x512xf32, #tpu.memory_space<vmem>>, %arg14: memref<1x512xf32, #tpu.memory_space<vmem>>, %arg15: memref<512x128xf32, #tpu.memory_space<vmem>>, %arg16: memref<1x128xf32, #tpu.memory_space<vmem>>, %arg17: memref<1x128xf32, #tpu.memory_space<vmem>>, %arg18: memref<1x128xf32, #tpu.memory_space<vmem>>, %arg19: memref<1x128xf32, #tpu.memory_space<vmem>>, %arg20: memref<1x128xf32, #tpu.memory_space<vmem>>, %arg21: memref<128x384xf32, #tpu.memory_space<vmem>>, %arg22: memref<1x384xf32, #tpu.memory_space<vmem>>, %arg23: memref<128x128xf32, #tpu.memory_space<vmem>>, %arg24: memref<1x128xf32, #tpu.memory_space<vmem>>, %arg25: memref<128x512xf32, #tpu.memory_space<vmem>>, %arg26: memref<1x512xf32, #tpu.memory_space<vmem>>, %arg27: memref<512x128xf32, #tpu.memory_space<vmem>>, %arg28: memref<1x128xf32, #tpu.memory_space<vmem>>, %arg29: memref<1x128xf32, #tpu.memory_space<vmem>>, %arg30: memref<1x128xf32, #tpu.memory_space<vmem>>, %arg31: memref<1x128xf32, #tpu.memory_space<vmem>>, %arg32: memref<1x128xf32, #tpu.memory_space<vmem>>, %arg33: memref<256x256xf32, #tpu.memory_space<vmem>>, %arg34: memref<1x256xf32, #tpu.memory_space<vmem>>, %arg35: memref<256x128xf32, #tpu.memory_space<vmem>>, %arg36: memref<1x128xf32, #tpu.memory_space<vmem>>, %arg37: memref<128x128xf32, #tpu.memory_space<vmem>>, %arg38: memref<1x128xf32, #tpu.memory_space<vmem>>, %arg39: memref<8x128xf32, #tpu.memory_space<vmem>>) attributes {dimension_semantics = [#tpu.dimension_semantics<parallel>], iteration_bounds = array<i64: 1>, scalar_prefetch = 0 : i64, scratch_operands = 0 : i64, tpu.core_type = #tpu.core_type<tc>, window_params = [{transform_indices = @transform_0, window_bounds = array<i64: 8, 16>}, {transform_indices = @transform_1, window_bounds = array<i64: 8, 768>}, {pipeline_mode = #tpu.pipeline_mode<synchronous>, transform_indices = @transform_2, window_bounds = array<i64: 128, 128>}, {pipeline_mode = #tpu.pipeline_mode<synchronous>, transform_indices = @transform_3, window_bounds = array<i64: 128, 128>}, {pipeline_mode = #tpu.pipeline_mode<synchronous>, transform_indices = @transform_4, window_bounds = array<i64: 16, 128>}, {pipeline_mode = #tpu.pipeline_mode<synchronous>, transform_indices = @transform_5, window_bounds = array<i64: 1, 128>}, {pipeline_mode = #tpu.pipeline_mode<synchronous>, transform_indices = @transform_6, window_bounds = array<i64: 768, 128>}, {pipeline_mode = #tpu.pipeline_mode<synchronous>, transform_indices = @transform_7, window_bounds = array<i64: 1, 128>}, {pipeline_mode = #tpu.pipeline_mode<synchronous>, transform_indices = @transform_8, window_bounds = array<i64: 128, 384>}, {pipeline_mode = #tpu.pipeline_mode<synchronous>, transform_indices = @transform_9, window_bounds = array<i64: 1, 384>}, {pipeline_mode = #tpu.pipeline_mode<synchronous>, transform_indices = @transform_10, window_bounds = array<i64: 128, 128>}, {pipeline_mode = #tpu.pipeline_mode<synchronous>, transform_indices = @transform_11, window_bounds = array<i64: 1, 128>}, {pipeline_mode = #tpu.pipeline_mode<synchronous>, transform_indices = @transform_12, window_bounds = array<i64: 128, 512>}, {pipeline_mode = #tpu.pipeline_mode<synchronous>, transform_indices = @transform_13, window_bounds = array<i64: 1, 512>}, {pipeline_mode = #tpu.pipeline_mode<synchronous>, transform_indices = @transform_14, window_bounds = array<i64: 512, 128>}, {pipeline_mode = #tpu.pipeline_mode<synchronous>, transform_indices = @transform_15, window_bounds = array<i64: 1, 128>}, {pipeline_mode = #tpu.pipeline_mode<synchronous>, transform_indices = @transform_16, window_bounds = array<i64: 1, 128>}, {pipeline_mode = #tpu.pipeline_mode<synchronous>, transform_indices = @transform_17, window_bounds = array<i64: 1, 128>}, {pipeline_mode = #tpu.pipeline_mode<synchronous>, transform_indices = @transform_18, window_bounds = array<i64: 1, 128>}, {pipeline_mode = #tpu.pipeline_mode<synchronous>, transform_indices = @transform_19, window_bounds = array<i64: 1, 128>}, {pipeline_mode = #tpu.pipeline_mode<synchronous>, transform_indices = @transform_20, window_bounds = array<i64: 128, 384>}, {pipeline_mode = #tpu.pipeline_mode<synchronous>, transform_indices = @transform_21, window_bounds = array<i64: 1, 384>}, {pipeline_mode = #tpu.pipeline_mode<synchronous>, transform_indices = @transform_22, window_bounds = array<i64: 128, 128>}, {pipeline_mode = #tpu.pipeline_mode<synchronous>, transform_indices = @transform_23, window_bounds = array<i64: 1, 128>}, {pipeline_mode = #tpu.pipeline_mode<synchronous>, transform_indices = @transform_24, window_bounds = array<i64: 128, 512>}, {pipeline_mode = #tpu.pipeline_mode<synchronous>, transform_indices = @transform_25, window_bounds = array<i64: 1, 512>}, {pipeline_mode = #tpu.pipeline_mode<synchronous>, transform_indices = @transform_26, window_bounds = array<i64: 512, 128>}, {pipeline_mode = #tpu.pipeline_mode<synchronous>, transform_indices = @transform_27, window_bounds = array<i64: 1, 128>}, {pipeline_mode = #tpu.pipeline_mode<synchronous>, transform_indices = @transform_28, window_bounds = array<i64: 1, 128>}, {pipeline_mode = #tpu.pipeline_mode<synchronous>, transform_indices = @transform_29, window_bounds = array<i64: 1, 128>}, {pipeline_mode = #tpu.pipeline_mode<synchronous>, transform_indices = @transform_30, window_bounds = array<i64: 1, 128>}, {pipeline_mode = #tpu.pipeline_mode<synchronous>, transform_indices = @transform_31, window_bounds = array<i64: 1, 128>}, {pipeline_mode = #tpu.pipeline_mode<synchronous>, transform_indices = @transform_32, window_bounds = array<i64: 256, 256>}, {pipeline_mode = #tpu.pipeline_mode<synchronous>, transform_indices = @transform_33, window_bounds = array<i64: 1, 256>}, {pipeline_mode = #tpu.pipeline_mode<synchronous>, transform_indices = @transform_34, window_bounds = array<i64: 256, 128>}, {pipeline_mode = #tpu.pipeline_mode<synchronous>, transform_indices = @transform_35, window_bounds = array<i64: 1, 128>}, {pipeline_mode = #tpu.pipeline_mode<synchronous>, transform_indices = @transform_36, window_bounds = array<i64: 128, 128>}, {pipeline_mode = #tpu.pipeline_mode<synchronous>, transform_indices = @transform_37, window_bounds = array<i64: 1, 128>}, {transform_indices = @transform_38, window_bounds = array<i64: 8, 128>}]} {
    %c0 = arith.constant 0 : index
    %c0_0 = arith.constant 0 : index
    %0 = vector.load %arg3[%c0, %c0_0] : memref<128x128xf32, #tpu.memory_space<vmem>>, vector<128x128xf32>
    %c0_1 = arith.constant 0 : index
    %c0_2 = arith.constant 0 : index
    %1 = vector.load %arg4[%c0_1, %c0_2] : memref<128x128xf32, #tpu.memory_space<vmem>>, vector<128x128xf32>
    %c0_3 = arith.constant 0 : index
    %c0_4 = arith.constant 0 : index
    %2 = vector.load %arg5[%c0_3, %c0_4] : memref<16x128xf32, #tpu.memory_space<vmem>>, vector<16x128xf32>
    %c0_5 = arith.constant 0 : index
    %c0_6 = arith.constant 0 : index
    %3 = vector.load %arg6[%c0_5, %c0_6] : memref<1x128xf32, #tpu.memory_space<vmem>>, vector<1x128xf32>
    %c0_7 = arith.constant 0 : index
    %c0_8 = arith.constant 0 : index
    %4 = vector.load %arg7[%c0_7, %c0_8] : memref<768x128xf32, #tpu.memory_space<vmem>>, vector<768x128xf32>
    %c0_9 = arith.constant 0 : index
    %c0_10 = arith.constant 0 : index
    %5 = vector.load %arg8[%c0_9, %c0_10] : memref<1x128xf32, #tpu.memory_space<vmem>>, vector<1x128xf32>
    %c0_11 = arith.constant 0 : index
    %c0_12 = arith.constant 0 : index
    %6 = vector.load %arg9[%c0_11, %c0_12] : memref<128x384xf32, #tpu.memory_space<vmem>>, vector<128x384xf32>
    %c0_13 = arith.constant 0 : index
    %c0_14 = arith.constant 0 : index
    %7 = vector.load %arg10[%c0_13, %c0_14] : memref<1x384xf32, #tpu.memory_space<vmem>>, vector<1x384xf32>
    %c0_15 = arith.constant 0 : index
    %c0_16 = arith.constant 0 : index
    %8 = vector.load %arg11[%c0_15, %c0_16] : memref<128x128xf32, #tpu.memory_space<vmem>>, vector<128x128xf32>
    %c0_17 = arith.constant 0 : index
    %c0_18 = arith.constant 0 : index
    %9 = vector.load %arg12[%c0_17, %c0_18] : memref<1x128xf32, #tpu.memory_space<vmem>>, vector<1x128xf32>
    %c0_19 = arith.constant 0 : index
    %c0_20 = arith.constant 0 : index
    %10 = vector.load %arg13[%c0_19, %c0_20] : memref<128x512xf32, #tpu.memory_space<vmem>>, vector<128x512xf32>
    %c0_21 = arith.constant 0 : index
    %c0_22 = arith.constant 0 : index
    %11 = vector.load %arg14[%c0_21, %c0_22] : memref<1x512xf32, #tpu.memory_space<vmem>>, vector<1x512xf32>
    %c0_23 = arith.constant 0 : index
    %c0_24 = arith.constant 0 : index
    %12 = vector.load %arg15[%c0_23, %c0_24] : memref<512x128xf32, #tpu.memory_space<vmem>>, vector<512x128xf32>
    %c0_25 = arith.constant 0 : index
    %c0_26 = arith.constant 0 : index
    %13 = vector.load %arg16[%c0_25, %c0_26] : memref<1x128xf32, #tpu.memory_space<vmem>>, vector<1x128xf32>
    %c0_27 = arith.constant 0 : index
    %c0_28 = arith.constant 0 : index
    %14 = vector.load %arg17[%c0_27, %c0_28] : memref<1x128xf32, #tpu.memory_space<vmem>>, vector<1x128xf32>
    %c0_29 = arith.constant 0 : index
    %c0_30 = arith.constant 0 : index
    %15 = vector.load %arg18[%c0_29, %c0_30] : memref<1x128xf32, #tpu.memory_space<vmem>>, vector<1x128xf32>
    %c0_31 = arith.constant 0 : index
    %c0_32 = arith.constant 0 : index
    %16 = vector.load %arg19[%c0_31, %c0_32] : memref<1x128xf32, #tpu.memory_space<vmem>>, vector<1x128xf32>
    %c0_33 = arith.constant 0 : index
    %c0_34 = arith.constant 0 : index
    %17 = vector.load %arg20[%c0_33, %c0_34] : memref<1x128xf32, #tpu.memory_space<vmem>>, vector<1x128xf32>
    %c0_35 = arith.constant 0 : index
    %c0_36 = arith.constant 0 : index
    %18 = vector.load %arg21[%c0_35, %c0_36] : memref<128x384xf32, #tpu.memory_space<vmem>>, vector<128x384xf32>
    %c0_37 = arith.constant 0 : index
    %c0_38 = arith.constant 0 : index
    %19 = vector.load %arg22[%c0_37, %c0_38] : memref<1x384xf32, #tpu.memory_space<vmem>>, vector<1x384xf32>
    %c0_39 = arith.constant 0 : index
    %c0_40 = arith.constant 0 : index
    %20 = vector.load %arg23[%c0_39, %c0_40] : memref<128x128xf32, #tpu.memory_space<vmem>>, vector<128x128xf32>
    %c0_41 = arith.constant 0 : index
    %c0_42 = arith.constant 0 : index
    %21 = vector.load %arg24[%c0_41, %c0_42] : memref<1x128xf32, #tpu.memory_space<vmem>>, vector<1x128xf32>
    %c0_43 = arith.constant 0 : index
    %c0_44 = arith.constant 0 : index
    %22 = vector.load %arg25[%c0_43, %c0_44] : memref<128x512xf32, #tpu.memory_space<vmem>>, vector<128x512xf32>
    %c0_45 = arith.constant 0 : index
    %c0_46 = arith.constant 0 : index
    %23 = vector.load %arg26[%c0_45, %c0_46] : memref<1x512xf32, #tpu.memory_space<vmem>>, vector<1x512xf32>
    %c0_47 = arith.constant 0 : index
    %c0_48 = arith.constant 0 : index
    %24 = vector.load %arg27[%c0_47, %c0_48] : memref<512x128xf32, #tpu.memory_space<vmem>>, vector<512x128xf32>
    %c0_49 = arith.constant 0 : index
    %c0_50 = arith.constant 0 : index
    %25 = vector.load %arg28[%c0_49, %c0_50] : memref<1x128xf32, #tpu.memory_space<vmem>>, vector<1x128xf32>
    %c0_51 = arith.constant 0 : index
    %c0_52 = arith.constant 0 : index
    %26 = vector.load %arg29[%c0_51, %c0_52] : memref<1x128xf32, #tpu.memory_space<vmem>>, vector<1x128xf32>
    %c0_53 = arith.constant 0 : index
    %c0_54 = arith.constant 0 : index
    %27 = vector.load %arg30[%c0_53, %c0_54] : memref<1x128xf32, #tpu.memory_space<vmem>>, vector<1x128xf32>
    %c0_55 = arith.constant 0 : index
    %c0_56 = arith.constant 0 : index
    %28 = vector.load %arg31[%c0_55, %c0_56] : memref<1x128xf32, #tpu.memory_space<vmem>>, vector<1x128xf32>
    %c0_57 = arith.constant 0 : index
    %c0_58 = arith.constant 0 : index
    %29 = vector.load %arg32[%c0_57, %c0_58] : memref<1x128xf32, #tpu.memory_space<vmem>>, vector<1x128xf32>
    %c0_59 = arith.constant 0 : index
    %c0_60 = arith.constant 0 : index
    %30 = vector.load %arg33[%c0_59, %c0_60] : memref<256x256xf32, #tpu.memory_space<vmem>>, vector<256x256xf32>
    %c0_61 = arith.constant 0 : index
    %c0_62 = arith.constant 0 : index
    %31 = vector.load %arg34[%c0_61, %c0_62] : memref<1x256xf32, #tpu.memory_space<vmem>>, vector<1x256xf32>
    %c0_63 = arith.constant 0 : index
    %c0_64 = arith.constant 0 : index
    %32 = vector.load %arg35[%c0_63, %c0_64] : memref<256x128xf32, #tpu.memory_space<vmem>>, vector<256x128xf32>
    %c0_65 = arith.constant 0 : index
    %c0_66 = arith.constant 0 : index
    %33 = vector.load %arg36[%c0_65, %c0_66] : memref<1x128xf32, #tpu.memory_space<vmem>>, vector<1x128xf32>
    %c0_67 = arith.constant 0 : index
    %c0_68 = arith.constant 0 : index
    %34 = vector.load %arg37[%c0_67, %c0_68] : memref<128x128xf32, #tpu.memory_space<vmem>>, vector<128x128xf32>
    %c0_69 = arith.constant 0 : index
    %c0_70 = arith.constant 0 : index
    %35 = vector.load %arg38[%c0_69, %c0_70] : memref<1x128xf32, #tpu.memory_space<vmem>>, vector<1x128xf32>
    %c0_71 = arith.constant 0 : index
    %c0_72 = arith.constant 0 : index
    %36 = vector.load %arg1[%c0_71, %c0_72] : memref<8x16xf32, #tpu.memory_space<vmem>>, vector<8x16xf32>
    %cst = arith.constant dense<0.000000e+00> : vector<8x128xf32>
    %37 = tpu.matmul %36, %2, %cst {dimension_numbers = #tpu.dot_dimension_numbers<[1], [0], [0], [1], [0, 0, 1, 1], [], []>} : vector<8x16xf32>, vector<16x128xf32>, vector<8x128xf32> -> vector<8x128xf32>
    %38 = vector.broadcast %3 : vector<1x128xf32> to vector<8x128xf32>
    %39 = arith.addf %37, %38 : vector<8x128xf32>
    %cst_73 = arith.constant 0.000000e+00 : f32
    %40 = vector.broadcast %cst_73 : f32 to vector<8x128xf32>
    %41 = arith.maximumf %39, %40 : vector<8x128xf32>
    %c0_74 = arith.constant 0 : index
    %c0_75 = arith.constant 0 : index
    %42 = vector.load %arg2[%c0_74, %c0_75] : memref<8x768xf32, #tpu.memory_space<vmem>>, vector<8x768xf32>
    %cst_76 = arith.constant dense<0.000000e+00> : vector<8x128xf32>
    %43 = tpu.matmul %42, %4, %cst_76 {dimension_numbers = #tpu.dot_dimension_numbers<[1], [0], [0], [1], [0, 0, 1, 1], [], []>} : vector<8x768xf32>, vector<768x128xf32>, vector<8x128xf32> -> vector<8x128xf32>
    %44 = vector.broadcast %5 : vector<1x128xf32> to vector<8x128xf32>
    %45 = arith.addf %43, %44 : vector<8x128xf32>
    %cst_77 = arith.constant 0.000000e+00 : f32
    %46 = vector.broadcast %cst_77 : f32 to vector<8x128xf32>
    %47 = arith.maximumf %45, %46 : vector<8x128xf32>
    %48 = tpu.concatenate %41, %47 in 0 : vector<8x128xf32>, vector<8x128xf32> -> vector<16x128xf32>
    %cst_78 = arith.constant dense<0.000000e+00> : vector<16x384xf32>
    %49 = tpu.matmul %48, %6, %cst_78 {dimension_numbers = #tpu.dot_dimension_numbers<[1], [0], [0], [1], [0, 0, 1, 1], [], []>} : vector<16x128xf32>, vector<128x384xf32>, vector<16x384xf32> -> vector<16x384xf32>
    %50 = vector.broadcast %7 : vector<1x384xf32> to vector<16x384xf32>
    %51 = arith.addf %49, %50 : vector<16x384xf32>
    %52 = vector.extract_strided_slice %51 {offsets = [0, 0], sizes = [16, 128], strides = [1, 1]} : vector<16x384xf32> to vector<16x128xf32>
    %53 = vector.extract_strided_slice %51 {offsets = [0, 128], sizes = [16, 128], strides = [1, 1]} : vector<16x384xf32> to vector<16x128xf32>
    %54 = vector.extract_strided_slice %51 {offsets = [0, 256], sizes = [16, 128], strides = [1, 1]} : vector<16x384xf32> to vector<16x128xf32>
    %c8_i32 = arith.constant 8 : i32
    %55 = tpu.dynamic_rotate %53 by %c8_i32 dim 0 : vector<16x128xf32>, i32 -> vector<16x128xf32>
    %c8_i32_79 = arith.constant 8 : i32
    %56 = tpu.dynamic_rotate %54 by %c8_i32_79 dim 0 : vector<16x128xf32>, i32 -> vector<16x128xf32>
    %57 = arith.mulf %52, %53 : vector<16x128xf32>
    %cst_80 = arith.constant dense<0.000000e+00> : vector<16x128xf32>
    %58 = tpu.matmul %57, %0, %cst_80 {dimension_numbers = #tpu.dot_dimension_numbers<[1], [0], [0], [1], [0, 0, 1, 1], [], []>} : vector<16x128xf32>, vector<128x128xf32>, vector<16x128xf32> -> vector<16x128xf32>
    %59 = arith.mulf %52, %55 : vector<16x128xf32>
    %cst_81 = arith.constant dense<0.000000e+00> : vector<16x128xf32>
    %60 = tpu.matmul %59, %0, %cst_81 {dimension_numbers = #tpu.dot_dimension_numbers<[1], [0], [0], [1], [0, 0, 1, 1], [], []>} : vector<16x128xf32>, vector<128x128xf32>, vector<16x128xf32> -> vector<16x128xf32>
    %61 = arith.maximumf %58, %60 : vector<16x128xf32>
    %62 = arith.subf %58, %61 : vector<16x128xf32>
    %63 = math.exp %62 : vector<16x128xf32>
    %64 = arith.subf %60, %61 : vector<16x128xf32>
    %65 = math.exp %64 : vector<16x128xf32>
    %66 = arith.addf %63, %65 : vector<16x128xf32>
    %67 = tpu.reciprocal %66 : vector<16x128xf32> -> vector<16x128xf32>
    %68 = arith.mulf %63, %67 : vector<16x128xf32>
    %69 = arith.subf %54, %56 : vector<16x128xf32>
    %70 = arith.mulf %68, %69 : vector<16x128xf32>
    %71 = arith.addf %56, %70 : vector<16x128xf32>
    %cst_82 = arith.constant dense<0.000000e+00> : vector<16x128xf32>
    %72 = tpu.matmul %71, %8, %cst_82 {dimension_numbers = #tpu.dot_dimension_numbers<[1], [0], [0], [1], [0, 0, 1, 1], [], []>} : vector<16x128xf32>, vector<128x128xf32>, vector<16x128xf32> -> vector<16x128xf32>
    %73 = vector.broadcast %9 : vector<1x128xf32> to vector<16x128xf32>
    %74 = arith.addf %72, %73 : vector<16x128xf32>
    %75 = arith.addf %48, %74 : vector<16x128xf32>
    %cst_83 = arith.constant dense<0.000000e+00> : vector<16x128xf32>
    %76 = tpu.matmul %75, %1, %cst_83 {dimension_numbers = #tpu.dot_dimension_numbers<[1], [0], [0], [1], [0, 0, 1, 1], [], []>} : vector<16x128xf32>, vector<128x128xf32>, vector<16x128xf32> -> vector<16x128xf32>
    %77 = arith.subf %75, %76 : vector<16x128xf32>
    %78 = arith.mulf %77, %77 : vector<16x128xf32>
    %cst_84 = arith.constant dense<0.000000e+00> : vector<16x128xf32>
    %79 = tpu.matmul %78, %1, %cst_84 {dimension_numbers = #tpu.dot_dimension_numbers<[1], [0], [0], [1], [0, 0, 1, 1], [], []>} : vector<16x128xf32>, vector<128x128xf32>, vector<16x128xf32> -> vector<16x128xf32>
    %cst_85 = arith.constant 9.99999974E-6 : f32
    %80 = vector.broadcast %cst_85 : f32 to vector<16x128xf32>
    %81 = arith.addf %79, %80 : vector<16x128xf32>
    %82 = math.rsqrt %81 : vector<16x128xf32>
    %83 = arith.mulf %77, %82 : vector<16x128xf32>
    %84 = vector.broadcast %14 : vector<1x128xf32> to vector<16x128xf32>
    %85 = arith.mulf %83, %84 : vector<16x128xf32>
    %86 = vector.broadcast %15 : vector<1x128xf32> to vector<16x128xf32>
    %87 = arith.addf %85, %86 : vector<16x128xf32>
    %cst_86 = arith.constant dense<0.000000e+00> : vector<16x512xf32>
    %88 = tpu.matmul %87, %10, %cst_86 {dimension_numbers = #tpu.dot_dimension_numbers<[1], [0], [0], [1], [0, 0, 1, 1], [], []>} : vector<16x128xf32>, vector<128x512xf32>, vector<16x512xf32> -> vector<16x512xf32>
    %89 = vector.broadcast %11 : vector<1x512xf32> to vector<16x512xf32>
    %90 = arith.addf %88, %89 : vector<16x512xf32>
    %cst_87 = arith.constant 0.000000e+00 : f32
    %91 = vector.broadcast %cst_87 : f32 to vector<16x512xf32>
    %92 = arith.maximumf %90, %91 : vector<16x512xf32>
    %cst_88 = arith.constant dense<0.000000e+00> : vector<16x128xf32>
    %93 = tpu.matmul %92, %12, %cst_88 {dimension_numbers = #tpu.dot_dimension_numbers<[1], [0], [0], [1], [0, 0, 1, 1], [], []>} : vector<16x512xf32>, vector<512x128xf32>, vector<16x128xf32> -> vector<16x128xf32>
    %94 = vector.broadcast %13 : vector<1x128xf32> to vector<16x128xf32>
    %95 = arith.addf %93, %94 : vector<16x128xf32>
    %96 = arith.addf %87, %95 : vector<16x128xf32>
    %cst_89 = arith.constant dense<0.000000e+00> : vector<16x128xf32>
    %97 = tpu.matmul %96, %1, %cst_89 {dimension_numbers = #tpu.dot_dimension_numbers<[1], [0], [0], [1], [0, 0, 1, 1], [], []>} : vector<16x128xf32>, vector<128x128xf32>, vector<16x128xf32> -> vector<16x128xf32>
    %98 = arith.subf %96, %97 : vector<16x128xf32>
    %99 = arith.mulf %98, %98 : vector<16x128xf32>
    %cst_90 = arith.constant dense<0.000000e+00> : vector<16x128xf32>
    %100 = tpu.matmul %99, %1, %cst_90 {dimension_numbers = #tpu.dot_dimension_numbers<[1], [0], [0], [1], [0, 0, 1, 1], [], []>} : vector<16x128xf32>, vector<128x128xf32>, vector<16x128xf32> -> vector<16x128xf32>
    %cst_91 = arith.constant 9.99999974E-6 : f32
    %101 = vector.broadcast %cst_91 : f32 to vector<16x128xf32>
    %102 = arith.addf %100, %101 : vector<16x128xf32>
    %103 = math.rsqrt %102 : vector<16x128xf32>
    %104 = arith.mulf %98, %103 : vector<16x128xf32>
    %105 = vector.broadcast %16 : vector<1x128xf32> to vector<16x128xf32>
    %106 = arith.mulf %104, %105 : vector<16x128xf32>
    %107 = vector.broadcast %17 : vector<1x128xf32> to vector<16x128xf32>
    %108 = arith.addf %106, %107 : vector<16x128xf32>
    %cst_92 = arith.constant dense<0.000000e+00> : vector<16x384xf32>
    %109 = tpu.matmul %108, %18, %cst_92 {dimension_numbers = #tpu.dot_dimension_numbers<[1], [0], [0], [1], [0, 0, 1, 1], [], []>} : vector<16x128xf32>, vector<128x384xf32>, vector<16x384xf32> -> vector<16x384xf32>
    %110 = vector.broadcast %19 : vector<1x384xf32> to vector<16x384xf32>
    %111 = arith.addf %109, %110 : vector<16x384xf32>
    %112 = vector.extract_strided_slice %111 {offsets = [0, 0], sizes = [16, 128], strides = [1, 1]} : vector<16x384xf32> to vector<16x128xf32>
    %113 = vector.extract_strided_slice %111 {offsets = [0, 128], sizes = [16, 128], strides = [1, 1]} : vector<16x384xf32> to vector<16x128xf32>
    %114 = vector.extract_strided_slice %111 {offsets = [0, 256], sizes = [16, 128], strides = [1, 1]} : vector<16x384xf32> to vector<16x128xf32>
    %c8_i32_93 = arith.constant 8 : i32
    %115 = tpu.dynamic_rotate %113 by %c8_i32_93 dim 0 : vector<16x128xf32>, i32 -> vector<16x128xf32>
    %c8_i32_94 = arith.constant 8 : i32
    %116 = tpu.dynamic_rotate %114 by %c8_i32_94 dim 0 : vector<16x128xf32>, i32 -> vector<16x128xf32>
    %117 = arith.mulf %112, %113 : vector<16x128xf32>
    %cst_95 = arith.constant dense<0.000000e+00> : vector<16x128xf32>
    %118 = tpu.matmul %117, %0, %cst_95 {dimension_numbers = #tpu.dot_dimension_numbers<[1], [0], [0], [1], [0, 0, 1, 1], [], []>} : vector<16x128xf32>, vector<128x128xf32>, vector<16x128xf32> -> vector<16x128xf32>
    %119 = arith.mulf %112, %115 : vector<16x128xf32>
    %cst_96 = arith.constant dense<0.000000e+00> : vector<16x128xf32>
    %120 = tpu.matmul %119, %0, %cst_96 {dimension_numbers = #tpu.dot_dimension_numbers<[1], [0], [0], [1], [0, 0, 1, 1], [], []>} : vector<16x128xf32>, vector<128x128xf32>, vector<16x128xf32> -> vector<16x128xf32>
    %121 = arith.maximumf %118, %120 : vector<16x128xf32>
    %122 = arith.subf %118, %121 : vector<16x128xf32>
    %123 = math.exp %122 : vector<16x128xf32>
    %124 = arith.subf %120, %121 : vector<16x128xf32>
    %125 = math.exp %124 : vector<16x128xf32>
    %126 = arith.addf %123, %125 : vector<16x128xf32>
    %127 = tpu.reciprocal %126 : vector<16x128xf32> -> vector<16x128xf32>
    %128 = arith.mulf %123, %127 : vector<16x128xf32>
    %129 = arith.subf %114, %116 : vector<16x128xf32>
    %130 = arith.mulf %128, %129 : vector<16x128xf32>
    %131 = arith.addf %116, %130 : vector<16x128xf32>
    %cst_97 = arith.constant dense<0.000000e+00> : vector<16x128xf32>
    %132 = tpu.matmul %131, %20, %cst_97 {dimension_numbers = #tpu.dot_dimension_numbers<[1], [0], [0], [1], [0, 0, 1, 1], [], []>} : vector<16x128xf32>, vector<128x128xf32>, vector<16x128xf32> -> vector<16x128xf32>
    %133 = vector.broadcast %21 : vector<1x128xf32> to vector<16x128xf32>
    %134 = arith.addf %132, %133 : vector<16x128xf32>
    %135 = arith.addf %108, %134 : vector<16x128xf32>
    %cst_98 = arith.constant dense<0.000000e+00> : vector<16x128xf32>
    %136 = tpu.matmul %135, %1, %cst_98 {dimension_numbers = #tpu.dot_dimension_numbers<[1], [0], [0], [1], [0, 0, 1, 1], [], []>} : vector<16x128xf32>, vector<128x128xf32>, vector<16x128xf32> -> vector<16x128xf32>
    %137 = arith.subf %135, %136 : vector<16x128xf32>
    %138 = arith.mulf %137, %137 : vector<16x128xf32>
    %cst_99 = arith.constant dense<0.000000e+00> : vector<16x128xf32>
    %139 = tpu.matmul %138, %1, %cst_99 {dimension_numbers = #tpu.dot_dimension_numbers<[1], [0], [0], [1], [0, 0, 1, 1], [], []>} : vector<16x128xf32>, vector<128x128xf32>, vector<16x128xf32> -> vector<16x128xf32>
    %cst_100 = arith.constant 9.99999974E-6 : f32
    %140 = vector.broadcast %cst_100 : f32 to vector<16x128xf32>
    %141 = arith.addf %139, %140 : vector<16x128xf32>
    %142 = math.rsqrt %141 : vector<16x128xf32>
    %143 = arith.mulf %137, %142 : vector<16x128xf32>
    %144 = vector.broadcast %26 : vector<1x128xf32> to vector<16x128xf32>
    %145 = arith.mulf %143, %144 : vector<16x128xf32>
    %146 = vector.broadcast %27 : vector<1x128xf32> to vector<16x128xf32>
    %147 = arith.addf %145, %146 : vector<16x128xf32>
    %cst_101 = arith.constant dense<0.000000e+00> : vector<16x512xf32>
    %148 = tpu.matmul %147, %22, %cst_101 {dimension_numbers = #tpu.dot_dimension_numbers<[1], [0], [0], [1], [0, 0, 1, 1], [], []>} : vector<16x128xf32>, vector<128x512xf32>, vector<16x512xf32> -> vector<16x512xf32>
    %149 = vector.broadcast %23 : vector<1x512xf32> to vector<16x512xf32>
    %150 = arith.addf %148, %149 : vector<16x512xf32>
    %cst_102 = arith.constant 0.000000e+00 : f32
    %151 = vector.broadcast %cst_102 : f32 to vector<16x512xf32>
    %152 = arith.maximumf %150, %151 : vector<16x512xf32>
    %cst_103 = arith.constant dense<0.000000e+00> : vector<16x128xf32>
    %153 = tpu.matmul %152, %24, %cst_103 {dimension_numbers = #tpu.dot_dimension_numbers<[1], [0], [0], [1], [0, 0, 1, 1], [], []>} : vector<16x512xf32>, vector<512x128xf32>, vector<16x128xf32> -> vector<16x128xf32>
    %154 = vector.broadcast %25 : vector<1x128xf32> to vector<16x128xf32>
    %155 = arith.addf %153, %154 : vector<16x128xf32>
    %156 = arith.addf %147, %155 : vector<16x128xf32>
    %cst_104 = arith.constant dense<0.000000e+00> : vector<16x128xf32>
    %157 = tpu.matmul %156, %1, %cst_104 {dimension_numbers = #tpu.dot_dimension_numbers<[1], [0], [0], [1], [0, 0, 1, 1], [], []>} : vector<16x128xf32>, vector<128x128xf32>, vector<16x128xf32> -> vector<16x128xf32>
    %158 = arith.subf %156, %157 : vector<16x128xf32>
    %159 = arith.mulf %158, %158 : vector<16x128xf32>
    %cst_105 = arith.constant dense<0.000000e+00> : vector<16x128xf32>
    %160 = tpu.matmul %159, %1, %cst_105 {dimension_numbers = #tpu.dot_dimension_numbers<[1], [0], [0], [1], [0, 0, 1, 1], [], []>} : vector<16x128xf32>, vector<128x128xf32>, vector<16x128xf32> -> vector<16x128xf32>
    %cst_106 = arith.constant 9.99999974E-6 : f32
    %161 = vector.broadcast %cst_106 : f32 to vector<16x128xf32>
    %162 = arith.addf %160, %161 : vector<16x128xf32>
    %163 = math.rsqrt %162 : vector<16x128xf32>
    %164 = arith.mulf %158, %163 : vector<16x128xf32>
    %165 = vector.broadcast %28 : vector<1x128xf32> to vector<16x128xf32>
    %166 = arith.mulf %164, %165 : vector<16x128xf32>
    %167 = vector.broadcast %29 : vector<1x128xf32> to vector<16x128xf32>
    %168 = arith.addf %166, %167 : vector<16x128xf32>
    %169 = vector.extract_strided_slice %168 {offsets = [0, 0], sizes = [8, 128], strides = [1, 1]} : vector<16x128xf32> to vector<8x128xf32>
    %170 = vector.extract_strided_slice %168 {offsets = [8, 0], sizes = [8, 128], strides = [1, 1]} : vector<16x128xf32> to vector<8x128xf32>
    %171 = tpu.concatenate %169, %170 in 1 : vector<8x128xf32>, vector<8x128xf32> -> vector<8x256xf32>
    %cst_107 = arith.constant dense<0.000000e+00> : vector<8x256xf32>
    %172 = tpu.matmul %171, %30, %cst_107 {dimension_numbers = #tpu.dot_dimension_numbers<[1], [0], [0], [1], [0, 0, 1, 1], [], []>} : vector<8x256xf32>, vector<256x256xf32>, vector<8x256xf32> -> vector<8x256xf32>
    %173 = vector.broadcast %31 : vector<1x256xf32> to vector<8x256xf32>
    %174 = arith.addf %172, %173 : vector<8x256xf32>
    %cst_108 = arith.constant 0.000000e+00 : f32
    %175 = vector.broadcast %cst_108 : f32 to vector<8x256xf32>
    %176 = arith.maximumf %174, %175 : vector<8x256xf32>
    %cst_109 = arith.constant dense<0.000000e+00> : vector<8x128xf32>
    %177 = tpu.matmul %176, %32, %cst_109 {dimension_numbers = #tpu.dot_dimension_numbers<[1], [0], [0], [1], [0, 0, 1, 1], [], []>} : vector<8x256xf32>, vector<256x128xf32>, vector<8x128xf32> -> vector<8x128xf32>
    %178 = vector.broadcast %33 : vector<1x128xf32> to vector<8x128xf32>
    %179 = arith.addf %177, %178 : vector<8x128xf32>
    %cst_110 = arith.constant 0.000000e+00 : f32
    %180 = vector.broadcast %cst_110 : f32 to vector<8x128xf32>
    %181 = arith.maximumf %179, %180 : vector<8x128xf32>
    %cst_111 = arith.constant dense<0.000000e+00> : vector<8x128xf32>
    %182 = tpu.matmul %181, %34, %cst_111 {dimension_numbers = #tpu.dot_dimension_numbers<[1], [0], [0], [1], [0, 0, 1, 1], [], []>} : vector<8x128xf32>, vector<128x128xf32>, vector<8x128xf32> -> vector<8x128xf32>
    %183 = vector.broadcast %35 : vector<1x128xf32> to vector<8x128xf32>
    %184 = arith.addf %182, %183 : vector<8x128xf32>
    %c0_112 = arith.constant 0 : index
    %c0_113 = arith.constant 0 : index
    %185 = vector.load %arg39[%c0_112, %c0_113] : memref<8x128xf32, #tpu.memory_space<vmem>>, vector<8x128xf32>
    tpu.vector_store %arg39[%c0_112, %c0_113], %184 {strides = array<i32>} : memref<8x128xf32, #tpu.memory_space<vmem>>, vector<8x128xf32>,
    return
  }
  func.func @transform_0(%arg0: i32) -> (i32, i32) {
    %c0_i32 = arith.constant 0 : i32
    %c0_i32_0 = arith.constant 0 : i32
    return %arg0, %c0_i32 : i32, i32
  }
  func.func @transform_1(%arg0: i32) -> (i32, i32) {
    %c0_i32 = arith.constant 0 : i32
    %c0_i32_0 = arith.constant 0 : i32
    return %arg0, %c0_i32 : i32, i32
  }
  func.func @transform_2(%arg0: i32) -> (i32, i32) {
    %c0_i32 = arith.constant 0 : i32
    %c0_i32_0 = arith.constant 0 : i32
    %c0_i32_1 = arith.constant 0 : i32
    return %c0_i32, %c0_i32_0 : i32, i32
  }
  func.func @transform_3(%arg0: i32) -> (i32, i32) {
    %c0_i32 = arith.constant 0 : i32
    %c0_i32_0 = arith.constant 0 : i32
    %c0_i32_1 = arith.constant 0 : i32
    return %c0_i32, %c0_i32_0 : i32, i32
  }
  func.func @transform_4(%arg0: i32) -> (i32, i32) {
    %c0_i32 = arith.constant 0 : i32
    %c0_i32_0 = arith.constant 0 : i32
    %c0_i32_1 = arith.constant 0 : i32
    return %c0_i32, %c0_i32_0 : i32, i32
  }
  func.func @transform_5(%arg0: i32) -> (i32, i32) {
    %c0_i32 = arith.constant 0 : i32
    %c0_i32_0 = arith.constant 0 : i32
    %c0_i32_1 = arith.constant 0 : i32
    return %c0_i32, %c0_i32_0 : i32, i32
  }
  func.func @transform_6(%arg0: i32) -> (i32, i32) {
    %c0_i32 = arith.constant 0 : i32
    %c0_i32_0 = arith.constant 0 : i32
    %c0_i32_1 = arith.constant 0 : i32
    return %c0_i32, %c0_i32_0 : i32, i32
  }
  func.func @transform_7(%arg0: i32) -> (i32, i32) {
    %c0_i32 = arith.constant 0 : i32
    %c0_i32_0 = arith.constant 0 : i32
    %c0_i32_1 = arith.constant 0 : i32
    return %c0_i32, %c0_i32_0 : i32, i32
  }
  func.func @transform_8(%arg0: i32) -> (i32, i32) {
    %c0_i32 = arith.constant 0 : i32
    %c0_i32_0 = arith.constant 0 : i32
    %c0_i32_1 = arith.constant 0 : i32
    return %c0_i32, %c0_i32_0 : i32, i32
  }
  func.func @transform_9(%arg0: i32) -> (i32, i32) {
    %c0_i32 = arith.constant 0 : i32
    %c0_i32_0 = arith.constant 0 : i32
    %c0_i32_1 = arith.constant 0 : i32
    return %c0_i32, %c0_i32_0 : i32, i32
  }
  func.func @transform_10(%arg0: i32) -> (i32, i32) {
    %c0_i32 = arith.constant 0 : i32
    %c0_i32_0 = arith.constant 0 : i32
    %c0_i32_1 = arith.constant 0 : i32
    return %c0_i32, %c0_i32_0 : i32, i32
  }
  func.func @transform_11(%arg0: i32) -> (i32, i32) {
    %c0_i32 = arith.constant 0 : i32
    %c0_i32_0 = arith.constant 0 : i32
    %c0_i32_1 = arith.constant 0 : i32
    return %c0_i32, %c0_i32_0 : i32, i32
  }
  func.func @transform_12(%arg0: i32) -> (i32, i32) {
    %c0_i32 = arith.constant 0 : i32
    %c0_i32_0 = arith.constant 0 : i32
    %c0_i32_1 = arith.constant 0 : i32
    return %c0_i32, %c0_i32_0 : i32, i32
  }
  func.func @transform_13(%arg0: i32) -> (i32, i32) {
    %c0_i32 = arith.constant 0 : i32
    %c0_i32_0 = arith.constant 0 : i32
    %c0_i32_1 = arith.constant 0 : i32
    return %c0_i32, %c0_i32_0 : i32, i32
  }
  func.func @transform_14(%arg0: i32) -> (i32, i32) {
    %c0_i32 = arith.constant 0 : i32
    %c0_i32_0 = arith.constant 0 : i32
    %c0_i32_1 = arith.constant 0 : i32
    return %c0_i32, %c0_i32_0 : i32, i32
  }
  func.func @transform_15(%arg0: i32) -> (i32, i32) {
    %c0_i32 = arith.constant 0 : i32
    %c0_i32_0 = arith.constant 0 : i32
    %c0_i32_1 = arith.constant 0 : i32
    return %c0_i32, %c0_i32_0 : i32, i32
  }
  func.func @transform_16(%arg0: i32) -> (i32, i32) {
    %c0_i32 = arith.constant 0 : i32
    %c0_i32_0 = arith.constant 0 : i32
    %c0_i32_1 = arith.constant 0 : i32
    return %c0_i32, %c0_i32_0 : i32, i32
  }
  func.func @transform_17(%arg0: i32) -> (i32, i32) {
    %c0_i32 = arith.constant 0 : i32
    %c0_i32_0 = arith.constant 0 : i32
    %c0_i32_1 = arith.constant 0 : i32
    return %c0_i32, %c0_i32_0 : i32, i32
  }
  func.func @transform_18(%arg0: i32) -> (i32, i32) {
    %c0_i32 = arith.constant 0 : i32
    %c0_i32_0 = arith.constant 0 : i32
    %c0_i32_1 = arith.constant 0 : i32
    return %c0_i32, %c0_i32_0 : i32, i32
  }
  func.func @transform_19(%arg0: i32) -> (i32, i32) {
    %c0_i32 = arith.constant 0 : i32
    %c0_i32_0 = arith.constant 0 : i32
    %c0_i32_1 = arith.constant 0 : i32
    return %c0_i32, %c0_i32_0 : i32, i32
  }
  func.func @transform_20(%arg0: i32) -> (i32, i32) {
    %c0_i32 = arith.constant 0 : i32
    %c0_i32_0 = arith.constant 0 : i32
    %c0_i32_1 = arith.constant 0 : i32
    return %c0_i32, %c0_i32_0 : i32, i32
  }
  func.func @transform_21(%arg0: i32) -> (i32, i32) {
    %c0_i32 = arith.constant 0 : i32
    %c0_i32_0 = arith.constant 0 : i32
    %c0_i32_1 = arith.constant 0 : i32
    return %c0_i32, %c0_i32_0 : i32, i32
  }
  func.func @transform_22(%arg0: i32) -> (i32, i32) {
    %c0_i32 = arith.constant 0 : i32
    %c0_i32_0 = arith.constant 0 : i32
    %c0_i32_1 = arith.constant 0 : i32
    return %c0_i32, %c0_i32_0 : i32, i32
  }
  func.func @transform_23(%arg0: i32) -> (i32, i32) {
    %c0_i32 = arith.constant 0 : i32
    %c0_i32_0 = arith.constant 0 : i32
    %c0_i32_1 = arith.constant 0 : i32
    return %c0_i32, %c0_i32_0 : i32, i32
  }
  func.func @transform_24(%arg0: i32) -> (i32, i32) {
    %c0_i32 = arith.constant 0 : i32
    %c0_i32_0 = arith.constant 0 : i32
    %c0_i32_1 = arith.constant 0 : i32
    return %c0_i32, %c0_i32_0 : i32, i32
  }
  func.func @transform_25(%arg0: i32) -> (i32, i32) {
    %c0_i32 = arith.constant 0 : i32
    %c0_i32_0 = arith.constant 0 : i32
    %c0_i32_1 = arith.constant 0 : i32
    return %c0_i32, %c0_i32_0 : i32, i32
  }
  func.func @transform_26(%arg0: i32) -> (i32, i32) {
    %c0_i32 = arith.constant 0 : i32
    %c0_i32_0 = arith.constant 0 : i32
    %c0_i32_1 = arith.constant 0 : i32
    return %c0_i32, %c0_i32_0 : i32, i32
  }
  func.func @transform_27(%arg0: i32) -> (i32, i32) {
    %c0_i32 = arith.constant 0 : i32
    %c0_i32_0 = arith.constant 0 : i32
    %c0_i32_1 = arith.constant 0 : i32
    return %c0_i32, %c0_i32_0 : i32, i32
  }
  func.func @transform_28(%arg0: i32) -> (i32, i32) {
    %c0_i32 = arith.constant 0 : i32
    %c0_i32_0 = arith.constant 0 : i32
    %c0_i32_1 = arith.constant 0 : i32
    return %c0_i32, %c0_i32_0 : i32, i32
  }
  func.func @transform_29(%arg0: i32) -> (i32, i32) {
    %c0_i32 = arith.constant 0 : i32
    %c0_i32_0 = arith.constant 0 : i32
    %c0_i32_1 = arith.constant 0 : i32
    return %c0_i32, %c0_i32_0 : i32, i32
  }
  func.func @transform_30(%arg0: i32) -> (i32, i32) {
    %c0_i32 = arith.constant 0 : i32
    %c0_i32_0 = arith.constant 0 : i32
    %c0_i32_1 = arith.constant 0 : i32
    return %c0_i32, %c0_i32_0 : i32, i32
  }
  func.func @transform_31(%arg0: i32) -> (i32, i32) {
    %c0_i32 = arith.constant 0 : i32
    %c0_i32_0 = arith.constant 0 : i32
    %c0_i32_1 = arith.constant 0 : i32
    return %c0_i32, %c0_i32_0 : i32, i32
  }
  func.func @transform_32(%arg0: i32) -> (i32, i32) {
    %c0_i32 = arith.constant 0 : i32
    %c0_i32_0 = arith.constant 0 : i32
    %c0_i32_1 = arith.constant 0 : i32
    return %c0_i32, %c0_i32_0 : i32, i32
  }
  func.func @transform_33(%arg0: i32) -> (i32, i32) {
    %c0_i32 = arith.constant 0 : i32
    %c0_i32_0 = arith.constant 0 : i32
    %c0_i32_1 = arith.constant 0 : i32
    return %c0_i32, %c0_i32_0 : i32, i32
  }
  func.func @transform_34(%arg0: i32) -> (i32, i32) {
    %c0_i32 = arith.constant 0 : i32
    %c0_i32_0 = arith.constant 0 : i32
    %c0_i32_1 = arith.constant 0 : i32
    return %c0_i32, %c0_i32_0 : i32, i32
  }
  func.func @transform_35(%arg0: i32) -> (i32, i32) {
    %c0_i32 = arith.constant 0 : i32
    %c0_i32_0 = arith.constant 0 : i32
    %c0_i32_1 = arith.constant 0 : i32
    return %c0_i32, %c0_i32_0 : i32, i32
  }
  func.func @transform_36(%arg0: i32) -> (i32, i32) {
    %c0_i32 = arith.constant 0 : i32
    %c0_i32_0 = arith.constant 0 : i32
    %c0_i32_1 = arith.constant 0 : i32
    return %c0_i32, %c0_i32_0 : i32, i32
  }
  func.func @transform_37(%arg0: i32) -> (i32, i32) {
    %c0_i32 = arith.constant 0 : i32
    %c0_i32_0 = arith.constant 0 : i32
    %c0_i32_1 = arith.constant 0 : i32
    return %c0_i32, %c0_i32_0 : i32, i32
  }
  func.func @transform_38(%arg0: i32) -> (i32, i32) {
    %c0_i32 = arith.constant 0 : i32
    %c0_i32_0 = arith.constant 0 : i32
    return %arg0, %c0_i32 : i32, i32
  }
}

</mosaic_0001>

<bundles_post_ra>
// kernel: tpu_custom_call.1
= control target key start
LH: loop header
LB: loop body
LE: loop exit
PB: predicated region body
PF: predicated region fallthrough
CT: control target
= control target key end

     0   :  { %s7281_s6 = smov 1   ;;  %s7282_s10 = smov 2   ;;  %s8163_s0 = inlined_call_operand.smem [shape: u32[39], index: -1, kind: input, shape index: {}] }
   0x1   :  { %s7373_s5 = sld [smem:[%s8163_s0]]   ;;  %s7283_s14 = smov 3  }
   0x2   :  { %s7378_s9 = sld [smem:[%s8163_s0 + %s7281_s6]]   ;;  %s7284_s18 = smov 4  }
   0x3   :  { %s7383_s13 = sld [smem:[%s8163_s0 + %s7282_s10]]   ;;  %s7285_s22 = smov 5  }
   0x4   :  { %s7388_s17 = sld [smem:[%s8163_s0 + %s7283_s14]]   ;;  %s7286_s26 = smov 6  }
   0x5   :  { %s7393_s21 = sld [smem:[%s8163_s0 + %s7284_s18]]   ;;  %s7287_s30 = smov 7  }
   0x6   :  { %s7398_s25 = sld [smem:[%s8163_s0 + %s7285_s22]]   ;;  %s7288_s4 = smov 8  }
   0x7   :  { %8183 = sst [smem:[#allocation75_spill]] %s7373_s5  ;;  %s7289_s10 = smov 9  }
   0x8   :  { %s7403_s29 = sld [smem:[%s8163_s0 + %s7286_s26]]   ;;  %s7290_s15 = smov 10  }
   0x9   :  { %8184 = sst [smem:[#allocation76_spill]] %s7383_s13  ;;  %s7291_s20 = smov 11  }
   0xa   :  { %s7408_s3 = sld [smem:[%s8163_s0 + %s7287_s30]]   ;;  %s7292_s26 = smov 12  }
   0xb   :  { %8185 = sst [smem:[#allocation77_spill]] %s7393_s21  ;;  %s7293_s1 = smov 13  }
   0xc   :  { %s7413_s8 = sld [smem:[%s8163_s0 + %s7288_s4]]   ;;  %s7294_s7 = smov 14  }
   0xd   :  { %s7418_s14 = sld [smem:[%s8163_s0 + %s7289_s10]]   ;;  %s7296_s22 = smov 16  }
   0xe   :  { %8186 = sst [smem:[#allocation78_spill]] %s7403_s29  ;;  %s7297_s28 = smov 17  }
   0xf   :  { %s7423_s19 = sld [smem:[%s8163_s0 + %s7290_s15]]   ;;  %s7295_s15 = smov 15  }
  0x10   :  { %s7428_s24 = sld [smem:[%s8163_s0 + %s7291_s20]]  }
  0x11   :  { %s7433_s30 = sld [smem:[%s8163_s0 + %s7292_s26]]  }
  0x12   :  { %8187 = sst [smem:[#allocation79_spill]] %s7413_s8 }
  0x13   :  { %s7438_s6 = sld [smem:[%s8163_s0 + %s7293_s1]]  }
  0x14   :  { %s7443_s12 = sld [smem:[%s8163_s0 + %s7294_s7]]   ;;  %s7298_s7 = smov 18  }
  0x15   :  { %8188 = sst [smem:[#allocation80_spill]] %s7423_s19 }
  0x16   :  { %s7448_s20 = sld [smem:[%s8163_s0 + %s7295_s15]]   ;;  %s7299_s15 = smov 19  }
  0x17   :  { %8189 = sst [smem:[#allocation81_spill]] %s7433_s30 }
  0x18   :  { %s7453_s27 = sld [smem:[%s8163_s0 + %s7296_s22]]   ;;  %s7300_s22 = smov 20  }
  0x19   :  { %8190 = sst [smem:[#allocation82_spill]] %s7438_s6 }
  0x1a   :  { %s7458_s4 = sld [smem:[%s8163_s0 + %s7297_s28]]   ;;  %s7301_s28 = smov 21  }
  0x1b   :  { %s7463_s6 = sld [smem:[%s8163_s0 + %s7298_s7]]   ;;  %s7302_s7 = smov 22  }
  0x1c   :  { %8191 = sst [smem:[#allocation83_spill]] %s7448_s20 }
  0x1d   :  { %s7468_s20 = sld [smem:[%s8163_s0 + %s7299_s15]]   ;;  %s7303_s15 = smov 23  }
  0x1e   :  { %s7473_s30 = sld [smem:[%s8163_s0 + %s7300_s22]]   ;;  %s7304_s22 = smov 24  }
  0x1f   :  { %s7483_s19 = sld [smem:[%s8163_s0 + %s7302_s7]]   ;;  %s7306_s7 = smov 26  }
  0x20   :  { %8192 = sst [smem:[#allocation84_spill]] %s7458_s4 }
  0x21   :  { %s7478_s4 = sld [smem:[%s8163_s0 + %s7301_s28]]   ;;  %s7305_s28 = smov 25  }
  0x22   :  { %s7493_s8 = sld [smem:[%s8163_s0 + %s7304_s22]]   ;;  %s7308_s22 = smov 28  }
  0x23   :  { %8193 = sst [smem:[#allocation85_spill]] %s7468_s20 }
  0x24   :  { %s7488_s20 = sld [smem:[%s8163_s0 + %s7303_s15]]   ;;  %s7307_s15 = smov 27  }
  0x25   :  { %s7503_s29 = sld [smem:[%s8163_s0 + %s7306_s7]]   ;;  %s7310_s7 = smov 30  }
  0x26   :  { %s7513_s21 = sld [smem:[%s8163_s0 + %s7308_s22]]   ;;  %s7312_s22 = smov 32  }
  0x27   :  { %8194 = sst [smem:[#allocation86_spill]] %s7478_s4 }
  0x28   :  { %s7498_s4 = sld [smem:[%s8163_s0 + %s7305_s28]]   ;;  %s7309_s28 = smov 29  }
  0x2a   :  { %8195 = sst [smem:[#allocation87_spill]] %s7488_s20 }
  0x2b   :  { %8197 = sst [smem:[#allocation89_spill]] %s7503_s29 }
  0x2c   :  { %s7508_s20 = sld [smem:[%s8163_s0 + %s7307_s15]]   ;;  %s7311_s15 = smov 31  }
  0x2d   :  { %8198 = sst [smem:[#allocation90_spill]] %s7513_s21 }
  0x2e   :  { %8196 = sst [smem:[#allocation88_spill]] %s7498_s4 }
  0x2f   :  { %s7518_s4 = sld [smem:[%s8163_s0 + %s7309_s28]]   ;;  %s7313_s28 = smov 33  }
  0x30   :  { %s7523_s29 = sld [smem:[%s8163_s0 + %s7310_s7]]   ;;  %s7314_s7 = smov 34  }
  0x31   :  { %s7528_s13 = sld [smem:[%s8163_s0 + %s7311_s15]]   ;;  %s7315_s15 = smov 35  }
  0x32   :  { %s7533_s21 = sld [smem:[%s8163_s0 + %s7312_s22]]   ;;  %s7316_s22 = smov 36  }
  0x33   :  { %s7538_s5 = sld [smem:[%s8163_s0 + %s7313_s28]]   ;;  %s7317_s28 = smov 37  }
  0x36   :  { %8199 = sst [smem:[#allocation91_spill]] %s7523_s29 }
  0x37   :  { %8200 = sst [smem:[#allocation92_spill]] %s7528_s13 }
  0x38   :  { %8201 = sst [smem:[#allocation93_spill]] %s7533_s21 }
  0x39   :  { %8202 = sst [smem:[#allocation94_spill]] %s7538_s5 }
  0x3a   :  { %s7543_s29 = sld [smem:[%s8163_s0 + %s7314_s7]]   ;;  %s7318_s7 = smov 38  }
  0x3b   :  { %s7548_s13 = sld [smem:[%s8163_s0 + %s7315_s15]]  }
  0x3c   :  { %s7553_s21 = sld [smem:[%s8163_s0 + %s7316_s22]]  }
  0x3d   :  { %s7558_s5 = sld [smem:[%s8163_s0 + %s7317_s28]]  }
  0x40   :  { %8203 = sst [smem:[#allocation95_spill]] %s7543_s29 }
  0x41   :  { %s7563_s29 = sld [smem:[%s8163_s0 + %s7318_s7]]  }
  0x42   :  { %82 = vsyncpa [#allocation3], 0 }
  0x43   :  { %83 = vsyncpa [#allocation6], 0 }
  0x44   :  { %84 = vsyncpa [#allocation9], 0 }
  0x45   :  { %85 = vsyncpa [#allocation12], 0 }
  0x46   :  { %86 = vsyncpa [#allocation15], 0 }
  0x47   :  { %87 = vsyncpa [#allocation18], 0 }
  0x48   :  { %88 = vsyncpa [#allocation21], 0 }
  0x49   :  { %89 = vsyncpa [#allocation24], 0 }
  0x4a   :  { %90 = vsyncpa [#allocation27], 0 }
  0x4b   :  { %91 = vsyncpa [#allocation30], 0 }
  0x4c   :  { %92 = vsyncpa [#allocation33], 0 }
  0x4d   :  { %93 = vsyncpa [#allocation36], 0 }
  0x4e   :  { %94 = vsyncpa [#allocation39], 0 }
  0x4f   :  { %95 = vsyncpa [#allocation42], 0 }
  0x50   :  { %96 = vsyncpa [#allocation45], 0 }
  0x51   :  { %97 = vsyncpa [#allocation48], 0 }
  0x52   :  { %98 = vsyncpa [#allocation51], 0 }
  0x53   :  { %99 = vsyncpa [#allocation54], 0 }
  0x54   :  { %100 = vsyncpa [#allocation4], 0  ;;  %s7319_s0 = smov [#allocation5]   ;;  %s6473_s16 = scalar_lea.hbm %s7378_s9, 768 }
  0x55   :  { %s117_s15 = sshll.u32 %s7319_s0, 4  ;;  %p6474_p0 = scmp.ne.s32.totalorder %s7378_s9, %s6473_s16  ;;  %s118_s15 = int_to_ptr.vmem [resolvable:$true] %s117_s15 }
  0x56   :  { %p6477_p1 = scmp.lt.u32.totalorder %s6473_s16, %s7378_s9 }
  0x58   :  { %p6479_p2 = pnand %p6477_p1, %p6474_p0 }
  0x5a   :  { %6482 = shalt.err (!%p6479_p2)
}
  0x5b   :  { %s6483_s18 = scalar_lea.vmem %s118_s15, 768  ;;  %p6488_p4 = scmp.lt.s32.totalorder %s118_s15, %s118_s15 }
  0x5c   :  { %p6484_p3 = scmp.ne.s32.totalorder %s118_s15, %s6483_s18  ;;  %p6489_p5 = scmp.lt.s32.totalorder %s6483_s18, %s6483_s18 }
  0x5e   :  { %p6490_p6 = por %p6489_p5, %p6488_p4 }
  0x60   :  { %p6491_p7 = pnand %p6490_p6, %p6484_p3 }
  0x62   :  { %6494 = shalt.err (!%p6491_p7)
}
  0x63   :  { %120 = dma.hbm_to_vmem [thread:$0]  %s7378_s9, 768, %s118_s15, [#allocation6]  }
  0x64   :  { %s7320_s22 = smov [#allocation8]   ;;  %s7321_s26 = smov [#allocation11]  }
  0x65   :  { %s138_s23 = sshll.u32 %s7320_s22, 4  ;;  %s163_s28 = sshll.u32 %s7321_s26, 4  ;;  %s139_s23 = int_to_ptr.vmem [resolvable:$true] %s138_s23  ;;  %s164_s28 = int_to_ptr.vmem [resolvable:$true] %s163_s28 }
  0x66   :  { %s6495_s1 = scalar_lea.hbm %s7388_s17, 2048 }
  0x67   :  { %p6496_p8 = scmp.ne.s32.totalorder %s7388_s17, %s6495_s1  ;;  %p6499_p9 = scmp.lt.u32.totalorder %s6495_s1, %s7388_s17 }
  0x69   :  { %p6501_p10 = pnand %p6499_p9, %p6496_p8 }
  0x6b   :  { %6504 = shalt.err (!%p6501_p10)
}
  0x6c   :  { %s6505_s2 = scalar_lea.vmem %s139_s23, 2048  ;;  %p6510_p12 = scmp.lt.s32.totalorder %s139_s23, %s139_s23 }
  0x6d   :  { %p6506_p11 = scmp.ne.s32.totalorder %s139_s23, %s6505_s2  ;;  %p6511_p13 = scmp.lt.s32.totalorder %s6505_s2, %s6505_s2 }
  0x6f   :  { %p6512_p0 = por %p6511_p13, %p6510_p12 }
  0x71   :  { %p6513_p1 = pnand %p6512_p0, %p6506_p11 }
  0x73   :  { %6516 = shalt.err (!%p6513_p1)
}
  0x74   :  { %s7322_s7 = smov 128   ;;  %s7323_s9 = smov 8  }
  0x75   :  { %144 = dma.hbm_to_vmem [thread:$0]  %s7388_s17, 2048, %s139_s23, [#allocation9], %s7322_s7, %s7322_s7, %s7323_s9  }
  0x76   :  { %s6517_s10 = scalar_lea.hbm %s7398_s25, 16 }
  0x77   :  { %p6518_p2 = scmp.ne.s32.totalorder %s7398_s25, %s6517_s10  ;;  %p6521_p3 = scmp.lt.u32.totalorder %s6517_s10, %s7398_s25 }
  0x79   :  { %p6523_p4 = pnand %p6521_p3, %p6518_p2 }
  0x7b   :  { %6526 = shalt.err (!%p6523_p4)
}
  0x7c   :  { %s6527_s11 = scalar_lea.vmem %s164_s28, 16  ;;  %s6531_s0 = scalar_lea.vmem %s164_s28, 32 }
  0x7d   :  { %p6528_p5 = scmp.ne.s32.totalorder %s164_s28, %s6527_s11  ;;  %p6532_p6 = scmp.lt.s32.totalorder %s164_s28, %s164_s28 }
  0x7e   :  { %p6533_p7 = scmp.lt.s32.totalorder %s6531_s0, %s6527_s11 }
  0x80   :  { %p6534_p8 = por %p6533_p7, %p6532_p6 }
  0x82   :  { %p6535_p9 = pnand %p6534_p8, %p6528_p5 }
  0x84   :  { %6538 = shalt.err (!%p6535_p9)
}
  0x85   :  { %166 = dma.hbm_to_vmem [thread:$0]  %s7398_s25, 16, %s164_s28, [#allocation12]  }
  0x86   :  { %s7324_s17 = smov [#allocation14]   ;;  %s7325_s16 = smov [#allocation17]  }
  0x87   :  { %s185_s15 = sshll.u32 %s7324_s17, 4  ;;  %s207_s18 = sshll.u32 %s7325_s16, 4  ;;  %s186_s15 = int_to_ptr.vmem [resolvable:$true] %s185_s15  ;;  %s208_s18 = int_to_ptr.vmem [resolvable:$true] %s207_s18 }
  0x88   :  { %s6539_s22 = scalar_lea.hbm %s7408_s3, 16 }
  0x89   :  { %p6540_p10 = scmp.ne.s32.totalorder %s7408_s3, %s6539_s22  ;;  %p6543_p11 = scmp.lt.u32.totalorder %s6539_s22, %s7408_s3 }
  0x8b   :  { %p6545_p12 = pnand %p6543_p11, %p6540_p10 }
  0x8d   :  { %6548 = shalt.err (!%p6545_p12)
}
  0x8e   :  { %s6549_s23 = scalar_lea.vmem %s186_s15, 16  ;;  %s6553_s26 = scalar_lea.vmem %s186_s15, 32 }
  0x8f   :  { %p6550_p13 = scmp.ne.s32.totalorder %s186_s15, %s6549_s23  ;;  %p6554_p0 = scmp.lt.s32.totalorder %s186_s15, %s186_s15 }
  0x90   :  { %p6555_p1 = scmp.lt.s32.totalorder %s6553_s26, %s6549_s23 }
  0x92   :  { %p6556_p2 = por %p6555_p1, %p6554_p0 }
  0x94   :  { %p6557_p3 = pnand %p6556_p2, %p6550_p13 }
  0x96   :  { %6560 = shalt.err (!%p6557_p3)
}
  0x97   :  { %188 = dma.hbm_to_vmem [thread:$0]  %s7408_s3, 16, %s186_s15, [#allocation15]  }
  0x98   :  { %s6561_s25 = scalar_lea.hbm %s7418_s14, 48 }
  0x99   :  { %p6562_p4 = scmp.ne.s32.totalorder %s7418_s14, %s6561_s25  ;;  %p6565_p5 = scmp.lt.u32.totalorder %s6561_s25, %s7418_s14 }
  0x9b   :  { %p6567_p6 = pnand %p6565_p5, %p6562_p4 }
  0x9d   :  { %6570 = shalt.err (!%p6567_p6)
}
  0x9e   :  { %s6571_s28 = scalar_lea.vmem %s208_s18, 48  ;;  %s6575_s1 = scalar_lea.vmem %s208_s18, 64 }
  0x9f   :  { %p6572_p7 = scmp.ne.s32.totalorder %s208_s18, %s6571_s28  ;;  %p6576_p8 = scmp.lt.s32.totalorder %s208_s18, %s208_s18 }
  0xa0   :  { %p6577_p9 = scmp.lt.s32.totalorder %s6575_s1, %s6571_s28 }
  0xa2   :  { %p6578_p10 = por %p6577_p9, %p6576_p8 }
  0xa4   :  { %p6579_p11 = pnand %p6578_p10, %p6572_p7 }
  0xa6   :  { %6582 = shalt.err (!%p6579_p11)
}
  0xa7   :  { %210 = dma.hbm_to_vmem [thread:$0]  %s7418_s14, 48, %s208_s18, [#allocation18]  }
  0xa8   :  { %s7326_s3 = smov [#allocation20]   ;;  %s7327_s10 = smov [#allocation23]  }
  0xa9   :  { %s229_s2 = sshll.u32 %s7326_s3, 4  ;;  %s252_s11 = sshll.u32 %s7327_s10, 4  ;;  %s230_s2 = int_to_ptr.vmem [resolvable:$true] %s229_s2  ;;  %s253_s11 = int_to_ptr.vmem [resolvable:$true] %s252_s11 }
  0xaa   :  { %s6583_s0 = scalar_lea.hbm %s7428_s24, 16 }
  0xab   :  { %p6584_p12 = scmp.ne.s32.totalorder %s7428_s24, %s6583_s0  ;;  %p6587_p13 = scmp.lt.u32.totalorder %s6583_s0, %s7428_s24 }
  0xad   :  { %p6589_p0 = pnand %p6587_p13, %p6584_p12 }
  0xaf   :  { %6592 = shalt.err (!%p6589_p0)
}
  0xb0   :  { %s6593_s17 = scalar_lea.vmem %s230_s2, 16  ;;  %s6597_s15 = scalar_lea.vmem %s230_s2, 32 }
  0xb1   :  { %p6594_p1 = scmp.ne.s32.totalorder %s230_s2, %s6593_s17  ;;  %p6598_p2 = scmp.lt.s32.totalorder %s230_s2, %s230_s2 }
  0xb2   :  { %p6599_p3 = scmp.lt.s32.totalorder %s6597_s15, %s6593_s17 }
  0xb4   :  { %p6600_p4 = por %p6599_p3, %p6598_p2 }
  0xb6   :  { %p6601_p5 = pnand %p6600_p4, %p6594_p1 }
  0xb8   :  { %6604 = shalt.err (!%p6601_p5)
}
  0xb9   :  { %232 = dma.hbm_to_vmem [thread:$0]  %s7428_s24, 16, %s230_s2, [#allocation21]  }
  0xba   :  { %s6605_s14 = scalar_lea.hbm %s7443_s12, 8192 }
  0xbb   :  { %p6606_p6 = scmp.ne.s32.totalorder %s7443_s12, %s6605_s14  ;;  %p6609_p7 = scmp.lt.u32.totalorder %s6605_s14, %s7443_s12 }
  0xbd   :  { %p6611_p8 = pnand %p6609_p7, %p6606_p6 }
  0xbf   :  { %6614 = shalt.err (!%p6611_p8)
}
  0xc0   :  { %s6615_s16 = scalar_lea.vmem %s253_s11, 8192  ;;  %p6620_p10 = scmp.lt.s32.totalorder %s253_s11, %s253_s11 }
  0xc1   :  { %p6616_p9 = scmp.ne.s32.totalorder %s253_s11, %s6615_s16  ;;  %p6621_p11 = scmp.lt.s32.totalorder %s6615_s16, %s6615_s16 }
  0xc3   :  { %p6622_p12 = por %p6621_p11, %p6620_p10 }
  0xc5   :  { %p6623_p13 = pnand %p6622_p12, %p6616_p9 }
  0xc7   :  { %6626 = shalt.err (!%p6623_p13)
}
  0xc8   :  { %258 = dma.hbm_to_vmem [thread:$0]  %s7443_s12, 8192, %s253_s11, [#allocation24], %s7322_s7, %s7322_s7, %s7323_s9  }
  0xc9   :  { %s7328_s24 = smov [#allocation26]   ;;  %s7329_s22 = smov [#allocation29]  }
  0xca   :  { %s275_s18 = sshll.u32 %s7328_s24, 4  ;;  %s295_s23 = sshll.u32 %s7329_s22, 4  ;;  %s276_s18 = int_to_ptr.vmem [resolvable:$true] %s275_s18  ;;  %s296_s23 = int_to_ptr.vmem [resolvable:$true] %s295_s23 }
  0xcb   :  { %s6627_s26 = scalar_lea.hbm %s7453_s27, 16 }
  0xcc   :  { %p6628_p0 = scmp.ne.s32.totalorder %s7453_s27, %s6627_s26  ;;  %p6631_p1 = scmp.lt.u32.totalorder %s6627_s26, %s7453_s27 }
  0xce   :  { %p6633_p2 = pnand %p6631_p1, %p6628_p0 }
  0xd0   :  { %6636 = shalt.err (!%p6633_p2)
}
  0xd1   :  { %s6637_s25 = scalar_lea.vmem %s276_s18, 16  ;;  %s6641_s28 = scalar_lea.vmem %s276_s18, 32 }
  0xd2   :  { %p6638_p3 = scmp.ne.s32.totalorder %s276_s18, %s6637_s25  ;;  %p6642_p4 = scmp.lt.s32.totalorder %s276_s18, %s276_s18 }
  0xd3   :  { %p6643_p5 = scmp.lt.s32.totalorder %s6641_s28, %s6637_s25 }
  0xd5   :  { %p6644_p6 = por %p6643_p5, %p6642_p4 }
  0xd7   :  { %p6645_p7 = pnand %p6644_p6, %p6638_p3 }
  0xd9   :  { %6648 = shalt.err (!%p6645_p7)
}
  0xda   :  { %278 = dma.hbm_to_vmem [thread:$0]  %s7453_s27, 16, %s276_s18, [#allocation27]  }
  0xdb   :  { %s6649_s12 = scalar_lea.hbm %s7463_s6, 16 }
  0xdc   :  { %p6650_p8 = scmp.ne.s32.totalorder %s7463_s6, %s6649_s12  ;;  %p6653_p9 = scmp.lt.u32.totalorder %s6649_s12, %s7463_s6 }
  0xde   :  { %p6655_p10 = pnand %p6653_p9, %p6650_p8 }
  0xe0   :  { %6658 = shalt.err (!%p6655_p10)
}
  0xe1   :  { %s6659_s1 = scalar_lea.vmem %s296_s23, 16  ;;  %s6663_s3 = scalar_lea.vmem %s296_s23, 32 }
  0xe2   :  { %p6660_p11 = scmp.ne.s32.totalorder %s296_s23, %s6659_s1  ;;  %p6664_p12 = scmp.lt.s32.totalorder %s296_s23, %s296_s23 }
  0xe3   :  { %p6665_p13 = scmp.lt.s32.totalorder %s6663_s3, %s6659_s1 }
  0xe5   :  { %p6666_p0 = por %p6665_p13, %p6664_p12 }
  0xe7   :  { %p6667_p1 = pnand %p6666_p0, %p6660_p11 }
  0xe9   :  { %6670 = shalt.err (!%p6667_p1)
}
  0xea   :  { %298 = dma.hbm_to_vmem [thread:$0]  %s7463_s6, 16, %s296_s23, [#allocation30]  }
  0xeb   :  { %s7330_s27 = smov [#allocation32]   ;;  %s7331_s10 = smov [#allocation35]  }
  0xec   :  { %s314_s2 = sshll.u32 %s7330_s27, 4  ;;  %s336_s11 = sshll.u32 %s7331_s10, 4  ;;  %s315_s2 = int_to_ptr.vmem [resolvable:$true] %s314_s2  ;;  %s337_s11 = int_to_ptr.vmem [resolvable:$true] %s336_s11 }
  0xed   :  { %s6671_s0 = scalar_lea.hbm %s7473_s30, 6144 }
  0xee   :  { %p6672_p2 = scmp.ne.s32.totalorder %s7473_s30, %s6671_s0  ;;  %p6675_p3 = scmp.lt.u32.totalorder %s6671_s0, %s7473_s30 }
  0xf0   :  { %p6677_p4 = pnand %p6675_p3, %p6672_p2 }
  0xf2   :  { %6680 = shalt.err (!%p6677_p4)
}
  0xf3   :  { %s6681_s17 = scalar_lea.vmem %s315_s2, 6144  ;;  %p6686_p6 = scmp.lt.s32.totalorder %s315_s2, %s315_s2 }
  0xf4   :  { %p6682_p5 = scmp.ne.s32.totalorder %s315_s2, %s6681_s17  ;;  %p6687_p7 = scmp.lt.s32.totalorder %s6681_s17, %s6681_s17 }
  0xf6   :  { %p6688_p8 = por %p6687_p7, %p6686_p6 }
  0xf8   :  { %p6689_p9 = pnand %p6688_p8, %p6682_p5 }
  0xfa   :  { %6692 = shalt.err (!%p6689_p9)
}
  0xfb   :  { %s7332_s15 = smov 384   ;;  %s7333_s6 = smov 24  }
  0xfc   :  { %320 = dma.hbm_to_vmem [thread:$0]  %s7473_s30, 6144, %s315_s2, [#allocation33], %s7332_s15, %s7332_s15, %s7333_s6  }
  0xfd   :  { %s6693_s14 = scalar_lea.hbm %s7483_s19, 2048 }
  0xfe   :  { %p6694_p10 = scmp.ne.s32.totalorder %s7483_s19, %s6693_s14  ;;  %p6697_p11 = scmp.lt.u32.totalorder %s6693_s14, %s7483_s19 }
 0x100   :  { %p6699_p12 = pnand %p6697_p11, %p6694_p10 }
 0x102   :  { %6702 = shalt.err (!%p6699_p12)
}
 0x103   :  { %s6703_s16 = scalar_lea.vmem %s337_s11, 2048  ;;  %p6708_p0 = scmp.lt.s32.totalorder %s337_s11, %s337_s11 }
 0x104   :  { %p6704_p13 = scmp.ne.s32.totalorder %s337_s11, %s6703_s16  ;;  %p6709_p1 = scmp.lt.s32.totalorder %s6703_s16, %s6703_s16 }
 0x106   :  { %p6710_p2 = por %p6709_p1, %p6708_p0 }
 0x108   :  { %p6711_p3 = pnand %p6710_p2, %p6704_p13 }
 0x10a   :  { %6714 = shalt.err (!%p6711_p3)
}
 0x10b   :  { %342 = dma.hbm_to_vmem [thread:$0]  %s7483_s19, 2048, %s337_s11, [#allocation36], %s7322_s7, %s7322_s7, %s7323_s9  }
 0x10c   :  { %s7334_s30 = smov [#allocation38]   ;;  %s7335_s18 = smov [#allocation41]  }
 0x10d   :  { %s358_s24 = sshll.u32 %s7334_s30, 4  ;;  %s385_s22 = sshll.u32 %s7335_s18, 4  ;;  %s359_s24 = int_to_ptr.vmem [resolvable:$true] %s358_s24  ;;  %s386_s22 = int_to_ptr.vmem [resolvable:$true] %s385_s22 }
 0x10e   :  { %s6715_s23 = scalar_lea.hbm %s7493_s8, 8192 }
 0x10f   :  { %p6716_p4 = scmp.ne.s32.totalorder %s7493_s8, %s6715_s23  ;;  %p6719_p5 = scmp.lt.u32.totalorder %s6715_s23, %s7493_s8 }
 0x111   :  { %p6721_p6 = pnand %p6719_p5, %p6716_p4 }
 0x113   :  { %6724 = shalt.err (!%p6721_p6)
}
 0x114   :  { %s6725_s26 = scalar_lea.vmem %s359_s24, 8192  ;;  %p6730_p8 = scmp.lt.s32.totalorder %s359_s24, %s359_s24 }
 0x115   :  { %p6726_p7 = scmp.ne.s32.totalorder %s359_s24, %s6725_s26  ;;  %p6731_p9 = scmp.lt.s32.totalorder %s6725_s26, %s6725_s26 }
 0x117   :  { %p6732_p10 = por %p6731_p9, %p6730_p8 }
 0x119   :  { %p6733_p11 = pnand %p6732_p10, %p6726_p7 }
 0x11b   :  { %6736 = shalt.err (!%p6733_p11)
}
 0x11c   :  { %s7336_s25 = smov 512   ;;  %s7337_s19 = smov 32  }
 0x11d   :  { %364 = dma.hbm_to_vmem [thread:$0]  %s7493_s8, 8192, %s359_s24, [#allocation39], %s7336_s25, %s7336_s25, %s7337_s19  }
 0x11e   :  { %s6737_s28 = scalar_lea.hbm %s7508_s20, 16 }
 0x11f   :  { %p6738_p12 = scmp.ne.s32.totalorder %s7508_s20, %s6737_s28  ;;  %p6741_p13 = scmp.lt.u32.totalorder %s6737_s28, %s7508_s20 }
 0x121   :  { %p6743_p0 = pnand %p6741_p13, %p6738_p12 }
 0x123   :  { %6746 = shalt.err (!%p6743_p0)
}
 0x124   :  { %s6747_s12 = scalar_lea.vmem %s386_s22, 16  ;;  %s6751_s1 = scalar_lea.vmem %s386_s22, 32 }
 0x125   :  { %p6748_p1 = scmp.ne.s32.totalorder %s386_s22, %s6747_s12  ;;  %p6752_p2 = scmp.lt.s32.totalorder %s386_s22, %s386_s22 }
 0x126   :  { %p6753_p3 = scmp.lt.s32.totalorder %s6751_s1, %s6747_s12 }
 0x128   :  { %p6754_p4 = por %p6753_p3, %p6752_p2 }
 0x12a   :  { %p6755_p5 = pnand %p6754_p4, %p6748_p1 }
 0x12c   :  { %6758 = shalt.err (!%p6755_p5)
}
 0x12d   :  { %388 = dma.hbm_to_vmem [thread:$0]  %s7508_s20, 16, %s386_s22, [#allocation42]  }
 0x12e   :  { %s7338_s8 = smov [#allocation44]   ;;  %s7339_s27 = smov [#allocation47]  }
 0x12f   :  { %s405_s3 = sshll.u32 %s7338_s8, 4  ;;  %s425_s2 = sshll.u32 %s7339_s27, 4  ;;  %s406_s3 = int_to_ptr.vmem [resolvable:$true] %s405_s3  ;;  %s426_s2 = int_to_ptr.vmem [resolvable:$true] %s425_s2 }
 0x130   :  { %s6759_s10 = scalar_lea.hbm %s7518_s4, 16 }
 0x131   :  { %p6760_p6 = scmp.ne.s32.totalorder %s7518_s4, %s6759_s10  ;;  %p6763_p7 = scmp.lt.u32.totalorder %s6759_s10, %s7518_s4 }
 0x133   :  { %p6765_p8 = pnand %p6763_p7, %p6760_p6 }
 0x135   :  { %6768 = shalt.err (!%p6765_p8)
}
 0x136   :  { %s6769_s11 = scalar_lea.vmem %s406_s3, 16  ;;  %s6773_s0 = scalar_lea.vmem %s406_s3, 32 }
 0x137   :  { %p6770_p9 = scmp.ne.s32.totalorder %s406_s3, %s6769_s11  ;;  %p6774_p10 = scmp.lt.s32.totalorder %s406_s3, %s406_s3 }
 0x138   :  { %p6775_p11 = scmp.lt.s32.totalorder %s6773_s0, %s6769_s11 }
 0x13a   :  { %p6776_p12 = por %p6775_p11, %p6774_p10 }
 0x13c   :  { %p6777_p13 = pnand %p6776_p12, %p6770_p9 }
 0x13e   :  { %6780 = shalt.err (!%p6777_p13)
}
 0x13f   :  { %s8204_s20 = sld [smem:[#allocation92_spill]] }
 0x140   :  { %408 = dma.hbm_to_vmem [thread:$0]  %s7518_s4, 16, %s406_s3, [#allocation45]  }
 0x145   :  { %s6781_s17 = scalar_lea.hbm %s8204_s20, 16 }
 0x146   :  { %p6782_p0 = scmp.ne.s32.totalorder %s8204_s20, %s6781_s17  ;;  %p6785_p1 = scmp.lt.u32.totalorder %s6781_s17, %s8204_s20 }
 0x148   :  { %p6787_p2 = pnand %p6785_p1, %p6782_p0 }
 0x14a   :  { %6790 = shalt.err (!%p6787_p2)
}
 0x14b   :  { %s6791_s14 = scalar_lea.vmem %s426_s2, 16  ;;  %s6795_s16 = scalar_lea.vmem %s426_s2, 32 }
 0x14c   :  { %p6792_p3 = scmp.ne.s32.totalorder %s426_s2, %s6791_s14  ;;  %p6796_p4 = scmp.lt.s32.totalorder %s426_s2, %s426_s2 }
 0x14d   :  { %p6797_p5 = scmp.lt.s32.totalorder %s6795_s16, %s6791_s14 }
 0x14f   :  { %p6798_p6 = por %p6797_p5, %p6796_p4 }
 0x151   :  { %p6799_p7 = pnand %p6798_p6, %p6792_p3 }
 0x153   :  { %6802 = shalt.err (!%p6799_p7)
}
 0x154   :  { %s8205_s30 = sld [smem:[#allocation94_spill]]  ;;  %s7340_s4 = smov [#allocation50]  }
 0x155   :  { %428 = dma.hbm_to_vmem [thread:$0]  %s8204_s20, 16, %s426_s2, [#allocation48]  }
 0x156   :  { %s447_s24 = sshll.u32 %s7340_s4, 4  ;;  %s7341_s18 = smov [#allocation2]   ;;  %s448_s24 = int_to_ptr.vmem [resolvable:$true] %s447_s24 }
 0x157   :  { %s107_s22 = sshll.u32 %s7341_s18, 4  ;;  %s108_s22 = int_to_ptr.vmem [resolvable:$true] %s107_s22 }
 0x15a   :  { %s6803_s23 = scalar_lea.hbm %s8205_s30, 32 }
 0x15b   :  { %p6804_p8 = scmp.ne.s32.totalorder %s8205_s30, %s6803_s23  ;;  %p6807_p9 = scmp.lt.u32.totalorder %s6803_s23, %s8205_s30 }
 0x15d   :  { %p6809_p10 = pnand %p6807_p9, %p6804_p8 }
 0x15f   :  { %6812 = shalt.err (!%p6809_p10)
}
 0x160   :  { %s6813_s26 = scalar_lea.vmem %s448_s24, 32  ;;  %p6818_p12 = scmp.lt.s32.totalorder %s448_s24, %s448_s24 }
 0x161   :  { %p6814_p11 = scmp.ne.s32.totalorder %s448_s24, %s6813_s26  ;;  %p6819_p13 = scmp.lt.s32.totalorder %s6813_s26, %s6813_s26 }
 0x163   :  { %p6820_p0 = por %p6819_p13, %p6818_p12 }
 0x165   :  { %p6821_p1 = pnand %p6820_p0, %p6814_p11 }
 0x167   :  { %6824 = shalt.err (!%p6821_p1)
}
 0x168   :  { %s8206_s28 = sld [smem:[#allocation75_spill]] }
 0x169   :  { %450 = dma.hbm_to_vmem [thread:$0]  %s8205_s30, 32, %s448_s24, [#allocation51]  }
 0x16e   :  { %s6825_s12 = scalar_lea.hbm %s8206_s28, 128 }
 0x16f   :  { %p6826_p2 = scmp.ne.s32.totalorder %s8206_s28, %s6825_s12  ;;  %p6829_p3 = scmp.lt.u32.totalorder %s6825_s12, %s8206_s28 }
 0x171   :  { %p6831_p4 = pnand %p6829_p3, %p6826_p2 }
 0x173   :  { %6834 = shalt.err (!%p6831_p4)
}
 0x174   :  { %s6835_s1 = scalar_lea.vmem %s108_s22, 128  ;;  %p6840_p6 = scmp.lt.s32.totalorder %s108_s22, %s108_s22 }
 0x175   :  { %p6836_p5 = scmp.ne.s32.totalorder %s108_s22, %s6835_s1  ;;  %p6841_p7 = scmp.lt.s32.totalorder %s6835_s1, %s6835_s1 }
 0x177   :  { %p6842_p8 = por %p6841_p7, %p6840_p6 }
 0x179   :  { %p6843_p9 = pnand %p6842_p8, %p6836_p5 }
 0x17b   :  { %6846 = shalt.err (!%p6843_p9)
}
 0x17c   :  { %s8207_s8 = sld [smem:[#allocation76_spill]]  ;;  %s7342_s3 = smov [#allocation7]  }
 0x17d   :  { %110 = dma.hbm_to_vmem [thread:$0]  %s8206_s28, 128, %s108_s22, [#allocation3]  }
 0x17e   :  { %s126_s27 = sshll.u32 %s7342_s3, 4  ;;  %s7343_s2 = smov [#allocation10]   ;;  %s127_s27 = int_to_ptr.vmem [resolvable:$true] %s126_s27 }
 0x17f   :  { %s150_s10 = sshll.u32 %s7343_s2, 4  ;;  %s151_s10 = int_to_ptr.vmem [resolvable:$true] %s150_s10 }
 0x182   :  { %s6847_s11 = scalar_lea.hbm %s8207_s8, 2048 }
 0x183   :  { %p6848_p10 = scmp.ne.s32.totalorder %s8207_s8, %s6847_s11  ;;  %p6851_p11 = scmp.lt.u32.totalorder %s6847_s11, %s8207_s8 }
 0x185   :  { %p6853_p12 = pnand %p6851_p11, %p6848_p10 }
 0x187   :  { %6856 = shalt.err (!%p6853_p12)
}
 0x188   :  { %s6857_s0 = scalar_lea.vmem %s127_s27, 2048  ;;  %p6862_p0 = scmp.lt.s32.totalorder %s127_s27, %s127_s27 }
 0x189   :  { %p6858_p13 = scmp.ne.s32.totalorder %s127_s27, %s6857_s0  ;;  %p6863_p1 = scmp.lt.s32.totalorder %s6857_s0, %s6857_s0 }
 0x18b   :  { %p6864_p2 = por %p6863_p1, %p6862_p0 }
 0x18d   :  { %p6865_p3 = pnand %p6864_p2, %p6858_p13 }
 0x18f   :  { %6868 = shalt.err (!%p6865_p3)
}
 0x190   :  { %s8208_s20 = sld [smem:[#allocation77_spill]] }
 0x191   :  { %132 = dma.hbm_to_vmem [thread:$0]  %s8207_s8, 2048, %s127_s27, [#allocation6], %s7322_s7, %s7322_s7, %s7323_s9  }
 0x196   :  { %s6869_s17 = scalar_lea.hbm %s8208_s20, 256 }
 0x197   :  { %p6870_p4 = scmp.ne.s32.totalorder %s8208_s20, %s6869_s17  ;;  %p6873_p5 = scmp.lt.u32.totalorder %s6869_s17, %s8208_s20 }
 0x199   :  { %p6875_p6 = pnand %p6873_p5, %p6870_p4 }
 0x19b   :  { %6878 = shalt.err (!%p6875_p6)
}
 0x19c   :  { %s6879_s14 = scalar_lea.vmem %s151_s10, 256  ;;  %p6884_p8 = scmp.lt.s32.totalorder %s151_s10, %s151_s10 }
 0x19d   :  { %p6880_p7 = scmp.ne.s32.totalorder %s151_s10, %s6879_s14  ;;  %p6885_p9 = scmp.lt.s32.totalorder %s6879_s14, %s6879_s14 }
 0x19f   :  { %p6886_p10 = por %p6885_p9, %p6884_p8 }
 0x1a1   :  { %p6887_p11 = pnand %p6886_p10, %p6880_p7 }
 0x1a3   :  { %6890 = shalt.err (!%p6887_p11)
}
 0x1a4   :  { %s8209_s16 = sld [smem:[#allocation78_spill]]  ;;  %s7344_s30 = smov [#allocation13]  }
 0x1a5   :  { %156 = dma.hbm_to_vmem [thread:$0]  %s8208_s20, 256, %s151_s10, [#allocation9], %s7322_s7, %s7322_s7, %s7323_s9  }
 0x1a6   :  { %s172_s4 = sshll.u32 %s7344_s30, 4  ;;  %s7345_s24 = smov [#allocation16]   ;;  %s173_s4 = int_to_ptr.vmem [resolvable:$true] %s172_s4 }
 0x1a7   :  { %s194_s18 = sshll.u32 %s7345_s24, 4  ;;  %s195_s18 = int_to_ptr.vmem [resolvable:$true] %s194_s18 }
 0x1aa   :  { %s6891_s22 = scalar_lea.hbm %s8209_s16, 12288 }
 0x1ab   :  { %p6892_p12 = scmp.ne.s32.totalorder %s8209_s16, %s6891_s22  ;;  %p6895_p13 = scmp.lt.u32.totalorder %s6891_s22, %s8209_s16 }
 0x1ad   :  { %p6897_p0 = pnand %p6895_p13, %p6892_p12 }
 0x1af   :  { %6900 = shalt.err (!%p6897_p0)
}
 0x1b0   :  { %s6901_s23 = scalar_lea.vmem %s173_s4, 12288  ;;  %p6906_p2 = scmp.lt.s32.totalorder %s173_s4, %s173_s4 }
 0x1b1   :  { %p6902_p1 = scmp.ne.s32.totalorder %s173_s4, %s6901_s23  ;;  %p6907_p3 = scmp.lt.s32.totalorder %s6901_s23, %s6901_s23 }
 0x1b3   :  { %p6908_p4 = por %p6907_p3, %p6906_p2 }
 0x1b5   :  { %p6909_p5 = pnand %p6908_p4, %p6902_p1 }
 0x1b7   :  { %6912 = shalt.err (!%p6909_p5)
}
 0x1b8   :  { %s8210_s26 = sld [smem:[#allocation79_spill]] }
 0x1b9   :  { %178 = dma.hbm_to_vmem [thread:$0]  %s8209_s16, 12288, %s173_s4, [#allocation12], %s7322_s7, %s7322_s7, %s7323_s9  }
 0x1be   :  { %s6913_s28 = scalar_lea.hbm %s8210_s26, 6144 }
 0x1bf   :  { %p6914_p6 = scmp.ne.s32.totalorder %s8210_s26, %s6913_s28  ;;  %p6917_p7 = scmp.lt.u32.totalorder %s6913_s28, %s8210_s26 }
 0x1c1   :  { %p6919_p8 = pnand %p6917_p7, %p6914_p6 }
 0x1c3   :  { %6922 = shalt.err (!%p6919_p8)
}
 0x1c4   :  { %s6923_s12 = scalar_lea.vmem %s195_s18, 6144  ;;  %p6928_p10 = scmp.lt.s32.totalorder %s195_s18, %s195_s18 }
 0x1c5   :  { %p6924_p9 = scmp.ne.s32.totalorder %s195_s18, %s6923_s12  ;;  %p6929_p11 = scmp.lt.s32.totalorder %s6923_s12, %s6923_s12 }
 0x1c7   :  { %p6930_p12 = por %p6929_p11, %p6928_p10 }
 0x1c9   :  { %p6931_p13 = pnand %p6930_p12, %p6924_p9 }
 0x1cb   :  { %6934 = shalt.err (!%p6931_p13)
}
 0x1cc   :  { %s8211_s1 = sld [smem:[#allocation80_spill]]  ;;  %s7346_s8 = smov [#allocation19]  }
 0x1cd   :  { %200 = dma.hbm_to_vmem [thread:$0]  %s8210_s26, 6144, %s195_s18, [#allocation15], %s7332_s15, %s7332_s15, %s7333_s6  }
 0x1ce   :  { %s216_s3 = sshll.u32 %s7346_s8, 4  ;;  %s7347_s27 = smov [#allocation22]   ;;  %s217_s3 = int_to_ptr.vmem [resolvable:$true] %s216_s3 }
 0x1cf   :  { %s238_s2 = sshll.u32 %s7347_s27, 4  ;;  %s239_s2 = int_to_ptr.vmem [resolvable:$true] %s238_s2 }
 0x1d2   :  { %s6935_s10 = scalar_lea.hbm %s8211_s1, 2048 }
 0x1d3   :  { %p6936_p0 = scmp.ne.s32.totalorder %s8211_s1, %s6935_s10  ;;  %p6939_p1 = scmp.lt.u32.totalorder %s6935_s10, %s8211_s1 }
 0x1d5   :  { %p6941_p2 = pnand %p6939_p1, %p6936_p0 }
 0x1d7   :  { %6944 = shalt.err (!%p6941_p2)
}
 0x1d8   :  { %s6945_s11 = scalar_lea.vmem %s217_s3, 2048  ;;  %p6950_p4 = scmp.lt.s32.totalorder %s217_s3, %s217_s3 }
 0x1d9   :  { %p6946_p3 = scmp.ne.s32.totalorder %s217_s3, %s6945_s11  ;;  %p6951_p5 = scmp.lt.s32.totalorder %s6945_s11, %s6945_s11 }
 0x1db   :  { %p6952_p6 = por %p6951_p5, %p6950_p4 }
 0x1dd   :  { %p6953_p7 = pnand %p6952_p6, %p6946_p3 }
 0x1df   :  { %6956 = shalt.err (!%p6953_p7)
}
 0x1e0   :  { %s8212_s15 = sld [smem:[#allocation81_spill]] }
 0x1e1   :  { %222 = dma.hbm_to_vmem [thread:$0]  %s8211_s1, 2048, %s217_s3, [#allocation18], %s7322_s7, %s7322_s7, %s7323_s9  }
 0x1e6   :  { %s6957_s6 = scalar_lea.hbm %s8212_s15, 8192 }
 0x1e7   :  { %p6958_p8 = scmp.ne.s32.totalorder %s8212_s15, %s6957_s6  ;;  %p6961_p9 = scmp.lt.u32.totalorder %s6957_s6, %s8212_s15 }
 0x1e9   :  { %p6963_p10 = pnand %p6961_p9, %p6958_p8 }
 0x1eb   :  { %6966 = shalt.err (!%p6963_p10)
}
 0x1ec   :  { %s6967_s0 = scalar_lea.vmem %s239_s2, 8192  ;;  %p6972_p12 = scmp.lt.s32.totalorder %s239_s2, %s239_s2 }
 0x1ed   :  { %p6968_p11 = scmp.ne.s32.totalorder %s239_s2, %s6967_s0  ;;  %p6973_p13 = scmp.lt.s32.totalorder %s6967_s0, %s6967_s0 }
 0x1ef   :  { %p6974_p0 = por %p6973_p13, %p6972_p12 }
 0x1f1   :  { %p6975_p1 = pnand %p6974_p0, %p6968_p11 }
 0x1f3   :  { %6978 = shalt.err (!%p6975_p1)
}
 0x1f4   :  { %s8213_s20 = sld [smem:[#allocation83_spill]]  ;;  %s7348_s17 = smov [#allocation25]  }
 0x1f5   :  { %244 = dma.hbm_to_vmem [thread:$0]  %s8212_s15, 8192, %s239_s2, [#allocation21], %s7336_s25, %s7336_s25, %s7337_s19  }
 0x1f6   :  { %s265_s14 = sshll.u32 %s7348_s17, 4  ;;  %s7349_s16 = smov [#allocation28]   ;;  %s266_s14 = int_to_ptr.vmem [resolvable:$true] %s265_s14 }
 0x1f7   :  { %s285_s30 = sshll.u32 %s7349_s16, 4  ;;  %s286_s30 = int_to_ptr.vmem [resolvable:$true] %s285_s30 }
 0x1fa   :  { %s6979_s4 = scalar_lea.hbm %s8213_s20, 16 }
 0x1fb   :  { %p6980_p2 = scmp.ne.s32.totalorder %s8213_s20, %s6979_s4  ;;  %p6983_p3 = scmp.lt.u32.totalorder %s6979_s4, %s8213_s20 }
 0x1fd   :  { %p6985_p4 = pnand %p6983_p3, %p6980_p2 }
 0x1ff   :  { %6988 = shalt.err (!%p6985_p4)
}
 0x200   :  { %s6989_s24 = scalar_lea.vmem %s266_s14, 16  ;;  %s6993_s18 = scalar_lea.vmem %s266_s14, 32 }
 0x201   :  { %p6990_p5 = scmp.ne.s32.totalorder %s266_s14, %s6989_s24  ;;  %p6994_p6 = scmp.lt.s32.totalorder %s266_s14, %s266_s14 }
 0x202   :  { %p6995_p7 = scmp.lt.s32.totalorder %s6993_s18, %s6989_s24 }
 0x204   :  { %p6996_p8 = por %p6995_p7, %p6994_p6 }
 0x206   :  { %p6997_p9 = pnand %p6996_p8, %p6990_p5 }
 0x208   :  { %7000 = shalt.err (!%p6997_p9)
}
 0x209   :  { %s8214_s25 = sld [smem:[#allocation84_spill]] }
 0x20a   :  { %268 = dma.hbm_to_vmem [thread:$0]  %s8213_s20, 16, %s266_s14, [#allocation24]  }
 0x20f   :  { %s7001_s19 = scalar_lea.hbm %s8214_s25, 16 }
 0x210   :  { %p7002_p10 = scmp.ne.s32.totalorder %s8214_s25, %s7001_s19  ;;  %p7005_p11 = scmp.lt.u32.totalorder %s7001_s19, %s8214_s25 }
 0x212   :  { %p7007_p12 = pnand %p7005_p11, %p7002_p10 }
 0x214   :  { %7010 = shalt.err (!%p7007_p12)
}
 0x215   :  { %s7011_s22 = scalar_lea.vmem %s286_s30, 16  ;;  %s7015_s23 = scalar_lea.vmem %s286_s30, 32 }
 0x216   :  { %p7012_p13 = scmp.ne.s32.totalorder %s286_s30, %s7011_s22  ;;  %p7016_p0 = scmp.lt.s32.totalorder %s286_s30, %s286_s30 }
 0x217   :  { %p7017_p1 = scmp.lt.s32.totalorder %s7015_s23, %s7011_s22 }
 0x219   :  { %p7018_p2 = por %p7017_p1, %p7016_p0 }
 0x21b   :  { %p7019_p3 = pnand %p7018_p2, %p7012_p13 }
 0x21d   :  { %7022 = shalt.err (!%p7019_p3)
}
 0x21e   :  { %s8215_s26 = sld [smem:[#allocation85_spill]]  ;;  %s7350_s28 = smov [#allocation31]  }
 0x21f   :  { %288 = dma.hbm_to_vmem [thread:$0]  %s8214_s25, 16, %s286_s30, [#allocation27]  }
 0x220   :  { %s305_s12 = sshll.u32 %s7350_s28, 4  ;;  %s7351_s1 = smov [#allocation34]   ;;  %s306_s12 = int_to_ptr.vmem [resolvable:$true] %s305_s12 }
 0x221   :  { %s327_s8 = sshll.u32 %s7351_s1, 4  ;;  %s328_s8 = int_to_ptr.vmem [resolvable:$true] %s327_s8 }
 0x224   :  { %s7023_s3 = scalar_lea.hbm %s8215_s26, 16 }
 0x225   :  { %p7024_p4 = scmp.ne.s32.totalorder %s8215_s26, %s7023_s3  ;;  %p7027_p5 = scmp.lt.u32.totalorder %s7023_s3, %s8215_s26 }
 0x227   :  { %p7029_p6 = pnand %p7027_p5, %p7024_p4 }
 0x229   :  { %7032 = shalt.err (!%p7029_p6)
}
 0x22a   :  { %s7033_s27 = scalar_lea.vmem %s306_s12, 16  ;;  %s7037_s2 = scalar_lea.vmem %s306_s12, 32 }
 0x22b   :  { %p7034_p7 = scmp.ne.s32.totalorder %s306_s12, %s7033_s27  ;;  %p7038_p8 = scmp.lt.s32.totalorder %s306_s12, %s306_s12 }
 0x22c   :  { %p7039_p9 = scmp.lt.s32.totalorder %s7037_s2, %s7033_s27 }
 0x22e   :  { %p7040_p10 = por %p7039_p9, %p7038_p8 }
 0x230   :  { %p7041_p11 = pnand %p7040_p10, %p7034_p7 }
 0x232   :  { %7044 = shalt.err (!%p7041_p11)
}
 0x233   :  { %s8216_s10 = sld [smem:[#allocation86_spill]] }
 0x234   :  { %308 = dma.hbm_to_vmem [thread:$0]  %s8215_s26, 16, %s306_s12, [#allocation30]  }
 0x239   :  { %s7045_s11 = scalar_lea.hbm %s8216_s10, 48 }
 0x23a   :  { %p7046_p12 = scmp.ne.s32.totalorder %s8216_s10, %s7045_s11  ;;  %p7049_p13 = scmp.lt.u32.totalorder %s7045_s11, %s8216_s10 }
 0x23c   :  { %p7051_p0 = pnand %p7049_p13, %p7046_p12 }
 0x23e   :  { %7054 = shalt.err (!%p7051_p0)
}
 0x23f   :  { %s7055_s15 = scalar_lea.vmem %s328_s8, 48  ;;  %s7059_s6 = scalar_lea.vmem %s328_s8, 64 }
 0x240   :  { %p7056_p1 = scmp.ne.s32.totalorder %s328_s8, %s7055_s15  ;;  %p7060_p2 = scmp.lt.s32.totalorder %s328_s8, %s328_s8 }
 0x241   :  { %p7061_p3 = scmp.lt.s32.totalorder %s7059_s6, %s7055_s15 }
 0x243   :  { %p7062_p4 = por %p7061_p3, %p7060_p2 }
 0x245   :  { %p7063_p5 = pnand %p7062_p4, %p7056_p1 }
 0x247   :  { %7066 = shalt.err (!%p7063_p5)
}
 0x248   :  { %s8217_s0 = sld [smem:[#allocation87_spill]]  ;;  %s7352_s20 = smov [#allocation37]  }
 0x249   :  { %330 = dma.hbm_to_vmem [thread:$0]  %s8216_s10, 48, %s328_s8, [#allocation33]  }
 0x24a   :  { %s349_s17 = sshll.u32 %s7352_s20, 4  ;;  %s7353_s14 = smov [#allocation40]   ;;  %s350_s17 = int_to_ptr.vmem [resolvable:$true] %s349_s17 }
 0x24b   :  { %s372_s16 = sshll.u32 %s7353_s14, 4  ;;  %s373_s16 = int_to_ptr.vmem [resolvable:$true] %s372_s16 }
 0x24e   :  { %s7067_s30 = scalar_lea.hbm %s8217_s0, 16 }
 0x24f   :  { %p7068_p6 = scmp.ne.s32.totalorder %s8217_s0, %s7067_s30  ;;  %p7071_p7 = scmp.lt.u32.totalorder %s7067_s30, %s8217_s0 }
 0x251   :  { %p7073_p8 = pnand %p7071_p7, %p7068_p6 }
 0x253   :  { %7076 = shalt.err (!%p7073_p8)
}
 0x254   :  { %s7077_s4 = scalar_lea.vmem %s350_s17, 16  ;;  %s7081_s24 = scalar_lea.vmem %s350_s17, 32 }
 0x255   :  { %p7078_p9 = scmp.ne.s32.totalorder %s350_s17, %s7077_s4  ;;  %p7082_p10 = scmp.lt.s32.totalorder %s350_s17, %s350_s17 }
 0x256   :  { %p7083_p11 = scmp.lt.s32.totalorder %s7081_s24, %s7077_s4 }
 0x258   :  { %p7084_p12 = por %p7083_p11, %p7082_p10 }
 0x25a   :  { %p7085_p13 = pnand %p7084_p12, %p7078_p9 }
 0x25c   :  { %7088 = shalt.err (!%p7085_p13)
}
 0x25d   :  { %s8218_s18 = sld [smem:[#allocation89_spill]] }
 0x25e   :  { %352 = dma.hbm_to_vmem [thread:$0]  %s8217_s0, 16, %s350_s17, [#allocation36]  }
 0x263   :  { %s7089_s25 = scalar_lea.hbm %s8218_s18, 8192 }
 0x264   :  { %p7090_p0 = scmp.ne.s32.totalorder %s8218_s18, %s7089_s25  ;;  %p7093_p1 = scmp.lt.u32.totalorder %s7089_s25, %s8218_s18 }
 0x266   :  { %p7095_p2 = pnand %p7093_p1, %p7090_p0 }
 0x268   :  { %7098 = shalt.err (!%p7095_p2)
}
 0x269   :  { %s7099_s19 = scalar_lea.vmem %s373_s16, 8192  ;;  %p7104_p4 = scmp.lt.s32.totalorder %s373_s16, %s373_s16 }
 0x26a   :  { %p7100_p3 = scmp.ne.s32.totalorder %s373_s16, %s7099_s19  ;;  %p7105_p5 = scmp.lt.s32.totalorder %s7099_s19, %s7099_s19 }
 0x26c   :  { %p7106_p6 = por %p7105_p5, %p7104_p4 }
 0x26e   :  { %p7107_p7 = pnand %p7106_p6, %p7100_p3 }
 0x270   :  { %7110 = shalt.err (!%p7107_p7)
}
 0x271   :  { %s8219_s22 = sld [smem:[#allocation90_spill]]  ;;  %s7354_s23 = smov [#allocation43]  }
 0x272   :  { %378 = dma.hbm_to_vmem [thread:$0]  %s8218_s18, 8192, %s373_s16, [#allocation39], %s7322_s7, %s7322_s7, %s7323_s9  }
 0x273   :  { %s395_s26 = sshll.u32 %s7354_s23, 4  ;;  %s7355_s28 = smov [#allocation46]   ;;  %s396_s26 = int_to_ptr.vmem [resolvable:$true] %s395_s26 }
 0x274   :  { %s415_s12 = sshll.u32 %s7355_s28, 4  ;;  %s416_s12 = int_to_ptr.vmem [resolvable:$true] %s415_s12 }
 0x277   :  { %s7111_s1 = scalar_lea.hbm %s8219_s22, 16 }
 0x278   :  { %p7112_p8 = scmp.ne.s32.totalorder %s8219_s22, %s7111_s1  ;;  %p7115_p9 = scmp.lt.u32.totalorder %s7111_s1, %s8219_s22 }
 0x27a   :  { %p7117_p10 = pnand %p7115_p9, %p7112_p8 }
 0x27c   :  { %7120 = shalt.err (!%p7117_p10)
}
 0x27d   :  { %s7121_s8 = scalar_lea.vmem %s396_s26, 16  ;;  %s7125_s3 = scalar_lea.vmem %s396_s26, 32 }
 0x27e   :  { %p7122_p11 = scmp.ne.s32.totalorder %s396_s26, %s7121_s8  ;;  %p7126_p12 = scmp.lt.s32.totalorder %s396_s26, %s396_s26 }
 0x27f   :  { %p7127_p13 = scmp.lt.s32.totalorder %s7125_s3, %s7121_s8 }
 0x281   :  { %p7128_p0 = por %p7127_p13, %p7126_p12 }
 0x283   :  { %p7129_p1 = pnand %p7128_p0, %p7122_p11 }
 0x285   :  { %7132 = shalt.err (!%p7129_p1)
}
 0x286   :  { %s8220_s27 = sld [smem:[#allocation91_spill]] }
 0x287   :  { %398 = dma.hbm_to_vmem [thread:$0]  %s8219_s22, 16, %s396_s26, [#allocation42]  }
 0x28c   :  { %s7133_s2 = scalar_lea.hbm %s8220_s27, 16 }
 0x28d   :  { %p7134_p2 = scmp.ne.s32.totalorder %s8220_s27, %s7133_s2  ;;  %p7137_p3 = scmp.lt.u32.totalorder %s7133_s2, %s8220_s27 }
 0x28f   :  { %p7139_p4 = pnand %p7137_p3, %p7134_p2 }
 0x291   :  { %7142 = shalt.err (!%p7139_p4)
}
 0x292   :  { %s7143_s10 = scalar_lea.vmem %s416_s12, 16  ;;  %s7147_s11 = scalar_lea.vmem %s416_s12, 32 }
 0x293   :  { %p7144_p5 = scmp.ne.s32.totalorder %s416_s12, %s7143_s10  ;;  %p7148_p6 = scmp.lt.s32.totalorder %s416_s12, %s416_s12 }
 0x294   :  { %p7149_p7 = scmp.lt.s32.totalorder %s7147_s11, %s7143_s10 }
 0x296   :  { %p7150_p8 = por %p7149_p7, %p7148_p6 }
 0x298   :  { %p7151_p9 = pnand %p7150_p8, %p7144_p5 }
 0x29a   :  { %7154 = shalt.err (!%p7151_p9)
}
 0x29b   :  { %s8221_s15 = sld [smem:[#allocation93_spill]]  ;;  %s7356_s6 = smov [#allocation49]  }
 0x29c   :  { %418 = dma.hbm_to_vmem [thread:$0]  %s8220_s27, 16, %s416_s12, [#allocation45]  }
 0x29d   :  { %s434_s0 = sshll.u32 %s7356_s6, 4  ;;  %s435_s0 = int_to_ptr.vmem [resolvable:$true] %s434_s0 }
 0x2a1   :  { %s7155_s20 = scalar_lea.hbm %s8221_s15, 8192 }
 0x2a2   :  { %p7156_p10 = scmp.ne.s32.totalorder %s8221_s15, %s7155_s20  ;;  %p7159_p11 = scmp.lt.u32.totalorder %s7155_s20, %s8221_s15 }
 0x2a4   :  { %p7161_p12 = pnand %p7159_p11, %p7156_p10 }
 0x2a6   :  { %7164 = shalt.err (!%p7161_p12)
}
 0x2a7   :  { %s7165_s17 = scalar_lea.vmem %s435_s0, 8192  ;;  %p7170_p0 = scmp.lt.s32.totalorder %s435_s0, %s435_s0 }
 0x2a8   :  { %p7166_p13 = scmp.ne.s32.totalorder %s435_s0, %s7165_s17  ;;  %p7171_p1 = scmp.lt.s32.totalorder %s7165_s17, %s7165_s17 }
 0x2aa   :  { %p7172_p2 = por %p7171_p1, %p7170_p0 }
 0x2ac   :  { %p7173_p3 = pnand %p7172_p2, %p7166_p13 }
 0x2ae   :  { %7176 = shalt.err (!%p7173_p3)
}
 0x2af   :  { %s7357_s14 = smov 256   ;;  %s8222_s16 = sld [smem:[#allocation95_spill]] }
 0x2b0   :  { %s7358_s30 = smov 16   ;;  %s7359_s4 = smov [#allocation52]  }
 0x2b1   :  { %440 = dma.hbm_to_vmem [thread:$0]  %s8221_s15, 8192, %s435_s0, [#allocation48], %s7357_s14, %s7357_s14, %s7358_s30  }
 0x2b2   :  { %s456_s24 = sshll.u32 %s7359_s4, 4  ;;  %s7360_s18 = smov [#allocation53]   ;;  %s457_s24 = int_to_ptr.vmem [resolvable:$true] %s456_s24 }
 0x2b3   :  { %s469_s25 = sshll.u32 %s7360_s18, 4  ;;  %s470_s25 = int_to_ptr.vmem [resolvable:$true] %s469_s25 }
 0x2b5   :  { %s7177_s19 = scalar_lea.hbm %s8222_s16, 4096 }
 0x2b6   :  { %p7178_p4 = scmp.ne.s32.totalorder %s8222_s16, %s7177_s19  ;;  %p7181_p5 = scmp.lt.u32.totalorder %s7177_s19, %s8222_s16 }
 0x2b8   :  { %p7183_p6 = pnand %p7181_p5, %p7178_p4 }
 0x2ba   :  { %7186 = shalt.err (!%p7183_p6)
}
 0x2bb   :  { %s7187_s22 = scalar_lea.vmem %s457_s24, 4096  ;;  %p7192_p8 = scmp.lt.s32.totalorder %s457_s24, %s457_s24 }
 0x2bc   :  { %p7188_p7 = scmp.ne.s32.totalorder %s457_s24, %s7187_s22  ;;  %p7193_p9 = scmp.lt.s32.totalorder %s7187_s22, %s7187_s22 }
 0x2be   :  { %p7194_p10 = por %p7193_p9, %p7192_p8 }
 0x2c0   :  { %p7195_p11 = pnand %p7194_p10, %p7188_p7 }
 0x2c2   :  { %7198 = shalt.err (!%p7195_p11)
}
 0x2c3   :  { %462 = dma.hbm_to_vmem [thread:$0]  %s8222_s16, 4096, %s457_s24, [#allocation51], %s7322_s7, %s7322_s7, %s7323_s9  }
 0x2c4   :  { %s7199_s23 = scalar_lea.hbm %s7548_s13, 16 }
 0x2c5   :  { %p7200_p12 = scmp.ne.s32.totalorder %s7548_s13, %s7199_s23  ;;  %p7203_p13 = scmp.lt.u32.totalorder %s7199_s23, %s7548_s13 }
 0x2c7   :  { %p7205_p0 = pnand %p7203_p13, %p7200_p12 }
 0x2c9   :  { %7208 = shalt.err (!%p7205_p0)
}
 0x2ca   :  { %s7209_s26 = scalar_lea.vmem %s470_s25, 16  ;;  %s7213_s28 = scalar_lea.vmem %s470_s25, 32 }
 0x2cb   :  { %p7210_p1 = scmp.ne.s32.totalorder %s470_s25, %s7209_s26  ;;  %p7214_p2 = scmp.lt.s32.totalorder %s470_s25, %s470_s25 }
 0x2cc   :  { %p7215_p3 = scmp.lt.s32.totalorder %s7213_s28, %s7209_s26 }
 0x2ce   :  { %p7216_p4 = por %p7215_p3, %p7214_p2 }
 0x2d0   :  { %p7217_p5 = pnand %p7216_p4, %p7210_p1 }
 0x2d2   :  { %7220 = shalt.err (!%p7217_p5)
}
 0x2d3   :  { %472 = dma.hbm_to_vmem [thread:$0]  %s7548_s13, 16, %s470_s25, [#allocation54]  }
 0x2d4   :  { %7243 = dma.done.wait [#allocation3], 128  }
 0x2d5   :  { %7244 = vsyncadd [#allocation3], 4294967168 }
 0x2d6   :  { %7245 = dma.done.wait [#allocation6], 2816  }
 0x2d7   :  { %7246 = vsyncadd [#allocation6], 4294964480 }
 0x2d8   :  { %7247 = dma.done.wait [#allocation9], 2304  }
 0x2d9   :  { %7248 = vsyncadd [#allocation9], 4294964992 }
 0x2da   :  { %7249 = dma.done.wait [#allocation12], 12304  }
 0x2db   :  { %7250 = vsyncadd [#allocation12], 4294954992 }
 0x2dc   :  { %7251 = dma.done.wait [#allocation15], 6160  }
 0x2dd   :  { %7252 = vsyncadd [#allocation15], 4294961136 }
 0x2de   :  { %7253 = dma.done.wait [#allocation18], 2096  }
 0x2df   :  { %7254 = vsyncadd [#allocation18], 4294965200 }
 0x2e0   :  { %7255 = dma.done.wait [#allocation21], 8208  }
 0x2e1   :  { %7256 = vsyncadd [#allocation21], 4294959088 }
 0x2e2   :  { %7257 = dma.done.wait [#allocation24], 8208  }
 0x2e3   :  { %7258 = vsyncadd [#allocation24], 4294959088 }
 0x2e4   :  { %7259 = dma.done.wait [#allocation27], 32  }
 0x2e5   :  { %7260 = vsyncadd [#allocation27], 4294967264 }
 0x2e6   :  { %7261 = dma.done.wait [#allocation30], 32  }
 0x2e7   :  { %7262 = vsyncadd [#allocation30], 4294967264 }
 0x2e8   :  { %7263 = dma.done.wait [#allocation33], 6192  }
 0x2e9   :  { %7264 = vsyncadd [#allocation33], 4294961104 }
 0x2ea   :  { %7265 = dma.done.wait [#allocation36], 2064  }
 0x2eb   :  { %7266 = vsyncadd [#allocation36], 4294965232 }
 0x2ec   :  { %7267 = dma.done.wait [#allocation39], 16384  }
 0x2ed   :  { %7268 = vsyncadd [#allocation39], 4294950912 }
 0x2ee   :  { %7269 = dma.done.wait [#allocation42], 32  }
 0x2ef   :  { %7270 = vsyncadd [#allocation42], 4294967264 }
 0x2f0   :  { %7271 = dma.done.wait [#allocation45], 32  }
 0x2f1   :  { %7272 = vsyncadd [#allocation45], 4294967264 }
 0x2f2   :  { %7273 = dma.done.wait [#allocation48], 8208  }
 0x2f3   :  { %7274 = vsyncadd [#allocation48], 4294959088 }
 0x2f4   :  { %7275 = dma.done.wait [#allocation51], 4128  }
 0x2f5   :  { %7276 = vsyncadd [#allocation51], 4294963168 }
 0x2f6   :  { %7277 = dma.done.wait [#allocation54], 16  }
 0x2f7   :  { %7278 = vsyncadd [#allocation54], 4294967280  ;;  %v7361_v0 = vmov 0.0|0.0   ;;  %vm7362_vm0 = vmmov 0   ;;  %v7363_v1 = vmov 0.0   ;;  %v611_v2 = vld [vmem:[#allocation10] sm:$0xff] }
 0x2f8   :  { %5298 = vmatprep.subr.bf16.mxu0 %v7361_v0  ;;  %4700 = vmatprep.mubr.msk.f32.mxu0 %vm7362_vm0, %v7363_v1  ;;  %v612_v3 = vld [vmem:[#allocation10 + $0x8] sm:$0xff]  ;;  %v630_v4 = vld [vmem:[#allocation13 + $0x80] sm:$0xff]  ;;  %v631_v6 = vld [vmem:[#allocation13 + $0x88] sm:$0xff]  ;;  %vm1233_vm1 = vcmask 130048   ;;  %s8223_s13 = sld [smem:[#allocation82_spill]]  ;;  %s8224_s7 = sld [smem:[#allocation88_spill]] }
 0x2f9   :  { %v5299_v5 = vpack.c.bf16 %v612_v3, %v611_v2  ;;  %v614_v7 = vld [vmem:[#allocation13] sm:$0xff]  ;;  %v615_v8 = vld [vmem:[#allocation13 + $0x8] sm:$0xff]  ;;  %v5301_v9 = vpack.c.bf16 %v631_v6, %v630_v4  ;;  %v1226_v13 = vld [vmem:[#allocation2] sm:$0xff]  ;;  %s7364_s9 = smov [#allocation55]  }
 0x2fa   :  { %v5303_v10 = vpack.c.bf16 %v615_v8, %v614_v7  ;;  %v662_v11 = vld [vmem:[#allocation13 + $0x180] sm:$0xff]  ;;  %v663_v12 = vld [vmem:[#allocation13 + $0x188] sm:$0xff]  ;;  %v632_v15 = vld [vmem:[#allocation13 + $0x90] sm:$0xff]  ;;  %s4015_s12 = sshll.u32 %s7364_s9, 4  ;;  %s4016_s12 = int_to_ptr.vmem [resolvable:$true] %s4015_s12 }
 0x2fb   :  { %5300 = vmatpush3.bf16.msra.mxu0 %v5299_v5  ;;  %v5333_v14 = vpack.c.bf16 %v663_v12, %v662_v11  ;;  %v633_v16 = vld [vmem:[#allocation13 + $0x98] sm:$0xff]  ;;  %v646_v17 = vld [vmem:[#allocation13 + $0x100] sm:$0xff]  ;;  %5302 = vmatprep.subr.bf16.mxu1 %v5301_v9  ;;  %v647_v19 = vld [vmem:[#allocation13 + $0x108] sm:$0xff]  ;;  %s7221_s1 = scalar_lea.vmem %s4016_s12, 128  ;;  %p7226_p7 = scmp.lt.s32.totalorder %s4016_s12, %s4016_s12 }
 0x2fc   :  { %v5305_v18 = vpack.c.bf16 %v633_v16, %v632_v15  ;;  %v616_v20 = vld [vmem:[#allocation13 + $0x10] sm:$0xff]  ;;  %v617_v21 = vld [vmem:[#allocation13 + $0x18] sm:$0xff]  ;;  %5304 = vmatpush3.bf16.msra.mxu1 %v5303_v10  ;;  %v5335_v22 = vpack.c.bf16 %v647_v19, %v646_v17  ;;  %v634_v26 = vld [vmem:[#allocation13 + $0xa0] sm:$0xff]  ;;  %p7222_p6 = scmp.ne.s32.totalorder %s4016_s12, %s7221_s1  ;;  %p7227_p8 = scmp.lt.s32.totalorder %s7221_s1, %s7221_s1 }
 0x2fd   :  { %5334 = vmatprep.subr.bf16.mxu0 %v5333_v14  ;;  %v5307_v23 = vpack.c.bf16 %v617_v21, %v616_v20  ;;  %v664_v24 = vld [vmem:[#allocation13 + $0x190] sm:$0xff]  ;;  %v665_v25 = vld [vmem:[#allocation13 + $0x198] sm:$0xff]  ;;  %v635_v28 = vld [vmem:[#allocation13 + $0xa8] sm:$0xff] }
 0x2fe   :  { %4701 = vmatmul.mubr.msk.f32.vlgmr.msra.gmra.mrb[0].mxu0 %vm1233_vm1, %v1226_v13  ;;  %5306 = vmatprep.subr.bf16.mxu1 %v5305_v18  ;;  %v5337_v27 = vpack.c.bf16 %v665_v25, %v664_v24  ;;  %v648_v29 = vld [vmem:[#allocation13 + $0x110] sm:$0xff]  ;;  %v649_v30 = vld [vmem:[#allocation13 + $0x118] sm:$0xff]  ;;  %v5309_v31 = vpack.c.bf16 %v635_v28, %v634_v26  ;;  %v618_v33 = vld [vmem:[#allocation13 + $0x20] sm:$0xff]  ;;  %p7228_p9 = por %p7227_p8, %p7226_p7 }
 0x2ff   :  { %5336 = vmatpush3.bf16.msra.mxu0 %v5335_v22  ;;  %v5339_v32 = vpack.c.bf16 %v649_v30, %v648_v29  ;;  %v619_v34 = vld [vmem:[#allocation13 + $0x28] sm:$0xff]  ;;  %v666_v35 = vld [vmem:[#allocation13 + $0x1a0] sm:$0xff]  ;;  %v636_v37 = vld [vmem:[#allocation13 + $0xb0] sm:$0xff] }
 0x300   :  { %5338 = vmatprep.subr.bf16.mxu0 %v5337_v27  ;;  %v667_v36 = vld [vmem:[#allocation13 + $0x1a8] sm:$0xff]  ;;  %v637_v38 = vld [vmem:[#allocation13 + $0xb8] sm:$0xff]  ;;  %5308 = vmatpush3.bf16.msra.mxu1 %v5307_v23  ;;  %v5311_v39 = vpack.c.bf16 %v619_v34, %v618_v33  ;;  %v650_v41 = vld [vmem:[#allocation13 + $0x120] sm:$0xff]  ;;  %p7229_p10 = pnand %p7228_p9, %p7222_p6 }
 0x301   :  { %v5341_v40 = vpack.c.bf16 %v667_v36, %v666_v35  ;;  %v651_v42 = vld [vmem:[#allocation13 + $0x128] sm:$0xff]  ;;  %v620_v43 = vld [vmem:[#allocation13 + $0x30] sm:$0xff]  ;;  %5310 = vmatprep.subr.bf16.mxu1 %v5309_v31  ;;  %v5313_v44 = vpack.c.bf16 %v637_v38, %v636_v37  ;;  %v621_v45 = vld [vmem:[#allocation13 + $0x38] sm:$0xff] }
 0x302   :  { %v668_v46 = vld [vmem:[#allocation13 + $0x1b0] sm:$0xff]  ;;  %v669_v47 = vld [vmem:[#allocation13 + $0x1b8] sm:$0xff]  ;;  %v5343_v48 = vpack.c.bf16 %v651_v42, %v650_v41  ;;  %v638_v49 = vld [vmem:[#allocation13 + $0xc0] sm:$0xff]  ;;  %v5315_v54 = vpack.c.bf16 %v621_v45, %v620_v43 }
 0x303   :  { %5340 = vmatpush3.bf16.msra.mxu0 %v5339_v32  ;;  %v639_v50 = vld [vmem:[#allocation13 + $0xc8] sm:$0xff]  ;;  %v5345_v51 = vpack.c.bf16 %v669_v47, %v668_v46  ;;  %v652_v52 = vld [vmem:[#allocation13 + $0x130] sm:$0xff]  ;;  %v653_v53 = vld [vmem:[#allocation13 + $0x138] sm:$0xff] }
 0x304   :  { %5342 = vmatprep.subr.bf16.mxu0 %v5341_v40  ;;  %5312 = vmatpush3.bf16.msra.mxu1 %v5311_v39  ;;  %v670_v55 = vld [vmem:[#allocation13 + $0x1c0] sm:$0xff]  ;;  %v671_v56 = vld [vmem:[#allocation13 + $0x1c8] sm:$0xff]  ;;  %v5317_v57 = vpack.c.bf16 %v639_v50, %v638_v49  ;;  %v5347_v60 = vpack.c.bf16 %v653_v53, %v652_v52  ;;  %v640_v61 = vld [vmem:[#allocation13 + $0xd0] sm:$0xff] }
 0x305   :  { %5314 = vmatprep.subr.bf16.mxu1 %v5313_v44  ;;  %v622_v58 = vld [vmem:[#allocation13 + $0x40] sm:$0xff]  ;;  %v623_v59 = vld [vmem:[#allocation13 + $0x48] sm:$0xff]  ;;  %v641_v62 = vld [vmem:[#allocation13 + $0xd8] sm:$0xff]  ;;  %v5349_v63 = vpack.c.bf16 %v671_v56, %v670_v55 }
 0x306   :  { %v654_v2 = vld [vmem:[#allocation13 + $0x140] sm:$0xff]  ;;  %v655_v3 = vld [vmem:[#allocation13 + $0x148] sm:$0xff]  ;;  %v5319_v4 = vpack.c.bf16 %v623_v59, %v622_v58  ;;  %v672_v5 = vld [vmem:[#allocation13 + $0x1d0] sm:$0xff]  ;;  %v5321_v7 = vpack.c.bf16 %v641_v62, %v640_v61 }
 0x307   :  { %5344 = vmatpush3.bf16.msra.mxu0 %v5343_v48  ;;  %v673_v6 = vld [vmem:[#allocation13 + $0x1d8] sm:$0xff]  ;;  %v624_v8 = vld [vmem:[#allocation13 + $0x50] sm:$0xff]  ;;  %v5351_v10 = vpack.c.bf16 %v655_v3, %v654_v2  ;;  %v642_v11 = vld [vmem:[#allocation13 + $0xe0] sm:$0xff] }
 0x308   :  { %5346 = vmatprep.subr.bf16.mxu0 %v5345_v51  ;;  %5316 = vmatpush3.bf16.msra.mxu1 %v5315_v54  ;;  %v625_v9 = vld [vmem:[#allocation13 + $0x58] sm:$0xff]  ;;  %v643_v12 = vld [vmem:[#allocation13 + $0xe8] sm:$0xff]  ;;  %v5353_v13 = vpack.c.bf16 %v673_v6, %v672_v5  ;;  %v656_v14 = vld [vmem:[#allocation13 + $0x150] sm:$0xff] }
 0x309   :  { %5318 = vmatprep.subr.bf16.mxu1 %v5317_v57  ;;  %v657_v15 = vld [vmem:[#allocation13 + $0x158] sm:$0xff]  ;;  %v5323_v16 = vpack.c.bf16 %v625_v9, %v624_v8  ;;  %v674_v17 = vld [vmem:[#allocation13 + $0x1e0] sm:$0xff]  ;;  %v675_v18 = vld [vmem:[#allocation13 + $0x1e8] sm:$0xff]  ;;  %v5325_v20 = vpack.c.bf16 %v643_v12, %v642_v11 }
 0x30a   :  { %v1309_v19 = vld [vmem:[#allocation5 + $0x8] sm:$0xff]  ;;  %v5355_v23 = vpack.c.bf16 %v657_v15, %v656_v14  ;;  %v644_v24 = vld [vmem:[#allocation13 + $0xf0] sm:$0xff]  ;;  %v645_v25 = vld [vmem:[#allocation13 + $0xf8] sm:$0xff]  ;;  %v5357_v26 = vpack.c.bf16 %v675_v18, %v674_v17 }
 0x30b   :  { %5348 = vmatpush3.bf16.msra.mxu0 %v5347_v60  ;;  %v626_v21 = vld [vmem:[#allocation13 + $0x60] sm:$0xff]  ;;  %v627_v22 = vld [vmem:[#allocation13 + $0x68] sm:$0xff]  ;;  %1384 = vmatprep.mubr.f32.mxu1 %v1309_v19  ;;  %v1311_v29 = vld [vmem:[#allocation5 + $0x18] sm:$0xff]  ;;  %v5329_v33 = vpack.c.bf16 %v645_v25, %v644_v24 }
 0x30c   :  { %5350 = vmatprep.subr.bf16.mxu0 %v5349_v63  ;;  %5320 = vmatpush3.bf16.msra.mxu1 %v5319_v4  ;;  %v658_v27 = vld [vmem:[#allocation13 + $0x160] sm:$0xff]  ;;  %v659_v28 = vld [vmem:[#allocation13 + $0x168] sm:$0xff]  ;;  %v5327_v30 = vpack.c.bf16 %v627_v22, %v626_v21  ;;  %v676_v31 = vld [vmem:[#allocation13 + $0x1f0] sm:$0xff] }
 0x30d   :  { %5322 = vmatprep.subr.bf16.mxu1 %v5321_v7  ;;  %v677_v32 = vld [vmem:[#allocation13 + $0x1f8] sm:$0xff]  ;;  %1454 = vmatprep.mubr.f32.mxu0 %v1311_v29  ;;  %v628_v34 = vld [vmem:[#allocation13 + $0x70] sm:$0xff]  ;;  %v5359_v36 = vpack.c.bf16 %v659_v28, %v658_v27  ;;  %v694_v37 = vld [vmem:[#allocation13 + $0x280] sm:$0xff] }
 0x30e   :  { %v629_v35 = vld [vmem:[#allocation13 + $0x78] sm:$0xff]  ;;  %v695_v38 = vld [vmem:[#allocation13 + $0x288] sm:$0xff]  ;;  %v5361_v39 = vpack.c.bf16 %v677_v32, %v676_v31  ;;  %v660_v40 = vld [vmem:[#allocation13 + $0x170] sm:$0xff] }
 0x30f   :  { %5352 = vmatpush3.bf16.msra.mxu0 %v5351_v10  ;;  %v661_v41 = vld [vmem:[#allocation13 + $0x178] sm:$0xff]  ;;  %v5331_v42 = vpack.c.bf16 %v629_v35, %v628_v34  ;;  %v5365_v43 = vpack.c.bf16 %v695_v38, %v694_v37  ;;  %v678_v44 = vld [vmem:[#allocation13 + $0x200] sm:$0xff]  ;;  %v679_v45 = vld [vmem:[#allocation13 + $0x208] sm:$0xff] }
 0x310   :  { %5354 = vmatprep.subr.bf16.mxu0 %v5353_v13  ;;  %5324 = vmatpush3.bf16.msra.mxu1 %v5323_v16  ;;  %v5363_v46 = vpack.c.bf16 %v661_v41, %v660_v40  ;;  %v696_v47 = vld [vmem:[#allocation13 + $0x290] sm:$0xff]  ;;  %v697_v48 = vld [vmem:[#allocation13 + $0x298] sm:$0xff]  ;;  %v5367_v50 = vpack.c.bf16 %v679_v45, %v678_v44  ;;  %v698_v55 = vld [vmem:[#allocation13 + $0x2a0] sm:$0xff] }
 0x311   :  { %5326 = vmatprep.subr.bf16.mxu1 %v5325_v20  ;;  %v1308_v49 = vld [vmem:[#allocation5] sm:$0xff]  ;;  %v1310_v51 = vld [vmem:[#allocation5 + $0x10] sm:$0xff]  ;;  %v5369_v54 = vpack.c.bf16 %v697_v48, %v696_v47  ;;  %v1313_v57 = vld [vmem:[#allocation5 + $0x28] sm:$0xff] }
 0x312   :  { %v680_v52 = vld [vmem:[#allocation13 + $0x210] sm:$0xff]  ;;  %v681_v53 = vld [vmem:[#allocation13 + $0x218] sm:$0xff]  ;;  %v699_v56 = vld [vmem:[#allocation13 + $0x2a8] sm:$0xff] }
 0x313   :  { %5356 = vmatpush3.bf16.msra.mxu0 %v5355_v23  ;;  %v712_v58 = vld [vmem:[#allocation16 + $0x8] sm:$0xff]  ;;  %v715_v59 = vld [vmem:[#allocation16 + $0x20] sm:$0xff]  ;;  %v714_v62 = vld [vmem:[#allocation16 + $0x18] sm:$0xff]  ;;  %v5371_v3 = vpack.c.bf16 %v681_v53, %v680_v52  ;;  %v5373_v9 = vpack.c.bf16 %v699_v56, %v698_v55 }
 0x314   :  { %5358 = vmatprep.subr.bf16.mxu0 %v5357_v26  ;;  %5328 = vmatpush3.bf16.msra.mxu1 %v5327_v30  ;;  %v711_v60 = vld [vmem:[#allocation16] sm:$0xff]  ;;  %v5397_v61 = vpack.c.bf16 %v715_v59, %v712_v58  ;;  %v718_v63 = vld [vmem:[#allocation16 + $0x38] sm:$0xff]  ;;  %v721_v2 = vld [vmem:[#allocation16 + $0x50] sm:$0xff] }
 0x315   :  { %5330 = vmatprep.subr.bf16.mxu1 %v5329_v33  ;;  %v682_v4 = vld [vmem:[#allocation13 + $0x220] sm:$0xff]  ;;  %v5399_v5 = vpack.c.bf16 %v714_v62, %v711_v60  ;;  %v5401_v6 = vpack.c.bf16 %v721_v2, %v718_v63  ;;  %v717_v7 = vld [vmem:[#allocation16 + $0x30] sm:$0xff]  ;;  %v720_v8 = vld [vmem:[#allocation16 + $0x48] sm:$0xff] }
 0x316   :  { %v683_v10 = vld [vmem:[#allocation13 + $0x228] sm:$0xff]  ;;  %v700_v13 = vld [vmem:[#allocation13 + $0x2b0] sm:$0xff]  ;;  %v701_v14 = vld [vmem:[#allocation13 + $0x2b8] sm:$0xff]  ;;  %v5403_v15 = vpack.c.bf16 %v720_v8, %v717_v7 }
 0x317   :  { %5360 = vmatpush3.bf16.msra.mxu0 %v5359_v36  ;;  %v724_v11 = vld [vmem:[#allocation16 + $0x68] sm:$0xff]  ;;  %v727_v12 = vld [vmem:[#allocation16 + $0x80] sm:$0xff]  ;;  %v5375_v16 = vpack.c.bf16 %v683_v10, %v682_v4  ;;  %v726_v20 = vld [vmem:[#allocation16 + $0x78] sm:$0xff]  ;;  %v5377_v21 = vpack.c.bf16 %v701_v14, %v700_v13 }
 0x318   :  { %5362 = vmatprep.subr.bf16.mxu0 %v5361_v39  ;;  %5332 = vmatpush3.bf16.msra.mxu1 %v5331_v42  ;;  %v684_v17 = vld [vmem:[#allocation13 + $0x230] sm:$0xff]  ;;  %v5405_v18 = vpack.c.bf16 %v727_v12, %v724_v11  ;;  %v723_v19 = vld [vmem:[#allocation16 + $0x60] sm:$0xff]  ;;  %v685_v22 = vld [vmem:[#allocation13 + $0x238] sm:$0xff] }
 0x319   :  { %5366 = vmatprep.subr.bf16.mxu1 %v5365_v43  ;;  %v730_v23 = vld [vmem:[#allocation16 + $0x98] sm:$0xff]  ;;  %v733_v24 = vld [vmem:[#allocation16 + $0xb0] sm:$0xff]  ;;  %v703_v26 = vld [vmem:[#allocation13 + $0x2c8] sm:$0xff]  ;;  %v5407_v27 = vpack.c.bf16 %v726_v20, %v723_v19  ;;  %v5379_v28 = vpack.c.bf16 %v685_v22, %v684_v17 }
 0x31a   :  { %v702_v25 = vld [vmem:[#allocation13 + $0x2c0] sm:$0xff]  ;;  %v5409_v30 = vpack.c.bf16 %v733_v24, %v730_v23  ;;  %v729_v31 = vld [vmem:[#allocation16 + $0x90] sm:$0xff]  ;;  %v732_v32 = vld [vmem:[#allocation16 + $0xa8] sm:$0xff] }
 0x31b   :  { %5364 = vmatpush3.bf16.msra.mxu0 %v5363_v46  ;;  %1385 = vmatmul.mubr.f32.vlgmr.msra.gmra.mrb[0].mxu1 %v1308_v49  ;;  %v686_v29 = vld [vmem:[#allocation13 + $0x240] sm:$0xff]  ;;  %v5381_v33 = vpack.c.bf16 %v703_v26, %v702_v25  ;;  %v687_v34 = vld [vmem:[#allocation13 + $0x248] sm:$0xff]  ;;  %v704_v37 = vld [vmem:[#allocation13 + $0x2d0] sm:$0xff]  ;;  %v5411_v39 = vpack.c.bf16 %v732_v32, %v729_v31 }
 0x31c   :  { %5368 = vmatpush3.bf16.msra.mxu1 %v5367_v50  ;;  %1524 = vmatprep.mubr.f32.mxu1 %v1313_v57  ;;  %v736_v35 = vld [vmem:[#allocation16 + $0xc8] sm:$0xff]  ;;  %v739_v36 = vld [vmem:[#allocation16 + $0xe0] sm:$0xff]  ;;  %v705_v38 = vld [vmem:[#allocation13 + $0x2d8] sm:$0xff]  ;;  %v5383_v40 = vpack.c.bf16 %v687_v34, %v686_v29 }
 0x31d   :  { %5370 = vmatprep.subr.bf16.mxu1 %v5369_v54  ;;  %5398 = vmatprep.subr.bf16.mxu0 %v5397_v61  ;;  %v688_v41 = vld [vmem:[#allocation13 + $0x250] sm:$0xff]  ;;  %v5413_v42 = vpack.c.bf16 %v739_v36, %v736_v35  ;;  %v735_v43 = vld [vmem:[#allocation16 + $0xc0] sm:$0xff]  ;;  %v738_v44 = vld [vmem:[#allocation16 + $0xd8] sm:$0xff]  ;;  %v5385_v45 = vpack.c.bf16 %v705_v38, %v704_v37 }
 0x31e   :  { %1455 = vmatmul.mubr.f32.vlgmr.msra.gmra.mrb[2].mxu0 %v1310_v51  ;;  %v689_v46 = vld [vmem:[#allocation13 + $0x258] sm:$0xff]  ;;  %v706_v49 = vld [vmem:[#allocation13 + $0x2e0] sm:$0xff]  ;;  %v707_v50 = vld [vmem:[#allocation13 + $0x2e8] sm:$0xff]  ;;  %v5415_v51 = vpack.c.bf16 %v738_v44, %v735_v43 }
 0x31f   :  { %1611 = vmatprep.mubr.f32.mxu0 %v7363_v1  ;;  %5400 = vmatpush1.bf16.msra.mxu0 %v5399_v5  ;;  %v742_v47 = vld [vmem:[#allocation16 + $0xf8] sm:$0xff]  ;;  %v745_v48 = vld [vmem:[#allocation16 + $0x110] sm:$0xff]  ;;  %v5387_v52 = vpack.c.bf16 %v689_v46, %v688_v41  ;;  %v744_v56 = vld [vmem:[#allocation16 + $0x108] sm:$0xff]  ;;  %v5389_v57 = vpack.c.bf16 %v707_v50, %v706_v49 }
 0x320   :  { %5372 = vmatpush3.bf16.msra.mxu1 %v5371_v3  ;;  %5402 = vmatprep.subr.bf16.mxu0 %v5401_v6  ;;  %v690_v53 = vld [vmem:[#allocation13 + $0x260] sm:$0xff]  ;;  %v5417_v54 = vpack.c.bf16 %v745_v48, %v742_v47  ;;  %v741_v55 = vld [vmem:[#allocation16 + $0xf0] sm:$0xff]  ;;  %v691_v58 = vld [vmem:[#allocation13 + $0x268] sm:$0xff] }
 0x321   :  { %5374 = vmatprep.subr.bf16.mxu1 %v5373_v9  ;;  %v748_v59 = vld [vmem:[#allocation16 + $0x128] sm:$0xff]  ;;  %v751_v60 = vld [vmem:[#allocation16 + $0x140] sm:$0xff]  ;;  %v709_v62 = vld [vmem:[#allocation13 + $0x2f8] sm:$0xff]  ;;  %v5419_v63 = vpack.c.bf16 %v744_v56, %v741_v55  ;;  %v5391_v2 = vpack.c.bf16 %v691_v58, %v690_v53 }
 0x322   :  { %v708_v61 = vld [vmem:[#allocation13 + $0x2f0] sm:$0xff]  ;;  %v5421_v3 = vpack.c.bf16 %v751_v60, %v748_v59  ;;  %v747_v4 = vld [vmem:[#allocation16 + $0x120] sm:$0xff]  ;;  %v750_v5 = vld [vmem:[#allocation16 + $0x138] sm:$0xff] }
 0x323   :  { %5404 = vmatpush1.bf16.msra.mxu0 %v5403_v15  ;;  %v5393_v6 = vpack.c.bf16 %v709_v62, %v708_v61  ;;  %v692_v7 = vld [vmem:[#allocation13 + $0x270] sm:$0xff]  ;;  %v693_v8 = vld [vmem:[#allocation13 + $0x278] sm:$0xff]  ;;  %v5423_v9 = vpack.c.bf16 %v750_v5, %v747_v4  ;;  %v4081_v48 = vld [vmem:[#allocation14] ss:$0 sm:$0xff] }
 0x324   :  { %5376 = vmatpush3.bf16.msra.mxu1 %v5375_v16  ;;  %5406 = vmatprep.subr.bf16.mxu0 %v5405_v18  ;;  %v5395_v10 = vpack.c.bf16 %v693_v8, %v692_v7  ;;  %v1312_v11 = vld [vmem:[#allocation5 + $0x20] sm:$0xff]  ;;  %v757_v13 = vld [vmem:[#allocation16 + $0x170] sm:$0xff]  ;;  %v756_v16 = vld [vmem:[#allocation16 + $0x168] sm:$0xff] }
 0x325   :  { %5378 = vmatprep.subr.bf16.mxu1 %v5377_v21  ;;  %v754_v12 = vld [vmem:[#allocation16 + $0x158] sm:$0xff]  ;;  %v753_v15 = vld [vmem:[#allocation16 + $0x150] sm:$0xff]  ;;  %v716_v19 = vld [vmem:[#allocation16 + $0x28] sm:$0xff] }
 0x326   :  { %v5425_v14 = vpack.c.bf16 %v757_v13, %v754_v12  ;;  %v5427_v17 = vpack.c.bf16 %v756_v16, %v753_v15  ;;  %v713_v18 = vld [vmem:[#allocation16 + $0x10] sm:$0xff]  ;;  %v719_v21 = vld [vmem:[#allocation16 + $0x40] sm:$0xff]  ;;  %v722_v22 = vld [vmem:[#allocation16 + $0x58] sm:$0xff] }
 0x327   :  { %5408 = vmatpush1.bf16.msra.mxu0 %v5407_v27  ;;  %v5429_v20 = vpack.c.bf16 %v716_v19, %v713_v18  ;;  %v5433_v23 = vpack.c.bf16 %v722_v22, %v719_v21  ;;  %v725_v24 = vld [vmem:[#allocation16 + $0x70] sm:$0xff]  ;;  %v728_v25 = vld [vmem:[#allocation16 + $0x88] sm:$0xff]  ;;  %v731_v27 = vld [vmem:[#allocation16 + $0xa0] sm:$0xff] }
 0x328   :  { %5380 = vmatpush3.bf16.msra.mxu1 %v5379_v28  ;;  %5410 = vmatprep.subr.bf16.mxu0 %v5409_v30  ;;  %v5437_v26 = vpack.c.bf16 %v728_v25, %v725_v24  ;;  %v734_v28 = vld [vmem:[#allocation16 + $0xb8] sm:$0xff]  ;;  %v737_v30 = vld [vmem:[#allocation16 + $0xd0] sm:$0xff]  ;;  %v740_v31 = vld [vmem:[#allocation16 + $0xe8] sm:$0xff] }
 0x329   :  { %5382 = vmatprep.subr.bf16.mxu1 %v5381_v33  ;;  %v5441_v29 = vpack.c.bf16 %v734_v28, %v731_v27  ;;  %v5445_v32 = vpack.c.bf16 %v740_v31, %v737_v30  ;;  %v743_v33 = vld [vmem:[#allocation16 + $0x100] sm:$0xff]  ;;  %v746_v34 = vld [vmem:[#allocation16 + $0x118] sm:$0xff]  ;;  %v749_v36 = vld [vmem:[#allocation16 + $0x130] sm:$0xff] }
 0x32a   :  { %v5449_v35 = vpack.c.bf16 %v746_v34, %v743_v33  ;;  %v752_v37 = vld [vmem:[#allocation16 + $0x148] sm:$0xff]  ;;  %v580_v62 = vld [vmem:[#allocation7 + $0x8] sm:$0xff]  ;;  %v585_v8 = vld [vmem:[#allocation7 + $0x30] sm:$0xff] }
 0x32b   :  { %5412 = vmatpush1.bf16.msra.mxu0 %v5411_v39  ;;  %v5453_v38 = vpack.c.bf16 %v752_v37, %v749_v36  ;;  %v755_v39 = vld [vmem:[#allocation16 + $0x160] sm:$0xff]  ;;  %v579_v61 = vld [vmem:[#allocation7] sm:$0xff]  ;;  %v588_v12 = vld [vmem:[#allocation7 + $0x48] sm:$0xff] }
 0x32c   :  { %5384 = vmatpush3.bf16.msra.mxu1 %v5383_v40  ;;  %5414 = vmatprep.subr.bf16.mxu0 %v5413_v42  ;;  %v758_v40 = vld [vmem:[#allocation16 + $0x178] sm:$0xff]  ;;  %v583_v5 = vld [vmem:[#allocation7 + $0x20] sm:$0xff]  ;;  %v590_v15 = vld [vmem:[#allocation7 + $0x58] sm:$0xff] }
 0x32d   :  { %5386 = vmatprep.subr.bf16.mxu1 %v5385_v45  ;;  %v5457_v41 = vpack.c.bf16 %v758_v40, %v755_v39  ;;  %v4079_v42 = vld [vmem:[#allocation11] ss:$0 sm:$0xff]  ;;  %v592_v18 = vld [vmem:[#allocation7 + $0x68] sm:$0xff]  ;;  %v594_v21 = vld [vmem:[#allocation7 + $0x78] sm:$0xff] }
 0x32f   :  { %5416 = vmatpush1.bf16.msra.mxu0 %v5415_v51 }
 0x330   :  { %5388 = vmatpush3.bf16.msra.mxu1 %v5387_v52  ;;  %5418 = vmatprep.subr.bf16.mxu0 %v5417_v54 }
 0x331   :  { %5390 = vmatprep.subr.bf16.mxu1 %v5389_v57 }
 0x333   :  { %5420 = vmatpush1.bf16.msra.mxu0 %v5419_v63  ;;  %v581_v63 = vld [vmem:[#allocation7 + $0x10] sm:$0xff] }
 0x334   :  { %5392 = vmatpush3.bf16.msra.mxu1 %v5391_v2  ;;  %5422 = vmatprep.subr.bf16.mxu0 %v5421_v3  ;;  %v7754_v2 = vpack.c.bf16 %v580_v62, %v579_v61  ;;  %v582_v3 = vld [vmem:[#allocation7 + $0x18] sm:$0xff]  ;;  %v766_v61 = vld [vmem:[#allocation19 + $0x30] sm:$0xff]  ;;  %v767_v62 = vld [vmem:[#allocation19 + $0x38] sm:$0xff] }
 0x335   :  { %5394 = vmatprep.subr.bf16.mxu1 %v5393_v6  ;;  %v7756_v4 = vpack.c.bf16 %v582_v3, %v581_v63  ;;  %v584_v6 = vld [vmem:[#allocation7 + $0x28] sm:$0xff]  ;;  %v5537_v63 = vpack.c.bf16 %v767_v62, %v766_v61  ;;  %v768_v3 = vld [vmem:[#allocation19 + $0x40] sm:$0xff] }
 0x336   :  { %v7764_v7 = vpack.c.bf16 %v584_v6, %v583_v5  ;;  %v769_v5 = vld [vmem:[#allocation19 + $0x48] sm:$0xff] }
 0x337   :  { %5424 = vmatpush1.bf16.msra.mxu0 %v5423_v9  ;;  %v586_v9 = vld [vmem:[#allocation7 + $0x38] sm:$0xff]  ;;  %v5541_v6 = vpack.c.bf16 %v769_v5, %v768_v3 }
 0x338   :  { %5396 = vmatpush3.bf16.msra.mxu1 %v5395_v10  ;;  %5426 = vmatprep.subr.bf16.mxu0 %v5425_v14  ;;  %v7770_v10 = vpack.c.bf16 %v586_v9, %v585_v8  ;;  %v589_v14 = vld [vmem:[#allocation7 + $0x50] sm:$0xff]  ;;  %v770_v8 = vld [vmem:[#allocation19 + $0x50] sm:$0xff] }
 0x339   :  { %5430 = vmatprep.subr.bf16.mxu1 %v5429_v20  ;;  %v7782_v16 = vpack.c.bf16 %v590_v15, %v589_v14  ;;  %v771_v9 = vld [vmem:[#allocation19 + $0x58] sm:$0xff]  ;;  %v773_v14 = vld [vmem:[#allocation19 + $0x68] sm:$0xff] }
 0x33b   :  { %1525 = vmatmul.mubr.f32.vlgmr.msra.gmra.mrb[2].mxu1 %v1312_v11  ;;  %5428 = vmatpush1.bf16.msra.mxu0 %v5427_v17  ;;  %v587_v11 = vld [vmem:[#allocation7 + $0x40] sm:$0xff] }
 0x33c   :  { %5432 = vmatpush3.bf16.msra.mxu1 %v5429_v20  ;;  %5462 = vmatprep.subr.bf16.mxu0 %v7754_v2  ;;  %v7776_v13 = vpack.c.bf16 %v588_v12, %v587_v11  ;;  %v591_v17 = vld [vmem:[#allocation7 + $0x60] sm:$0xff]  ;;  %v593_v20 = vld [vmem:[#allocation7 + $0x70] sm:$0xff]  ;;  %v5545_v11 = vpack.c.bf16 %v771_v9, %v770_v8  ;;  %v772_v12 = vld [vmem:[#allocation19 + $0x60] sm:$0xff] }
 0x33d   :  { %5434 = vmatprep.subr.bf16.mxu1 %v5433_v23  ;;  %v7788_v19 = vpack.c.bf16 %v592_v18, %v591_v17  ;;  %v7796_v22 = vpack.c.bf16 %v594_v21, %v593_v20  ;;  %v5549_v15 = vpack.c.bf16 %v773_v14, %v772_v12  ;;  %v774_v17 = vld [vmem:[#allocation19 + $0x70] sm:$0xff]  ;;  %v775_v18 = vld [vmem:[#allocation19 + $0x78] sm:$0xff]  ;;  %v595_v21 = vld [vmem:[#allocation8] sm:$0xff] }
 0x33e   :  { %v5553_v20 = vpack.c.bf16 %v775_v18, %v774_v17 }
 0x340   :  { %5436 = vmatpush3.bf16.msra.mxu1 %v5433_v23  ;;  %v1532_v23 = vlaneseq }
 0x341   :  { %5438 = vmatprep.subr.bf16.mxu1 %v5437_v26 }
 0x342   :  { %v7802_v24 = vshrl.u32 %v1532_v23, 7  ;;  %v596_v23 = vld [vmem:[#allocation8 + $0x8] sm:$0xff] }
 0x344   :  { %5440 = vmatpush3.bf16.msra.mxu1 %v5437_v26  ;;  %v7805_v25 = vsub.s32 0, %v7802_v24  ;;  %v759_v26 = vld [vmem:[#allocation17] sm:$0x7]  ;;  %v7808_v27 = vsub.s32 1, %v7802_v24 }
 0x345   :  { %5442 = vmatprep.subr.bf16.mxu1 %v5441_v29 }
 0x346   :  { %v1535_v28 = vrot.slane %v759_v26, %v7805_v25 }
 0x348   :  { %5444 = vmatpush3.bf16.msra.mxu1 %v5441_v29  ;;  %v1539_v29 = vrot.slane %v759_v26, %v7808_v27 }
 0x349   :  { %5446 = vmatprep.subr.bf16.mxu1 %v5445_v32 }
 0x34c   :  { %5448 = vmatpush3.bf16.msra.mxu1 %v5445_v32 }
 0x34d   :  { %5450 = vmatprep.subr.bf16.mxu1 %v5449_v35 }
 0x350   :  { %5452 = vmatpush3.bf16.msra.mxu1 %v5449_v35  ;;  %v7813_v35 = vsub.s32 2, %v7802_v24 }
 0x351   :  { %5454 = vmatprep.subr.bf16.mxu1 %v5453_v38 }
 0x352   :  { %v1543_v36 = vrot.slane %v759_v26, %v7813_v35  ;;  %v597_v26 = vld [vmem:[#allocation8 + $0x10] sm:$0xff] }
 0x354   :  { %5456 = vmatpush3.bf16.msra.mxu1 %v5453_v38 }
 0x355   :  { %5458 = vmatprep.subr.bf16.mxu1 %v5457_v41 }
 0x358   :  { %5460 = vmatpush3.bf16.msra.mxu1 %v5457_v41 }
 0x359   :  { %5494 = vmatprep.subr.bf16.mxu1 %v7754_v2 }
 0x3d1   :  { %v1303_v43 = vpop.f32.mrb[0].mxu0 }
 0x3d2   :  { %v1304_v44 = vadd.f32 %v4079_v42, %v1303_v43  ;;  %v4702_v45 = vpop.f32.mrb[1].mxu0 }
 0x3d4   :  { %v7745_v46 = vmax.f32 %v1304_v44, 0.0 }
 0x3d6   :  { %1612 = vmatmul.mubr.f32.vlgmr.msra.gmra.mrb[4].mxu0 %v7745_v46  ;;  %4735 = vmatprep.mubr.f32.mxu1 %v7745_v46 }
 0x3d7   :  { %1617 = vmatprep.mubr.f32.mxu0 %v7363_v1  ;;  %5464 = vmatpush3.bf16.msra.mxu0 %v7754_v2 }
 0x3d8   :  { %5466 = vmatprep.subr.bf16.mxu0 %v7756_v4 }
 0x3db   :  { %5468 = vmatpush3.bf16.msra.mxu0 %v7756_v4 }
 0x3dc   :  { %5470 = vmatprep.subr.bf16.mxu0 %v7764_v7 }
 0x3df   :  { %5472 = vmatpush3.bf16.msra.mxu0 %v7764_v7 }
 0x3e0   :  { %5474 = vmatprep.subr.bf16.mxu0 %v7770_v10 }
 0x3e3   :  { %5476 = vmatpush3.bf16.msra.mxu0 %v7770_v10 }
 0x3e4   :  { %5478 = vmatprep.subr.bf16.mxu0 %v7776_v13 }
 0x3e7   :  { %5480 = vmatpush3.bf16.msra.mxu0 %v7776_v13 }
 0x3e8   :  { %5482 = vmatprep.subr.bf16.mxu0 %v7782_v16 }
 0x3eb   :  { %5484 = vmatpush3.bf16.msra.mxu0 %v7782_v16 }
 0x3ec   :  { %5486 = vmatprep.subr.bf16.mxu0 %v7788_v19 }
 0x3ee   :  { %v4131_v47 = vpop.f32.mrb[0].mxu1 }
 0x3ef   :  { %v4132_v49 = vpop.f32.mrb[1].mxu1  ;;  %5488 = vmatpush3.bf16.msra.mxu0 %v7788_v19 }
 0x3f0   :  { %v4133_v50 = vadd.f32 %v4132_v49, %v4131_v47  ;;  %5490 = vmatprep.subr.bf16.mxu0 %v7796_v22 }
 0x3f1   :  { %v4166_v51 = vpop.f32.mrb[2].mxu0 }
 0x3f2   :  { %v4167_v52 = vpop.f32.mrb[3].mxu0  ;;  %v1387_v53 = vadd.f32 %v4133_v50, %v4081_v48 }
 0x3f3   :  { %v4168_v54 = vadd.f32 %v4167_v52, %v4166_v51  ;;  %5492 = vmatpush3.bf16.msra.mxu0 %v7796_v22  ;;  %v760_v51 = vld [vmem:[#allocation19] sm:$0xff]  ;;  %v761_v52 = vld [vmem:[#allocation19 + $0x8] sm:$0xff] }
 0x3f5   :  { %v1457_v55 = vadd.f32 %v4168_v54, %v1387_v53  ;;  %v5525_v53 = vpack.c.bf16 %v761_v52, %v760_v51  ;;  %v762_v54 = vld [vmem:[#allocation19 + $0x10] sm:$0xff] }
 0x3f7   :  { %5526 = vmatprep.subr.bf16.mxu0 %v5525_v53 }
 0x40e   :  { %v4201_v56 = vpop.f32.mrb[2].mxu1 }
 0x40f   :  { %v4202_v57 = vpop.f32.mrb[3].mxu1 }
 0x410   :  { %v4203_v58 = vadd.f32 %v4202_v57, %v4201_v56  ;;  %v764_v57 = vld [vmem:[#allocation19 + $0x20] sm:$0xff] }
 0x412   :  { %v1527_v59 = vadd.f32 %v4203_v58, %v1457_v55  ;;  %v763_v55 = vld [vmem:[#allocation19 + $0x18] sm:$0xff]  ;;  %v765_v58 = vld [vmem:[#allocation19 + $0x28] sm:$0xff] }
 0x413   :  { %v5529_v56 = vpack.c.bf16 %v763_v55, %v762_v54 }
 0x414   :  { %v7750_v60 = vmax.f32 %v1527_v59, 0.0  ;;  %v5533_v59 = vpack.c.bf16 %v765_v58, %v764_v57 }
 0x416   :  { %1618 = vmatmul.mubr.f32.gmra.mrb[6].mxu0 %v7750_v60  ;;  %4736 = vmatmul.mubr.f32.vlgmr.msra.gmra.mrb[4].mxu1 %v7750_v60 }
 0x417   :  { %5496 = vmatpush3.bf16.msra.mxu1 %v7754_v2 }
 0x418   :  { %5498 = vmatprep.subr.bf16.mxu1 %v7756_v4 }
 0x41b   :  { %5500 = vmatpush3.bf16.msra.mxu1 %v7756_v4 }
 0x41c   :  { %5502 = vmatprep.subr.bf16.mxu1 %v7764_v7 }
 0x41f   :  { %5504 = vmatpush3.bf16.msra.mxu1 %v7764_v7 }
 0x420   :  { %5506 = vmatprep.subr.bf16.mxu1 %v7770_v10 }
 0x423   :  { %5508 = vmatpush3.bf16.msra.mxu1 %v7770_v10 }
 0x424   :  { %5510 = vmatprep.subr.bf16.mxu1 %v7776_v13 }
 0x427   :  { %5512 = vmatpush3.bf16.msra.mxu1 %v7776_v13 }
 0x428   :  { %5514 = vmatprep.subr.bf16.mxu1 %v7782_v16 }
 0x42b   :  { %5516 = vmatpush3.bf16.msra.mxu1 %v7782_v16 }
 0x42c   :  { %5518 = vmatprep.subr.bf16.mxu1 %v7788_v19 }
 0x42f   :  { %5520 = vmatpush3.bf16.msra.mxu1 %v7788_v19 }
 0x430   :  { %5522 = vmatprep.subr.bf16.mxu1 %v7796_v22 }
 0x433   :  { %5524 = vmatpush3.bf16.msra.mxu1 %v7796_v22 }
 0x4a9   :  { %v1613_v30 = vpop.f32.mrb[4].mxu0 }
 0x4aa   :  { %v1614_v31 = vadd.f32 %v1613_v30, %v1535_v28  ;;  %v1615_v32 = vpop.f32.mrb[5].mxu0 }
 0x4ab   :  { %v1616_v33 = vadd.f32 %v1615_v32, %v1539_v29  ;;  %v600_v32 = vld [vmem:[#allocation8 + $0x28] sm:$0xff] }
 0x4ad   :  { %v1699_v34 = vmul.f32 %v1616_v33, %v1614_v31 }
 0x4af   :  { %4770 = vmatprep.mubr.f32.mxu0 %v1699_v34  ;;  %v601_v34 = vld [vmem:[#allocation8 + $0x30] sm:$0xff] }
 0x4e9   :  { %v1619_v37 = vpop.f32.mrb[6].mxu0  ;;  %v4737_v38 = vpop.f32.mrb[4].mxu1 }
 0x4ea   :  { %v1620_v39 = vadd.f32 %v1619_v37, %v1535_v28  ;;  %v7816_v40 = vadd.f32 %v4737_v38, %v1543_v36  ;;  %v1621_v41 = vpop.f32.mrb[7].mxu0  ;;  %v1690_v42 = vpop.f32.mrb[5].mxu1  ;;  %v7824_v28 = vpack.c.bf16 %v596_v23, %v595_v21  ;;  %v603_v38 = vld [vmem:[#allocation8 + $0x40] sm:$0xff] }
 0x4eb   :  { %v1622_v43 = vadd.f32 %v1621_v41, %v1539_v29  ;;  %v7818_v44 = vadd.f32 %v1690_v42, %v1543_v36  ;;  %v598_v29 = vld [vmem:[#allocation8 + $0x18] sm:$0xff]  ;;  %v605_v42 = vld [vmem:[#allocation8 + $0x50] sm:$0xff] }
 0x4ec   :  { %v1777_v45 = vmul.f32 %v1620_v39, %v1616_v33  ;;  %v7826_v30 = vpack.c.bf16 %v598_v29, %v597_v26  ;;  %5558 = vmatprep.subr.bf16.mxu1 %v7824_v28  ;;  %v602_v36 = vld [vmem:[#allocation8 + $0x38] sm:$0xff] }
 0x4ed   :  { %v1700_v47 = vmul.f32 %v1622_v43, %v1620_v39  ;;  %v1776_v48 = vmul.f32 %v1622_v43, %v1614_v31  ;;  %v1873_v49 = vsub.f32 %v7818_v44, %v7816_v40  ;;  %v1874_v50 = vsub.f32 %v7816_v40, %v7818_v44  ;;  %v599_v31 = vld [vmem:[#allocation8 + $0x20] sm:$0xff]  ;;  %v604_v39 = vld [vmem:[#allocation8 + $0x48] sm:$0xff]  ;;  %v606_v43 = vld [vmem:[#allocation8 + $0x58] sm:$0xff] }
 0x4ee   :  { %v7832_v33 = vpack.c.bf16 %v600_v32, %v599_v31  ;;  %v7836_v37 = vpack.c.bf16 %v602_v36, %v601_v34  ;;  %v7840_v41 = vpack.c.bf16 %v604_v39, %v603_v38 }
 0x4ef   :  { %4771 = vmatmul.mubr.f32.vlgmr.msra.gmra.mrb[8].mxu0 %v1700_v47  ;;  %4805 = vmatprep.mubr.f32.mxu1 %v1776_v48  ;;  %v607_v47 = vld [vmem:[#allocation8 + $0x60] sm:$0xff]  ;;  %v608_v48 = vld [vmem:[#allocation8 + $0x68] sm:$0xff] }
 0x4f0   :  { %4806 = vmatmul.mubr.f32.vlgmr.msra.gmra.mrb[6].mxu1 %v1777_v45  ;;  %5528 = vmatpush3.bf16.msra.mxu0 %v5525_v53  ;;  %v7844_v45 = vpack.c.bf16 %v606_v43, %v605_v42  ;;  %v7848_v51 = vpack.c.bf16 %v608_v48, %v607_v47  ;;  %v778_v43 = vld [vmem:[#allocation22 + $0x8] sm:$0xff]  ;;  %v780_v48 = vld [vmem:[#allocation22 + $0x18] sm:$0xff] }
 0x4f1   :  { %5530 = vmatprep.subr.bf16.mxu0 %v5529_v56  ;;  %5560 = vmatpush3.bf16.msra.mxu1 %v7824_v28  ;;  %v782_v47 = vld [vmem:[#allocation22 + $0x28] sm:$0xff] }
 0x4f2   :  { %5562 = vmatprep.subr.bf16.mxu1 %v7826_v30 }
 0x4f4   :  { %5532 = vmatpush3.bf16.msra.mxu0 %v5529_v56 }
 0x4f5   :  { %5534 = vmatprep.subr.bf16.mxu0 %v5533_v59  ;;  %5564 = vmatpush3.bf16.msra.mxu1 %v7826_v30 }
 0x4f6   :  { %5566 = vmatprep.subr.bf16.mxu1 %v7832_v33 }
 0x4f8   :  { %5536 = vmatpush3.bf16.msra.mxu0 %v5533_v59 }
 0x4f9   :  { %5538 = vmatprep.subr.bf16.mxu0 %v5537_v63  ;;  %5568 = vmatpush3.bf16.msra.mxu1 %v7832_v33 }
 0x4fa   :  { %5570 = vmatprep.subr.bf16.mxu1 %v7836_v37 }
 0x4fc   :  { %5540 = vmatpush3.bf16.msra.mxu0 %v5537_v63 }
 0x4fd   :  { %5542 = vmatprep.subr.bf16.mxu0 %v5541_v6  ;;  %5572 = vmatpush3.bf16.msra.mxu1 %v7836_v37 }
 0x4fe   :  { %5574 = vmatprep.subr.bf16.mxu1 %v7840_v41 }
 0x500   :  { %5544 = vmatpush3.bf16.msra.mxu0 %v5541_v6 }
 0x501   :  { %5546 = vmatprep.subr.bf16.mxu0 %v5545_v11  ;;  %5576 = vmatpush3.bf16.msra.mxu1 %v7840_v41 }
 0x502   :  { %5578 = vmatprep.subr.bf16.mxu1 %v7844_v45 }
 0x504   :  { %5548 = vmatpush3.bf16.msra.mxu0 %v5545_v11 }
 0x505   :  { %5550 = vmatprep.subr.bf16.mxu0 %v5549_v15  ;;  %5580 = vmatpush3.bf16.msra.mxu1 %v7844_v45 }
 0x506   :  { %5582 = vmatprep.subr.bf16.mxu1 %v7848_v51 }
 0x508   :  { %5552 = vmatpush3.bf16.msra.mxu0 %v5549_v15 }
 0x509   :  { %5554 = vmatprep.subr.bf16.mxu0 %v5553_v20  ;;  %5584 = vmatpush3.bf16.msra.mxu1 %v7848_v51 }
 0x50c   :  { %5556 = vmatpush3.bf16.msra.mxu0 %v5553_v20 }
 0x50d   :  { %5590 = vmatprep.subr.bf16.mxu0 %v7824_v28 }
 0x5c2   :  { %v4772_v52 = vpop.f32.mrb[8].mxu0 }
 0x5c3   :  { %v1767_v53 = vpop.f32.mrb[9].mxu0  ;;  %v4807_v54 = vpop.f32.mrb[6].mxu1 }
 0x5c4   :  { %v1854_v55 = vmax.f32 %v4772_v52, %v4807_v54  ;;  %v1844_v56 = vpop.f32.mrb[7].mxu1 }
 0x5c5   :  { %v1853_v57 = vmax.f32 %v1767_v53, %v1844_v56 }
 0x5c6   :  { %v1856_v58 = vsub.f32 %v4772_v52, %v1854_v55  ;;  %v1862_v59 = vsub.f32 %v4807_v54, %v1854_v55  ;;  %v5621_v52 = vpack.c.bf16 %v782_v47, %v778_v43  ;;  %v777_v54 = vld [vmem:[#allocation22] sm:$0xff]  ;;  %v802_v43 = vld [vmem:[#allocation22 + $0xc8] sm:$0xff] }
 0x5c7   :  { %v1855_v61 = vsub.f32 %v1767_v53, %v1853_v57  ;;  %v1861_v62 = vsub.f32 %v1844_v56, %v1853_v57  ;;  %v784_v53 = vld [vmem:[#allocation22 + $0x38] sm:$0xff]  ;;  %v781_v55 = vld [vmem:[#allocation22 + $0x20] sm:$0xff]  ;;  %v806_v47 = vld [vmem:[#allocation22 + $0xe8] sm:$0xff] }
 0x5c8   :  { %v1859_v63 = vmul.f32 1.442695, %v1856_v58  ;;  %v1865_v3 = vmul.f32 1.442695, %v1862_v59  ;;  %v5653_v56 = vpack.c.bf16 %v784_v53, %v780_v48  ;;  %v5623_v57 = vpack.c.bf16 %v781_v55, %v777_v54  ;;  %v786_v58 = vld [vmem:[#allocation22 + $0x48] sm:$0xff]  ;;  %v804_v48 = vld [vmem:[#allocation22 + $0xd8] sm:$0xff] }
 0x5c9   :  { %v1857_v5 = vmul.f32 1.442695, %v1855_v61  ;;  %v1863_v6 = vmul.f32 1.442695, %v1861_v62  ;;  %v790_v59 = vld [vmem:[#allocation22 + $0x68] sm:$0xff]  ;;  %v789_v61 = vld [vmem:[#allocation22 + $0x60] sm:$0xff] }
 0x5ca   :  { %6433 = vpow2.f32 %v1859_v63  ;;  %v794_v63 = vld [vmem:[#allocation22 + $0x88] sm:$0xff]  ;;  %v808_v53 = vld [vmem:[#allocation22 + $0xf8] sm:$0xff]  ;;  %v801_v54 = vld [vmem:[#allocation22 + $0xc0] sm:$0xff] }
 0x5cb   :  { %6435 = vpow2.f32 %v1865_v3  ;;  %v798_v3 = vld [vmem:[#allocation22 + $0xa8] sm:$0xff]  ;;  %v805_v55 = vld [vmem:[#allocation22 + $0xe0] sm:$0xff] }
 0x5cc   :  { %6437 = vpow2.f32 %v1857_v5  ;;  %v5629_v5 = vpack.c.bf16 %v798_v3, %v794_v63  ;;  %v816_v3 = vld [vmem:[#allocation22 + $0x138] sm:$0xff] }
 0x5cd   :  { %6439 = vpow2.f32 %v1863_v6  ;;  %v793_v6 = vld [vmem:[#allocation22 + $0x80] sm:$0xff] }
 0x5d4   :  { %v6434_v8 = vpop.eup %6433 }
 0x5d5   :  { %v6436_v9 = vpop.eup %6435 }
 0x5d6   :  { %v6438_v11 = vpop.eup %6437  ;;  %v1868_v12 = vadd.f32 %v6436_v9, %v6434_v8 }
 0x5d7   :  { %v6440_v14 = vpop.eup %6439 }
 0x5d8   :  { %6441 = vrcp.f32 %v1868_v12  ;;  %v1867_v15 = vadd.f32 %v6440_v14, %v6438_v11 }
 0x5da   :  { %6443 = vrcp.f32 %v1867_v15  ;;  %v779_v15 = vld [vmem:[#allocation22 + $0x10] sm:$0xff] }
 0x5e2   :  { %v6442_v17 = vpop.eup %6441 }
 0x5e3   :  { %v1872_v18 = vmul.f32 %v6442_v17, %v6434_v8  ;;  %v797_v8 = vld [vmem:[#allocation22 + $0xa0] sm:$0xff]  ;;  %v783_v17 = vld [vmem:[#allocation22 + $0x30] sm:$0xff] }
 0x5e4   :  { %v6444_v20 = vpop.eup %6443  ;;  %v5631_v9 = vpack.c.bf16 %v797_v8, %v793_v6  ;;  %v813_v6 = vld [vmem:[#allocation22 + $0x120] sm:$0xff] }
 0x5e5   :  { %v1871_v21 = vmul.f32 %v6444_v20, %v6438_v11  ;;  %v1876_v23 = vmul.f32 %v1874_v50, %v1872_v18  ;;  %v4082_v50 = vld [vmem:[#allocation20] ss:$0 sm:$0xff] }
 0x5e6   :  { %v788_v20 = vld [vmem:[#allocation22 + $0x58] sm:$0xff] }
 0x5e7   :  { %v1875_v26 = vmul.f32 %v1873_v49, %v1871_v21  ;;  %v1878_v29 = vadd.f32 %v1876_v23, %v7818_v44  ;;  %v610_v44 = vld [vmem:[#allocation8 + $0x78] sm:$0xff] }
 0x5e8   :  { %v792_v21 = vld [vmem:[#allocation22 + $0x78] sm:$0xff] }
 0x5e9   :  { %v1877_v31 = vadd.f32 %v1875_v26, %v7816_v40  ;;  %v609_v40 = vld [vmem:[#allocation8 + $0x70] sm:$0xff]  ;;  %v5655_v26 = vpack.c.bf16 %v783_v17, %v779_v15  ;;  %v818_v15 = vld [vmem:[#allocation22 + $0x148] sm:$0xff] }
 0x5ea   :  { %v7874_v49 = vpack.c.bf16 %v610_v44, %v609_v40  ;;  %v787_v40 = vld [vmem:[#allocation22 + $0x50] sm:$0xff] }
 0x5eb   :  { %4840 = vmatprep.mubr.f32.mxu0 %v1877_v31  ;;  %v5657_v31 = vpack.c.bf16 %v792_v21, %v788_v20  ;;  %v791_v44 = vld [vmem:[#allocation22 + $0x70] sm:$0xff]  ;;  %v822_v20 = vld [vmem:[#allocation22 + $0x168] sm:$0xff]  ;;  %v820_v21 = vld [vmem:[#allocation22 + $0x158] sm:$0xff] }
 0x5ec   :  { %4841 = vmatmul.mubr.f32.vlgmr.msra.gmra.mrb[10].mxu0 %v1878_v29  ;;  %5586 = vmatprep.subr.bf16.mxu1 %v7874_v49 }
 0x5ed   :  { %5592 = vmatpush3.bf16.msra.mxu0 %v7824_v28  ;;  %5588 = vmatpush3.bf16.msra.mxu1 %v7874_v49 }
 0x5ee   :  { %5594 = vmatprep.subr.bf16.mxu0 %v7826_v30  ;;  %5622 = vmatprep.subr.bf16.mxu1 %v5621_v52  ;;  %v5633_v52 = vpack.c.bf16 %v806_v47, %v802_v43  ;;  %v832_v43 = vld [vmem:[#allocation22 + $0x1b8] sm:$0xff]  ;;  %v825_v47 = vld [vmem:[#allocation22 + $0x180] sm:$0xff] }
 0x5f1   :  { %5596 = vmatpush3.bf16.msra.mxu0 %v7826_v30 }
 0x5f2   :  { %5598 = vmatprep.subr.bf16.mxu0 %v7832_v33 }
 0x5f5   :  { %5600 = vmatpush3.bf16.msra.mxu0 %v7832_v33 }
 0x5f6   :  { %5602 = vmatprep.subr.bf16.mxu0 %v7836_v37 }
 0x5f9   :  { %5604 = vmatpush3.bf16.msra.mxu0 %v7836_v37 }
 0x5fa   :  { %5606 = vmatprep.subr.bf16.mxu0 %v7840_v41 }
 0x5fd   :  { %5608 = vmatpush3.bf16.msra.mxu0 %v7840_v41 }
 0x5fe   :  { %5610 = vmatprep.subr.bf16.mxu0 %v7844_v45 }
 0x601   :  { %5612 = vmatpush3.bf16.msra.mxu0 %v7844_v45 }
 0x602   :  { %5614 = vmatprep.subr.bf16.mxu0 %v7848_v51 }
 0x605   :  { %5616 = vmatpush3.bf16.msra.mxu0 %v7848_v51 }
 0x606   :  { %5618 = vmatprep.subr.bf16.mxu0 %v7874_v49 }
 0x609   :  { %5620 = vmatpush3.bf16.msra.mxu0 %v7874_v49 }
 0x60a   :  { %5654 = vmatprep.subr.bf16.mxu0 %v5653_v56  ;;  %v5665_v56 = vpack.c.bf16 %v808_v53, %v804_v48  ;;  %v827_v53 = vld [vmem:[#allocation22 + $0x190] sm:$0xff] }
 0x6bf   :  { %v4842_v32 = vpop.f32.mrb[10].mxu0 }
 0x6c0   :  { %v1957_v34 = vadd.f32 %v4842_v32, %v4082_v50  ;;  %v1951_v36 = vpop.f32.mrb[11].mxu0  ;;  %v800_v32 = vld [vmem:[#allocation22 + $0xb8] sm:$0xff] }
 0x6c1   :  { %v1952_v38 = vadd.f32 %v4082_v50, %v1951_v36  ;;  %v796_v50 = vld [vmem:[#allocation22 + $0x98] sm:$0xff] }
 0x6c2   :  { %v1961_v42 = vadd.f32 %v1957_v34, %v7750_v60  ;;  %v785_v60 = vld [vmem:[#allocation22 + $0x40] sm:$0xff]  ;;  %v5659_v34 = vpack.c.bf16 %v791_v44, %v787_v40  ;;  %v5661_v36 = vpack.c.bf16 %v800_v32, %v796_v50  ;;  %v819_v44 = vld [vmem:[#allocation22 + $0x150] sm:$0xff] }
 0x6c3   :  { %v1960_v39 = vadd.f32 %v1952_v38, %v7745_v46  ;;  %v5625_v46 = vpack.c.bf16 %v790_v59, %v786_v58  ;;  %v5627_v62 = vpack.c.bf16 %v789_v61, %v785_v60  ;;  %v795_v38 = vld [vmem:[#allocation22 + $0x90] sm:$0xff]  ;;  %v810_v60 = vld [vmem:[#allocation22 + $0x108] sm:$0xff]  ;;  %v821_v40 = vld [vmem:[#allocation22 + $0x160] sm:$0xff] }
 0x6c4   :  { %v803_v58 = vld [vmem:[#allocation22 + $0xd0] sm:$0xff]  ;;  %v814_v61 = vld [vmem:[#allocation22 + $0x128] sm:$0xff] }
 0x6c5   :  { %4875 = vmatprep.mubr.f32.mxu1 %v1960_v39  ;;  %v807_v59 = vld [vmem:[#allocation22 + $0xf0] sm:$0xff]  ;;  %v5637_v63 = vpack.c.bf16 %v814_v61, %v810_v60  ;;  %v840_v60 = vld [vmem:[#allocation22 + $0x1f8] sm:$0xff]  ;;  %v833_v61 = vld [vmem:[#allocation22 + $0x1c0] sm:$0xff] }
 0x6c6   :  { %4876 = vmatmul.mubr.f32.vlgmr.msra.gmra.mrb[8].mxu1 %v1961_v42  ;;  %v823_v32 = vld [vmem:[#allocation22 + $0x170] sm:$0xff] }
 0x6c7   :  { %2221 = vmatprep.mubr.f32.mxu1 %v7363_v1  ;;  %5624 = vmatpush1.bf16.msra.mxu1 %v5623_v57  ;;  %v5635_v57 = vpack.c.bf16 %v805_v55, %v801_v54  ;;  %v831_v54 = vld [vmem:[#allocation22 + $0x1b0] sm:$0xff] }
 0x6c8   :  { %5626 = vmatprep.subr.bf16.mxu1 %v5625_v46  ;;  %v5667_v46 = vpack.c.bf16 %v807_v59, %v803_v58  ;;  %v836_v58 = vld [vmem:[#allocation22 + $0x1d8] sm:$0xff]  ;;  %v5679_v59 = vpack.c.bf16 %v831_v54, %v827_v53 }
 0x6c9   :  { %v893_v53 = vld [vmem:[#allocation23 + $0x198] sm:$0xff] }
 0x6cb   :  { %5628 = vmatpush1.bf16.msra.mxu1 %v5627_v62  ;;  %v812_v62 = vld [vmem:[#allocation22 + $0x118] sm:$0xff] }
 0x6cc   :  { %5630 = vmatprep.subr.bf16.mxu1 %v5629_v5  ;;  %v809_v5 = vld [vmem:[#allocation22 + $0x100] sm:$0xff]  ;;  %v5669_v8 = vpack.c.bf16 %v816_v3, %v812_v62  ;;  %v835_v3 = vld [vmem:[#allocation22 + $0x1d0] sm:$0xff] }
 0x6cd   :  { %v837_v62 = vld [vmem:[#allocation22 + $0x1e0] sm:$0xff] }
 0x6cf   :  { %5632 = vmatpush1.bf16.msra.mxu1 %v5631_v9  ;;  %v5639_v9 = vpack.c.bf16 %v813_v6, %v809_v5  ;;  %v839_v5 = vld [vmem:[#allocation22 + $0x1f0] sm:$0xff]  ;;  %v5651_v6 = vpack.c.bf16 %v837_v62, %v833_v61  ;;  %v862_v61 = vld [vmem:[#allocation23 + $0xa0] sm:$0xff]  ;;  %v863_v62 = vld [vmem:[#allocation23 + $0xa8] sm:$0xff] }
 0x6d0   :  { %5634 = vmatprep.subr.bf16.mxu1 %v5633_v52  ;;  %v829_v52 = vld [vmem:[#allocation22 + $0x1a0] sm:$0xff] }
 0x6d1   :  { %v5647_v55 = vpack.c.bf16 %v829_v52, %v825_v47  ;;  %v892_v52 = vld [vmem:[#allocation23 + $0x190] sm:$0xff] }
 0x6d3   :  { %5636 = vmatpush1.bf16.msra.mxu1 %v5635_v57  ;;  %v838_v57 = vld [vmem:[#allocation22 + $0x1e8] sm:$0xff] }
 0x6d4   :  { %5638 = vmatprep.subr.bf16.mxu1 %v5637_v63  ;;  %v5681_v63 = vpack.c.bf16 %v840_v60, %v836_v58  ;;  %v844_v58 = vld [vmem:[#allocation23 + $0x10] sm:$0xff] }
 0x6d5   :  { %v876_v60 = vld [vmem:[#allocation23 + $0x110] sm:$0xff] }
 0x6d7   :  { %5640 = vmatpush1.bf16.msra.mxu1 %v5639_v9  ;;  %v858_v9 = vld [vmem:[#allocation23 + $0x80] sm:$0xff] }
 0x799   :  { %v4877_v11 = vpop.f32.mrb[8].mxu1 }
 0x79a   :  { %v7883_v12 = vsub.f32 %v1961_v42, %v4877_v11  ;;  %v2028_v14 = vpop.f32.mrb[9].mxu1  ;;  %v811_v11 = vld [vmem:[#allocation22 + $0x110] sm:$0xff] }
 0x79b   :  { %v7885_v18 = vsub.f32 %v1960_v39, %v2028_v14  ;;  %v799_v39 = vld [vmem:[#allocation22 + $0xb0] sm:$0xff] }
 0x79c   :  { %v2040_v29 = vmul.f32 %v7883_v12, %v7883_v12  ;;  %v5663_v42 = vpack.c.bf16 %v799_v39, %v795_v38  ;;  %v815_v14 = vld [vmem:[#allocation22 + $0x130] sm:$0xff]  ;;  %v5675_v38 = vpack.c.bf16 %v823_v32, %v819_v44  ;;  %v4083_v44 = vld [vmem:[#allocation26] ss:$0 sm:$0xff] }
 0x79d   :  { %v2039_v23 = vmul.f32 %v7885_v18, %v7885_v18  ;;  %v5671_v17 = vpack.c.bf16 %v815_v14, %v811_v11  ;;  %v859_v11 = vld [vmem:[#allocation23 + $0x88] sm:$0xff]  ;;  %v890_v14 = vld [vmem:[#allocation23 + $0x180] sm:$0xff] }
 0x79f   :  { %4910 = vmatprep.mubr.f32.mxu0 %v2039_v23  ;;  %v824_v23 = vld [vmem:[#allocation22 + $0x178] sm:$0xff] }
 0x7a0   :  { %4911 = vmatmul.mubr.f32.vlgmr.msra.gmra.mrb[12].mxu0 %v2040_v29  ;;  %v5673_v29 = vpack.c.bf16 %v824_v23, %v820_v21 }
 0x7a1   :  { %5656 = vmatpush1.bf16.msra.mxu0 %v5655_v26  ;;  %2298 = vmatprep.mubr.f32.mxu0 %v7363_v1  ;;  %v5641_v26 = vpack.c.bf16 %v822_v20, %v818_v15  ;;  %v5685_v15 = vpack.c.bf16 %v859_v11, %v858_v9  ;;  %v846_v9 = vld [vmem:[#allocation23 + $0x20] sm:$0xff]  ;;  %v847_v11 = vld [vmem:[#allocation23 + $0x28] sm:$0xff] }
 0x7a2   :  { %5658 = vmatprep.subr.bf16.mxu0 %v5657_v31  ;;  %v817_v31 = vld [vmem:[#allocation22 + $0x140] sm:$0xff] }
 0x7a3   :  { %v5643_v50 = vpack.c.bf16 %v821_v40, %v817_v31  ;;  %5642 = vmatprep.subr.bf16.mxu1 %v5641_v26 }
 0x7a5   :  { %5660 = vmatpush1.bf16.msra.mxu0 %v5659_v34  ;;  %v826_v34 = vld [vmem:[#allocation22 + $0x188] sm:$0xff]  ;;  %5644 = vmatpush1.bf16.msra.mxu1 %v5643_v50  ;;  %v4084_v50 = vld [vmem:[#allocation28] ss:$0 sm:$0xff] }
 0x7a6   :  { %5662 = vmatprep.subr.bf16.mxu0 %v5661_v36  ;;  %v830_v36 = vld [vmem:[#allocation22 + $0x1a8] sm:$0xff] }
 0x7a7   :  { %v5645_v39 = vpack.c.bf16 %v830_v36, %v826_v34  ;;  %v842_v36 = vld [vmem:[#allocation23] sm:$0xff] }
 0x7a9   :  { %5664 = vmatpush1.bf16.msra.mxu0 %v5663_v42  ;;  %v828_v42 = vld [vmem:[#allocation22 + $0x198] sm:$0xff]  ;;  %5646 = vmatprep.subr.bf16.mxu1 %v5645_v39  ;;  %v874_v39 = vld [vmem:[#allocation23 + $0x100] sm:$0xff] }
 0x7aa   :  { %5666 = vmatprep.subr.bf16.mxu0 %v5665_v56  ;;  %v5677_v48 = vpack.c.bf16 %v832_v43, %v828_v42  ;;  %v834_v56 = vld [vmem:[#allocation22 + $0x1c8] sm:$0xff]  ;;  %5648 = vmatpush1.bf16.msra.mxu1 %v5647_v55  ;;  %v860_v43 = vld [vmem:[#allocation23 + $0x90] sm:$0xff] }
 0x7ab   :  { %v875_v42 = vld [vmem:[#allocation23 + $0x108] sm:$0xff] }
 0x7ad   :  { %5668 = vmatpush1.bf16.msra.mxu0 %v5667_v46  ;;  %v5649_v46 = vpack.c.bf16 %v838_v57, %v834_v56  ;;  %v5719_v57 = vpack.c.bf16 %v875_v42, %v874_v39  ;;  %v866_v39 = vld [vmem:[#allocation23 + $0xc0] sm:$0xff]  ;;  %v867_v42 = vld [vmem:[#allocation23 + $0xc8] sm:$0xff] }
 0x7ae   :  { %5670 = vmatprep.subr.bf16.mxu0 %v5669_v8  ;;  %v5683_v8 = vpack.c.bf16 %v839_v5, %v835_v3  ;;  %v895_v3 = vld [vmem:[#allocation23 + $0x1a8] sm:$0xff] }
 0x7af   :  { %5650 = vmatprep.subr.bf16.mxu1 %v5649_v46 }
 0x7b0   :  { %5652 = vmatpush1.bf16.msra.mxu1 %v5651_v6 }
 0x7b1   :  { %5672 = vmatpush1.bf16.msra.mxu0 %v5671_v17  ;;  %v891_v17 = vld [vmem:[#allocation23 + $0x188] sm:$0xff]  ;;  %5686 = vmatprep.subr.bf16.mxu1 %v5685_v15 }
 0x7b2   :  { %5674 = vmatprep.subr.bf16.mxu0 %v5673_v29  ;;  %v5717_v20 = vpack.c.bf16 %v891_v17, %v890_v14  ;;  %v5693_v14 = vpack.c.bf16 %v863_v62, %v862_v61  ;;  %v878_v17 = vld [vmem:[#allocation23 + $0x120] sm:$0xff] }
 0x7b5   :  { %5676 = vmatpush1.bf16.msra.mxu0 %v5675_v38  ;;  %v843_v38 = vld [vmem:[#allocation23 + $0x8] sm:$0xff] }
 0x7b6   :  { %5678 = vmatprep.subr.bf16.mxu0 %v5677_v48  ;;  %v861_v48 = vld [vmem:[#allocation23 + $0x98] sm:$0xff]  ;;  %v5687_v56 = vpack.c.bf16 %v843_v38, %v842_v36  ;;  %v880_v36 = vld [vmem:[#allocation23 + $0x130] sm:$0xff] }
 0x7b7   :  { %v5689_v46 = vpack.c.bf16 %v861_v48, %v860_v43  ;;  %v881_v38 = vld [vmem:[#allocation23 + $0x138] sm:$0xff]  ;;  %v898_v43 = vld [vmem:[#allocation23 + $0x1c0] sm:$0xff] }
 0x7b9   :  { %5680 = vmatpush1.bf16.msra.mxu0 %v5679_v59  ;;  %v845_v59 = vld [vmem:[#allocation23 + $0x18] sm:$0xff] }
 0x7ba   :  { %5682 = vmatprep.subr.bf16.mxu0 %v5681_v63  ;;  %v894_v63 = vld [vmem:[#allocation23 + $0x1a0] sm:$0xff]  ;;  %v5691_v6 = vpack.c.bf16 %v845_v59, %v844_v58  ;;  %v883_v59 = vld [vmem:[#allocation23 + $0x148] sm:$0xff] }
 0x7bb   :  { %v5725_v15 = vpack.c.bf16 %v895_v3, %v894_v63  ;;  %v882_v58 = vld [vmem:[#allocation23 + $0x140] sm:$0xff]  ;;  %v852_v63 = vld [vmem:[#allocation23 + $0x50] sm:$0xff]  ;;  %v853_v3 = vld [vmem:[#allocation23 + $0x58] sm:$0xff] }
 0x7bc   :  { %v5735_v62 = vpack.c.bf16 %v883_v59, %v882_v58  ;;  %v841_v58 = vld [vmem:[%s8223_s13] sm:$0xf]  ;;  %v2151_v59 = vsub.s32 3, %v7802_v24 }
 0x7bd   :  { %5684 = vmatpush1.bf16.msra.mxu0 %v5683_v8 }
 0x7be   :  { %5718 = vmatprep.subr.bf16.mxu0 %v5717_v20  ;;  %v879_v20 = vld [vmem:[#allocation23 + $0x128] sm:$0xff] }
 0x873   :  { %v4912_v21 = vpop.f32.mrb[12].mxu0 }
 0x874   :  { %v2113_v23 = vadd.f32 1e-05, %v4912_v21  ;;  %v2107_v26 = vpop.f32.mrb[13].mxu0  ;;  %v864_v21 = vld [vmem:[#allocation23 + $0xb0] sm:$0xff] }
 0x875   :  { %v2108_v29 = vadd.f32 1e-05, %v2107_v26  ;;  %v896_v26 = vld [vmem:[#allocation23 + $0x1b0] sm:$0xff] }
 0x876   :  { %6445 = vrsqrt.f32 %v2113_v23  ;;  %v865_v23 = vld [vmem:[#allocation23 + $0xb8] sm:$0xff] }
 0x877   :  { %6447 = vrsqrt.f32 %v2108_v29  ;;  %v897_v29 = vld [vmem:[#allocation23 + $0x1b8] sm:$0xff] }
 0x880   :  { %v6446_v31 = vpop.eup %6445 }
 0x881   :  { %v6448_v40 = vpop.eup %6447  ;;  %v2119_v34 = vmul.f32 %v6446_v31, %v7883_v12  ;;  %v877_v12 = vld [vmem:[#allocation23 + $0x118] sm:$0xff]  ;;  %v5695_v31 = vpack.c.bf16 %v847_v11, %v846_v9  ;;  %v884_v9 = vld [vmem:[#allocation23 + $0x150] sm:$0xff] }
 0x882   :  { %v2118_v32 = vmul.f32 %v6448_v40, %v7885_v18  ;;  %v5721_v18 = vpack.c.bf16 %v893_v53, %v892_v52  ;;  %v5723_v8 = vpack.c.bf16 %v877_v12, %v876_v60  ;;  %v5727_v40 = vpack.c.bf16 %v879_v20, %v878_v17  ;;  %v850_v53 = vld [vmem:[#allocation23 + $0x40] sm:$0xff]  ;;  %v900_v60 = vld [vmem:[#allocation23 + $0x1d0] sm:$0xff]  ;;  %v901_v12 = vld [vmem:[#allocation23 + $0x1d8] sm:$0xff] }
 0x883   :  { %v2127_v55 = vmul.f32 %v4083_v44, %v2119_v34  ;;  %v5729_v34 = vpack.c.bf16 %v897_v29, %v896_v26  ;;  %v5731_v52 = vpack.c.bf16 %v881_v38, %v880_v36  ;;  %v885_v11 = vld [vmem:[#allocation23 + $0x158] sm:$0xff]  ;;  %v902_v17 = vld [vmem:[#allocation23 + $0x1e0] sm:$0xff]  ;;  %v903_v20 = vld [vmem:[#allocation23 + $0x1e8] sm:$0xff] }
 0x884   :  { %v2126_v47 = vmul.f32 %v4083_v44, %v2118_v32  ;;  %v848_v44 = vld [vmem:[#allocation23 + $0x30] sm:$0xff]  ;;  %v5697_v32 = vpack.c.bf16 %v865_v23, %v864_v21  ;;  %v5707_v21 = vpack.c.bf16 %v853_v3, %v852_v63  ;;  %v5739_v23 = vpack.c.bf16 %v885_v11, %v884_v9  ;;  %v873_v38 = vld [vmem:[#allocation23 + $0xf8] sm:$0xff] }
 0x885   :  { %v7900_v5 = vadd.f32 %v4084_v50, %v2127_v55  ;;  %v851_v55 = vld [vmem:[#allocation23 + $0x48] sm:$0xff]  ;;  %v5741_v29 = vpack.c.bf16 %v903_v20, %v902_v17  ;;  %v872_v36 = vld [vmem:[#allocation23 + $0xf0] sm:$0xff] }
 0x886   :  { %v7894_v54 = vadd.f32 %v4084_v50, %v2126_v47  ;;  %v849_v50 = vld [vmem:[#allocation23 + $0x38] sm:$0xff]  ;;  %v899_v47 = vld [vmem:[#allocation23 + $0x1c8] sm:$0xff]  ;;  %v5703_v61 = vpack.c.bf16 %v851_v55, %v850_v53  ;;  %v888_v55 = vld [vmem:[#allocation23 + $0x170] sm:$0xff] }
 0x887   :  { %v5699_v48 = vpack.c.bf16 %v849_v50, %v848_v44  ;;  %v886_v44 = vld [vmem:[#allocation23 + $0x160] sm:$0xff] }
 0x888   :  { %2222 = vmatmul.mubr.f32.vlgmr.msra.gmra.mrb[10].mxu1 %v7894_v54  ;;  %2299 = vmatmul.mubr.f32.vlgmr.msra.gmra.mrb[14].mxu0 %v7894_v54 }
 0x889   :  { %2227 = vmatprep.mubr.f32.mxu1 %v7363_v1  ;;  %2304 = vmatprep.mubr.f32.mxu0 %v7363_v1 }
 0x88a   :  { %5688 = vmatpush3.bf16.msra.mxu1 %v5687_v56  ;;  %5720 = vmatpush3.bf16.msra.mxu0 %v5719_v57  ;;  %v5701_v56 = vpack.c.bf16 %v867_v42, %v866_v39  ;;  %v5733_v57 = vpack.c.bf16 %v899_v47, %v898_v43  ;;  %v904_v39 = vld [vmem:[#allocation23 + $0x1f0] sm:$0xff]  ;;  %v5713_v42 = vpack.c.bf16 %v873_v38, %v872_v36  ;;  %v905_v43 = vld [vmem:[#allocation23 + $0x1f8] sm:$0xff] }
 0x88b   :  { %5690 = vmatprep.subr.bf16.mxu1 %v5689_v46  ;;  %5722 = vmatprep.subr.bf16.mxu0 %v5721_v18  ;;  %v868_v46 = vld [vmem:[#allocation23 + $0xd0] sm:$0xff]  ;;  %v869_v18 = vld [vmem:[#allocation23 + $0xd8] sm:$0xff] }
 0x88c   :  { %2228 = vmatmul.mubr.f32.gmra.mrb[12].mxu1 %v7900_v5  ;;  %2305 = vmatmul.mubr.f32.gmra.mrb[16].mxu0 %v7900_v5  ;;  %v856_v47 = vld [vmem:[#allocation23 + $0x70] sm:$0xff] }
 0x88e   :  { %5692 = vmatpush3.bf16.msra.mxu1 %v5691_v6  ;;  %5724 = vmatpush3.bf16.msra.mxu0 %v5723_v8  ;;  %v5705_v6 = vpack.c.bf16 %v869_v18, %v868_v46  ;;  %v5737_v8 = vpack.c.bf16 %v901_v12, %v900_v60  ;;  %v2140_v46 = vrot.slane %v841_v58, %v7805_v25 }
 0x88f   :  { %5694 = vmatprep.subr.bf16.mxu1 %v5693_v14  ;;  %5726 = vmatprep.subr.bf16.mxu0 %v5725_v15  ;;  %v870_v14 = vld [vmem:[#allocation23 + $0xe0] sm:$0xff]  ;;  %v871_v15 = vld [vmem:[#allocation23 + $0xe8] sm:$0xff]  ;;  %v2148_v18 = vrot.slane %v841_v58, %v7813_v35  ;;  %v2144_v60 = vrot.slane %v841_v58, %v7808_v27  ;;  %v2152_v12 = vrot.slane %v841_v58, %v2151_v59 }
 0x890   :  { %v5709_v26 = vpack.c.bf16 %v871_v15, %v870_v14 }
 0x892   :  { %5696 = vmatpush3.bf16.msra.mxu1 %v5695_v31  ;;  %5728 = vmatpush3.bf16.msra.mxu0 %v5727_v40  ;;  %v854_v31 = vld [vmem:[#allocation23 + $0x60] sm:$0xff]  ;;  %v855_v40 = vld [vmem:[#allocation23 + $0x68] sm:$0xff] }
 0x893   :  { %5698 = vmatprep.subr.bf16.mxu1 %v5697_v32  ;;  %5730 = vmatprep.subr.bf16.mxu0 %v5729_v34  ;;  %v5711_v50 = vpack.c.bf16 %v855_v40, %v854_v31  ;;  %v887_v32 = vld [vmem:[#allocation23 + $0x168] sm:$0xff] }
 0x894   :  { %v5743_v34 = vpack.c.bf16 %v887_v32, %v886_v44 }
 0x896   :  { %5700 = vmatpush3.bf16.msra.mxu1 %v5699_v48  ;;  %5732 = vmatpush3.bf16.msra.mxu0 %v5731_v52  ;;  %v857_v48 = vld [vmem:[#allocation23 + $0x78] sm:$0xff]  ;;  %v5745_v52 = vpack.c.bf16 %v905_v43, %v904_v39  ;;  %v4085_v43 = vld [vmem:[#allocation25] ss:$0 sm:$0xff] }
 0x897   :  { %5702 = vmatprep.subr.bf16.mxu1 %v5701_v56  ;;  %5734 = vmatprep.subr.bf16.mxu0 %v5733_v57  ;;  %v5715_v53 = vpack.c.bf16 %v857_v48, %v856_v47  ;;  %v889_v56 = vld [vmem:[#allocation23 + $0x178] sm:$0xff] }
 0x898   :  { %v5747_v57 = vpack.c.bf16 %v889_v56, %v888_v55 }
 0x89a   :  { %5704 = vmatpush3.bf16.msra.mxu1 %v5703_v61  ;;  %5736 = vmatpush3.bf16.msra.mxu0 %v5735_v62 }
 0x89b   :  { %5706 = vmatprep.subr.bf16.mxu1 %v5705_v6  ;;  %5738 = vmatprep.subr.bf16.mxu0 %v5737_v8 }
 0x89e   :  { %5708 = vmatpush3.bf16.msra.mxu1 %v5707_v21  ;;  %5740 = vmatpush3.bf16.msra.mxu0 %v5739_v23 }
 0x89f   :  { %5710 = vmatprep.subr.bf16.mxu1 %v5709_v26  ;;  %5742 = vmatprep.subr.bf16.mxu0 %v5741_v29 }
 0x8a2   :  { %5712 = vmatpush3.bf16.msra.mxu1 %v5711_v50  ;;  %5744 = vmatpush3.bf16.msra.mxu0 %v5743_v34 }
 0x8a3   :  { %5714 = vmatprep.subr.bf16.mxu1 %v5713_v42  ;;  %5746 = vmatprep.subr.bf16.mxu0 %v5745_v52 }
 0x8a6   :  { %5716 = vmatpush3.bf16.msra.mxu1 %v5715_v53  ;;  %5748 = vmatpush3.bf16.msra.mxu0 %v5747_v57 }
 0x8a7   :  { %5750 = vmatprep.subr.bf16.mxu1 %v7824_v28  ;;  %5782 = vmatprep.subr.bf16.mxu0 %v7824_v28 }
 0x95b   :  { %v2223_v61 = vpop.f32.mrb[10].mxu1  ;;  %v2300_v62 = vpop.f32.mrb[14].mxu0 }
 0x95c   :  { %v2224_v63 = vadd.f32 %v2223_v61, %v2140_v46  ;;  %v2301_v3 = vadd.f32 %v2300_v62, %v2148_v18  ;;  %v2225_v6 = vpop.f32.mrb[11].mxu1  ;;  %v2302_v8 = vpop.f32.mrb[15].mxu0 }
 0x95d   :  { %v2226_v9 = vadd.f32 %v2225_v6, %v2144_v60  ;;  %v2303_v11 = vadd.f32 %v2302_v8, %v2152_v12  ;;  %v912_v6 = vld [vmem:[#allocation32 + $0x8] sm:$0xff]  ;;  %v915_v8 = vld [vmem:[#allocation32 + $0x20] sm:$0xff] }
 0x95e   :  { %v2311_v21 = vmax.f32 %v2224_v63, 0.0  ;;  %v2313_v23 = vmax.f32 %v2301_v3, 0.0 }
 0x95f   :  { %v2312_v14 = vmax.f32 %v2226_v9, 0.0  ;;  %v2314_v15 = vmax.f32 %v2303_v11, 0.0  ;;  %v2229_v17 = vpop.f32.mrb[12].mxu1  ;;  %v2306_v20 = vpop.f32.mrb[16].mxu0  ;;  %v911_v9 = vld [vmem:[#allocation32] sm:$0xff]  ;;  %v5813_v11 = vpack.c.bf16 %v915_v8, %v912_v6  ;;  %v936_v8 = vld [vmem:[#allocation32 + $0xc8] sm:$0xff] }
 0x960   :  { %v2230_v26 = vadd.f32 %v2229_v17, %v2140_v46  ;;  %v2307_v29 = vadd.f32 %v2306_v20, %v2148_v18  ;;  %v2231_v31 = vpop.f32.mrb[13].mxu1  ;;  %v2308_v40 = vpop.f32.mrb[17].mxu0  ;;  %v916_v17 = vld [vmem:[#allocation32 + $0x28] sm:$0xff] }
 0x961   :  { %v2232_v44 = vadd.f32 %v2231_v31, %v2144_v60  ;;  %v2309_v50 = vadd.f32 %v2308_v40, %v2152_v12  ;;  %2389 = vmatprep.mubr.f32.mxu1 %v2312_v14  ;;  %2464 = vmatprep.mubr.f32.mxu0 %v2314_v15  ;;  %v914_v14 = vld [vmem:[#allocation32 + $0x18] sm:$0xff]  ;;  %v913_v15 = vld [vmem:[#allocation32 + $0x10] sm:$0xff]  ;;  %v920_v31 = vld [vmem:[#allocation32 + $0x48] sm:$0xff] }
 0x962   :  { %2390 = vmatmul.mubr.f32.vlgmr.msra.gmra.mrb[14].mxu1 %v2311_v21  ;;  %2465 = vmatmul.mubr.f32.vlgmr.msra.gmra.mrb[18].mxu0 %v2313_v23  ;;  %v2315_v36 = vmax.f32 %v2230_v26, 0.0  ;;  %v2317_v38 = vmax.f32 %v2307_v29, 0.0  ;;  %v5815_v20 = vpack.c.bf16 %v914_v14, %v911_v9  ;;  %v5845_v21 = vpack.c.bf16 %v916_v17, %v913_v15  ;;  %v918_v23 = vld [vmem:[#allocation32 + $0x38] sm:$0xff]  ;;  %v921_v26 = vld [vmem:[#allocation32 + $0x50] sm:$0xff]  ;;  %v924_v40 = vld [vmem:[#allocation32 + $0x68] sm:$0xff] }
 0x963   :  { %v2316_v32 = vmax.f32 %v2232_v44, 0.0  ;;  %v2318_v34 = vmax.f32 %v2309_v50, 0.0  ;;  %5752 = vmatpush3.bf16.msra.mxu1 %v7824_v28  ;;  %5784 = vmatpush3.bf16.msra.mxu0 %v7824_v28  ;;  %v917_v29 = vld [vmem:[#allocation32 + $0x30] sm:$0xff]  ;;  %v927_v44 = vld [vmem:[#allocation32 + $0x80] sm:$0xff]  ;;  %v938_v15 = vld [vmem:[#allocation32 + $0xd8] sm:$0xff] }
 0x964   :  { %5754 = vmatprep.subr.bf16.mxu1 %v7826_v30  ;;  %5786 = vmatprep.subr.bf16.mxu0 %v7826_v30  ;;  %v923_v50 = vld [vmem:[#allocation32 + $0x60] sm:$0xff]  ;;  %v937_v17 = vld [vmem:[#allocation32 + $0xd0] sm:$0xff] }
 0x965   :  { %2394 = vmatprep.mubr.f32.mxu1 %v2316_v32  ;;  %2469 = vmatprep.mubr.f32.mxu0 %v2318_v34  ;;  %v5821_v32 = vpack.c.bf16 %v927_v44, %v924_v40  ;;  %v926_v34 = vld [vmem:[#allocation32 + $0x78] sm:$0xff]  ;;  %v939_v9 = vld [vmem:[#allocation32 + $0xe0] sm:$0xff] }
 0x966   :  { %2395 = vmatmul.mubr.f32.gmra.mrb[16].mxu1 %v2315_v36  ;;  %2470 = vmatmul.mubr.f32.gmra.mrb[20].mxu0 %v2317_v38  ;;  %v5823_v36 = vpack.c.bf16 %v926_v34, %v923_v50  ;;  %v935_v14 = vld [vmem:[#allocation32 + $0xc0] sm:$0xff]  ;;  %v946_v50 = vld [vmem:[#allocation32 + $0x118] sm:$0xff] }
 0x967   :  { %5756 = vmatpush3.bf16.msra.mxu1 %v7826_v30  ;;  %5788 = vmatpush3.bf16.msra.mxu0 %v7826_v30  ;;  %v943_v40 = vld [vmem:[#allocation32 + $0x100] sm:$0xff] }
 0x968   :  { %5758 = vmatprep.subr.bf16.mxu1 %v7832_v33  ;;  %5790 = vmatprep.subr.bf16.mxu0 %v7832_v33  ;;  %v951_v34 = vld [vmem:[#allocation32 + $0x140] sm:$0xff] }
 0x96b   :  { %5760 = vmatpush3.bf16.msra.mxu1 %v7832_v33  ;;  %5792 = vmatpush3.bf16.msra.mxu0 %v7832_v33 }
 0x96c   :  { %5762 = vmatprep.subr.bf16.mxu1 %v7836_v37  ;;  %5794 = vmatprep.subr.bf16.mxu0 %v7836_v37 }
 0x96f   :  { %5764 = vmatpush3.bf16.msra.mxu1 %v7836_v37  ;;  %5796 = vmatpush3.bf16.msra.mxu0 %v7836_v37 }
 0x970   :  { %5766 = vmatprep.subr.bf16.mxu1 %v7840_v41  ;;  %5798 = vmatprep.subr.bf16.mxu0 %v7840_v41 }
 0x973   :  { %5768 = vmatpush3.bf16.msra.mxu1 %v7840_v41  ;;  %5800 = vmatpush3.bf16.msra.mxu0 %v7840_v41 }
 0x974   :  { %5770 = vmatprep.subr.bf16.mxu1 %v7844_v45  ;;  %5802 = vmatprep.subr.bf16.mxu0 %v7844_v45 }
 0x977   :  { %5772 = vmatpush3.bf16.msra.mxu1 %v7844_v45  ;;  %5804 = vmatpush3.bf16.msra.mxu0 %v7844_v45 }
 0x978   :  { %5774 = vmatprep.subr.bf16.mxu1 %v7848_v51  ;;  %5806 = vmatprep.subr.bf16.mxu0 %v7848_v51 }
 0x97b   :  { %5776 = vmatpush3.bf16.msra.mxu1 %v7848_v51  ;;  %5808 = vmatpush3.bf16.msra.mxu0 %v7848_v51 }
 0x97c   :  { %5778 = vmatprep.subr.bf16.mxu1 %v7874_v49  ;;  %5810 = vmatprep.subr.bf16.mxu0 %v7874_v49 }
 0x97f   :  { %5780 = vmatpush3.bf16.msra.mxu1 %v7874_v49  ;;  %5812 = vmatpush3.bf16.msra.mxu0 %v7874_v49 }
 0x980   :  { %5814 = vmatprep.subr.bf16.mxu1 %v5813_v11  ;;  %5846 = vmatprep.subr.bf16.mxu0 %v5845_v21  ;;  %v5829_v11 = vpack.c.bf16 %v939_v9, %v936_v8 }
 0xa35   :  { %v4344_v39 = vpop.f32.mrb[14].mxu1  ;;  %v4382_v42 = vpop.f32.mrb[18].mxu0 }
 0xa36   :  { %v4345_v47 = vpop.f32.mrb[15].mxu1  ;;  %v4383_v48 = vpop.f32.mrb[19].mxu0 }
 0xa37   :  { %v4346_v52 = vadd.f32 %v4345_v47, %v4344_v39  ;;  %v4384_v53 = vadd.f32 %v4383_v48, %v4382_v42  ;;  %v919_v47 = vld [vmem:[#allocation32 + $0x40] sm:$0xff]  ;;  %v922_v48 = vld [vmem:[#allocation32 + $0x58] sm:$0xff] }
 0xa39   :  { %v2392_v55 = vadd.f32 %v4346_v52, %v4085_v43  ;;  %v4347_v56 = vpop.f32.mrb[16].mxu1  ;;  %v4385_v57 = vpop.f32.mrb[20].mxu0 }
 0xa3a   :  { %v4348_v58 = vpop.f32.mrb[17].mxu1  ;;  %v4386_v46 = vpop.f32.mrb[21].mxu0 }
 0xa3b   :  { %v2467_v18 = vadd.f32 %v4384_v53, %v2392_v55  ;;  %v4349_v60 = vadd.f32 %v4348_v58, %v4347_v56  ;;  %v4387_v12 = vadd.f32 %v4386_v46, %v4385_v57  ;;  %v5849_v55 = vpack.c.bf16 %v922_v48, %v919_v47  ;;  %v925_v56 = vld [vmem:[#allocation32 + $0x70] sm:$0xff]  ;;  %v928_v57 = vld [vmem:[#allocation32 + $0x88] sm:$0xff]  ;;  %v930_v46 = vld [vmem:[#allocation32 + $0x98] sm:$0xff] }
 0xa3c   :  { %v5853_v58 = vpack.c.bf16 %v928_v57, %v925_v56  ;;  %v950_v47 = vld [vmem:[#allocation32 + $0x138] sm:$0xff]  ;;  %v949_v48 = vld [vmem:[#allocation32 + $0x130] sm:$0xff] }
 0xa3d   :  { %v2397_v61 = vadd.f32 %v4349_v60, %v4085_v43  ;;  %v2475_v62 = vadd.f32 %v2467_v18, %v7894_v54  ;;  %v5817_v54 = vpack.c.bf16 %v921_v26, %v918_v23  ;;  %v933_v18 = vld [vmem:[#allocation32 + $0xb0] sm:$0xff]  ;;  %v942_v23 = vld [vmem:[#allocation32 + $0xf8] sm:$0xff] }
 0xa3e   :  { %v5825_v60 = vpack.c.bf16 %v933_v18, %v930_v46  ;;  %v945_v26 = vld [vmem:[#allocation32 + $0x110] sm:$0xff]  ;;  %v958_v46 = vld [vmem:[#allocation32 + $0x178] sm:$0xff] }
 0xa3f   :  { %v2472_v63 = vadd.f32 %v4387_v12, %v2397_v61  ;;  %4945 = vmatprep.mubr.f32.mxu1 %v2475_v62  ;;  %v929_v12 = vld [vmem:[#allocation32 + $0x90] sm:$0xff]  ;;  %v932_v61 = vld [vmem:[#allocation32 + $0xa8] sm:$0xff] }
 0xa41   :  { %v2476_v3 = vadd.f32 %v2472_v63, %v7900_v5  ;;  %v5819_v5 = vpack.c.bf16 %v920_v31, %v917_v29  ;;  %v5827_v63 = vpack.c.bf16 %v932_v61, %v929_v12  ;;  %v941_v31 = vld [vmem:[#allocation32 + $0xf0] sm:$0xff]  ;;  %v956_v12 = vld [vmem:[#allocation32 + $0x168] sm:$0xff] }
 0xa43   :  { %4946 = vmatmul.mubr.f32.vlgmr.msra.gmra.mrb[18].mxu1 %v2476_v3 }
 0xa44   :  { %2731 = vmatprep.mubr.f32.mxu1 %v7363_v1  ;;  %5816 = vmatpush1.bf16.msra.mxu1 %v5815_v20  ;;  %v5831_v20 = vpack.c.bf16 %v938_v15, %v935_v14 }
 0xa45   :  { %5818 = vmatprep.subr.bf16.mxu1 %v5817_v54  ;;  %v5833_v54 = vpack.c.bf16 %v945_v26, %v942_v23 }
 0xa48   :  { %5820 = vmatpush1.bf16.msra.mxu1 %v5819_v5  ;;  %v944_v5 = vld [vmem:[#allocation32 + $0x108] sm:$0xff] }
 0xa49   :  { %5822 = vmatprep.subr.bf16.mxu1 %v5821_v32  ;;  %v5835_v44 = vpack.c.bf16 %v944_v5, %v941_v31  ;;  %v948_v32 = vld [vmem:[#allocation32 + $0x128] sm:$0xff] }
 0xa4c   :  { %5824 = vmatpush1.bf16.msra.mxu1 %v5823_v36  ;;  %v5865_v36 = vpack.c.bf16 %v946_v50, %v943_v40 }
 0xa4d   :  { %5826 = vmatprep.subr.bf16.mxu1 %v5825_v60  ;;  %v953_v60 = vld [vmem:[#allocation32 + $0x150] sm:$0xff] }
 0xa50   :  { %5828 = vmatpush1.bf16.msra.mxu1 %v5827_v63 }
 0xa51   :  { %5830 = vmatprep.subr.bf16.mxu1 %v5829_v11  ;;  %v4086_v11 = vld [vmem:[#allocation29] ss:$0 sm:$0xff] }
 0xa54   :  { %5832 = vmatpush1.bf16.msra.mxu1 %v5831_v20  ;;  %v4087_v20 = vld [vmem:[#allocation31] ss:$0 sm:$0xff] }
 0xa55   :  { %5834 = vmatprep.subr.bf16.mxu1 %v5833_v54 }
 0xa58   :  { %5836 = vmatpush1.bf16.msra.mxu1 %v5835_v44 }
 0xb16   :  { %v4947_v38 = vpop.f32.mrb[18].mxu1 }
 0xb17   :  { %v7946_v39 = vsub.f32 %v2476_v3, %v4947_v38  ;;  %v2543_v42 = vpop.f32.mrb[19].mxu1  ;;  %v934_v3 = vld [vmem:[#allocation32 + $0xb8] sm:$0xff]  ;;  %v5837_v38 = vpack.c.bf16 %v951_v34, %v948_v32 }
 0xb18   :  { %v7948_v43 = vsub.f32 %v2475_v62, %v2543_v42  ;;  %v931_v62 = vld [vmem:[#allocation32 + $0xa0] sm:$0xff] }
 0xb19   :  { %v2555_v53 = vmul.f32 %v7946_v39, %v7946_v39  ;;  %v5857_v6 = vpack.c.bf16 %v934_v3, %v931_v62  ;;  %v947_v42 = vld [vmem:[#allocation32 + $0x120] sm:$0xff]  ;;  %5838 = vmatprep.subr.bf16.mxu1 %v5837_v38  ;;  %v5843_v62 = vpack.c.bf16 %v956_v12, %v953_v60  ;;  %v966_v60 = vld [vmem:[#allocation35 + $0x30] sm:$0xff] }
 0xb1a   :  { %v2554_v52 = vmul.f32 %v7948_v43, %v7948_v43  ;;  %v5839_v57 = vpack.c.bf16 %v950_v47, %v947_v42  ;;  %v967_v12 = vld [vmem:[#allocation35 + $0x38] sm:$0xff] }
 0xb1c   :  { %4980 = vmatprep.mubr.f32.mxu0 %v2554_v52  ;;  %v952_v52 = vld [vmem:[#allocation32 + $0x148] sm:$0xff]  ;;  %5840 = vmatpush1.bf16.msra.mxu1 %v5839_v57 }
 0xb1d   :  { %4981 = vmatmul.mubr.f32.vlgmr.msra.gmra.mrb[22].mxu0 %v2555_v53  ;;  %v954_v53 = vld [vmem:[#allocation32 + $0x158] sm:$0xff]  ;;  %v5869_v56 = vpack.c.bf16 %v952_v52, %v949_v48  ;;  %v960_v48 = vld [vmem:[#allocation35] sm:$0xff]  ;;  %v961_v52 = vld [vmem:[#allocation35 + $0x8] sm:$0xff] }
 0xb1e   :  { %5848 = vmatpush3.bf16.msra.mxu0 %v5845_v21  ;;  %v940_v21 = vld [vmem:[#allocation32 + $0xe8] sm:$0xff] }
 0xb1f   :  { %5850 = vmatprep.subr.bf16.mxu0 %v5849_v55  ;;  %v5861_v29 = vpack.c.bf16 %v940_v21, %v937_v17 }
 0xb22   :  { %5852 = vmatpush3.bf16.msra.mxu0 %v5849_v55  ;;  %v957_v55 = vld [vmem:[#allocation32 + $0x170] sm:$0xff] }
 0xb23   :  { %5854 = vmatprep.subr.bf16.mxu0 %v5853_v58  ;;  %v5841_v18 = vpack.c.bf16 %v957_v55, %v954_v53  ;;  %v5941_v53 = vpack.c.bf16 %v961_v52, %v960_v48  ;;  %v962_v55 = vld [vmem:[#allocation35 + $0x10] sm:$0xff] }
 0xb25   :  { %5842 = vmatprep.subr.bf16.mxu1 %v5841_v18 }
 0xb26   :  { %5856 = vmatpush3.bf16.msra.mxu0 %v5853_v58  ;;  %v955_v58 = vld [vmem:[#allocation32 + $0x160] sm:$0xff]  ;;  %5844 = vmatpush1.bf16.msra.mxu1 %v5843_v62 }
 0xb27   :  { %5858 = vmatprep.subr.bf16.mxu0 %v5857_v6  ;;  %v5873_v61 = vpack.c.bf16 %v958_v46, %v955_v58  ;;  %5878 = vmatprep.subr.bf16.mxu1 %v7754_v2  ;;  %v964_v58 = vld [vmem:[#allocation35 + $0x20] sm:$0xff]  ;;  %v965_v46 = vld [vmem:[#allocation35 + $0x28] sm:$0xff] }
 0xb28   :  { %v5949_v18 = vpack.c.bf16 %v965_v46, %v964_v58  ;;  %v968_v62 = vld [vmem:[#allocation35 + $0x40] sm:$0xff] }
 0xb2a   :  { %5860 = vmatpush3.bf16.msra.mxu0 %v5857_v6 }
 0xb2b   :  { %5862 = vmatprep.subr.bf16.mxu0 %v5861_v29 }
 0xb2e   :  { %5864 = vmatpush3.bf16.msra.mxu0 %v5861_v29 }
 0xb2f   :  { %5866 = vmatprep.subr.bf16.mxu0 %v5865_v36 }
 0xb32   :  { %5868 = vmatpush3.bf16.msra.mxu0 %v5865_v36 }
 0xb33   :  { %5870 = vmatprep.subr.bf16.mxu0 %v5869_v56 }
 0xb36   :  { %5872 = vmatpush3.bf16.msra.mxu0 %v5869_v56  ;;  %v963_v56 = vld [vmem:[#allocation35 + $0x18] sm:$0xff] }
 0xb37   :  { %5874 = vmatprep.subr.bf16.mxu0 %v5873_v61  ;;  %v5945_v57 = vpack.c.bf16 %v963_v56, %v962_v55 }
 0xb3a   :  { %5876 = vmatpush3.bf16.msra.mxu0 %v5873_v61  ;;  %v5953_v61 = vpack.c.bf16 %v967_v12, %v966_v60 }
 0xb3b   :  { %5910 = vmatprep.subr.bf16.mxu0 %v7754_v2 }
 0xbf0   :  { %v4982_v63 = vpop.f32.mrb[22].mxu0 }
 0xbf1   :  { %v2628_v3 = vadd.f32 1e-05, %v4982_v63  ;;  %v2622_v6 = vpop.f32.mrb[23].mxu0  ;;  %v969_v63 = vld [vmem:[#allocation35 + $0x48] sm:$0xff] }
 0xbf2   :  { %v2623_v8 = vadd.f32 1e-05, %v2622_v6  ;;  %v970_v6 = vld [vmem:[#allocation35 + $0x50] sm:$0xff] }
 0xbf3   :  { %6449 = vrsqrt.f32 %v2628_v3  ;;  %v5957_v3 = vpack.c.bf16 %v969_v63, %v968_v62  ;;  %v978_v62 = vld [vmem:[#allocation38 + $0x8] sm:$0xff] }
 0xbf4   :  { %6451 = vrsqrt.f32 %v2623_v8  ;;  %v971_v8 = vld [vmem:[#allocation35 + $0x58] sm:$0xff]  ;;  %v982_v63 = vld [vmem:[#allocation38 + $0x28] sm:$0xff] }
 0xbfd   :  { %v6450_v9 = vpop.eup %6449 }
 0xbfe   :  { %v6452_v14 = vpop.eup %6451  ;;  %v2634_v15 = vmul.f32 %v6450_v9, %v7946_v39  ;;  %v5961_v9 = vpack.c.bf16 %v971_v8, %v970_v6  ;;  %v6037_v6 = vpack.c.bf16 %v982_v63, %v978_v62  ;;  %v984_v8 = vld [vmem:[#allocation38 + $0x38] sm:$0xff] }
 0xbff   :  { %v2633_v17 = vmul.f32 %v6452_v14, %v7948_v43  ;;  %v973_v14 = vld [vmem:[#allocation35 + $0x68] sm:$0xff] }
 0xc00   :  { %v2642_v21 = vmul.f32 %v4086_v11, %v2634_v15 }
 0xc01   :  { %v2641_v23 = vmul.f32 %v4086_v11, %v2633_v17  ;;  %v972_v11 = vld [vmem:[#allocation35 + $0x60] sm:$0xff]  ;;  %v974_v17 = vld [vmem:[#allocation35 + $0x70] sm:$0xff] }
 0xc02   :  { %v7960_v29 = vadd.f32 %v4087_v20, %v2642_v21  ;;  %v5965_v15 = vpack.c.bf16 %v973_v14, %v972_v11  ;;  %v981_v11 = vld [vmem:[#allocation38 + $0x20] sm:$0xff] }
 0xc03   :  { %v7958_v26 = vadd.f32 %v4087_v20, %v2641_v23  ;;  %v975_v20 = vld [vmem:[#allocation35 + $0x78] sm:$0xff] }
 0xc04   :  { %v5969_v21 = vpack.c.bf16 %v975_v20, %v974_v17  ;;  %v986_v17 = vld [vmem:[#allocation38 + $0x48] sm:$0xff] }
 0xc05   :  { %2732 = vmatmul.mubr.f32.vlgmr.msra.gmra.mrb[20].mxu1 %v7958_v26  ;;  %5015 = vmatprep.mubr.f32.mxu0 %v7958_v26  ;;  %v990_v20 = vld [vmem:[#allocation38 + $0x68] sm:$0xff] }
 0xc06   :  { %5016 = vmatmul.mubr.f32.vlgmr.msra.gmra.mrb[24].mxu0 %v7960_v29  ;;  %2737 = vmatprep.mubr.f32.mxu1 %v7363_v1 }
 0xc07   :  { %5880 = vmatpush3.bf16.msra.mxu1 %v7754_v2  ;;  %5912 = vmatpush3.bf16.msra.mxu0 %v7754_v2  ;;  %v959_v2 = vld [vmem:[#allocation34] sm:$0x7] }
 0xc08   :  { %5882 = vmatprep.subr.bf16.mxu1 %v7756_v4  ;;  %5914 = vmatprep.subr.bf16.mxu0 %v7756_v4 }
 0xc09   :  { %2738 = vmatmul.mubr.f32.gmra.mrb[22].mxu1 %v7960_v29 }
 0xc0b   :  { %5884 = vmatpush3.bf16.msra.mxu1 %v7756_v4  ;;  %5916 = vmatpush3.bf16.msra.mxu0 %v7756_v4  ;;  %v2655_v4 = vrot.slane %v959_v2, %v7805_v25 }
 0xc0c   :  { %5886 = vmatprep.subr.bf16.mxu1 %v7764_v7  ;;  %5918 = vmatprep.subr.bf16.mxu0 %v7764_v7 }
 0xc0f   :  { %5888 = vmatpush3.bf16.msra.mxu1 %v7764_v7  ;;  %5920 = vmatpush3.bf16.msra.mxu0 %v7764_v7  ;;  %v2659_v7 = vrot.slane %v959_v2, %v7808_v27 }
 0xc10   :  { %5890 = vmatprep.subr.bf16.mxu1 %v7770_v10  ;;  %5922 = vmatprep.subr.bf16.mxu0 %v7770_v10 }
 0xc13   :  { %5892 = vmatpush3.bf16.msra.mxu1 %v7770_v10  ;;  %5924 = vmatpush3.bf16.msra.mxu0 %v7770_v10  ;;  %v2663_v10 = vrot.slane %v959_v2, %v7813_v35 }
 0xc14   :  { %5894 = vmatprep.subr.bf16.mxu1 %v7776_v13  ;;  %5926 = vmatprep.subr.bf16.mxu0 %v7776_v13 }
 0xc17   :  { %5896 = vmatpush3.bf16.msra.mxu1 %v7776_v13  ;;  %5928 = vmatpush3.bf16.msra.mxu0 %v7776_v13 }
 0xc18   :  { %5898 = vmatprep.subr.bf16.mxu1 %v7782_v16  ;;  %5930 = vmatprep.subr.bf16.mxu0 %v7782_v16 }
 0xc1b   :  { %5900 = vmatpush3.bf16.msra.mxu1 %v7782_v16  ;;  %5932 = vmatpush3.bf16.msra.mxu0 %v7782_v16 }
 0xc1c   :  { %5902 = vmatprep.subr.bf16.mxu1 %v7788_v19  ;;  %5934 = vmatprep.subr.bf16.mxu0 %v7788_v19 }
 0xc1f   :  { %5904 = vmatpush3.bf16.msra.mxu1 %v7788_v19  ;;  %5936 = vmatpush3.bf16.msra.mxu0 %v7788_v19 }
 0xc20   :  { %5906 = vmatprep.subr.bf16.mxu1 %v7796_v22  ;;  %5938 = vmatprep.subr.bf16.mxu0 %v7796_v22 }
 0xc23   :  { %5908 = vmatpush3.bf16.msra.mxu1 %v7796_v22  ;;  %5940 = vmatpush3.bf16.msra.mxu0 %v7796_v22 }
 0xc24   :  { %5974 = vmatprep.subr.bf16.mxu0 %v7824_v28  ;;  %5942 = vmatprep.subr.bf16.mxu1 %v5941_v53 }
 0xcd8   :  { %v2733_v13 = vpop.f32.mrb[20].mxu1 }
 0xcd9   :  { %v2734_v16 = vadd.f32 %v2733_v13, %v2655_v4  ;;  %v2735_v19 = vpop.f32.mrb[21].mxu1  ;;  %v5017_v39 = vpop.f32.mrb[24].mxu0 }
 0xcda   :  { %v2736_v43 = vadd.f32 %v2735_v19, %v2659_v7  ;;  %v8001_v54 = vadd.f32 %v5017_v39, %v2663_v10  ;;  %v2810_v31 = vpop.f32.mrb[25].mxu0 }
 0xcdb   :  { %v8003_v5 = vadd.f32 %v2810_v31, %v2663_v10 }
 0xcdc   :  { %v2819_v22 = vmul.f32 %v2736_v43, %v2734_v16  ;;  %v2739_v40 = vpop.f32.mrb[22].mxu1 }
 0xcdd   :  { %v2993_v44 = vsub.f32 %v8003_v5, %v8001_v54  ;;  %v2994_v50 = vsub.f32 %v8001_v54, %v8003_v5  ;;  %v2740_v32 = vadd.f32 %v2739_v40, %v2655_v4  ;;  %v2741_v34 = vpop.f32.mrb[23].mxu1 }
 0xcde   :  { %v2742_v36 = vadd.f32 %v2741_v34, %v2659_v7  ;;  %5050 = vmatprep.mubr.f32.mxu1 %v2819_v22 }
 0xcdf   :  { %v2897_v38 = vmul.f32 %v2740_v32, %v2736_v43 }
 0xce0   :  { %v2820_v42 = vmul.f32 %v2742_v36, %v2740_v32  ;;  %v2896_v47 = vmul.f32 %v2742_v36, %v2734_v16 }
 0xce2   :  { %5051 = vmatmul.mubr.f32.vlgmr.msra.gmra.mrb[24].mxu1 %v2820_v42  ;;  %5085 = vmatprep.mubr.f32.mxu0 %v2896_v47 }
 0xce3   :  { %5086 = vmatmul.mubr.f32.vlgmr.msra.gmra.mrb[26].mxu0 %v2897_v38  ;;  %5944 = vmatpush3.bf16.msra.mxu1 %v5941_v53 }
 0xce4   :  { %5976 = vmatpush3.bf16.msra.mxu0 %v7824_v28  ;;  %5946 = vmatprep.subr.bf16.mxu1 %v5945_v57 }
 0xce5   :  { %5978 = vmatprep.subr.bf16.mxu0 %v7826_v30 }
 0xce7   :  { %5948 = vmatpush3.bf16.msra.mxu1 %v5945_v57 }
 0xce8   :  { %5980 = vmatpush3.bf16.msra.mxu0 %v7826_v30  ;;  %5950 = vmatprep.subr.bf16.mxu1 %v5949_v18 }
 0xce9   :  { %5982 = vmatprep.subr.bf16.mxu0 %v7832_v33 }
 0xceb   :  { %5952 = vmatpush3.bf16.msra.mxu1 %v5949_v18 }
 0xcec   :  { %5984 = vmatpush3.bf16.msra.mxu0 %v7832_v33  ;;  %5954 = vmatprep.subr.bf16.mxu1 %v5953_v61 }
 0xced   :  { %5986 = vmatprep.subr.bf16.mxu0 %v7836_v37 }
 0xcef   :  { %5956 = vmatpush3.bf16.msra.mxu1 %v5953_v61 }
 0xcf0   :  { %5988 = vmatpush3.bf16.msra.mxu0 %v7836_v37  ;;  %5958 = vmatprep.subr.bf16.mxu1 %v5957_v3 }
 0xcf1   :  { %5990 = vmatprep.subr.bf16.mxu0 %v7840_v41 }
 0xcf3   :  { %5960 = vmatpush3.bf16.msra.mxu1 %v5957_v3  ;;  %v980_v3 = vld [vmem:[#allocation38 + $0x18] sm:$0xff] }
 0xcf4   :  { %5992 = vmatpush3.bf16.msra.mxu0 %v7840_v41  ;;  %5962 = vmatprep.subr.bf16.mxu1 %v5961_v9  ;;  %v6069_v14 = vpack.c.bf16 %v984_v8, %v980_v3  ;;  %v1003_v3 = vld [vmem:[#allocation38 + $0xd0] sm:$0xff] }
 0xcf5   :  { %5994 = vmatprep.subr.bf16.mxu0 %v7844_v45 }
 0xcf7   :  { %5964 = vmatpush3.bf16.msra.mxu1 %v5961_v9  ;;  %v977_v9 = vld [vmem:[#allocation38] sm:$0xff] }
 0xcf8   :  { %5996 = vmatpush3.bf16.msra.mxu0 %v7844_v45  ;;  %5966 = vmatprep.subr.bf16.mxu1 %v5965_v15 }
 0xcf9   :  { %5998 = vmatprep.subr.bf16.mxu0 %v7848_v51 }
 0xcfb   :  { %5968 = vmatpush3.bf16.msra.mxu1 %v5965_v15  ;;  %v6039_v15 = vpack.c.bf16 %v981_v11, %v977_v9  ;;  %v1010_v9 = vld [vmem:[#allocation38 + $0x108] sm:$0xff] }
 0xcfc   :  { %6000 = vmatpush3.bf16.msra.mxu0 %v7848_v51  ;;  %5970 = vmatprep.subr.bf16.mxu1 %v5969_v21  ;;  %v1014_v11 = vld [vmem:[#allocation38 + $0x128] sm:$0xff] }
 0xcfd   :  { %6002 = vmatprep.subr.bf16.mxu0 %v7874_v49 }
 0xcff   :  { %5972 = vmatpush3.bf16.msra.mxu1 %v5969_v21  ;;  %v989_v21 = vld [vmem:[#allocation38 + $0x60] sm:$0xff] }
 0xd00   :  { %6004 = vmatpush3.bf16.msra.mxu0 %v7874_v49  ;;  %6006 = vmatprep.subr.bf16.mxu1 %v7824_v28 }
 0xd01   :  { %6038 = vmatprep.subr.bf16.mxu0 %v6037_v6  ;;  %v1007_v6 = vld [vmem:[#allocation38 + $0xf0] sm:$0xff] }
 0xd02   :  { %v6083_v8 = vpack.c.bf16 %v1007_v6, %v1003_v3  ;;  %v1035_v3 = vld [vmem:[#allocation38 + $0x1d0] sm:$0xff] }
 0xd03   :  { %v1039_v6 = vld [vmem:[#allocation38 + $0x1f0] sm:$0xff] }
 0xdb5   :  { %v5052_v23 = vpop.f32.mrb[24].mxu1 }
 0xdb6   :  { %v2887_v2 = vpop.f32.mrb[25].mxu1  ;;  %v5087_v4 = vpop.f32.mrb[26].mxu0 }
 0xdb7   :  { %v2974_v7 = vmax.f32 %v5052_v23, %v5087_v4  ;;  %v2964_v10 = vpop.f32.mrb[27].mxu0 }
 0xdb8   :  { %v2973_v13 = vmax.f32 %v2887_v2, %v2964_v10 }
 0xdb9   :  { %v2976_v16 = vsub.f32 %v5052_v23, %v2974_v7  ;;  %v2982_v19 = vsub.f32 %v5087_v4, %v2974_v7  ;;  %v998_v4 = vld [vmem:[#allocation38 + $0xa8] sm:$0xff] }
 0xdba   :  { %v2975_v39 = vsub.f32 %v2887_v2, %v2973_v13  ;;  %v2981_v43 = vsub.f32 %v2964_v10, %v2973_v13  ;;  %v994_v2 = vld [vmem:[#allocation38 + $0x88] sm:$0xff]  ;;  %v993_v10 = vld [vmem:[#allocation38 + $0x80] sm:$0xff] }
 0xdbb   :  { %v2979_v31 = vmul.f32 1.442695, %v2976_v16  ;;  %v2985_v22 = vmul.f32 1.442695, %v2982_v19  ;;  %v6045_v7 = vpack.c.bf16 %v998_v4, %v994_v2  ;;  %v997_v13 = vld [vmem:[#allocation38 + $0xa0] sm:$0xff]  ;;  %v1015_v2 = vld [vmem:[#allocation38 + $0x130] sm:$0xff] }
 0xdbc   :  { %v2977_v40 = vmul.f32 1.442695, %v2975_v39  ;;  %v2983_v32 = vmul.f32 1.442695, %v2981_v43  ;;  %v6047_v16 = vpack.c.bf16 %v997_v13, %v993_v10  ;;  %v1018_v4 = vld [vmem:[#allocation38 + $0x148] sm:$0xff]  ;;  %v1020_v13 = vld [vmem:[#allocation38 + $0x158] sm:$0xff] }
 0xdbd   :  { %6453 = vpow2.f32 %v2979_v31  ;;  %v979_v31 = vld [vmem:[#allocation38 + $0x10] sm:$0xff]  ;;  %v1022_v10 = vld [vmem:[#allocation38 + $0x168] sm:$0xff] }
 0xdbe   :  { %6455 = vpow2.f32 %v2985_v22  ;;  %v983_v22 = vld [vmem:[#allocation38 + $0x30] sm:$0xff] }
 0xdbf   :  { %6457 = vpow2.f32 %v2977_v40 }
 0xdc0   :  { %6459 = vpow2.f32 %v2983_v32  ;;  %v988_v32 = vld [vmem:[#allocation38 + $0x58] sm:$0xff] }
 0xdc7   :  { %v6454_v34 = vpop.eup %6453 }
 0xdc8   :  { %v6456_v36 = vpop.eup %6455 }
 0xdc9   :  { %v6458_v38 = vpop.eup %6457  ;;  %v2988_v42 = vadd.f32 %v6456_v36, %v6454_v34 }
 0xdca   :  { %v6460_v47 = vpop.eup %6459 }
 0xdcb   :  { %6461 = vrcp.f32 %v2988_v42  ;;  %v2987_v48 = vadd.f32 %v6460_v47, %v6458_v38 }
 0xdcd   :  { %6463 = vrcp.f32 %v2987_v48  ;;  %v987_v48 = vld [vmem:[#allocation38 + $0x50] sm:$0xff] }
 0xdd5   :  { %v6462_v52 = vpop.eup %6461 }
 0xdd6   :  { %v2992_v53 = vmul.f32 %v6462_v52, %v6454_v34  ;;  %v992_v34 = vld [vmem:[#allocation38 + $0x78] sm:$0xff]  ;;  %v991_v52 = vld [vmem:[#allocation38 + $0x70] sm:$0xff] }
 0xdd7   :  { %v6464_v55 = vpop.eup %6463  ;;  %v6073_v47 = vpack.c.bf16 %v992_v34, %v988_v32  ;;  %v1019_v32 = vld [vmem:[#allocation38 + $0x150] sm:$0xff] }
 0xdd8   :  { %v2991_v56 = vmul.f32 %v6464_v55, %v6458_v38  ;;  %v2996_v57 = vmul.f32 %v2994_v50, %v2992_v53  ;;  %v6071_v38 = vpack.c.bf16 %v983_v22, %v979_v31  ;;  %v996_v53 = vld [vmem:[#allocation38 + $0x98] sm:$0xff]  ;;  %v1017_v31 = vld [vmem:[#allocation38 + $0x140] sm:$0xff] }
 0xdd9   :  { %v1000_v55 = vld [vmem:[#allocation38 + $0xb8] sm:$0xff]  ;;  %v1021_v22 = vld [vmem:[#allocation38 + $0x160] sm:$0xff] }
 0xdda   :  { %v2995_v58 = vmul.f32 %v2993_v44, %v2991_v56  ;;  %v2998_v46 = vadd.f32 %v2996_v57, %v8003_v5  ;;  %v6075_v56 = vpack.c.bf16 %v991_v52, %v987_v48  ;;  %v6077_v57 = vpack.c.bf16 %v1000_v55, %v996_v53  ;;  %v1028_v52 = vld [vmem:[#allocation38 + $0x198] sm:$0xff]  ;;  %v1025_v55 = vld [vmem:[#allocation38 + $0x180] sm:$0xff] }
 0xddb   :  { %v6059_v34 = vpack.c.bf16 %v1021_v22, %v1017_v31  ;;  %v1032_v53 = vld [vmem:[#allocation38 + $0x1b8] sm:$0xff]  ;;  %v1043_v31 = vld [vmem:[#allocation40 + $0x8] sm:$0xff]  ;;  %v1074_v22 = vld [vmem:[#allocation40 + $0x100] sm:$0xff] }
 0xddc   :  { %v2997_v18 = vadd.f32 %v2995_v58, %v8001_v54  ;;  %v4088_v54 = vld [vmem:[#allocation37] ss:$0 sm:$0xff]  ;;  %v995_v58 = vld [vmem:[#allocation38 + $0x90] sm:$0xff] }
 0xdde   :  { %5120 = vmatprep.mubr.f32.mxu1 %v2997_v18 }
 0xddf   :  { %5121 = vmatmul.mubr.f32.vlgmr.msra.gmra.mrb[26].mxu1 %v2998_v46  ;;  %v999_v46 = vld [vmem:[#allocation38 + $0xb0] sm:$0xff] }
 0xde0   :  { %6008 = vmatpush3.bf16.msra.mxu1 %v7824_v28  ;;  %v6079_v18 = vpack.c.bf16 %v999_v46, %v995_v58  ;;  %v1027_v58 = vld [vmem:[#allocation38 + $0x190] sm:$0xff] }
 0xde1   :  { %6010 = vmatprep.subr.bf16.mxu1 %v7826_v30  ;;  %v1031_v46 = vld [vmem:[#allocation38 + $0x1b0] sm:$0xff] }
 0xde4   :  { %6012 = vmatpush3.bf16.msra.mxu1 %v7826_v30 }
 0xde5   :  { %6014 = vmatprep.subr.bf16.mxu1 %v7832_v33 }
 0xde8   :  { %6016 = vmatpush3.bf16.msra.mxu1 %v7832_v33 }
 0xde9   :  { %6018 = vmatprep.subr.bf16.mxu1 %v7836_v37 }
 0xdec   :  { %6020 = vmatpush3.bf16.msra.mxu1 %v7836_v37 }
 0xded   :  { %6022 = vmatprep.subr.bf16.mxu1 %v7840_v41 }
 0xdf0   :  { %6024 = vmatpush3.bf16.msra.mxu1 %v7840_v41 }
 0xdf1   :  { %6026 = vmatprep.subr.bf16.mxu1 %v7844_v45 }
 0xdf4   :  { %6028 = vmatpush3.bf16.msra.mxu1 %v7844_v45 }
 0xdf5   :  { %6030 = vmatprep.subr.bf16.mxu1 %v7848_v51 }
 0xdf8   :  { %6032 = vmatpush3.bf16.msra.mxu1 %v7848_v51 }
 0xdf9   :  { %6034 = vmatprep.subr.bf16.mxu1 %v7874_v49 }
 0xdfc   :  { %6036 = vmatpush3.bf16.msra.mxu1 %v7874_v49 }
 0xdfd   :  { %6070 = vmatprep.subr.bf16.mxu1 %v6069_v14  ;;  %v1012_v14 = vld [vmem:[#allocation38 + $0x118] sm:$0xff] }
 0xeb2   :  { %v5122_v5 = vpop.f32.mrb[26].mxu1 }
 0xeb3   :  { %v3077_v44 = vadd.f32 %v5122_v5, %v4088_v54  ;;  %v3071_v50 = vpop.f32.mrb[27].mxu1  ;;  %v1006_v5 = vld [vmem:[#allocation38 + $0xe8] sm:$0xff] }
 0xeb4   :  { %v3072_v60 = vadd.f32 %v4088_v54, %v3071_v50  ;;  %v1002_v54 = vld [vmem:[#allocation38 + $0xc8] sm:$0xff] }
 0xeb5   :  { %v3081_v61 = vadd.f32 %v3077_v44, %v7960_v29  ;;  %v985_v29 = vld [vmem:[#allocation38 + $0x40] sm:$0xff]  ;;  %v1004_v44 = vld [vmem:[#allocation38 + $0xd8] sm:$0xff]  ;;  %v6049_v50 = vpack.c.bf16 %v1006_v5, %v1002_v54  ;;  %v1034_v54 = vld [vmem:[#allocation38 + $0x1c8] sm:$0xff] }
 0xeb6   :  { %v3080_v12 = vadd.f32 %v3072_v60, %v7958_v26  ;;  %v6041_v26 = vpack.c.bf16 %v990_v20, %v986_v17  ;;  %v6043_v23 = vpack.c.bf16 %v989_v21, %v985_v29  ;;  %v1008_v60 = vld [vmem:[#allocation38 + $0xf8] sm:$0xff]  ;;  %v1009_v20 = vld [vmem:[#allocation38 + $0x100] sm:$0xff]  ;;  %v1038_v5 = vld [vmem:[#allocation38 + $0x1e8] sm:$0xff] }
 0xeb7   :  { %v6081_v62 = vpack.c.bf16 %v1008_v60, %v1004_v44  ;;  %v1016_v17 = vld [vmem:[#allocation38 + $0x138] sm:$0xff]  ;;  %v6065_v60 = vpack.c.bf16 %v1038_v5, %v1034_v54  ;;  %v1063_v54 = vld [vmem:[#allocation40 + $0xa8] sm:$0xff]  ;;  %v1094_v5 = vld [vmem:[#allocation40 + $0x1a0] sm:$0xff] }
 0xeb8   :  { %5155 = vmatprep.mubr.f32.mxu0 %v3080_v12  ;;  %v6085_v29 = vpack.c.bf16 %v1016_v17, %v1012_v14  ;;  %v1036_v44 = vld [vmem:[#allocation38 + $0x1d8] sm:$0xff]  ;;  %v1059_v14 = vld [vmem:[#allocation40 + $0x88] sm:$0xff] }
 0xeb9   :  { %5156 = vmatmul.mubr.f32.vlgmr.msra.gmra.mrb[28].mxu0 %v3081_v61 }
 0xeba   :  { %3341 = vmatprep.mubr.f32.mxu0 %v7363_v1  ;;  %6040 = vmatpush1.bf16.msra.mxu0 %v6039_v15  ;;  %v6053_v15 = vpack.c.bf16 %v1014_v11, %v1010_v9  ;;  %v6099_v9 = vpack.c.bf16 %v1039_v6, %v1035_v3  ;;  %v1058_v11 = vld [vmem:[#allocation40 + $0x80] sm:$0xff] }
 0xebb   :  { %6042 = vmatprep.subr.bf16.mxu0 %v6041_v26  ;;  %v1013_v26 = vld [vmem:[#allocation38 + $0x120] sm:$0xff]  ;;  %v6101_v17 = vpack.c.bf16 %v1059_v14, %v1058_v11  ;;  %v1065_v11 = vld [vmem:[#allocation40 + $0xb8] sm:$0xff]  ;;  %v1096_v14 = vld [vmem:[#allocation40 + $0x1b0] sm:$0xff] }
 0xebc   :  { %v6055_v21 = vpack.c.bf16 %v1013_v26, %v1009_v20  ;;  %v1091_v20 = vld [vmem:[#allocation40 + $0x188] sm:$0xff]  ;;  %v1078_v6 = vld [vmem:[#allocation40 + $0x120] sm:$0xff] }
 0xebe   :  { %6044 = vmatpush1.bf16.msra.mxu0 %v6043_v23  ;;  %v1011_v23 = vld [vmem:[#allocation38 + $0x110] sm:$0xff] }
 0xebf   :  { %6046 = vmatprep.subr.bf16.mxu0 %v6045_v7  ;;  %v6087_v7 = vpack.c.bf16 %v1015_v2, %v1011_v23 }
 0xec2   :  { %6048 = vmatpush1.bf16.msra.mxu0 %v6047_v16  ;;  %v1024_v16 = vld [vmem:[#allocation38 + $0x178] sm:$0xff] }
 0xec3   :  { %6050 = vmatprep.subr.bf16.mxu0 %v6049_v50  ;;  %v6095_v50 = vpack.c.bf16 %v1031_v46, %v1027_v58  ;;  %v1076_v46 = vld [vmem:[#allocation40 + $0x110] sm:$0xff] }
 0xf8c   :  { %v5157_v19 = vpop.f32.mrb[28].mxu0 }
 0xf8d   :  { %v8051_v39 = vsub.f32 %v3081_v61, %v5157_v19  ;;  %v3148_v43 = vpop.f32.mrb[29].mxu0  ;;  %v1005_v61 = vld [vmem:[#allocation38 + $0xe0] sm:$0xff]  ;;  %v6057_v19 = vpack.c.bf16 %v1022_v10, %v1018_v4 }
 0xf8e   :  { %v8053_v40 = vsub.f32 %v3080_v12, %v3148_v43  ;;  %v1001_v12 = vld [vmem:[#allocation38 + $0xc0] sm:$0xff]  ;;  %v6089_v43 = vpack.c.bf16 %v1024_v16, %v1020_v13 }
 0xf8f   :  { %v3160_v42 = vmul.f32 %v8051_v39, %v8051_v39  ;;  %v6051_v63 = vpack.c.bf16 %v1005_v61, %v1001_v12  ;;  %v1040_v12 = vld [vmem:[#allocation38 + $0x1f8] sm:$0xff]  ;;  %v1033_v61 = vld [vmem:[#allocation38 + $0x1c0] sm:$0xff] }
 0xf90   :  { %v3159_v36 = vmul.f32 %v8053_v40, %v8053_v40  ;;  %v4089_v10 = vld [vmem:[#allocation43] ss:$0 sm:$0xff]  ;;  %v4090_v13 = vld [vmem:[#allocation44] ss:$0 sm:$0xff] }
 0xf91   :  { %6052 = vmatpush1.bf16.msra.mxu0 %v6051_v63  ;;  %v6097_v63 = vpack.c.bf16 %v1040_v12, %v1036_v44  ;;  %v1095_v44 = vld [vmem:[#allocation40 + $0x1a8] sm:$0xff] }
 0xf92   :  { %5190 = vmatprep.mubr.f32.mxu1 %v3159_v36  ;;  %6054 = vmatprep.subr.bf16.mxu0 %v6053_v15  ;;  %v1023_v36 = vld [vmem:[#allocation38 + $0x170] sm:$0xff]  ;;  %v1090_v15 = vld [vmem:[#allocation40 + $0x180] sm:$0xff]  ;;  %v6141_v3 = vpack.c.bf16 %v1095_v44, %v1094_v5  ;;  %v1071_v5 = vld [vmem:[#allocation40 + $0xe8] sm:$0xff] }
 0xf93   :  { %5191 = vmatmul.mubr.f32.vlgmr.msra.gmra.mrb[28].mxu1 %v3160_v42  ;;  %v1030_v42 = vld [vmem:[#allocation38 + $0x1a8] sm:$0xff]  ;;  %v6133_v26 = vpack.c.bf16 %v1091_v20, %v1090_v15  ;;  %v1097_v15 = vld [vmem:[#allocation40 + $0x1b8] sm:$0xff]  ;;  %v1102_v44 = vld [vmem:[#allocation40 + $0x1e0] sm:$0xff] }
 0xf94   :  { %6072 = vmatpush1.bf16.msra.mxu1 %v6071_v38  ;;  %3418 = vmatprep.mubr.f32.mxu1 %v7363_v1  ;;  %v1026_v38 = vld [vmem:[#allocation38 + $0x188] sm:$0xff] }
 0xf95   :  { %6074 = vmatprep.subr.bf16.mxu1 %v6073_v47  ;;  %6056 = vmatpush1.bf16.msra.mxu0 %v6055_v21  ;;  %v6091_v47 = vpack.c.bf16 %v1023_v36, %v1019_v32  ;;  %v6061_v48 = vpack.c.bf16 %v1030_v42, %v1026_v38  ;;  %v1075_v32 = vld [vmem:[#allocation40 + $0x108] sm:$0xff]  ;;  %v1061_v38 = vld [vmem:[#allocation40 + $0x98] sm:$0xff]  ;;  %v1092_v42 = vld [vmem:[#allocation40 + $0x190] sm:$0xff] }
 0xf96   :  { %6058 = vmatprep.subr.bf16.mxu0 %v6057_v19 }
 0xf98   :  { %6076 = vmatpush1.bf16.msra.mxu1 %v6075_v56  ;;  %v6093_v56 = vpack.c.bf16 %v1032_v53, %v1028_v52 }
 0xf99   :  { %6078 = vmatprep.subr.bf16.mxu1 %v6077_v57  ;;  %v1029_v57 = vld [vmem:[#allocation38 + $0x1a0] sm:$0xff]  ;;  %6060 = vmatpush1.bf16.msra.mxu0 %v6059_v34  ;;  %v1060_v34 = vld [vmem:[#allocation40 + $0x90] sm:$0xff] }
 0xf9a   :  { %6062 = vmatprep.subr.bf16.mxu0 %v6061_v48  ;;  %v6105_v58 = vpack.c.bf16 %v1061_v38, %v1060_v34  ;;  %v1083_v38 = vld [vmem:[#allocation40 + $0x148] sm:$0xff] }
 0xf9c   :  { %6080 = vmatpush1.bf16.msra.mxu1 %v6079_v18  ;;  %v6063_v18 = vpack.c.bf16 %v1029_v57, %v1025_v55  ;;  %v6135_v55 = vpack.c.bf16 %v1075_v32, %v1074_v22  ;;  %v1045_v57 = vld [vmem:[#allocation40 + $0x18] sm:$0xff]  ;;  %v1051_v22 = vld [vmem:[#allocation40 + $0x48] sm:$0xff] }
 0xf9d   :  { %6082 = vmatprep.subr.bf16.mxu1 %v6081_v62  ;;  %v1037_v62 = vld [vmem:[#allocation38 + $0x1e0] sm:$0xff] }
 0xf9e   :  { %6064 = vmatpush1.bf16.msra.mxu0 %v6063_v18  ;;  %v1062_v18 = vld [vmem:[#allocation40 + $0xa0] sm:$0xff] }
 0xf9f   :  { %6066 = vmatprep.subr.bf16.mxu0 %v6065_v60 }
 0xfa0   :  { %6084 = vmatpush1.bf16.msra.mxu1 %v6083_v8  ;;  %v6067_v8 = vpack.c.bf16 %v1037_v62, %v1033_v61  ;;  %v1046_v61 = vld [vmem:[#allocation40 + $0x20] sm:$0xff]  ;;  %v1047_v62 = vld [vmem:[#allocation40 + $0x28] sm:$0xff] }
 0xfa1   :  { %6086 = vmatprep.subr.bf16.mxu1 %v6085_v29 }
 0xfa2   :  { %6068 = vmatpush1.bf16.msra.mxu0 %v6067_v8  ;;  %v1079_v8 = vld [vmem:[#allocation40 + $0x128] sm:$0xff] }
 0xfa3   :  { %6102 = vmatprep.subr.bf16.mxu0 %v6101_v17  ;;  %v6111_v17 = vpack.c.bf16 %v1047_v62, %v1046_v61  ;;  %v6143_v20 = vpack.c.bf16 %v1079_v8, %v1078_v6  ;;  %v1055_v6 = vld [vmem:[#allocation40 + $0x68] sm:$0xff]  ;;  %v1086_v8 = vld [vmem:[#allocation40 + $0x160] sm:$0xff] }
 0xfa4   :  { %6088 = vmatpush1.bf16.msra.mxu1 %v6087_v7 }
 0xfa5   :  { %6090 = vmatprep.subr.bf16.mxu1 %v6089_v43  ;;  %v1042_v43 = vld [vmem:[#allocation40] sm:$0xff] }
 0xfa6   :  { %v6103_v53 = vpack.c.bf16 %v1043_v31, %v1042_v43  ;;  %v1050_v31 = vld [vmem:[#allocation40 + $0x40] sm:$0xff] }
 0xfa8   :  { %6092 = vmatpush1.bf16.msra.mxu1 %v6091_v47  ;;  %v1093_v47 = vld [vmem:[#allocation40 + $0x198] sm:$0xff] }
 0xfa9   :  { %6094 = vmatprep.subr.bf16.mxu1 %v6093_v56  ;;  %v1044_v56 = vld [vmem:[#allocation40 + $0x10] sm:$0xff] }
 0xfaa   :  { %v6107_v60 = vpack.c.bf16 %v1045_v57, %v1044_v56  ;;  %v1052_v57 = vld [vmem:[#allocation40 + $0x50] sm:$0xff] }
 0xfac   :  { %6096 = vmatpush1.bf16.msra.mxu1 %v6095_v50 }
 0xfad   :  { %6098 = vmatprep.subr.bf16.mxu1 %v6097_v63  ;;  %v6109_v63 = vpack.c.bf16 %v1063_v54, %v1062_v18  ;;  %v1085_v18 = vld [vmem:[#allocation40 + $0x158] sm:$0xff]  ;;  %v1070_v54 = vld [vmem:[#allocation40 + $0xe0] sm:$0xff] }
 0xfae   :  { %v6125_v62 = vpack.c.bf16 %v1071_v5, %v1070_v54 }
 0xfb0   :  { %6100 = vmatpush1.bf16.msra.mxu1 %v6099_v9  ;;  %v1064_v9 = vld [vmem:[#allocation40 + $0xb0] sm:$0xff] }
 0xfb1   :  { %6134 = vmatprep.subr.bf16.mxu1 %v6133_v26  ;;  %v1048_v26 = vld [vmem:[#allocation40 + $0x30] sm:$0xff] }
0x1066   :  { %v5192_v29 = vpop.f32.mrb[28].mxu1 }
0x1067   :  { %v3233_v21 = vadd.f32 1e-05, %v5192_v29  ;;  %v3227_v23 = vpop.f32.mrb[29].mxu1  ;;  %v1049_v29 = vld [vmem:[#allocation40 + $0x38] sm:$0xff] }
0x1068   :  { %v3228_v2 = vadd.f32 1e-05, %v3227_v23  ;;  %v6145_v23 = vpack.c.bf16 %v1097_v15, %v1096_v14  ;;  %v1072_v15 = vld [vmem:[#allocation40 + $0xf0] sm:$0xff] }
0x1069   :  { %6465 = vrsqrt.f32 %v3233_v21  ;;  %v6113_v21 = vpack.c.bf16 %v1065_v11, %v1064_v9  ;;  %v1087_v11 = vld [vmem:[#allocation40 + $0x168] sm:$0xff] }
0x106a   :  { %6467 = vrsqrt.f32 %v3228_v2  ;;  %v1080_v2 = vld [vmem:[#allocation40 + $0x130] sm:$0xff]  ;;  %v6159_v14 = vpack.c.bf16 %v1087_v11, %v1086_v8 }
0x1073   :  { %v6466_v4 = vpop.eup %6465 }
0x1074   :  { %v6468_v7 = vpop.eup %6467  ;;  %v3239_v19 = vmul.f32 %v6466_v4, %v8051_v39  ;;  %v1077_v39 = vld [vmem:[#allocation40 + $0x118] sm:$0xff] }
0x1075   :  { %v3238_v16 = vmul.f32 %v6468_v7, %v8053_v40  ;;  %v6137_v40 = vpack.c.bf16 %v1093_v47, %v1092_v42  ;;  %v6139_v12 = vpack.c.bf16 %v1077_v39, %v1076_v46  ;;  %v1081_v4 = vld [vmem:[#allocation40 + $0x138] sm:$0xff]  ;;  %v1066_v7 = vld [vmem:[#allocation40 + $0xc0] sm:$0xff]  ;;  %v1068_v42 = vld [vmem:[#allocation40 + $0xd0] sm:$0xff] }
0x1076   :  { %v3247_v52 = vmul.f32 %v4089_v10, %v3239_v19  ;;  %v6115_v19 = vpack.c.bf16 %v1049_v29, %v1048_v26  ;;  %v6147_v43 = vpack.c.bf16 %v1081_v4, %v1080_v2  ;;  %v1069_v47 = vld [vmem:[#allocation40 + $0xd8] sm:$0xff]  ;;  %v1084_v39 = vld [vmem:[#allocation40 + $0x150] sm:$0xff] }
0x1077   :  { %v3246_v36 = vmul.f32 %v4089_v10, %v3238_v16  ;;  %v1067_v10 = vld [vmem:[#allocation40 + $0xc8] sm:$0xff]  ;;  %v6155_v61 = vpack.c.bf16 %v1085_v18, %v1084_v39  ;;  %v1105_v29 = vld [vmem:[#allocation40 + $0x1f8] sm:$0xff] }
0x1078   :  { %v8068_v50 = vadd.f32 %v4090_v13, %v3247_v52  ;;  %v1099_v16 = vld [vmem:[#allocation40 + $0x1c8] sm:$0xff]  ;;  %v6117_v32 = vpack.c.bf16 %v1067_v10, %v1066_v7  ;;  %v1100_v52 = vld [vmem:[#allocation40 + $0x1d0] sm:$0xff]  ;;  %v1089_v10 = vld [vmem:[#allocation40 + $0x178] sm:$0xff] }
0x1079   :  { %v8062_v48 = vadd.f32 %v4090_v13, %v3246_v36  ;;  %v1098_v13 = vld [vmem:[#allocation40 + $0x1c0] sm:$0xff]  ;;  %v1088_v7 = vld [vmem:[#allocation40 + $0x170] sm:$0xff] }
0x107a   :  { %v6149_v34 = vpack.c.bf16 %v1099_v16, %v1098_v13  ;;  %v1082_v36 = vld [vmem:[#allocation40 + $0x140] sm:$0xff]  ;;  %v6163_v13 = vpack.c.bf16 %v1089_v10, %v1088_v7 }
0x107b   :  { %3342 = vmatmul.mubr.f32.vlgmr.msra.gmra.mrb[30].mxu0 %v8062_v48  ;;  %3419 = vmatmul.mubr.f32.vlgmr.msra.gmra.mrb[30].mxu1 %v8062_v48  ;;  %v6151_v56 = vpack.c.bf16 %v1083_v38, %v1082_v36  ;;  %v1041_v16 = vld [vmem:[%s8224_s7] sm:$0xf] }
0x107c   :  { %3347 = vmatprep.mubr.f32.mxu0 %v7363_v1  ;;  %3424 = vmatprep.mubr.f32.mxu1 %v7363_v1 }
0x107d   :  { %6104 = vmatpush3.bf16.msra.mxu0 %v6103_v53  ;;  %6136 = vmatpush3.bf16.msra.mxu1 %v6135_v55  ;;  %v1101_v53 = vld [vmem:[#allocation40 + $0x1d8] sm:$0xff]  ;;  %v6119_v55 = vpack.c.bf16 %v1051_v22, %v1050_v31  ;;  %v3264_v31 = vrot.slane %v1041_v16, %v7808_v27  ;;  %v3272_v22 = vrot.slane %v1041_v16, %v2151_v59 }
0x107e   :  { %6106 = vmatprep.subr.bf16.mxu0 %v6105_v58  ;;  %6138 = vmatprep.subr.bf16.mxu1 %v6137_v40  ;;  %v1053_v58 = vld [vmem:[#allocation40 + $0x58] sm:$0xff]  ;;  %v6121_v40 = vpack.c.bf16 %v1069_v47, %v1068_v42  ;;  %v6153_v46 = vpack.c.bf16 %v1101_v53, %v1100_v52 }
0x107f   :  { %3348 = vmatmul.mubr.f32.gmra.mrb[32].mxu0 %v8068_v50  ;;  %3425 = vmatmul.mubr.f32.gmra.mrb[32].mxu1 %v8068_v50 }
0x1081   :  { %6108 = vmatpush3.bf16.msra.mxu0 %v6107_v60  ;;  %6140 = vmatpush3.bf16.msra.mxu1 %v6139_v12  ;;  %v1103_v60 = vld [vmem:[#allocation40 + $0x1e8] sm:$0xff]  ;;  %v6123_v12 = vpack.c.bf16 %v1053_v58, %v1052_v57 }
0x1082   :  { %6110 = vmatprep.subr.bf16.mxu0 %v6109_v63  ;;  %6142 = vmatprep.subr.bf16.mxu1 %v6141_v3  ;;  %v6157_v63 = vpack.c.bf16 %v1103_v60, %v1102_v44  ;;  %v1054_v3 = vld [vmem:[#allocation40 + $0x60] sm:$0xff] }
0x1083   :  { %v6127_v9 = vpack.c.bf16 %v1055_v6, %v1054_v3 }
0x1085   :  { %6112 = vmatpush3.bf16.msra.mxu0 %v6111_v17  ;;  %6144 = vmatpush3.bf16.msra.mxu1 %v6143_v20  ;;  %v1073_v17 = vld [vmem:[#allocation40 + $0xf8] sm:$0xff]  ;;  %v1104_v20 = vld [vmem:[#allocation40 + $0x1f0] sm:$0xff] }
0x1086   :  { %6114 = vmatprep.subr.bf16.mxu0 %v6113_v21  ;;  %6146 = vmatprep.subr.bf16.mxu1 %v6145_v23  ;;  %v6129_v26 = vpack.c.bf16 %v1073_v17, %v1072_v15  ;;  %v1056_v21 = vld [vmem:[#allocation40 + $0x70] sm:$0xff]  ;;  %v1057_v23 = vld [vmem:[#allocation40 + $0x78] sm:$0xff]  ;;  %v6161_v2 = vpack.c.bf16 %v1105_v29, %v1104_v20 }
0x1087   :  { %v6131_v4 = vpack.c.bf16 %v1057_v23, %v1056_v21  ;;  %v1112_v20 = vld [vmem:[#allocation49 + $0x8] sm:$0xff]  ;;  %v1111_v29 = vld [vmem:[#allocation49] sm:$0xff]  ;;  %v1113_v23 = vld [vmem:[#allocation49 + $0x10] sm:$0xff] }
0x1088   :  { %v6231_v7 = vpack.c.bf16 %v1113_v23, %v1111_v29  ;;  %v1154_v29 = vld [vmem:[#allocation49 + $0x158] sm:$0xff] }
0x1089   :  { %6116 = vmatpush3.bf16.msra.mxu0 %v6115_v19  ;;  %6148 = vmatpush3.bf16.msra.mxu1 %v6147_v43  ;;  %v3260_v19 = vrot.slane %v1041_v16, %v7805_v25  ;;  %v3268_v43 = vrot.slane %v1041_v16, %v7813_v35  ;;  %v1120_v16 = vld [vmem:[#allocation49 + $0x48] sm:$0xff] }
0x108a   :  { %6118 = vmatprep.subr.bf16.mxu0 %v6117_v32  ;;  %6150 = vmatprep.subr.bf16.mxu1 %v6149_v34 }
0x108d   :  { %6120 = vmatpush3.bf16.msra.mxu0 %v6119_v55  ;;  %6152 = vmatpush3.bf16.msra.mxu1 %v6151_v56 }
0x108e   :  { %6122 = vmatprep.subr.bf16.mxu0 %v6121_v40  ;;  %6154 = vmatprep.subr.bf16.mxu1 %v6153_v46 }
0x1091   :  { %6124 = vmatpush3.bf16.msra.mxu0 %v6123_v12  ;;  %6156 = vmatpush3.bf16.msra.mxu1 %v6155_v61 }
0x1092   :  { %6126 = vmatprep.subr.bf16.mxu0 %v6125_v62  ;;  %6158 = vmatprep.subr.bf16.mxu1 %v6157_v63 }
0x1095   :  { %6128 = vmatpush3.bf16.msra.mxu0 %v6127_v9  ;;  %6160 = vmatpush3.bf16.msra.mxu1 %v6159_v14 }
0x1096   :  { %6130 = vmatprep.subr.bf16.mxu0 %v6129_v26  ;;  %6162 = vmatprep.subr.bf16.mxu1 %v6161_v2  ;;  %v1114_v26 = vld [vmem:[#allocation49 + $0x18] sm:$0xff]  ;;  %v1116_v2 = vld [vmem:[#allocation49 + $0x28] sm:$0xff] }
0x1097   :  { %v6229_v21 = vpack.c.bf16 %v1114_v26, %v1112_v20  ;;  %v1149_v20 = vld [vmem:[#allocation49 + $0x130] sm:$0xff]  ;;  %v1152_v26 = vld [vmem:[#allocation49 + $0x148] sm:$0xff] }
0x1098   :  { %v6269_v23 = vpack.c.bf16 %v1154_v29, %v1152_v26  ;;  %v1198_v26 = vld [vmem:[#allocation52 + $0xb0] sm:$0xff]  ;;  %v1199_v29 = vld [vmem:[#allocation52 + $0xb8] sm:$0xff] }
0x1099   :  { %6132 = vmatpush3.bf16.msra.mxu0 %v6131_v4  ;;  %6164 = vmatpush3.bf16.msra.mxu1 %v6163_v13  ;;  %v1118_v4 = vld [vmem:[#allocation49 + $0x38] sm:$0xff]  ;;  %v1115_v13 = vld [vmem:[#allocation49 + $0x20] sm:$0xff] }
0x109a   :  { %6166 = vmatprep.subr.bf16.mxu0 %v7824_v28  ;;  %6198 = vmatprep.subr.bf16.mxu1 %v7824_v28  ;;  %v6233_v10 = vpack.c.bf16 %v1118_v4, %v1116_v2  ;;  %v1151_v2 = vld [vmem:[#allocation49 + $0x140] sm:$0xff]  ;;  %v1153_v4 = vld [vmem:[#allocation49 + $0x150] sm:$0xff] }
0x114e   :  { %v3343_v32 = vpop.f32.mrb[30].mxu0  ;;  %v3420_v34 = vpop.f32.mrb[30].mxu1 }
0x114f   :  { %v3344_v36 = vadd.f32 %v3343_v32, %v3260_v19  ;;  %v3421_v38 = vadd.f32 %v3420_v34, %v3268_v43  ;;  %v3345_v42 = vpop.f32.mrb[31].mxu0  ;;  %v3422_v47 = vpop.f32.mrb[31].mxu1  ;;  %v1124_v32 = vld [vmem:[#allocation49 + $0x68] sm:$0xff]  ;;  %v1126_v34 = vld [vmem:[#allocation49 + $0x78] sm:$0xff] }
0x1150   :  { %v3346_v52 = vadd.f32 %v3345_v42, %v3264_v31  ;;  %v3423_v53 = vadd.f32 %v3422_v47, %v3272_v22  ;;  %v1123_v42 = vld [vmem:[#allocation49 + $0x60] sm:$0xff]  ;;  %v1125_v47 = vld [vmem:[#allocation49 + $0x70] sm:$0xff] }
0x1151   :  { %v3431_v40 = vmax.f32 %v3344_v36, 0.0  ;;  %v3433_v46 = vmax.f32 %v3421_v38, 0.0  ;;  %v6241_v38 = vpack.c.bf16 %v1126_v34, %v1124_v32  ;;  %v1155_v32 = vld [vmem:[#allocation49 + $0x160] sm:$0xff]  ;;  %v1157_v34 = vld [vmem:[#allocation49 + $0x170] sm:$0xff] }
0x1152   :  { %v3432_v55 = vmax.f32 %v3346_v52, 0.0  ;;  %v3434_v56 = vmax.f32 %v3423_v53, 0.0  ;;  %v3349_v57 = vpop.f32.mrb[32].mxu0  ;;  %v3426_v58 = vpop.f32.mrb[32].mxu1  ;;  %v1128_v52 = vld [vmem:[#allocation49 + $0x88] sm:$0xff]  ;;  %v1130_v53 = vld [vmem:[#allocation49 + $0x98] sm:$0xff] }
0x1153   :  { %v3350_v35 = vadd.f32 %v3349_v57, %v3260_v19  ;;  %v3427_v39 = vadd.f32 %v3426_v58, %v3268_v43  ;;  %v3351_v18 = vpop.f32.mrb[33].mxu0  ;;  %v3428_v54 = vpop.f32.mrb[33].mxu1  ;;  %v1122_v19 = vld [vmem:[#allocation49 + $0x58] sm:$0xff]  ;;  %v1127_v57 = vld [vmem:[#allocation49 + $0x80] sm:$0xff]  ;;  %v1129_v58 = vld [vmem:[#allocation49 + $0x90] sm:$0xff] }
0x1154   :  { %v3352_v24 = vadd.f32 %v3351_v18, %v3264_v31  ;;  %v3429_v59 = vadd.f32 %v3428_v54, %v3272_v22  ;;  %3509 = vmatprep.mubr.f32.mxu0 %v3432_v55  ;;  %3584 = vmatprep.mubr.f32.mxu1 %v3434_v56  ;;  %v1119_v31 = vld [vmem:[#allocation49 + $0x40] sm:$0xff]  ;;  %v1121_v22 = vld [vmem:[#allocation49 + $0x50] sm:$0xff]  ;;  %v6243_v55 = vpack.c.bf16 %v1125_v47, %v1123_v42 }
0x1155   :  { %3510 = vmatmul.mubr.f32.vlgmr.msra.gmra.mrb[34].mxu0 %v3431_v40  ;;  %3585 = vmatmul.mubr.f32.vlgmr.msra.gmra.mrb[34].mxu1 %v3433_v46  ;;  %v3435_v60 = vmax.f32 %v3350_v35, 0.0  ;;  %v3437_v12 = vmax.f32 %v3427_v39, 0.0  ;;  %v6239_v36 = vpack.c.bf16 %v1121_v22, %v1119_v31  ;;  %v6245_v56 = vpack.c.bf16 %v1130_v53, %v1128_v52  ;;  %v1132_v40 = vld [vmem:[#allocation49 + $0xa8] sm:$0xff]  ;;  %v1134_v46 = vld [vmem:[#allocation49 + $0xb8] sm:$0xff]  ;;  %v1131_v18 = vld [vmem:[#allocation49 + $0xa0] sm:$0xff] }
0x1156   :  { %v3436_v5 = vmax.f32 %v3352_v24, 0.0  ;;  %v3438_v44 = vmax.f32 %v3429_v59, 0.0  ;;  %6168 = vmatpush3.bf16.msra.mxu0 %v7824_v28  ;;  %6200 = vmatpush3.bf16.msra.mxu1 %v7824_v28  ;;  %v6247_v35 = vpack.c.bf16 %v1129_v58, %v1127_v57  ;;  %v6249_v39 = vpack.c.bf16 %v1134_v46, %v1132_v40  ;;  %v1133_v54 = vld [vmem:[#allocation49 + $0xb0] sm:$0xff]  ;;  %v1136_v24 = vld [vmem:[#allocation49 + $0xc8] sm:$0xff]  ;;  %v1138_v59 = vld [vmem:[#allocation49 + $0xd8] sm:$0xff] }
0x1157   :  { %6170 = vmatprep.subr.bf16.mxu0 %v7826_v30  ;;  %6202 = vmatprep.subr.bf16.mxu1 %v7826_v30  ;;  %v1158_v31 = vld [vmem:[#allocation49 + $0x178] sm:$0xff]  ;;  %v1159_v42 = vld [vmem:[#allocation49 + $0x180] sm:$0xff]  ;;  %v1161_v47 = vld [vmem:[#allocation49 + $0x190] sm:$0xff] }
0x1158   :  { %3514 = vmatprep.mubr.f32.mxu0 %v3436_v5  ;;  %3589 = vmatprep.mubr.f32.mxu1 %v3438_v44  ;;  %v6251_v5 = vpack.c.bf16 %v1133_v54, %v1131_v18  ;;  %v6253_v44 = vpack.c.bf16 %v1138_v59, %v1136_v24  ;;  %v6279_v52 = vpack.c.bf16 %v1161_v47, %v1159_v42  ;;  %v1164_v53 = vld [vmem:[#allocation49 + $0x1a8] sm:$0xff]  ;;  %v1165_v58 = vld [vmem:[#allocation49 + $0x1b0] sm:$0xff]  ;;  %v1170_v46 = vld [vmem:[#allocation49 + $0x1d8] sm:$0xff] }
0x1159   :  { %3515 = vmatmul.mubr.f32.gmra.mrb[36].mxu0 %v3435_v60  ;;  %3590 = vmatmul.mubr.f32.gmra.mrb[36].mxu1 %v3437_v12  ;;  %v1135_v60 = vld [vmem:[#allocation49 + $0xc0] sm:$0xff]  ;;  %v1137_v12 = vld [vmem:[#allocation49 + $0xd0] sm:$0xff]  ;;  %v1168_v40 = vld [vmem:[#allocation49 + $0x1c8] sm:$0xff] }
0x115a   :  { %6172 = vmatpush3.bf16.msra.mxu0 %v7826_v30  ;;  %6204 = vmatpush3.bf16.msra.mxu1 %v7826_v30  ;;  %v1167_v18 = vld [vmem:[#allocation49 + $0x1c0] sm:$0xff]  ;;  %v1169_v54 = vld [vmem:[#allocation49 + $0x1d0] sm:$0xff]  ;;  %v1172_v24 = vld [vmem:[#allocation49 + $0x1e8] sm:$0xff] }
0x115b   :  { %6174 = vmatprep.subr.bf16.mxu0 %v7832_v33  ;;  %6206 = vmatprep.subr.bf16.mxu1 %v7832_v33  ;;  %v1174_v59 = vld [vmem:[#allocation49 + $0x1f8] sm:$0xff] }
0x115e   :  { %6176 = vmatpush3.bf16.msra.mxu0 %v7832_v33  ;;  %6208 = vmatpush3.bf16.msra.mxu1 %v7832_v33  ;;  %v4091_v33 = vld [vmem:[#allocation41] ss:$0 sm:$0xff] }
0x115f   :  { %6178 = vmatprep.subr.bf16.mxu0 %v7836_v37  ;;  %6210 = vmatprep.subr.bf16.mxu1 %v7836_v37 }
0x1162   :  { %6180 = vmatpush3.bf16.msra.mxu0 %v7836_v37  ;;  %6212 = vmatpush3.bf16.msra.mxu1 %v7836_v37 }
0x1163   :  { %6182 = vmatprep.subr.bf16.mxu0 %v7840_v41  ;;  %6214 = vmatprep.subr.bf16.mxu1 %v7840_v41 }
0x1166   :  { %6184 = vmatpush3.bf16.msra.mxu0 %v7840_v41  ;;  %6216 = vmatpush3.bf16.msra.mxu1 %v7840_v41 }
0x1167   :  { %6186 = vmatprep.subr.bf16.mxu0 %v7844_v45  ;;  %6218 = vmatprep.subr.bf16.mxu1 %v7844_v45 }
0x116a   :  { %6188 = vmatpush3.bf16.msra.mxu0 %v7844_v45  ;;  %6220 = vmatpush3.bf16.msra.mxu1 %v7844_v45 }
0x116b   :  { %6190 = vmatprep.subr.bf16.mxu0 %v7848_v51  ;;  %6222 = vmatprep.subr.bf16.mxu1 %v7848_v51 }
0x116e   :  { %6192 = vmatpush3.bf16.msra.mxu0 %v7848_v51  ;;  %6224 = vmatpush3.bf16.msra.mxu1 %v7848_v51 }
0x116f   :  { %6194 = vmatprep.subr.bf16.mxu0 %v7874_v49  ;;  %6226 = vmatprep.subr.bf16.mxu1 %v7874_v49 }
0x1172   :  { %6196 = vmatpush3.bf16.msra.mxu0 %v7874_v49  ;;  %6228 = vmatpush3.bf16.msra.mxu1 %v7874_v49 }
0x1173   :  { %6230 = vmatprep.subr.bf16.mxu0 %v6229_v21 }
0x1228   :  { %v4564_v28 = vpop.f32.mrb[34].mxu0  ;;  %v4602_v30 = vpop.f32.mrb[34].mxu1 }
0x1229   :  { %v4565_v37 = vpop.f32.mrb[35].mxu0  ;;  %v4603_v41 = vpop.f32.mrb[35].mxu1 }
0x122a   :  { %v4566_v45 = vadd.f32 %v4565_v37, %v4564_v28  ;;  %v4604_v61 = vadd.f32 %v4603_v41, %v4602_v30  ;;  %v1140_v28 = vld [vmem:[#allocation49 + $0xe8] sm:$0xff]  ;;  %v1142_v30 = vld [vmem:[#allocation49 + $0xf8] sm:$0xff]  ;;  %v1139_v41 = vld [vmem:[#allocation49 + $0xe0] sm:$0xff] }
0x122b   :  { %v6257_v37 = vpack.c.bf16 %v1142_v30, %v1140_v28  ;;  %v1192_v30 = vld [vmem:[#allocation52 + $0x80] sm:$0xff] }
0x122c   :  { %v3512_v62 = vadd.f32 %v4566_v45, %v4091_v33  ;;  %v4567_v63 = vpop.f32.mrb[36].mxu0  ;;  %v4605_v3 = vpop.f32.mrb[36].mxu1  ;;  %v1141_v45 = vld [vmem:[#allocation49 + $0xf0] sm:$0xff] }
0x122d   :  { %v4568_v6 = vpop.f32.mrb[37].mxu0  ;;  %v4606_v51 = vpop.f32.mrb[37].mxu1 }
0x122e   :  { %v3587_v8 = vadd.f32 %v4604_v61, %v3512_v62  ;;  %v4569_v9 = vadd.f32 %v4568_v6, %v4567_v63  ;;  %v4607_v11 = vadd.f32 %v4606_v51, %v4605_v3  ;;  %v1144_v61 = vld [vmem:[#allocation49 + $0x108] sm:$0xff]  ;;  %v1146_v62 = vld [vmem:[#allocation49 + $0x118] sm:$0xff]  ;;  %v6259_v63 = vpack.c.bf16 %v1141_v45, %v1139_v41  ;;  %v1143_v6 = vld [vmem:[#allocation49 + $0x100] sm:$0xff] }
0x122f   :  { %v6261_v3 = vpack.c.bf16 %v1146_v62, %v1144_v61  ;;  %v1145_v51 = vld [vmem:[#allocation49 + $0x110] sm:$0xff]  ;;  %v1195_v62 = vld [vmem:[#allocation52 + $0x98] sm:$0xff] }
0x1230   :  { %v3517_v14 = vadd.f32 %v4569_v9, %v4091_v33  ;;  %v8111_v15 = vadd.f32 %v3587_v8, %v8062_v48  ;;  %v1117_v48 = vld [vmem:[#allocation49 + $0x30] sm:$0xff]  ;;  %v6255_v33 = vpack.c.bf16 %v1137_v12, %v1135_v60  ;;  %v1148_v8 = vld [vmem:[#allocation49 + $0x128] sm:$0xff]  ;;  %v1150_v9 = vld [vmem:[#allocation49 + $0x138] sm:$0xff] }
0x1231   :  { %v6235_v43 = vpack.c.bf16 %v1117_v48, %v1115_v13  ;;  %v1171_v60 = vld [vmem:[#allocation49 + $0x1e0] sm:$0xff]  ;;  %v1173_v12 = vld [vmem:[#allocation49 + $0x1f0] sm:$0xff] }
0x1232   :  { %v3592_v49 = vadd.f32 %v4607_v11, %v3517_v14  ;;  %5225 = vmatprep.mubr.f32.mxu0 %v8111_v15  ;;  %v6263_v11 = vpack.c.bf16 %v1145_v51, %v1143_v6  ;;  %v6265_v14 = vpack.c.bf16 %v1150_v9, %v1148_v8  ;;  %v6291_v28 = vpack.c.bf16 %v1173_v12, %v1171_v60  ;;  %v1177_v45 = vld [vmem:[#allocation52 + $0x8] sm:$0xff]  ;;  %v1194_v61 = vld [vmem:[#allocation52 + $0x90] sm:$0xff]  ;;  %v1179_v51 = vld [vmem:[#allocation52 + $0x18] sm:$0xff] }
0x1233   :  { %v1178_v6 = vld [vmem:[#allocation52 + $0x10] sm:$0xff]  ;;  %v1196_v8 = vld [vmem:[#allocation52 + $0xa0] sm:$0xff]  ;;  %v1197_v9 = vld [vmem:[#allocation52 + $0xa8] sm:$0xff] }
0x1234   :  { %v8115_v17 = vadd.f32 %v3592_v49, %v8068_v50  ;;  %v6237_v50 = vpack.c.bf16 %v1122_v19, %v1120_v16  ;;  %v1147_v49 = vld [vmem:[#allocation49 + $0x120] sm:$0xff]  ;;  %v1206_v12 = vld [vmem:[#allocation52 + $0xf0] sm:$0xff] }
0x1235   :  { %v6267_v21 = vpack.c.bf16 %v1149_v20, %v1147_v49  ;;  %v1180_v49 = vld [vmem:[#allocation52 + $0x20] sm:$0xff]  ;;  %v1181_v20 = vld [vmem:[#allocation52 + $0x28] sm:$0xff] }
0x1236   :  { %5226 = vmatmul.mubr.f32.vlgmr.msra.gmra.mrb[38].mxu0 %v8115_v17 }
0x1237   :  { %6232 = vmatpush1.bf16.msra.mxu0 %v6231_v7  ;;  %v6271_v7 = vpack.c.bf16 %v1153_v4, %v1151_v2  ;;  %v1182_v2 = vld [vmem:[#allocation52 + $0x30] sm:$0xff]  ;;  %v1183_v4 = vld [vmem:[#allocation52 + $0x38] sm:$0xff] }
0x1238   :  { %6234 = vmatprep.subr.bf16.mxu0 %v6233_v10 }
0x123b   :  { %6236 = vmatpush1.bf16.msra.mxu0 %v6235_v43 }
0x123c   :  { %6238 = vmatprep.subr.bf16.mxu0 %v6237_v50  ;;  %v1156_v50 = vld [vmem:[#allocation49 + $0x168] sm:$0xff] }
0x123d   :  { %v6273_v22 = vpack.c.bf16 %v1158_v31, %v1156_v50  ;;  %v1185_v50 = vld [vmem:[#allocation52 + $0x48] sm:$0xff]  ;;  %v1202_v31 = vld [vmem:[#allocation52 + $0xd0] sm:$0xff] }
0x123f   :  { %6240 = vmatpush1.bf16.msra.mxu0 %v6239_v36  ;;  %v6275_v36 = vpack.c.bf16 %v1157_v34, %v1155_v32 }
0x1240   :  { %6242 = vmatprep.subr.bf16.mxu0 %v6241_v38  ;;  %v1162_v38 = vld [vmem:[#allocation49 + $0x198] sm:$0xff] }
0x1243   :  { %6244 = vmatpush1.bf16.msra.mxu0 %v6243_v55  ;;  %v1166_v55 = vld [vmem:[#allocation49 + $0x1b8] sm:$0xff] }
0x1244   :  { %6246 = vmatprep.subr.bf16.mxu0 %v6245_v56  ;;  %v1163_v56 = vld [vmem:[#allocation49 + $0x1a0] sm:$0xff]  ;;  %v6281_v57 = vpack.c.bf16 %v1166_v55, %v1164_v53 }
0x1247   :  { %6248 = vmatpush1.bf16.msra.mxu0 %v6247_v35  ;;  %v6283_v35 = vpack.c.bf16 %v1165_v58, %v1163_v56  ;;  %v4092_v58 = vld [vmem:[#allocation46] ss:$0 sm:$0xff] }
0x1248   :  { %6250 = vmatprep.subr.bf16.mxu0 %v6249_v39  ;;  %v6285_v39 = vpack.c.bf16 %v1170_v46, %v1168_v40 }
0x124b   :  { %6252 = vmatpush1.bf16.msra.mxu0 %v6251_v5  ;;  %v6287_v5 = vpack.c.bf16 %v1169_v54, %v1167_v18 }
0x124c   :  { %6254 = vmatprep.subr.bf16.mxu0 %v6253_v44  ;;  %v6289_v44 = vpack.c.bf16 %v1174_v59, %v1172_v24 }
0x124f   :  { %6256 = vmatpush1.bf16.msra.mxu0 %v6255_v33  ;;  %v1193_v33 = vld [vmem:[#allocation52 + $0x88] sm:$0xff] }
0x1250   :  { %6258 = vmatprep.subr.bf16.mxu0 %v6257_v37  ;;  %v1176_v37 = vld [vmem:[#allocation52] sm:$0xff]  ;;  %v6293_v41 = vpack.c.bf16 %v1193_v33, %v1192_v30  ;;  %v1190_v33 = vld [vmem:[#allocation52 + $0x70] sm:$0xff] }
0x1252   :  { %6294 = vmatprep.subr.bf16.mxu1 %v6293_v41 }
0x1253   :  { %6260 = vmatpush1.bf16.msra.mxu0 %v6259_v63  ;;  %v6295_v63 = vpack.c.bf16 %v1177_v45, %v1176_v37 }
0x1254   :  { %6262 = vmatprep.subr.bf16.mxu0 %v6261_v3  ;;  %v6297_v3 = vpack.c.bf16 %v1195_v62, %v1194_v61 }
0x1257   :  { %6264 = vmatpush1.bf16.msra.mxu0 %v6263_v11  ;;  %v6299_v11 = vpack.c.bf16 %v1179_v51, %v1178_v6  ;;  %v1210_v6 = vld [vmem:[%s7553_s21 + $0x8] sm:$0xff] }
0x1258   :  { %6266 = vmatprep.subr.bf16.mxu0 %v6265_v14  ;;  %v6301_v14 = vpack.c.bf16 %v1197_v9, %v1196_v8 }
0x125b   :  { %6268 = vmatpush1.bf16.msra.mxu0 %v6267_v21  ;;  %v6303_v21 = vpack.c.bf16 %v1181_v20, %v1180_v49  ;;  %v1212_v49 = vld [vmem:[%s7553_s21 + $0x18] sm:$0xff]  ;;  %v1214_v20 = vld [vmem:[%s7553_s21 + $0x28] sm:$0xff] }
0x125c   :  { %6270 = vmatprep.subr.bf16.mxu0 %v6269_v23  ;;  %v6305_v23 = vpack.c.bf16 %v1199_v29, %v1198_v26  ;;  %v1215_v29 = vld [vmem:[%s7553_s21 + $0x30] sm:$0xff] }
0x125f   :  { %6272 = vmatpush1.bf16.msra.mxu0 %v6271_v7  ;;  %v1200_v7 = vld [vmem:[#allocation52 + $0xc0] sm:$0xff] }
0x1260   :  { %6274 = vmatprep.subr.bf16.mxu0 %v6273_v22  ;;  %v1203_v22 = vld [vmem:[#allocation52 + $0xd8] sm:$0xff] }
0x1261   :  { %v6313_v34 = vpack.c.bf16 %v1203_v22, %v1202_v31  ;;  %v1223_v31 = vld [vmem:[%s7553_s21 + $0x70] sm:$0xff]  ;;  %v1224_v22 = vld [vmem:[%s7553_s21 + $0x78] sm:$0xff] }
0x1263   :  { %6276 = vmatpush1.bf16.msra.mxu0 %v6275_v36  ;;  %v1186_v36 = vld [vmem:[#allocation52 + $0x50] sm:$0xff] }
0x1309   :  { %v5227_v10 = vpop.f32.mrb[38].mxu0 }
0x130a   :  { %v8119_v13 = vsub.f32 %v8115_v17, %v5227_v10  ;;  %v3663_v48 = vpop.f32.mrb[39].mxu0  ;;  %v1160_v17 = vld [vmem:[#allocation49 + $0x188] sm:$0xff] }
0x130b   :  { %v8122_v16 = vsub.f32 %v8111_v15, %v3663_v48  ;;  %v6277_v15 = vpack.c.bf16 %v1162_v38, %v1160_v17  ;;  %v1201_v10 = vld [vmem:[#allocation52 + $0xc8] sm:$0xff]  ;;  %v6307_v48 = vpack.c.bf16 %v1183_v4, %v1182_v2  ;;  %v1187_v17 = vld [vmem:[#allocation52 + $0x58] sm:$0xff]  ;;  %v1204_v38 = vld [vmem:[#allocation52 + $0xe0] sm:$0xff] }
0x130c   :  { %v3675_v43 = vmul.f32 %v8119_v13, %v8119_v13  ;;  %v6315_v42 = vpack.c.bf16 %v1187_v17, %v1186_v36  ;;  %v1217_v2 = vld [vmem:[%s7553_s21 + $0x40] sm:$0xff]  ;;  %v4094_v36 = vld [vmem:[#allocation53] ss:$0 sm:$0xff] }
0x130d   :  { %v3674_v19 = vmul.f32 %v8122_v16, %v8122_v16  ;;  %6278 = vmatprep.subr.bf16.mxu0 %v6277_v15  ;;  %v1205_v15 = vld [vmem:[#allocation52 + $0xe8] sm:$0xff] }
0x130e   :  { %6280 = vmatpush1.bf16.msra.mxu0 %v6279_v52  ;;  %v6317_v47 = vpack.c.bf16 %v1205_v15, %v1204_v38 }
0x130f   :  { %5260 = vmatprep.mubr.f32.mxu1 %v3674_v19  ;;  %6282 = vmatprep.subr.bf16.mxu0 %v6281_v57  ;;  %v6309_v19 = vpack.c.bf16 %v1201_v10, %v1200_v7  ;;  %v1219_v7 = vld [vmem:[%s7553_s21 + $0x50] sm:$0xff]  ;;  %v1220_v10 = vld [vmem:[%s7553_s21 + $0x58] sm:$0xff] }
0x1310   :  { %5261 = vmatmul.mubr.f32.vlgmr.msra.gmra.mrb[38].mxu1 %v3675_v43  ;;  %v1184_v43 = vld [vmem:[#allocation52 + $0x40] sm:$0xff] }
0x1311   :  { %6296 = vmatpush3.bf16.msra.mxu1 %v6295_v63  ;;  %v6311_v32 = vpack.c.bf16 %v1185_v50, %v1184_v43  ;;  %v1222_v43 = vld [vmem:[%s7553_s21 + $0x68] sm:$0xff] }
0x1312   :  { %6284 = vmatpush1.bf16.msra.mxu0 %v6283_v35  ;;  %6298 = vmatprep.subr.bf16.mxu1 %v6297_v3  ;;  %v4093_v35 = vld [vmem:[#allocation47] ss:$0 sm:$0xff]  ;;  %v1209_v3 = vld [vmem:[%s7553_s21] sm:$0xff] }
0x1313   :  { %6286 = vmatprep.subr.bf16.mxu0 %v6285_v39  ;;  %v6326_v9 = vpack.c.bf16 %v1210_v6, %v1209_v3 }
0x1315   :  { %6300 = vmatpush3.bf16.msra.mxu1 %v6299_v11 }
0x1316   :  { %6288 = vmatpush1.bf16.msra.mxu0 %v6287_v5  ;;  %6302 = vmatprep.subr.bf16.mxu1 %v6301_v14  ;;  %v1188_v5 = vld [vmem:[#allocation52 + $0x60] sm:$0xff] }
0x1317   :  { %6290 = vmatprep.subr.bf16.mxu0 %v6289_v44  ;;  %v1189_v44 = vld [vmem:[#allocation52 + $0x68] sm:$0xff] }
0x1318   :  { %v6319_v60 = vpack.c.bf16 %v1189_v44, %v1188_v5  ;;  %v1211_v14 = vld [vmem:[%s7553_s21 + $0x10] sm:$0xff] }
0x1319   :  { %6304 = vmatpush3.bf16.msra.mxu1 %v6303_v21  ;;  %v1216_v21 = vld [vmem:[%s7553_s21 + $0x38] sm:$0xff] }
0x131a   :  { %6292 = vmatpush1.bf16.msra.mxu0 %v6291_v28  ;;  %6306 = vmatprep.subr.bf16.mxu1 %v6305_v23  ;;  %v1207_v28 = vld [vmem:[#allocation52 + $0xf8] sm:$0xff]  ;;  %v6335_v23 = vpack.c.bf16 %v1216_v21, %v1215_v29 }
0x131b   :  { %v6321_v30 = vpack.c.bf16 %v1207_v28, %v1206_v12 }
0x131d   :  { %6308 = vmatpush3.bf16.msra.mxu1 %v6307_v48  ;;  %v6341_v48 = vpack.c.bf16 %v1220_v10, %v1219_v7 }
0x131e   :  { %6310 = vmatprep.subr.bf16.mxu1 %v6309_v19  ;;  %v1221_v19 = vld [vmem:[%s7553_s21 + $0x60] sm:$0xff] }
0x131f   :  { %v6344_v50 = vpack.c.bf16 %v1222_v43, %v1221_v19 }
0x1321   :  { %6312 = vmatpush3.bf16.msra.mxu1 %v6311_v32  ;;  %v6347_v32 = vpack.c.bf16 %v1224_v22, %v1223_v31 }
0x1322   :  { %6314 = vmatprep.subr.bf16.mxu1 %v6313_v34 }
0x1325   :  { %6316 = vmatpush3.bf16.msra.mxu1 %v6315_v42 }
0x1326   :  { %6318 = vmatprep.subr.bf16.mxu1 %v6317_v47  ;;  %v4095_v47 = vld [vmem:[%s7558_s5] ss:$0 sm:$0xff] }
0x1329   :  { %6320 = vmatpush3.bf16.msra.mxu1 %v6319_v60 }
0x132a   :  { %6322 = vmatprep.subr.bf16.mxu1 %v6321_v30 }
0x13e3   :  { %v5262_v52 = vpop.f32.mrb[38].mxu1 }
0x13e4   :  { %v3748_v53 = vadd.f32 1e-05, %v5262_v52  ;;  %v3742_v55 = vpop.f32.mrb[39].mxu1 }
0x13e5   :  { %v3743_v56 = vadd.f32 1e-05, %v3742_v55 }
0x13e6   :  { %6469 = vrsqrt.f32 %v3748_v53 }
0x13e7   :  { %6471 = vrsqrt.f32 %v3743_v56 }
0x13f0   :  { %v6470_v57 = vpop.eup %6469 }
0x13f1   :  { %v6472_v40 = vpop.eup %6471  ;;  %v3754_v46 = vmul.f32 %v6470_v57, %v8119_v13  ;;  %v1191_v13 = vld [vmem:[#allocation52 + $0x78] sm:$0xff] }
0x13f2   :  { %v3753_v39 = vmul.f32 %v6472_v40, %v8122_v16  ;;  %v6323_v37 = vpack.c.bf16 %v1191_v13, %v1190_v33  ;;  %v1175_v16 = vld [vmem:[#allocation50] sm:$0x3] }
0x13f3   :  { %v3762_v18 = vmul.f32 %v4092_v58, %v3754_v46  ;;  %v3775_v41 = vrot.slane %v1175_v16, %v7805_v25  ;;  %v3779_v45 = vrot.slane %v1175_v16, %v7808_v27  ;;  %v6329_v25 = vpack.c.bf16 %v1212_v49, %v1211_v14  ;;  %v1213_v27 = vld [vmem:[%s7553_s21 + $0x20] sm:$0xff] }
0x13f4   :  { %v3761_v54 = vmul.f32 %v4092_v58, %v3753_v39  ;;  %6324 = vmatpush3.bf16.msra.mxu1 %v6323_v37  ;;  %v6332_v26 = vpack.c.bf16 %v1214_v20, %v1213_v27 }
0x13f5   :  { %v3770_v24 = vadd.f32 %v4093_v35, %v3762_v18  ;;  %6325 = vmatprep.subr.bf16.mxu1 %v7361_v0 }
0x13f6   :  { %v3769_v59 = vadd.f32 %v4093_v35, %v3761_v54 }
0x13f7   :  { %3846 = vmatprep.mubr.f32.mxu0 %v3770_v24 }
0x13f8   :  { %3847 = vmatmul.mubr.f32.vlgmr.msra.gmra.mrb[40].mxu0 %v3769_v59 }
0x14cb   :  { %v3848_v61 = vpop.f32.mrb[40].mxu0 }
0x14cc   :  { %v3849_v62 = vadd.f32 %v3848_v61, %v3775_v41  ;;  %v3850_v63 = vpop.f32.mrb[41].mxu0 }
0x14cd   :  { %v3851_v51 = vadd.f32 %v3850_v63, %v3779_v45 }
0x14ce   :  { %v3853_v11 = vmax.f32 %v3849_v62, 0.0 }
0x14cf   :  { %v3854_v8 = vmax.f32 %v3851_v51, 0.0 }
0x14d1   :  { %3925 = vmatprep.mubr.f32.mxu1 %v3854_v8 }
0x14d2   :  { %3926 = vmatmul.mubr.f32.vlgmr.msra.gmra.mrb[40].mxu1 %v3853_v11 }
0x14d3   :  { %6327 = vmatpush3.bf16.msra.mxu1 %v6326_v9  ;;  %5295 = vmatprep.mubr.msk.f32.mxu1 %vm7362_vm0, %v7363_v1  ;;  %v1218_v1 = vld [vmem:[%s7553_s21 + $0x48] sm:$0xff] }
0x14d4   :  { %6328 = vmatprep.subr.bf16.mxu1 %v7361_v0  ;;  %v6338_v4 = vpack.c.bf16 %v1218_v1, %v1217_v2 }
0x14d7   :  { %6330 = vmatpush3.bf16.msra.mxu1 %v6329_v25 }
0x14d8   :  { %6331 = vmatprep.subr.bf16.mxu1 %v7361_v0 }
0x14db   :  { %6333 = vmatpush3.bf16.msra.mxu1 %v6332_v26 }
0x14dc   :  { %6334 = vmatprep.subr.bf16.mxu1 %v7361_v0 }
0x14df   :  { %6336 = vmatpush3.bf16.msra.mxu1 %v6335_v23 }
0x14e0   :  { %6337 = vmatprep.subr.bf16.mxu1 %v7361_v0 }
0x14e3   :  { %6339 = vmatpush3.bf16.msra.mxu1 %v6338_v4 }
0x14e4   :  { %6340 = vmatprep.subr.bf16.mxu1 %v7361_v0 }
0x14e7   :  { %6342 = vmatpush3.bf16.msra.mxu1 %v6341_v48 }
0x14e8   :  { %6343 = vmatprep.subr.bf16.mxu1 %v7361_v0 }
0x14eb   :  { %6345 = vmatpush3.bf16.msra.mxu1 %v6344_v50 }
0x14ec   :  { %6346 = vmatprep.subr.bf16.mxu1 %v7361_v0 }
0x14ef   :  { %6348 = vmatpush3.bf16.msra.mxu1 %v6347_v32 }
0x15a5   :  { %v4676_v34 = vpop.f32.mrb[40].mxu1 }
0x15a6   :  { %v4677_v17 = vpop.f32.mrb[41].mxu1 }
0x15a7   :  { %v4678_v38 = vadd.f32 %v4677_v17, %v4676_v34 }
0x15a9   :  { %v3928_v15 = vadd.f32 %v4678_v38, %v4094_v36 }
0x15ab   :  { %v3931_v42 = vmax.f32 %v3928_v15, 0.0 }
0x15ad   :  { %5296 = vmatmul.mubr.f32.vlgmr.msra.gmra.mrb[42].mxu1 %v3931_v42 }
0x1680   :  { %v4004_v52 = vpop.f32.mrb[42].mxu1 }
0x1681   :  { %v4005_v53 = vadd.f32 %v4095_v47, %v4004_v52  ;;  %v5297_v55 = vpop.f32.mrb[43].mxu1 }
0x1683   :  { %4008 = vst [vmem:[#allocation55] sm:$0xff] %v4005_v53 }
0x1684   :  { %7232 = shalt.err (!%p7229_p10)
}
0x1685   :  { %s7233_s21 = scalar_lea.hbm %s7563_s29, 128 }
0x1686   :  { %p7234_p11 = scmp.ne.s32.totalorder %s7563_s29, %s7233_s21  ;;  %p7237_p12 = scmp.lt.u32.totalorder %s7233_s21, %s7563_s29 }
0x1688   :  { %p7239_p13 = pnand %p7237_p12, %p7234_p11 }
0x168a   :  { %7242 = shalt.err (!%p7239_p13)
}
0x168b   :  { %4018 = dma.vmem_to_hbm [thread:$0]  %s4016_s12, 128, %s7563_s29, [#allocation4]  }
0x168c   :  { %7279 = dma.done.wait [#allocation4], 128  }
0x168d   :  { %7280 = vsyncadd [#allocation4], 4294967168 }
0x168e   :  { %4022 = vsyncpa [#allocation3], 1 }
0x168f   :  { %4023 = vsyncpa [#allocation6], 1 }
0x1690   :  { %4024 = vsyncpa [#allocation9], 1 }
0x1691   :  { %4025 = vsyncpa [#allocation12], 1 }
0x1692   :  { %4026 = vsyncpa [#allocation15], 1 }
0x1693   :  { %4027 = vsyncpa [#allocation18], 1 }
0x1694   :  { %4028 = vsyncpa [#allocation21], 1 }
0x1695   :  { %4029 = vsyncpa [#allocation24], 1 }
0x1696   :  { %4030 = vsyncpa [#allocation27], 1 }
0x1697   :  { %4031 = vsyncpa [#allocation30], 1 }
0x1698   :  { %4032 = vsyncpa [#allocation33], 1 }
0x1699   :  { %4033 = vsyncpa [#allocation36], 1 }
0x169a   :  { %4034 = vsyncpa [#allocation39], 1 }
0x169b   :  { %4035 = vsyncpa [#allocation42], 1 }
0x169c   :  { %4036 = vsyncpa [#allocation45], 1 }
0x169d   :  { %4037 = vsyncpa [#allocation48], 1 }
0x169e   :  { %4038 = vsyncpa [#allocation51], 1 }
0x169f   :  { %4039 = vsyncpa [#allocation54], 1 }
0x16a0   :  { %4040 = vsyncpa [#allocation4], 1 }

// kernel: tpu_custom_call.1
= control target key start
LH: loop header
LB: loop body
LE: loop exit
PB: predicated region body
PF: predicated region fallthrough
CT: control target
= control target key end

     0   :  { %s7281_s6 = smov 1   ;;  %s7282_s10 = smov 2   ;;  %s8163_s0 = inlined_call_operand.smem [shape: u32[39], index: -1, kind: input, shape index: {}] }
   0x1   :  { %s7373_s5 = sld [smem:[%s8163_s0]]   ;;  %s7283_s14 = smov 3  }
   0x2   :  { %s7378_s9 = sld [smem:[%s8163_s0 + %s7281_s6]]   ;;  %s7284_s18 = smov 4  }
   0x3   :  { %s7383_s13 = sld [smem:[%s8163_s0 + %s7282_s10]]   ;;  %s7285_s22 = smov 5  }
   0x4   :  { %s7388_s17 = sld [smem:[%s8163_s0 + %s7283_s14]]   ;;  %s7286_s26 = smov 6  }
   0x5   :  { %s7393_s21 = sld [smem:[%s8163_s0 + %s7284_s18]]   ;;  %s7287_s30 = smov 7  }
   0x6   :  { %s7398_s25 = sld [smem:[%s8163_s0 + %s7285_s22]]   ;;  %s7288_s4 = smov 8  }
   0x7   :  { %8183 = sst [smem:[#allocation75_spill]] %s7373_s5  ;;  %s7289_s10 = smov 9  }
   0x8   :  { %s7403_s29 = sld [smem:[%s8163_s0 + %s7286_s26]]   ;;  %s7290_s15 = smov 10  }
   0x9   :  { %8184 = sst [smem:[#allocation76_spill]] %s7383_s13  ;;  %s7291_s20 = smov 11  }
   0xa   :  { %s7408_s3 = sld [smem:[%s8163_s0 + %s7287_s30]]   ;;  %s7292_s26 = smov 12  }
   0xb   :  { %8185 = sst [smem:[#allocation77_spill]] %s7393_s21  ;;  %s7293_s1 = smov 13  }
   0xc   :  { %s7413_s8 = sld [smem:[%s8163_s0 + %s7288_s4]]   ;;  %s7294_s7 = smov 14  }
   0xd   :  { %s7418_s14 = sld [smem:[%s8163_s0 + %s7289_s10]]   ;;  %s7296_s22 = smov 16  }
   0xe   :  { %8186 = sst [smem:[#allocation78_spill]] %s7403_s29  ;;  %s7297_s28 = smov 17  }
   0xf   :  { %s7423_s19 = sld [smem:[%s8163_s0 + %s7290_s15]]   ;;  %s7295_s15 = smov 15  }
  0x10   :  { %s7428_s24 = sld [smem:[%s8163_s0 + %s7291_s20]]  }
  0x11   :  { %s7433_s30 = sld [smem:[%s8163_s0 + %s7292_s26]]  }
  0x12   :  { %8187 = sst [smem:[#allocation79_spill]] %s7413_s8 }
  0x13   :  { %s7438_s6 = sld [smem:[%s8163_s0 + %s7293_s1]]  }
  0x14   :  { %s7443_s12 = sld [smem:[%s8163_s0 + %s7294_s7]]   ;;  %s7298_s7 = smov 18  }
  0x15   :  { %8188 = sst [smem:[#allocation80_spill]] %s7423_s19 }
  0x16   :  { %s7448_s20 = sld [smem:[%s8163_s0 + %s7295_s15]]   ;;  %s7299_s15 = smov 19  }
  0x17   :  { %8189 = sst [smem:[#allocation81_spill]] %s7433_s30 }
  0x18   :  { %s7453_s27 = sld [smem:[%s8163_s0 + %s7296_s22]]   ;;  %s7300_s22 = smov 20  }
  0x19   :  { %8190 = sst [smem:[#allocation82_spill]] %s7438_s6 }
  0x1a   :  { %s7458_s4 = sld [smem:[%s8163_s0 + %s7297_s28]]   ;;  %s7301_s28 = smov 21  }
  0x1b   :  { %s7463_s6 = sld [smem:[%s8163_s0 + %s7298_s7]]   ;;  %s7302_s7 = smov 22  }
  0x1c   :  { %8191 = sst [smem:[#allocation83_spill]] %s7448_s20 }
  0x1d   :  { %s7468_s20 = sld [smem:[%s8163_s0 + %s7299_s15]]   ;;  %s7303_s15 = smov 23  }
  0x1e   :  { %s7473_s30 = sld [smem:[%s8163_s0 + %s7300_s22]]   ;;  %s7304_s22 = smov 24  }
  0x1f   :  { %s7483_s19 = sld [smem:[%s8163_s0 + %s7302_s7]]   ;;  %s7306_s7 = smov 26  }
  0x20   :  { %8192 = sst [smem:[#allocation84_spill]] %s7458_s4 }
  0x21   :  { %s7478_s4 = sld [smem:[%s8163_s0 + %s7301_s28]]   ;;  %s7305_s28 = smov 25  }
  0x22   :  { %s7493_s8 = sld [smem:[%s8163_s0 + %s7304_s22]]   ;;  %s7308_s22 = smov 28  }
  0x23   :  { %8193 = sst [smem:[#allocation85_spill]] %s7468_s20 }
  0x24   :  { %s7488_s20 = sld [smem:[%s8163_s0 + %s7303_s15]]   ;;  %s7307_s15 = smov 27  }
  0x25   :  { %s7503_s29 = sld [smem:[%s8163_s0 + %s7306_s7]]   ;;  %s7310_s7 = smov 30  }
  0x26   :  { %s7513_s21 = sld [smem:[%s8163_s0 + %s7308_s22]]   ;;  %s7312_s22 = smov 32  }
  0x27   :  { %8194 = sst [smem:[#allocation86_spill]] %s7478_s4 }
  0x28   :  { %s7498_s4 = sld [smem:[%s8163_s0 + %s7305_s28]]   ;;  %s7309_s28 = smov 29  }
  0x2a   :  { %8195 = sst [smem:[#allocation87_spill]] %s7488_s20 }
  0x2b   :  { %8197 = sst [smem:[#allocation89_spill]] %s7503_s29 }
  0x2c   :  { %s7508_s20 = sld [smem:[%s8163_s0 + %s7307_s15]]   ;;  %s7311_s15 = smov 31  }
  0x2d   :  { %8198 = sst [smem:[#allocation90_spill]] %s7513_s21 }
  0x2e   :  { %8196 = sst [smem:[#allocation88_spill]] %s7498_s4 }
  0x2f   :  { %s7518_s4 = sld [smem:[%s8163_s0 + %s7309_s28]]   ;;  %s7313_s28 = smov 33  }
  0x30   :  { %s7523_s29 = sld [smem:[%s8163_s0 + %s7310_s7]]   ;;  %s7314_s7 = smov 34  }
  0x31   :  { %s7528_s13 = sld [smem:[%s8163_s0 + %s7311_s15]]   ;;  %s7315_s15 = smov 35  }
  0x32   :  { %s7533_s21 = sld [smem:[%s8163_s0 + %s7312_s22]]   ;;  %s7316_s22 = smov 36  }
  0x33   :  { %s7538_s5 = sld [smem:[%s8163_s0 + %s7313_s28]]   ;;  %s7317_s28 = smov 37  }
  0x36   :  { %8199 = sst [smem:[#allocation91_spill]] %s7523_s29 }
  0x37   :  { %8200 = sst [smem:[#allocation92_spill]] %s7528_s13 }
  0x38   :  { %8201 = sst [smem:[#allocation93_spill]] %s7533_s21 }
  0x39   :  { %8202 = sst [smem:[#allocation94_spill]] %s7538_s5 }
  0x3a   :  { %s7543_s29 = sld [smem:[%s8163_s0 + %s7314_s7]]   ;;  %s7318_s7 = smov 38  }
  0x3b   :  { %s7548_s13 = sld [smem:[%s8163_s0 + %s7315_s15]]  }
  0x3c   :  { %s7553_s21 = sld [smem:[%s8163_s0 + %s7316_s22]]  }
  0x3d   :  { %s7558_s5 = sld [smem:[%s8163_s0 + %s7317_s28]]  }
  0x40   :  { %8203 = sst [smem:[#allocation95_spill]] %s7543_s29 }
  0x41   :  { %s7563_s29 = sld [smem:[%s8163_s0 + %s7318_s7]]  }
  0x42   :  { %82 = vsyncpa [#allocation3], 0 }
  0x43   :  { %83 = vsyncpa [#allocation6], 0 }
  0x44   :  { %84 = vsyncpa [#allocation9], 0 }
  0x45   :  { %85 = vsyncpa [#allocation12], 0 }
  0x46   :  { %86 = vsyncpa [#allocation15], 0 }
  0x47   :  { %87 = vsyncpa [#allocation18], 0 }
  0x48   :  { %88 = vsyncpa [#allocation21], 0 }
  0x49   :  { %89 = vsyncpa [#allocation24], 0 }
  0x4a   :  { %90 = vsyncpa [#allocation27], 0 }
  0x4b   :  { %91 = vsyncpa [#allocation30], 0 }
  0x4c   :  { %92 = vsyncpa [#allocation33], 0 }
  0x4d   :  { %93 = vsyncpa [#allocation36], 0 }
  0x4e   :  { %94 = vsyncpa [#allocation39], 0 }
  0x4f   :  { %95 = vsyncpa [#allocation42], 0 }
  0x50   :  { %96 = vsyncpa [#allocation45], 0 }
  0x51   :  { %97 = vsyncpa [#allocation48], 0 }
  0x52   :  { %98 = vsyncpa [#allocation51], 0 }
  0x53   :  { %99 = vsyncpa [#allocation54], 0 }
  0x54   :  { %100 = vsyncpa [#allocation4], 0  ;;  %s7319_s0 = smov [#allocation5]   ;;  %s6473_s16 = scalar_lea.hbm %s7378_s9, 768 }
  0x55   :  { %s117_s15 = sshll.u32 %s7319_s0, 4  ;;  %p6474_p0 = scmp.ne.s32.totalorder %s7378_s9, %s6473_s16  ;;  %s118_s15 = int_to_ptr.vmem [resolvable:$true] %s117_s15 }
  0x56   :  { %p6477_p1 = scmp.lt.u32.totalorder %s6473_s16, %s7378_s9 }
  0x58   :  { %p6479_p2 = pnand %p6477_p1, %p6474_p0 }
  0x5a   :  { %6482 = shalt.err (!%p6479_p2)
}
  0x5b   :  { %s6483_s18 = scalar_lea.vmem %s118_s15, 768  ;;  %p6488_p4 = scmp.lt.s32.totalorder %s118_s15, %s118_s15 }
  0x5c   :  { %p6484_p3 = scmp.ne.s32.totalorder %s118_s15, %s6483_s18  ;;  %p6489_p5 = scmp.lt.s32.totalorder %s6483_s18, %s6483_s18 }
  0x5e   :  { %p6490_p6 = por %p6489_p5, %p6488_p4 }
  0x60   :  { %p6491_p7 = pnand %p6490_p6, %p6484_p3 }
  0x62   :  { %6494 = shalt.err (!%p6491_p7)
}
  0x63   :  { %120 = dma.hbm_to_vmem [thread:$0]  %s7378_s9, 768, %s118_s15, [#allocation6]  }
  0x64   :  { %s7320_s22 = smov [#allocation8]   ;;  %s7321_s26 = smov [#allocation11]  }
  0x65   :  { %s138_s23 = sshll.u32 %s7320_s22, 4  ;;  %s163_s28 = sshll.u32 %s7321_s26, 4  ;;  %s139_s23 = int_to_ptr.vmem [resolvable:$true] %s138_s23  ;;  %s164_s28 = int_to_ptr.vmem [resolvable:$true] %s163_s28 }
  0x66   :  { %s6495_s1 = scalar_lea.hbm %s7388_s17, 2048 }
  0x67   :  { %p6496_p8 = scmp.ne.s32.totalorder %s7388_s17, %s6495_s1  ;;  %p6499_p9 = scmp.lt.u32.totalorder %s6495_s1, %s7388_s17 }
  0x69   :  { %p6501_p10 = pnand %p6499_p9, %p6496_p8 }
  0x6b   :  { %6504 = shalt.err (!%p6501_p10)
}
  0x6c   :  { %s6505_s2 = scalar_lea.vmem %s139_s23, 2048  ;;  %p6510_p12 = scmp.lt.s32.totalorder %s139_s23, %s139_s23 }
  0x6d   :  { %p6506_p11 = scmp.ne.s32.totalorder %s139_s23, %s6505_s2  ;;  %p6511_p13 = scmp.lt.s32.totalorder %s6505_s2, %s6505_s2 }
  0x6f   :  { %p6512_p0 = por %p6511_p13, %p6510_p12 }
  0x71   :  { %p6513_p1 = pnand %p6512_p0, %p6506_p11 }
  0x73   :  { %6516 = shalt.err (!%p6513_p1)
}
  0x74   :  { %s7322_s7 = smov 128   ;;  %s7323_s9 = smov 8  }
  0x75   :  { %144 = dma.hbm_to_vmem [thread:$0]  %s7388_s17, 2048, %s139_s23, [#allocation9], %s7322_s7, %s7322_s7, %s7323_s9  }
  0x76   :  { %s6517_s10 = scalar_lea.hbm %s7398_s25, 16 }
  0x77   :  { %p6518_p2 = scmp.ne.s32.totalorder %s7398_s25, %s6517_s10  ;;  %p6521_p3 = scmp.lt.u32.totalorder %s6517_s10, %s7398_s25 }
  0x79   :  { %p6523_p4 = pnand %p6521_p3, %p6518_p2 }
  0x7b   :  { %6526 = shalt.err (!%p6523_p4)
}
  0x7c   :  { %s6527_s11 = scalar_lea.vmem %s164_s28, 16  ;;  %s6531_s0 = scalar_lea.vmem %s164_s28, 32 }
  0x7d   :  { %p6528_p5 = scmp.ne.s32.totalorder %s164_s28, %s6527_s11  ;;  %p6532_p6 = scmp.lt.s32.totalorder %s164_s28, %s164_s28 }
  0x7e   :  { %p6533_p7 = scmp.lt.s32.totalorder %s6531_s0, %s6527_s11 }
  0x80   :  { %p6534_p8 = por %p6533_p7, %p6532_p6 }
  0x82   :  { %p6535_p9 = pnand %p6534_p8, %p6528_p5 }
  0x84   :  { %6538 = shalt.err (!%p6535_p9)
}
  0x85   :  { %166 = dma.hbm_to_vmem [thread:$0]  %s7398_s25, 16, %s164_s28, [#allocation12]  }
  0x86   :  { %s7324_s17 = smov [#allocation14]   ;;  %s7325_s16 = smov [#allocation17]  }
  0x87   :  { %s185_s15 = sshll.u32 %s7324_s17, 4  ;;  %s207_s18 = sshll.u32 %s7325_s16, 4  ;;  %s186_s15 = int_to_ptr.vmem [resolvable:$true] %s185_s15  ;;  %s208_s18 = int_to_ptr.vmem [resolvable:$true] %s207_s18 }
  0x88   :  { %s6539_s22 = scalar_lea.hbm %s7408_s3, 16 }
  0x89   :  { %p6540_p10 = scmp.ne.s32.totalorder %s7408_s3, %s6539_s22  ;;  %p6543_p11 = scmp.lt.u32.totalorder %s6539_s22, %s7408_s3 }
  0x8b   :  { %p6545_p12 = pnand %p6543_p11, %p6540_p10 }
  0x8d   :  { %6548 = shalt.err (!%p6545_p12)
}
  0x8e   :  { %s6549_s23 = scalar_lea.vmem %s186_s15, 16  ;;  %s6553_s26 = scalar_lea.vmem %s186_s15, 32 }
  0x8f   :  { %p6550_p13 = scmp.ne.s32.totalorder %s186_s15, %s6549_s23  ;;  %p6554_p0 = scmp.lt.s32.totalorder %s186_s15, %s186_s15 }
  0x90   :  { %p6555_p1 = scmp.lt.s32.totalorder %s6553_s26, %s6549_s23 }
  0x92   :  { %p6556_p2 = por %p6555_p1, %p6554_p0 }
  0x94   :  { %p6557_p3 = pnand %p6556_p2, %p6550_p13 }
  0x96   :  { %6560 = shalt.err (!%p6557_p3)
}
  0x97   :  { %188 = dma.hbm_to_vmem [thread:$0]  %s7408_s3, 16, %s186_s15, [#allocation15]  }
  0x98   :  { %s6561_s25 = scalar_lea.hbm %s7418_s14, 48 }
  0x99   :  { %p6562_p4 = scmp.ne.s32.totalorder %s7418_s14, %s6561_s25  ;;  %p6565_p5 = scmp.lt.u32.totalorder %s6561_s25, %s7418_s14 }
  0x9b   :  { %p6567_p6 = pnand %p6565_p5, %p6562_p4 }
  0x9d   :  { %6570 = shalt.err (!%p6567_p6)
}
  0x9e   :  { %s6571_s28 = scalar_lea.vmem %s208_s18, 48  ;;  %s6575_s1 = scalar_lea.vmem %s208_s18, 64 }
  0x9f   :  { %p6572_p7 = scmp.ne.s32.totalorder %s208_s18, %s6571_s28  ;;  %p6576_p8 = scmp.lt.s32.totalorder %s208_s18, %s208_s18 }
  0xa0   :  { %p6577_p9 = scmp.lt.s32.totalorder %s6575_s1, %s6571_s28 }
  0xa2   :  { %p6578_p10 = por %p6577_p9, %p6576_p8 }
  0xa4   :  { %p6579_p11 = pnand %p6578_p10, %p6572_p7 }
  0xa6   :  { %6582 = shalt.err (!%p6579_p11)
}
  0xa7   :  { %210 = dma.hbm_to_vmem [thread:$0]  %s7418_s14, 48, %s208_s18, [#allocation18]  }
  0xa8   :  { %s7326_s3 = smov [#allocation20]   ;;  %s7327_s10 = smov [#allocation23]  }
  0xa9   :  { %s229_s2 = sshll.u32 %s7326_s3, 4  ;;  %s252_s11 = sshll.u32 %s7327_s10, 4  ;;  %s230_s2 = int_to_ptr.vmem [resolvable:$true] %s229_s2  ;;  %s253_s11 = int_to_ptr.vmem [resolvable:$true] %s252_s11 }
  0xaa   :  { %s6583_s0 = scalar_lea.hbm %s7428_s24, 16 }
  0xab   :  { %p6584_p12 = scmp.ne.s32.totalorder %s7428_s24, %s6583_s0  ;;  %p6587_p13 = scmp.lt.u32.totalorder %s6583_s0, %s7428_s24 }
  0xad   :  { %p6589_p0 = pnand %p6587_p13, %p6584_p12 }
  0xaf   :  { %6592 = shalt.err (!%p6589_p0)
}
  0xb0   :  { %s6593_s17 = scalar_lea.vmem %s230_s2, 16  ;;  %s6597_s15 = scalar_lea.vmem %s230_s2, 32 }
  0xb1   :  { %p6594_p1 = scmp.ne.s32.totalorder %s230_s2, %s6593_s17  ;;  %p6598_p2 = scmp.lt.s32.totalorder %s230_s2, %s230_s2 }
  0xb2   :  { %p6599_p3 = scmp.lt.s32.totalorder %s6597_s15, %s6593_s17 }
  0xb4   :  { %p6600_p4 = por %p6599_p3, %p6598_p2 }
  0xb6   :  { %p6601_p5 = pnand %p6600_p4, %p6594_p1 }
  0xb8   :  { %6604 = shalt.err (!%p6601_p5)
}
  0xb9   :  { %232 = dma.hbm_to_vmem [thread:$0]  %s7428_s24, 16, %s230_s2, [#allocation21]  }
  0xba   :  { %s6605_s14 = scalar_lea.hbm %s7443_s12, 8192 }
  0xbb   :  { %p6606_p6 = scmp.ne.s32.totalorder %s7443_s12, %s6605_s14  ;;  %p6609_p7 = scmp.lt.u32.totalorder %s6605_s14, %s7443_s12 }
  0xbd   :  { %p6611_p8 = pnand %p6609_p7, %p6606_p6 }
  0xbf   :  { %6614 = shalt.err (!%p6611_p8)
}
  0xc0   :  { %s6615_s16 = scalar_lea.vmem %s253_s11, 8192  ;;  %p6620_p10 = scmp.lt.s32.totalorder %s253_s11, %s253_s11 }
  0xc1   :  { %p6616_p9 = scmp.ne.s32.totalorder %s253_s11, %s6615_s16  ;;  %p6621_p11 = scmp.lt.s32.totalorder %s6615_s16, %s6615_s16 }
  0xc3   :  { %p6622_p12 = por %p6621_p11, %p6620_p10 }
  0xc5   :  { %p6623_p13 = pnand %p6622_p12, %p6616_p9 }
  0xc7   :  { %6626 = shalt.err (!%p6623_p13)
}
  0xc8   :  { %258 = dma.hbm_to_vmem [thread:$0]  %s7443_s12, 8192, %s253_s11, [#allocation24], %s7322_s7, %s7322_s7, %s7323_s9  }
  0xc9   :  { %s7328_s24 = smov [#allocation26]   ;;  %s7329_s22 = smov [#allocation29]  }
  0xca   :  { %s275_s18 = sshll.u32 %s7328_s24, 4  ;;  %s295_s23 = sshll.u32 %s7329_s22, 4  ;;  %s276_s18 = int_to_ptr.vmem [resolvable:$true] %s275_s18  ;;  %s296_s23 = int_to_ptr.vmem [resolvable:$true] %s295_s23 }
  0xcb   :  { %s6627_s26 = scalar_lea.hbm %s7453_s27, 16 }
  0xcc   :  { %p6628_p0 = scmp.ne.s32.totalorder %s7453_s27, %s6627_s26  ;;  %p6631_p1 = scmp.lt.u32.totalorder %s6627_s26, %s7453_s27 }
  0xce   :  { %p6633_p2 = pnand %p6631_p1, %p6628_p0 }
  0xd0   :  { %6636 = shalt.err (!%p6633_p2)
}
  0xd1   :  { %s6637_s25 = scalar_lea.vmem %s276_s18, 16  ;;  %s6641_s28 = scalar_lea.vmem %s276_s18, 32 }
  0xd2   :  { %p6638_p3 = scmp.ne.s32.totalorder %s276_s18, %s6637_s25  ;;  %p6642_p4 = scmp.lt.s32.totalorder %s276_s18, %s276_s18 }
  0xd3   :  { %p6643_p5 = scmp.lt.s32.totalorder %s6641_s28, %s6637_s25 }
  0xd5   :  { %p6644_p6 = por %p6643_p5, %p6642_p4 }
  0xd7   :  { %p6645_p7 = pnand %p6644_p6, %p6638_p3 }
  0xd9   :  { %6648 = shalt.err (!%p6645_p7)
}
  0xda   :  { %278 = dma.hbm_to_vmem [thread:$0]  %s7453_s27, 16, %s276_s18, [#allocation27]  }
  0xdb   :  { %s6649_s12 = scalar_lea.hbm %s7463_s6, 16 }
  0xdc   :  { %p6650_p8 = scmp.ne.s32.totalorder %s7463_s6, %s6649_s12  ;;  %p6653_p9 = scmp.lt.u32.totalorder %s6649_s12, %s7463_s6 }
  0xde   :  { %p6655_p10 = pnand %p6653_p9, %p6650_p8 }
  0xe0   :  { %6658 = shalt.err (!%p6655_p10)
}
  0xe1   :  { %s6659_s1 = scalar_lea.vmem %s296_s23, 16  ;;  %s6663_s3 = scalar_lea.vmem %s296_s23, 32 }
  0xe2   :  { %p6660_p11 = scmp.ne.s32.totalorder %s296_s23, %s6659_s1  ;;  %p6664_p12 = scmp.lt.s32.totalorder %s296_s23, %s296_s23 }
  0xe3   :  { %p6665_p13 = scmp.lt.s32.totalorder %s6663_s3, %s6659_s1 }
  0xe5   :  { %p6666_p0 = por %p6665_p13, %p6664_p12 }
  0xe7   :  { %p6667_p1 = pnand %p6666_p0, %p6660_p11 }
  0xe9   :  { %6670 = shalt.err (!%p6667_p1)
}
  0xea   :  { %298 = dma.hbm_to_vmem [thread:$0]  %s7463_s6, 16, %s296_s23, [#allocation30]  }
  0xeb   :  { %s7330_s27 = smov [#allocation32]   ;;  %s7331_s10 = smov [#allocation35]  }
  0xec   :  { %s314_s2 = sshll.u32 %s7330_s27, 4  ;;  %s336_s11 = sshll.u32 %s7331_s10, 4  ;;  %s315_s2 = int_to_ptr.vmem [resolvable:$true] %s314_s2  ;;  %s337_s11 = int_to_ptr.vmem [resolvable:$true] %s336_s11 }
  0xed   :  { %s6671_s0 = scalar_lea.hbm %s7473_s30, 6144 }
  0xee   :  { %p6672_p2 = scmp.ne.s32.totalorder %s7473_s30, %s6671_s0  ;;  %p6675_p3 = scmp.lt.u32.totalorder %s6671_s0, %s7473_s30 }
  0xf0   :  { %p6677_p4 = pnand %p6675_p3, %p6672_p2 }
  0xf2   :  { %6680 = shalt.err (!%p6677_p4)
}
  0xf3   :  { %s6681_s17 = scalar_lea.vmem %s315_s2, 6144  ;;  %p6686_p6 = scmp.lt.s32.totalorder %s315_s2, %s315_s2 }
  0xf4   :  { %p6682_p5 = scmp.ne.s32.totalorder %s315_s2, %s6681_s17  ;;  %p6687_p7 = scmp.lt.s32.totalorder %s6681_s17, %s6681_s17 }
  0xf6   :  { %p6688_p8 = por %p6687_p7, %p6686_p6 }
  0xf8   :  { %p6689_p9 = pnand %p6688_p8, %p6682_p5 }
  0xfa   :  { %6692 = shalt.err (!%p6689_p9)
}
  0xfb   :  { %s7332_s15 = smov 384   ;;  %s7333_s6 = smov 24  }
  0xfc   :  { %320 = dma.hbm_to_vmem [thread:$0]  %s7473_s30, 6144, %s315_s2, [#allocation33], %s7332_s15, %s7332_s15, %s7333_s6  }
  0xfd   :  { %s6693_s14 = scalar_lea.hbm %s7483_s19, 2048 }
  0xfe   :  { %p6694_p10 = scmp.ne.s32.totalorder %s7483_s19, %s6693_s14  ;;  %p6697_p11 = scmp.lt.u32.totalorder %s6693_s14, %s7483_s19 }
 0x100   :  { %p6699_p12 = pnand %p6697_p11, %p6694_p10 }
 0x102   :  { %6702 = shalt.err (!%p6699_p12)
}
 0x103   :  { %s6703_s16 = scalar_lea.vmem %s337_s11, 2048  ;;  %p6708_p0 = scmp.lt.s32.totalorder %s337_s11, %s337_s11 }
 0x104   :  { %p6704_p13 = scmp.ne.s32.totalorder %s337_s11, %s6703_s16  ;;  %p6709_p1 = scmp.lt.s32.totalorder %s6703_s16, %s6703_s16 }
 0x106   :  { %p6710_p2 = por %p6709_p1, %p6708_p0 }
 0x108   :  { %p6711_p3 = pnand %p6710_p2, %p6704_p13 }
 0x10a   :  { %6714 = shalt.err (!%p6711_p3)
}
 0x10b   :  { %342 = dma.hbm_to_vmem [thread:$0]  %s7483_s19, 2048, %s337_s11, [#allocation36], %s7322_s7, %s7322_s7, %s7323_s9  }
 0x10c   :  { %s7334_s30 = smov [#allocation38]   ;;  %s7335_s18 = smov [#allocation41]  }
 0x10d   :  { %s358_s24 = sshll.u32 %s7334_s30, 4  ;;  %s385_s22 = sshll.u32 %s7335_s18, 4  ;;  %s359_s24 = int_to_ptr.vmem [resolvable:$true] %s358_s24  ;;  %s386_s22 = int_to_ptr.vmem [resolvable:$true] %s385_s22 }
 0x10e   :  { %s6715_s23 = scalar_lea.hbm %s7493_s8, 8192 }
 0x10f   :  { %p6716_p4 = scmp.ne.s32.totalorder %s7493_s8, %s6715_s23  ;;  %p6719_p5 = scmp.lt.u32.totalorder %s6715_s23, %s7493_s8 }
 0x111   :  { %p6721_p6 = pnand %p6719_p5, %p6716_p4 }
 0x113   :  { %6724 = shalt.err (!%p6721_p6)
}
 0x114   :  { %s6725_s26 = scalar_lea.vmem %s359_s24, 8192  ;;  %p6730_p8 = scmp.lt.s32.totalorder %s359_s24, %s359_s24 }
 0x115   :  { %p6726_p7 = scmp.ne.s32.totalorder %s359_s24, %s6725_s26  ;;  %p6731_p9 = scmp.lt.s32.totalorder %s6725_s26, %s6725_s26 }
 0x117   :  { %p6732_p10 = por %p6731_p9, %p6730_p8 }
 0x119   :  { %p6733_p11 = pnand %p6732_p10, %p6726_p7 }
 0x11b   :  { %6736 = shalt.err (!%p6733_p11)
}
 0x11c   :  { %s7336_s25 = smov 512   ;;  %s7337_s19 = smov 32  }
 0x11d   :  { %364 = dma.hbm_to_vmem [thread:$0]  %s7493_s8, 8192, %s359_s24, [#allocation39], %s7336_s25, %s7336_s25, %s7337_s19  }
 0x11e   :  { %s6737_s28 = scalar_lea.hbm %s7508_s20, 16 }
 0x11f   :  { %p6738_p12 = scmp.ne.s32.totalorder %s7508_s20, %s6737_s28  ;;  %p6741_p13 = scmp.lt.u32.totalorder %s6737_s28, %s7508_s20 }
 0x121   :  { %p6743_p0 = pnand %p6741_p13, %p6738_p12 }
 0x123   :  { %6746 = shalt.err (!%p6743_p0)
}
 0x124   :  { %s6747_s12 = scalar_lea.vmem %s386_s22, 16  ;;  %s6751_s1 = scalar_lea.vmem %s386_s22, 32 }
 0x125   :  { %p6748_p1 = scmp.ne.s32.totalorder %s386_s22, %s6747_s12  ;;  %p6752_p2 = scmp.lt.s32.totalorder %s386_s22, %s386_s22 }
 0x126   :  { %p6753_p3 = scmp.lt.s32.totalorder %s6751_s1, %s6747_s12 }
 0x128   :  { %p6754_p4 = por %p6753_p3, %p6752_p2 }
 0x12a   :  { %p6755_p5 = pnand %p6754_p4, %p6748_p1 }
 0x12c   :  { %6758 = shalt.err (!%p6755_p5)
}
 0x12d   :  { %388 = dma.hbm_to_vmem [thread:$0]  %s7508_s20, 16, %s386_s22, [#allocation42]  }
 0x12e   :  { %s7338_s8 = smov [#allocation44]   ;;  %s7339_s27 = smov [#allocation47]  }
 0x12f   :  { %s405_s3 = sshll.u32 %s7338_s8, 4  ;;  %s425_s2 = sshll.u32 %s7339_s27, 4  ;;  %s406_s3 = int_to_ptr.vmem [resolvable:$true] %s405_s3  ;;  %s426_s2 = int_to_ptr.vmem [resolvable:$true] %s425_s2 }
 0x130   :  { %s6759_s10 = scalar_lea.hbm %s7518_s4, 16 }
 0x131   :  { %p6760_p6 = scmp.ne.s32.totalorder %s7518_s4, %s6759_s10  ;;  %p6763_p7 = scmp.lt.u32.totalorder %s6759_s10, %s7518_s4 }
 0x133   :  { %p6765_p8 = pnand %p6763_p7, %p6760_p6 }
 0x135   :  { %6768 = shalt.err (!%p6765_p8)
}
 0x136   :  { %s6769_s11 = scalar_lea.vmem %s406_s3, 16  ;;  %s6773_s0 = scalar_lea.vmem %s406_s3, 32 }
 0x137   :  { %p6770_p9 = scmp.ne.s32.totalorder %s406_s3, %s6769_s11  ;;  %p6774_p10 = scmp.lt.s32.totalorder %s406_s3, %s406_s3 }
 0x138   :  { %p6775_p11 = scmp.lt.s32.totalorder %s6773_s0, %s6769_s11 }
 0x13a   :  { %p6776_p12 = por %p6775_p11, %p6774_p10 }
 0x13c   :  { %p6777_p13 = pnand %p6776_p12, %p6770_p9 }
 0x13e   :  { %6780 = shalt.err (!%p6777_p13)
}
 0x13f   :  { %s8204_s20 = sld [smem:[#allocation92_spill]] }
 0x140   :  { %408 = dma.hbm_to_vmem [thread:$0]  %s7518_s4, 16, %s406_s3, [#allocation45]  }
 0x145   :  { %s6781_s17 = scalar_lea.hbm %s8204_s20, 16 }
 0x146   :  { %p6782_p0 = scmp.ne.s32.totalorder %s8204_s20, %s6781_s17  ;;  %p6785_p1 = scmp.lt.u32.totalorder %s6781_s17, %s8204_s20 }
 0x148   :  { %p6787_p2 = pnand %p6785_p1, %p6782_p0 }
 0x14a   :  { %6790 = shalt.err (!%p6787_p2)
}
 0x14b   :  { %s6791_s14 = scalar_lea.vmem %s426_s2, 16  ;;  %s6795_s16 = scalar_lea.vmem %s426_s2, 32 }
 0x14c   :  { %p6792_p3 = scmp.ne.s32.totalorder %s426_s2, %s6791_s14  ;;  %p6796_p4 = scmp.lt.s32.totalorder %s426_s2, %s426_s2 }
 0x14d   :  { %p6797_p5 = scmp.lt.s32.totalorder %s6795_s16, %s6791_s14 }
 0x14f   :  { %p6798_p6 = por %p6797_p5, %p6796_p4 }
 0x151   :  { %p6799_p7 = pnand %p6798_p6, %p6792_p3 }
 0x153   :  { %6802 = shalt.err (!%p6799_p7)
}
 0x154   :  { %s8205_s30 = sld [smem:[#allocation94_spill]]  ;;  %s7340_s4 = smov [#allocation50]  }
 0x155   :  { %428 = dma.hbm_to_vmem [thread:$0]  %s8204_s20, 16, %s426_s2, [#allocation48]  }
 0x156   :  { %s447_s24 = sshll.u32 %s7340_s4, 4  ;;  %s7341_s18 = smov [#allocation2]   ;;  %s448_s24 = int_to_ptr.vmem [resolvable:$true] %s447_s24 }
 0x157   :  { %s107_s22 = sshll.u32 %s7341_s18, 4  ;;  %s108_s22 = int_to_ptr.vmem [resolvable:$true] %s107_s22 }
 0x15a   :  { %s6803_s23 = scalar_lea.hbm %s8205_s30, 32 }
 0x15b   :  { %p6804_p8 = scmp.ne.s32.totalorder %s8205_s30, %s6803_s23  ;;  %p6807_p9 = scmp.lt.u32.totalorder %s6803_s23, %s8205_s30 }
 0x15d   :  { %p6809_p10 = pnand %p6807_p9, %p6804_p8 }
 0x15f   :  { %6812 = shalt.err (!%p6809_p10)
}
 0x160   :  { %s6813_s26 = scalar_lea.vmem %s448_s24, 32  ;;  %p6818_p12 = scmp.lt.s32.totalorder %s448_s24, %s448_s24 }
 0x161   :  { %p6814_p11 = scmp.ne.s32.totalorder %s448_s24, %s6813_s26  ;;  %p6819_p13 = scmp.lt.s32.totalorder %s6813_s26, %s6813_s26 }
 0x163   :  { %p6820_p0 = por %p6819_p13, %p6818_p12 }
 0x165   :  { %p6821_p1 = pnand %p6820_p0, %p6814_p11 }
 0x167   :  { %6824 = shalt.err (!%p6821_p1)
}
 0x168   :  { %s8206_s28 = sld [smem:[#allocation75_spill]] }
 0x169   :  { %450 = dma.hbm_to_vmem [thread:$0]  %s8205_s30, 32, %s448_s24, [#allocation51]  }
 0x16e   :  { %s6825_s12 = scalar_lea.hbm %s8206_s28, 128 }
 0x16f   :  { %p6826_p2 = scmp.ne.s32.totalorder %s8206_s28, %s6825_s12  ;;  %p6829_p3 = scmp.lt.u32.totalorder %s6825_s12, %s8206_s28 }
 0x171   :  { %p6831_p4 = pnand %p6829_p3, %p6826_p2 }
 0x173   :  { %6834 = shalt.err (!%p6831_p4)
}
 0x174   :  { %s6835_s1 = scalar_lea.vmem %s108_s22, 128  ;;  %p6840_p6 = scmp.lt.s32.totalorder %s108_s22, %s108_s22 }
 0x175   :  { %p6836_p5 = scmp.ne.s32.totalorder %s108_s22, %s6835_s1  ;;  %p6841_p7 = scmp.lt.s32.totalorder %s6835_s1, %s6835_s1 }
 0x177   :  { %p6842_p8 = por %p6841_p7, %p6840_p6 }
 0x179   :  { %p6843_p9 = pnand %p6842_p8, %p6836_p5 }
 0x17b   :  { %6846 = shalt.err (!%p6843_p9)
}
 0x17c   :  { %s8207_s8 = sld [smem:[#allocation76_spill]]  ;;  %s7342_s3 = smov [#allocation7]  }
 0x17d   :  { %110 = dma.hbm_to_vmem [thread:$0]  %s8206_s28, 128, %s108_s22, [#allocation3]  }
 0x17e   :  { %s126_s27 = sshll.u32 %s7342_s3, 4  ;;  %s7343_s2 = smov [#allocation10]   ;;  %s127_s27 = int_to_ptr.vmem [resolvable:$true] %s126_s27 }
 0x17f   :  { %s150_s10 = sshll.u32 %s7343_s2, 4  ;;  %s151_s10 = int_to_ptr.vmem [resolvable:$true] %s150_s10 }
 0x182   :  { %s6847_s11 = scalar_lea.hbm %s8207_s8, 2048 }
 0x183   :  { %p6848_p10 = scmp.ne.s32.totalorder %s8207_s8, %s6847_s11  ;;  %p6851_p11 = scmp.lt.u32.totalorder %s6847_s11, %s8207_s8 }
 0x185   :  { %p6853_p12 = pnand %p6851_p11, %p6848_p10 }
 0x187   :  { %6856 = shalt.err (!%p6853_p12)
}
 0x188   :  { %s6857_s0 = scalar_lea.vmem %s127_s27, 2048  ;;  %p6862_p0 = scmp.lt.s32.totalorder %s127_s27, %s127_s27 }
 0x189   :  { %p6858_p13 = scmp.ne.s32.totalorder %s127_s27, %s6857_s0  ;;  %p6863_p1 = scmp.lt.s32.totalorder %s6857_s0, %s6857_s0 }
 0x18b   :  { %p6864_p2 = por %p6863_p1, %p6862_p0 }
 0x18d   :  { %p6865_p3 = pnand %p6864_p2, %p6858_p13 }
 0x18f   :  { %6868 = shalt.err (!%p6865_p3)
}
 0x190   :  { %s8208_s20 = sld [smem:[#allocation77_spill]] }
 0x191   :  { %132 = dma.hbm_to_vmem [thread:$0]  %s8207_s8, 2048, %s127_s27, [#allocation6], %s7322_s7, %s7322_s7, %s7323_s9  }
 0x196   :  { %s6869_s17 = scalar_lea.hbm %s8208_s20, 256 }
 0x197   :  { %p6870_p4 = scmp.ne.s32.totalorder %s8208_s20, %s6869_s17  ;;  %p6873_p5 = scmp.lt.u32.totalorder %s6869_s17, %s8208_s20 }
 0x199   :  { %p6875_p6 = pnand %p6873_p5, %p6870_p4 }
 0x19b   :  { %6878 = shalt.err (!%p6875_p6)
}
 0x19c   :  { %s6879_s14 = scalar_lea.vmem %s151_s10, 256  ;;  %p6884_p8 = scmp.lt.s32.totalorder %s151_s10, %s151_s10 }
 0x19d   :  { %p6880_p7 = scmp.ne.s32.totalorder %s151_s10, %s6879_s14  ;;  %p6885_p9 = scmp.lt.s32.totalorder %s6879_s14, %s6879_s14 }
 0x19f   :  { %p6886_p10 = por %p6885_p9, %p6884_p8 }
 0x1a1   :  { %p6887_p11 = pnand %p6886_p10, %p6880_p7 }
 0x1a3   :  { %6890 = shalt.err (!%p6887_p11)
}
 0x1a4   :  { %s8209_s16 = sld [smem:[#allocation78_spill]]  ;;  %s7344_s30 = smov [#allocation13]  }
 0x1a5   :  { %156 = dma.hbm_to_vmem [thread:$0]  %s8208_s20, 256, %s151_s10, [#allocation9], %s7322_s7, %s7322_s7, %s7323_s9  }
 0x1a6   :  { %s172_s4 = sshll.u32 %s7344_s30, 4  ;;  %s7345_s24 = smov [#allocation16]   ;;  %s173_s4 = int_to_ptr.vmem [resolvable:$true] %s172_s4 }
 0x1a7   :  { %s194_s18 = sshll.u32 %s7345_s24, 4  ;;  %s195_s18 = int_to_ptr.vmem [resolvable:$true] %s194_s18 }
 0x1aa   :  { %s6891_s22 = scalar_lea.hbm %s8209_s16, 12288 }
 0x1ab   :  { %p6892_p12 = scmp.ne.s32.totalorder %s8209_s16, %s6891_s22  ;;  %p6895_p13 = scmp.lt.u32.totalorder %s6891_s22, %s8209_s16 }
 0x1ad   :  { %p6897_p0 = pnand %p6895_p13, %p6892_p12 }
 0x1af   :  { %6900 = shalt.err (!%p6897_p0)
}
 0x1b0   :  { %s6901_s23 = scalar_lea.vmem %s173_s4, 12288  ;;  %p6906_p2 = scmp.lt.s32.totalorder %s173_s4, %s173_s4 }
 0x1b1   :  { %p6902_p1 = scmp.ne.s32.totalorder %s173_s4, %s6901_s23  ;;  %p6907_p3 = scmp.lt.s32.totalorder %s6901_s23, %s6901_s23 }
 0x1b3   :  { %p6908_p4 = por %p6907_p3, %p6906_p2 }
 0x1b5   :  { %p6909_p5 = pnand %p6908_p4, %p6902_p1 }
 0x1b7   :  { %6912 = shalt.err (!%p6909_p5)
}
 0x1b8   :  { %s8210_s26 = sld [smem:[#allocation79_spill]] }
 0x1b9   :  { %178 = dma.hbm_to_vmem [thread:$0]  %s8209_s16, 12288, %s173_s4, [#allocation12], %s7322_s7, %s7322_s7, %s7323_s9  }
 0x1be   :  { %s6913_s28 = scalar_lea.hbm %s8210_s26, 6144 }
 0x1bf   :  { %p6914_p6 = scmp.ne.s32.totalorder %s8210_s26, %s6913_s28  ;;  %p6917_p7 = scmp.lt.u32.totalorder %s6913_s28, %s8210_s26 }
 0x1c1   :  { %p6919_p8 = pnand %p6917_p7, %p6914_p6 }
 0x1c3   :  { %6922 = shalt.err (!%p6919_p8)
}
 0x1c4   :  { %s6923_s12 = scalar_lea.vmem %s195_s18, 6144  ;;  %p6928_p10 = scmp.lt.s32.totalorder %s195_s18, %s195_s18 }
 0x1c5   :  { %p6924_p9 = scmp.ne.s32.totalorder %s195_s18, %s6923_s12  ;;  %p6929_p11 = scmp.lt.s32.totalorder %s6923_s12, %s6923_s12 }
 0x1c7   :  { %p6930_p12 = por %p6929_p11, %p6928_p10 }
 0x1c9   :  { %p6931_p13 = pnand %p6930_p12, %p6924_p9 }
 0x1cb   :  { %6934 = shalt.err (!%p6931_p13)
}
 0x1cc   :  { %s8211_s1 = sld [smem:[#allocation80_spill]]  ;;  %s7346_s8 = smov [#allocation19]  }
 0x1cd   :  { %200 = dma.hbm_to_vmem [thread:$0]  %s8210_s26, 6144, %s195_s18, [#allocation15], %s7332_s15, %s7332_s15, %s7333_s6  }
 0x1ce   :  { %s216_s3 = sshll.u32 %s7346_s8, 4  ;;  %s7347_s27 = smov [#allocation22]   ;;  %s217_s3 = int_to_ptr.vmem [resolvable:$true] %s216_s3 }
 0x1cf   :  { %s238_s2 = sshll.u32 %s7347_s27, 4  ;;  %s239_s2 = int_to_ptr.vmem [resolvable:$true] %s238_s2 }
 0x1d2   :  { %s6935_s10 = scalar_lea.hbm %s8211_s1, 2048 }
 0x1d3   :  { %p6936_p0 = scmp.ne.s32.totalorder %s8211_s1, %s6935_s10  ;;  %p6939_p1 = scmp.lt.u32.totalorder %s6935_s10, %s8211_s1 }
 0x1d5   :  { %p6941_p2 = pnand %p6939_p1, %p6936_p0 }
 0x1d7   :  { %6944 = shalt.err (!%p6941_p2)
}
 0x1d8   :  { %s6945_s11 = scalar_lea.vmem %s217_s3, 2048  ;;  %p6950_p4 = scmp.lt.s32.totalorder %s217_s3, %s217_s3 }
 0x1d9   :  { %p6946_p3 = scmp.ne.s32.totalorder %s217_s3, %s6945_s11  ;;  %p6951_p5 = scmp.lt.s32.totalorder %s6945_s11, %s6945_s11 }
 0x1db   :  { %p6952_p6 = por %p6951_p5, %p6950_p4 }
 0x1dd   :  { %p6953_p7 = pnand %p6952_p6, %p6946_p3 }
 0x1df   :  { %6956 = shalt.err (!%p6953_p7)
}
 0x1e0   :  { %s8212_s15 = sld [smem:[#allocation81_spill]] }
 0x1e1   :  { %222 = dma.hbm_to_vmem [thread:$0]  %s8211_s1, 2048, %s217_s3, [#allocation18], %s7322_s7, %s7322_s7, %s7323_s9  }
 0x1e6   :  { %s6957_s6 = scalar_lea.hbm %s8212_s15, 8192 }
 0x1e7   :  { %p6958_p8 = scmp.ne.s32.totalorder %s8212_s15, %s6957_s6  ;;  %p6961_p9 = scmp.lt.u32.totalorder %s6957_s6, %s8212_s15 }
 0x1e9   :  { %p6963_p10 = pnand %p6961_p9, %p6958_p8 }
 0x1eb   :  { %6966 = shalt.err (!%p6963_p10)
}
 0x1ec   :  { %s6967_s0 = scalar_lea.vmem %s239_s2, 8192  ;;  %p6972_p12 = scmp.lt.s32.totalorder %s239_s2, %s239_s2 }
 0x1ed   :  { %p6968_p11 = scmp.ne.s32.totalorder %s239_s2, %s6967_s0  ;;  %p6973_p13 = scmp.lt.s32.totalorder %s6967_s0, %s6967_s0 }
 0x1ef   :  { %p6974_p0 = por %p6973_p13, %p6972_p12 }
 0x1f1   :  { %p6975_p1 = pnand %p6974_p0, %p6968_p11 }
 0x1f3   :  { %6978 = shalt.err (!%p6975_p1)
}
 0x1f4   :  { %s8213_s20 = sld [smem:[#allocation83_spill]]  ;;  %s7348_s17 = smov [#allocation25]  }
 0x1f5   :  { %244 = dma.hbm_to_vmem [thread:$0]  %s8212_s15, 8192, %s239_s2, [#allocation21], %s7336_s25, %s7336_s25, %s7337_s19  }
 0x1f6   :  { %s265_s14 = sshll.u32 %s7348_s17, 4  ;;  %s7349_s16 = smov [#allocation28]   ;;  %s266_s14 = int_to_ptr.vmem [resolvable:$true] %s265_s14 }
 0x1f7   :  { %s285_s30 = sshll.u32 %s7349_s16, 4  ;;  %s286_s30 = int_to_ptr.vmem [resolvable:$true] %s285_s30 }
 0x1fa   :  { %s6979_s4 = scalar_lea.hbm %s8213_s20, 16 }
 0x1fb   :  { %p6980_p2 = scmp.ne.s32.totalorder %s8213_s20, %s6979_s4  ;;  %p6983_p3 = scmp.lt.u32.totalorder %s6979_s4, %s8213_s20 }
 0x1fd   :  { %p6985_p4 = pnand %p6983_p3, %p6980_p2 }
 0x1ff   :  { %6988 = shalt.err (!%p6985_p4)
}
 0x200   :  { %s6989_s24 = scalar_lea.vmem %s266_s14, 16  ;;  %s6993_s18 = scalar_lea.vmem %s266_s14, 32 }
 0x201   :  { %p6990_p5 = scmp.ne.s32.totalorder %s266_s14, %s6989_s24  ;;  %p6994_p6 = scmp.lt.s32.totalorder %s266_s14, %s266_s14 }
 0x202   :  { %p6995_p7 = scmp.lt.s32.totalorder %s6993_s18, %s6989_s24 }
 0x204   :  { %p6996_p8 = por %p6995_p7, %p6994_p6 }
 0x206   :  { %p6997_p9 = pnand %p6996_p8, %p6990_p5 }
 0x208   :  { %7000 = shalt.err (!%p6997_p9)
}
 0x209   :  { %s8214_s25 = sld [smem:[#allocation84_spill]] }
 0x20a   :  { %268 = dma.hbm_to_vmem [thread:$0]  %s8213_s20, 16, %s266_s14, [#allocation24]  }
 0x20f   :  { %s7001_s19 = scalar_lea.hbm %s8214_s25, 16 }
 0x210   :  { %p7002_p10 = scmp.ne.s32.totalorder %s8214_s25, %s7001_s19  ;;  %p7005_p11 = scmp.lt.u32.totalorder %s7001_s19, %s8214_s25 }
 0x212   :  { %p7007_p12 = pnand %p7005_p11, %p7002_p10 }
 0x214   :  { %7010 = shalt.err (!%p7007_p12)
}
 0x215   :  { %s7011_s22 = scalar_lea.vmem %s286_s30, 16  ;;  %s7015_s23 = scalar_lea.vmem %s286_s30, 32 }
 0x216   :  { %p7012_p13 = scmp.ne.s32.totalorder %s286_s30, %s7011_s22  ;;  %p7016_p0 = scmp.lt.s32.totalorder %s286_s30, %s286_s30 }
 0x217   :  { %p7017_p1 = scmp.lt.s32.totalorder %s7015_s23, %s7011_s22 }
 0x219   :  { %p7018_p2 = por %p7017_p1, %p7016_p0 }
 0x21b   :  { %p7019_p3 = pnand %p7018_p2, %p7012_p13 }
 0x21d   :  { %7022 = shalt.err (!%p7019_p3)
}
 0x21e   :  { %s8215_s26 = sld [smem:[#allocation85_spill]]  ;;  %s7350_s28 = smov [#allocation31]  }
 0x21f   :  { %288 = dma.hbm_to_vmem [thread:$0]  %s8214_s25, 16, %s286_s30, [#allocation27]  }
 0x220   :  { %s305_s12 = sshll.u32 %s7350_s28, 4  ;;  %s7351_s1 = smov [#allocation34]   ;;  %s306_s12 = int_to_ptr.vmem [resolvable:$true] %s305_s12 }
 0x221   :  { %s327_s8 = sshll.u32 %s7351_s1, 4  ;;  %s328_s8 = int_to_ptr.vmem [resolvable:$true] %s327_s8 }
 0x224   :  { %s7023_s3 = scalar_lea.hbm %s8215_s26, 16 }
 0x225   :  { %p7024_p4 = scmp.ne.s32.totalorder %s8215_s26, %s7023_s3  ;;  %p7027_p5 = scmp.lt.u32.totalorder %s7023_s3, %s8215_s26 }
 0x227   :  { %p7029_p6 = pnand %p7027_p5, %p7024_p4 }
 0x229   :  { %7032 = shalt.err (!%p7029_p6)
}
 0x22a   :  { %s7033_s27 = scalar_lea.vmem %s306_s12, 16  ;;  %s7037_s2 = scalar_lea.vmem %s306_s12, 32 }
 0x22b   :  { %p7034_p7 = scmp.ne.s32.totalorder %s306_s12, %s7033_s27  ;;  %p7038_p8 = scmp.lt.s32.totalorder %s306_s12, %s306_s12 }
 0x22c   :  { %p7039_p9 = scmp.lt.s32.totalorder %s7037_s2, %s7033_s27 }
 0x22e   :  { %p7040_p10 = por %p7039_p9, %p7038_p8 }
 0x230   :  { %p7041_p11 = pnand %p7040_p10, %p7034_p7 }
 0x232   :  { %7044 = shalt.err (!%p7041_p11)
}
 0x233   :  { %s8216_s10 = sld [smem:[#allocation86_spill]] }
 0x234   :  { %308 = dma.hbm_to_vmem [thread:$0]  %s8215_s26, 16, %s306_s12, [#allocation30]  }
 0x239   :  { %s7045_s11 = scalar_lea.hbm %s8216_s10, 48 }
 0x23a   :  { %p7046_p12 = scmp.ne.s32.totalorder %s8216_s10, %s7045_s11  ;;  %p7049_p13 = scmp.lt.u32.totalorder %s7045_s11, %s8216_s10 }
 0x23c   :  { %p7051_p0 = pnand %p7049_p13, %p7046_p12 }
 0x23e   :  { %7054 = shalt.err (!%p7051_p0)
}
 0x23f   :  { %s7055_s15 = scalar_lea.vmem %s328_s8, 48  ;;  %s7059_s6 = scalar_lea.vmem %s328_s8, 64 }
 0x240   :  { %p7056_p1 = scmp.ne.s32.totalorder %s328_s8, %s7055_s15  ;;  %p7060_p2 = scmp.lt.s32.totalorder %s328_s8, %s328_s8 }
 0x241   :  { %p7061_p3 = scmp.lt.s32.totalorder %s7059_s6, %s7055_s15 }
 0x243   :  { %p7062_p4 = por %p7061_p3, %p7060_p2 }
 0x245   :  { %p7063_p5 = pnand %p7062_p4, %p7056_p1 }
 0x247   :  { %7066 = shalt.err (!%p7063_p5)
}
 0x248   :  { %s8217_s0 = sld [smem:[#allocation87_spill]]  ;;  %s7352_s20 = smov [#allocation37]  }
 0x249   :  { %330 = dma.hbm_to_vmem [thread:$0]  %s8216_s10, 48, %s328_s8, [#allocation33]  }
 0x24a   :  { %s349_s17 = sshll.u32 %s7352_s20, 4  ;;  %s7353_s14 = smov [#allocation40]   ;;  %s350_s17 = int_to_ptr.vmem [resolvable:$true] %s349_s17 }
 0x24b   :  { %s372_s16 = sshll.u32 %s7353_s14, 4  ;;  %s373_s16 = int_to_ptr.vmem [resolvable:$true] %s372_s16 }
 0x24e   :  { %s7067_s30 = scalar_lea.hbm %s8217_s0, 16 }
 0x24f   :  { %p7068_p6 = scmp.ne.s32.totalorder %s8217_s0, %s7067_s30  ;;  %p7071_p7 = scmp.lt.u32.totalorder %s7067_s30, %s8217_s0 }
 0x251   :  { %p7073_p8 = pnand %p7071_p7, %p7068_p6 }
 0x253   :  { %7076 = shalt.err (!%p7073_p8)
}
 0x254   :  { %s7077_s4 = scalar_lea.vmem %s350_s17, 16  ;;  %s7081_s24 = scalar_lea.vmem %s350_s17, 32 }
 0x255   :  { %p7078_p9 = scmp.ne.s32.totalorder %s350_s17, %s7077_s4  ;;  %p7082_p10 = scmp.lt.s32.totalorder %s350_s17, %s350_s17 }
 0x256   :  { %p7083_p11 = scmp.lt.s32.totalorder %s7081_s24, %s7077_s4 }
 0x258   :  { %p7084_p12 = por %p7083_p11, %p7082_p10 }
 0x25a   :  { %p7085_p13 = pnand %p7084_p12, %p7078_p9 }
 0x25c   :  { %7088 = shalt.err (!%p7085_p13)
}
 0x25d   :  { %s8218_s18 = sld [smem:[#allocation89_spill]] }
 0x25e   :  { %352 = dma.hbm_to_vmem [thread:$0]  %s8217_s0, 16, %s350_s17, [#allocation36]  }
 0x263   :  { %s7089_s25 = scalar_lea.hbm %s8218_s18, 8192 }
 0x264   :  { %p7090_p0 = scmp.ne.s32.totalorder %s8218_s18, %s7089_s25  ;;  %p7093_p1 = scmp.lt.u32.totalorder %s7089_s25, %s8218_s18 }
 0x266   :  { %p7095_p2 = pnand %p7093_p1, %p7090_p0 }
 0x268   :  { %7098 = shalt.err (!%p7095_p2)
}
 0x269   :  { %s7099_s19 = scalar_lea.vmem %s373_s16, 8192  ;;  %p7104_p4 = scmp.lt.s32.totalorder %s373_s16, %s373_s16 }
 0x26a   :  { %p7100_p3 = scmp.ne.s32.totalorder %s373_s16, %s7099_s19  ;;  %p7105_p5 = scmp.lt.s32.totalorder %s7099_s19, %s7099_s19 }
 0x26c   :  { %p7106_p6 = por %p7105_p5, %p7104_p4 }
 0x26e   :  { %p7107_p7 = pnand %p7106_p6, %p7100_p3 }
 0x270   :  { %7110 = shalt.err (!%p7107_p7)
}
 0x271   :  { %s8219_s22 = sld [smem:[#allocation90_spill]]  ;;  %s7354_s23 = smov [#allocation43]  }
 0x272   :  { %378 = dma.hbm_to_vmem [thread:$0]  %s8218_s18, 8192, %s373_s16, [#allocation39], %s7322_s7, %s7322_s7, %s7323_s9  }
 0x273   :  { %s395_s26 = sshll.u32 %s7354_s23, 4  ;;  %s7355_s28 = smov [#allocation46]   ;;  %s396_s26 = int_to_ptr.vmem [resolvable:$true] %s395_s26 }
 0x274   :  { %s415_s12 = sshll.u32 %s7355_s28, 4  ;;  %s416_s12 = int_to_ptr.vmem [resolvable:$true] %s415_s12 }
 0x277   :  { %s7111_s1 = scalar_lea.hbm %s8219_s22, 16 }
 0x278   :  { %p7112_p8 = scmp.ne.s32.totalorder %s8219_s22, %s7111_s1  ;;  %p7115_p9 = scmp.lt.u32.totalorder %s7111_s1, %s8219_s22 }
 0x27a   :  { %p7117_p10 = pnand %p7115_p9, %p7112_p8 }
 0x27c   :  { %7120 = shalt.err (!%p7117_p10)
}
 0x27d   :  { %s7121_s8 = scalar_lea.vmem %s396_s26, 16  ;;  %s7125_s3 = scalar_lea.vmem %s396_s26, 32 }
 0x27e   :  { %p7122_p11 = scmp.ne.s32.totalorder %s396_s26, %s7121_s8  ;;  %p7126_p12 = scmp.lt.s32.totalorder %s396_s26, %s396_s26 }
 0x27f   :  { %p7127_p13 = scmp.lt.s32.totalorder %s7125_s3, %s7121_s8 }
 0x281   :  { %p7128_p0 = por %p7127_p13, %p7126_p12 }
 0x283   :  { %p7129_p1 = pnand %p7128_p0, %p7122_p11 }
 0x285   :  { %7132 = shalt.err (!%p7129_p1)
}
 0x286   :  { %s8220_s27 = sld [smem:[#allocation91_spill]] }
 0x287   :  { %398 = dma.hbm_to_vmem [thread:$0]  %s8219_s22, 16, %s396_s26, [#allocation42]  }
 0x28c   :  { %s7133_s2 = scalar_lea.hbm %s8220_s27, 16 }
 0x28d   :  { %p7134_p2 = scmp.ne.s32.totalorder %s8220_s27, %s7133_s2  ;;  %p7137_p3 = scmp.lt.u32.totalorder %s7133_s2, %s8220_s27 }
 0x28f   :  { %p7139_p4 = pnand %p7137_p3, %p7134_p2 }
 0x291   :  { %7142 = shalt.err (!%p7139_p4)
}
 0x292   :  { %s7143_s10 = scalar_lea.vmem %s416_s12, 16  ;;  %s7147_s11 = scalar_lea.vmem %s416_s12, 32 }
 0x293   :  { %p7144_p5 = scmp.ne.s32.totalorder %s416_s12, %s7143_s10  ;;  %p7148_p6 = scmp.lt.s32.totalorder %s416_s12, %s416_s12 }
 0x294   :  { %p7149_p7 = scmp.lt.s32.totalorder %s7147_s11, %s7143_s10 }
 0x296   :  { %p7150_p8 = por %p7149_p7, %p7148_p6 }
 0x298   :  { %p7151_p9 = pnand %p7150_p8, %p7144_p5 }
 0x29a   :  { %7154 = shalt.err (!%p7151_p9)
}
 0x29b   :  { %s8221_s15 = sld [smem:[#allocation93_spill]]  ;;  %s7356_s6 = smov [#allocation49]  }
 0x29c   :  { %418 = dma.hbm_to_vmem [thread:$0]  %s8220_s27, 16, %s416_s12, [#allocation45]  }
 0x29d   :  { %s434_s0 = sshll.u32 %s7356_s6, 4  ;;  %s435_s0 = int_to_ptr.vmem [resolvable:$true] %s434_s0 }
 0x2a1   :  { %s7155_s20 = scalar_lea.hbm %s8221_s15, 8192 }
 0x2a2   :  { %p7156_p10 = scmp.ne.s32.totalorder %s8221_s15, %s7155_s20  ;;  %p7159_p11 = scmp.lt.u32.totalorder %s7155_s20, %s8221_s15 }
 0x2a4   :  { %p7161_p12 = pnand %p7159_p11, %p7156_p10 }
 0x2a6   :  { %7164 = shalt.err (!%p7161_p12)
}
 0x2a7   :  { %s7165_s17 = scalar_lea.vmem %s435_s0, 8192  ;;  %p7170_p0 = scmp.lt.s32.totalorder %s435_s0, %s435_s0 }
 0x2a8   :  { %p7166_p13 = scmp.ne.s32.totalorder %s435_s0, %s7165_s17  ;;  %p7171_p1 = scmp.lt.s32.totalorder %s7165_s17, %s7165_s17 }
 0x2aa   :  { %p7172_p2 = por %p7171_p1, %p7170_p0 }
 0x2ac   :  { %p7173_p3 = pnand %p7172_p2, %p7166_p13 }
 0x2ae   :  { %7176 = shalt.err (!%p7173_p3)
}
 0x2af   :  { %s7357_s14 = smov 256   ;;  %s8222_s16 = sld [smem:[#allocation95_spill]] }
 0x2b0   :  { %s7358_s30 = smov 16   ;;  %s7359_s4 = smov [#allocation52]  }
 0x2b1   :  { %440 = dma.hbm_to_vmem [thread:$0]  %s8221_s15, 8192, %s435_s0, [#allocation48], %s7357_s14, %s7357_s14, %s7358_s30  }
 0x2b2   :  { %s456_s24 = sshll.u32 %s7359_s4, 4  ;;  %s7360_s18 = smov [#allocation53]   ;;  %s457_s24 = int_to_ptr.vmem [resolvable:$true] %s456_s24 }
 0x2b3   :  { %s469_s25 = sshll.u32 %s7360_s18, 4  ;;  %s470_s25 = int_to_ptr.vmem [resolvable:$true] %s469_s25 }
 0x2b5   :  { %s7177_s19 = scalar_lea.hbm %s8222_s16, 4096 }
 0x2b6   :  { %p7178_p4 = scmp.ne.s32.totalorder %s8222_s16, %s7177_s19  ;;  %p7181_p5 = scmp.lt.u32.totalorder %s7177_s19, %s8222_s16 }
 0x2b8   :  { %p7183_p6 = pnand %p7181_p5, %p7178_p4 }
 0x2ba   :  { %7186 = shalt.err (!%p7183_p6)
}
 0x2bb   :  { %s7187_s22 = scalar_lea.vmem %s457_s24, 4096  ;;  %p7192_p8 = scmp.lt.s32.totalorder %s457_s24, %s457_s24 }
 0x2bc   :  { %p7188_p7 = scmp.ne.s32.totalorder %s457_s24, %s7187_s22  ;;  %p7193_p9 = scmp.lt.s32.totalorder %s7187_s22, %s7187_s22 }
 0x2be   :  { %p7194_p10 = por %p7193_p9, %p7192_p8 }
 0x2c0   :  { %p7195_p11 = pnand %p7194_p10, %p7188_p7 }
 0x2c2   :  { %7198 = shalt.err (!%p7195_p11)
}
 0x2c3   :  { %462 = dma.hbm_to_vmem [thread:$0]  %s8222_s16, 4096, %s457_s24, [#allocation51], %s7322_s7, %s7322_s7, %s7323_s9  }
 0x2c4   :  { %s7199_s23 = scalar_lea.hbm %s7548_s13, 16 }
 0x2c5   :  { %p7200_p12 = scmp.ne.s32.totalorder %s7548_s13, %s7199_s23  ;;  %p7203_p13 = scmp.lt.u32.totalorder %s7199_s23, %s7548_s13 }
 0x2c7   :  { %p7205_p0 = pnand %p7203_p13, %p7200_p12 }
 0x2c9   :  { %7208 = shalt.err (!%p7205_p0)
}
 0x2ca   :  { %s7209_s26 = scalar_lea.vmem %s470_s25, 16  ;;  %s7213_s28 = scalar_lea.vmem %s470_s25, 32 }
 0x2cb   :  { %p7210_p1 = scmp.ne.s32.totalorder %s470_s25, %s7209_s26  ;;  %p7214_p2 = scmp.lt.s32.totalorder %s470_s25, %s470_s25 }
 0x2cc   :  { %p7215_p3 = scmp.lt.s32.totalorder %s7213_s28, %s7209_s26 }
 0x2ce   :  { %p7216_p4 = por %p7215_p3, %p7214_p2 }
 0x2d0   :  { %p7217_p5 = pnand %p7216_p4, %p7210_p1 }
 0x2d2   :  { %7220 = shalt.err (!%p7217_p5)
}
 0x2d3   :  { %472 = dma.hbm_to_vmem [thread:$0]  %s7548_s13, 16, %s470_s25, [#allocation54]  }
 0x2d4   :  { %7243 = dma.done.wait [#allocation3], 128  }
 0x2d5   :  { %7244 = vsyncadd [#allocation3], 4294967168 }
 0x2d6   :  { %7245 = dma.done.wait [#allocation6], 2816  }
 0x2d7   :  { %7246 = vsyncadd [#allocation6], 4294964480 }
 0x2d8   :  { %7247 = dma.done.wait [#allocation9], 2304  }
 0x2d9   :  { %7248 = vsyncadd [#allocation9], 4294964992 }
 0x2da   :  { %7249 = dma.done.wait [#allocation12], 12304  }
 0x2db   :  { %7250 = vsyncadd [#allocation12], 4294954992 }
 0x2dc   :  { %7251 = dma.done.wait [#allocation15], 6160  }
 0x2dd   :  { %7252 = vsyncadd [#allocation15], 4294961136 }
 0x2de   :  { %7253 = dma.done.wait [#allocation18], 2096  }
 0x2df   :  { %7254 = vsyncadd [#allocation18], 4294965200 }
 0x2e0   :  { %7255 = dma.done.wait [#allocation21], 8208  }
 0x2e1   :  { %7256 = vsyncadd [#allocation21], 4294959088 }
 0x2e2   :  { %7257 = dma.done.wait [#allocation24], 8208  }
 0x2e3   :  { %7258 = vsyncadd [#allocation24], 4294959088 }
 0x2e4   :  { %7259 = dma.done.wait [#allocation27], 32  }
 0x2e5   :  { %7260 = vsyncadd [#allocation27], 4294967264 }
 0x2e6   :  { %7261 = dma.done.wait [#allocation30], 32  }
 0x2e7   :  { %7262 = vsyncadd [#allocation30], 4294967264 }
 0x2e8   :  { %7263 = dma.done.wait [#allocation33], 6192  }
 0x2e9   :  { %7264 = vsyncadd [#allocation33], 4294961104 }
 0x2ea   :  { %7265 = dma.done.wait [#allocation36], 2064  }
 0x2eb   :  { %7266 = vsyncadd [#allocation36], 4294965232 }
 0x2ec   :  { %7267 = dma.done.wait [#allocation39], 16384  }
 0x2ed   :  { %7268 = vsyncadd [#allocation39], 4294950912 }
 0x2ee   :  { %7269 = dma.done.wait [#allocation42], 32  }
 0x2ef   :  { %7270 = vsyncadd [#allocation42], 4294967264 }
 0x2f0   :  { %7271 = dma.done.wait [#allocation45], 32  }
 0x2f1   :  { %7272 = vsyncadd [#allocation45], 4294967264 }
 0x2f2   :  { %7273 = dma.done.wait [#allocation48], 8208  }
 0x2f3   :  { %7274 = vsyncadd [#allocation48], 4294959088 }
 0x2f4   :  { %7275 = dma.done.wait [#allocation51], 4128  }
 0x2f5   :  { %7276 = vsyncadd [#allocation51], 4294963168 }
 0x2f6   :  { %7277 = dma.done.wait [#allocation54], 16  }
 0x2f7   :  { %7278 = vsyncadd [#allocation54], 4294967280  ;;  %v7361_v0 = vmov 0.0|0.0   ;;  %vm7362_vm0 = vmmov 0   ;;  %v7363_v1 = vmov 0.0   ;;  %v611_v2 = vld [vmem:[#allocation10] sm:$0xff] }
 0x2f8   :  { %5298 = vmatprep.subr.bf16.mxu0 %v7361_v0  ;;  %4700 = vmatprep.mubr.msk.f32.mxu0 %vm7362_vm0, %v7363_v1  ;;  %v612_v3 = vld [vmem:[#allocation10 + $0x8] sm:$0xff]  ;;  %v630_v4 = vld [vmem:[#allocation13 + $0x80] sm:$0xff]  ;;  %v631_v6 = vld [vmem:[#allocation13 + $0x88] sm:$0xff]  ;;  %vm1233_vm1 = vcmask 130048   ;;  %s8223_s13 = sld [smem:[#allocation82_spill]]  ;;  %s8224_s7 = sld [smem:[#allocation88_spill]] }
 0x2f9   :  { %v5299_v5 = vpack.c.bf16 %v612_v3, %v611_v2  ;;  %v614_v7 = vld [vmem:[#allocation13] sm:$0xff]  ;;  %v615_v8 = vld [vmem:[#allocation13 + $0x8] sm:$0xff]  ;;  %v5301_v9 = vpack.c.bf16 %v631_v6, %v630_v4  ;;  %v1226_v13 = vld [vmem:[#allocation2] sm:$0xff]  ;;  %s7364_s9 = smov [#allocation55]  }
 0x2fa   :  { %v5303_v10 = vpack.c.bf16 %v615_v8, %v614_v7  ;;  %v662_v11 = vld [vmem:[#allocation13 + $0x180] sm:$0xff]  ;;  %v663_v12 = vld [vmem:[#allocation13 + $0x188] sm:$0xff]  ;;  %v632_v15 = vld [vmem:[#allocation13 + $0x90] sm:$0xff]  ;;  %s4015_s12 = sshll.u32 %s7364_s9, 4  ;;  %s4016_s12 = int_to_ptr.vmem [resolvable:$true] %s4015_s12 }
 0x2fb   :  { %5300 = vmatpush3.bf16.msra.mxu0 %v5299_v5  ;;  %v5333_v14 = vpack.c.bf16 %v663_v12, %v662_v11  ;;  %v633_v16 = vld [vmem:[#allocation13 + $0x98] sm:$0xff]  ;;  %v646_v17 = vld [vmem:[#allocation13 + $0x100] sm:$0xff]  ;;  %5302 = vmatprep.subr.bf16.mxu1 %v5301_v9  ;;  %v647_v19 = vld [vmem:[#allocation13 + $0x108] sm:$0xff]  ;;  %s7221_s1 = scalar_lea.vmem %s4016_s12, 128  ;;  %p7226_p7 = scmp.lt.s32.totalorder %s4016_s12, %s4016_s12 }
 0x2fc   :  { %v5305_v18 = vpack.c.bf16 %v633_v16, %v632_v15  ;;  %v616_v20 = vld [vmem:[#allocation13 + $0x10] sm:$0xff]  ;;  %v617_v21 = vld [vmem:[#allocation13 + $0x18] sm:$0xff]  ;;  %5304 = vmatpush3.bf16.msra.mxu1 %v5303_v10  ;;  %v5335_v22 = vpack.c.bf16 %v647_v19, %v646_v17  ;;  %v634_v26 = vld [vmem:[#allocation13 + $0xa0] sm:$0xff]  ;;  %p7222_p6 = scmp.ne.s32.totalorder %s4016_s12, %s7221_s1  ;;  %p7227_p8 = scmp.lt.s32.totalorder %s7221_s1, %s7221_s1 }
 0x2fd   :  { %5334 = vmatprep.subr.bf16.mxu0 %v5333_v14  ;;  %v5307_v23 = vpack.c.bf16 %v617_v21, %v616_v20  ;;  %v664_v24 = vld [vmem:[#allocation13 + $0x190] sm:$0xff]  ;;  %v665_v25 = vld [vmem:[#allocation13 + $0x198] sm:$0xff]  ;;  %v635_v28 = vld [vmem:[#allocation13 + $0xa8] sm:$0xff] }
 0x2fe   :  { %4701 = vmatmul.mubr.msk.f32.vlgmr.msra.gmra.mrb[0].mxu0 %vm1233_vm1, %v1226_v13  ;;  %5306 = vmatprep.subr.bf16.mxu1 %v5305_v18  ;;  %v5337_v27 = vpack.c.bf16 %v665_v25, %v664_v24  ;;  %v648_v29 = vld [vmem:[#allocation13 + $0x110] sm:$0xff]  ;;  %v649_v30 = vld [vmem:[#allocation13 + $0x118] sm:$0xff]  ;;  %v5309_v31 = vpack.c.bf16 %v635_v28, %v634_v26  ;;  %v618_v33 = vld [vmem:[#allocation13 + $0x20] sm:$0xff]  ;;  %p7228_p9 = por %p7227_p8, %p7226_p7 }
 0x2ff   :  { %5336 = vmatpush3.bf16.msra.mxu0 %v5335_v22  ;;  %v5339_v32 = vpack.c.bf16 %v649_v30, %v648_v29  ;;  %v619_v34 = vld [vmem:[#allocation13 + $0x28] sm:$0xff]  ;;  %v666_v35 = vld [vmem:[#allocation13 + $0x1a0] sm:$0xff]  ;;  %v636_v37 = vld [vmem:[#allocation13 + $0xb0] sm:$0xff] }
 0x300   :  { %5338 = vmatprep.subr.bf16.mxu0 %v5337_v27  ;;  %v667_v36 = vld [vmem:[#allocation13 + $0x1a8] sm:$0xff]  ;;  %v637_v38 = vld [vmem:[#allocation13 + $0xb8] sm:$0xff]  ;;  %5308 = vmatpush3.bf16.msra.mxu1 %v5307_v23  ;;  %v5311_v39 = vpack.c.bf16 %v619_v34, %v618_v33  ;;  %v650_v41 = vld [vmem:[#allocation13 + $0x120] sm:$0xff]  ;;  %p7229_p10 = pnand %p7228_p9, %p7222_p6 }
 0x301   :  { %v5341_v40 = vpack.c.bf16 %v667_v36, %v666_v35  ;;  %v651_v42 = vld [vmem:[#allocation13 + $0x128] sm:$0xff]  ;;  %v620_v43 = vld [vmem:[#allocation13 + $0x30] sm:$0xff]  ;;  %5310 = vmatprep.subr.bf16.mxu1 %v5309_v31  ;;  %v5313_v44 = vpack.c.bf16 %v637_v38, %v636_v37  ;;  %v621_v45 = vld [vmem:[#allocation13 + $0x38] sm:$0xff] }
 0x302   :  { %v668_v46 = vld [vmem:[#allocation13 + $0x1b0] sm:$0xff]  ;;  %v669_v47 = vld [vmem:[#allocation13 + $0x1b8] sm:$0xff]  ;;  %v5343_v48 = vpack.c.bf16 %v651_v42, %v650_v41  ;;  %v638_v49 = vld [vmem:[#allocation13 + $0xc0] sm:$0xff]  ;;  %v5315_v54 = vpack.c.bf16 %v621_v45, %v620_v43 }
 0x303   :  { %5340 = vmatpush3.bf16.msra.mxu0 %v5339_v32  ;;  %v639_v50 = vld [vmem:[#allocation13 + $0xc8] sm:$0xff]  ;;  %v5345_v51 = vpack.c.bf16 %v669_v47, %v668_v46  ;;  %v652_v52 = vld [vmem:[#allocation13 + $0x130] sm:$0xff]  ;;  %v653_v53 = vld [vmem:[#allocation13 + $0x138] sm:$0xff] }
 0x304   :  { %5342 = vmatprep.subr.bf16.mxu0 %v5341_v40  ;;  %5312 = vmatpush3.bf16.msra.mxu1 %v5311_v39  ;;  %v670_v55 = vld [vmem:[#allocation13 + $0x1c0] sm:$0xff]  ;;  %v671_v56 = vld [vmem:[#allocation13 + $0x1c8] sm:$0xff]  ;;  %v5317_v57 = vpack.c.bf16 %v639_v50, %v638_v49  ;;  %v5347_v60 = vpack.c.bf16 %v653_v53, %v652_v52  ;;  %v640_v61 = vld [vmem:[#allocation13 + $0xd0] sm:$0xff] }
 0x305   :  { %5314 = vmatprep.subr.bf16.mxu1 %v5313_v44  ;;  %v622_v58 = vld [vmem:[#allocation13 + $0x40] sm:$0xff]  ;;  %v623_v59 = vld [vmem:[#allocation13 + $0x48] sm:$0xff]  ;;  %v641_v62 = vld [vmem:[#allocation13 + $0xd8] sm:$0xff]  ;;  %v5349_v63 = vpack.c.bf16 %v671_v56, %v670_v55 }
 0x306   :  { %v654_v2 = vld [vmem:[#allocation13 + $0x140] sm:$0xff]  ;;  %v655_v3 = vld [vmem:[#allocation13 + $0x148] sm:$0xff]  ;;  %v5319_v4 = vpack.c.bf16 %v623_v59, %v622_v58  ;;  %v672_v5 = vld [vmem:[#allocation13 + $0x1d0] sm:$0xff]  ;;  %v5321_v7 = vpack.c.bf16 %v641_v62, %v640_v61 }
 0x307   :  { %5344 = vmatpush3.bf16.msra.mxu0 %v5343_v48  ;;  %v673_v6 = vld [vmem:[#allocation13 + $0x1d8] sm:$0xff]  ;;  %v624_v8 = vld [vmem:[#allocation13 + $0x50] sm:$0xff]  ;;  %v5351_v10 = vpack.c.bf16 %v655_v3, %v654_v2  ;;  %v642_v11 = vld [vmem:[#allocation13 + $0xe0] sm:$0xff] }
 0x308   :  { %5346 = vmatprep.subr.bf16.mxu0 %v5345_v51  ;;  %5316 = vmatpush3.bf16.msra.mxu1 %v5315_v54  ;;  %v625_v9 = vld [vmem:[#allocation13 + $0x58] sm:$0xff]  ;;  %v643_v12 = vld [vmem:[#allocation13 + $0xe8] sm:$0xff]  ;;  %v5353_v13 = vpack.c.bf16 %v673_v6, %v672_v5  ;;  %v656_v14 = vld [vmem:[#allocation13 + $0x150] sm:$0xff] }
 0x309   :  { %5318 = vmatprep.subr.bf16.mxu1 %v5317_v57  ;;  %v657_v15 = vld [vmem:[#allocation13 + $0x158] sm:$0xff]  ;;  %v5323_v16 = vpack.c.bf16 %v625_v9, %v624_v8  ;;  %v674_v17 = vld [vmem:[#allocation13 + $0x1e0] sm:$0xff]  ;;  %v675_v18 = vld [vmem:[#allocation13 + $0x1e8] sm:$0xff]  ;;  %v5325_v20 = vpack.c.bf16 %v643_v12, %v642_v11 }
 0x30a   :  { %v1309_v19 = vld [vmem:[#allocation5 + $0x8] sm:$0xff]  ;;  %v5355_v23 = vpack.c.bf16 %v657_v15, %v656_v14  ;;  %v644_v24 = vld [vmem:[#allocation13 + $0xf0] sm:$0xff]  ;;  %v645_v25 = vld [vmem:[#allocation13 + $0xf8] sm:$0xff]  ;;  %v5357_v26 = vpack.c.bf16 %v675_v18, %v674_v17 }
 0x30b   :  { %5348 = vmatpush3.bf16.msra.mxu0 %v5347_v60  ;;  %v626_v21 = vld [vmem:[#allocation13 + $0x60] sm:$0xff]  ;;  %v627_v22 = vld [vmem:[#allocation13 + $0x68] sm:$0xff]  ;;  %1384 = vmatprep.mubr.f32.mxu1 %v1309_v19  ;;  %v1311_v29 = vld [vmem:[#allocation5 + $0x18] sm:$0xff]  ;;  %v5329_v33 = vpack.c.bf16 %v645_v25, %v644_v24 }
 0x30c   :  { %5350 = vmatprep.subr.bf16.mxu0 %v5349_v63  ;;  %5320 = vmatpush3.bf16.msra.mxu1 %v5319_v4  ;;  %v658_v27 = vld [vmem:[#allocation13 + $0x160] sm:$0xff]  ;;  %v659_v28 = vld [vmem:[#allocation13 + $0x168] sm:$0xff]  ;;  %v5327_v30 = vpack.c.bf16 %v627_v22, %v626_v21  ;;  %v676_v31 = vld [vmem:[#allocation13 + $0x1f0] sm:$0xff] }
 0x30d   :  { %5322 = vmatprep.subr.bf16.mxu1 %v5321_v7  ;;  %v677_v32 = vld [vmem:[#allocation13 + $0x1f8] sm:$0xff]  ;;  %1454 = vmatprep.mubr.f32.mxu0 %v1311_v29  ;;  %v628_v34 = vld [vmem:[#allocation13 + $0x70] sm:$0xff]  ;;  %v5359_v36 = vpack.c.bf16 %v659_v28, %v658_v27  ;;  %v694_v37 = vld [vmem:[#allocation13 + $0x280] sm:$0xff] }
 0x30e   :  { %v629_v35 = vld [vmem:[#allocation13 + $0x78] sm:$0xff]  ;;  %v695_v38 = vld [vmem:[#allocation13 + $0x288] sm:$0xff]  ;;  %v5361_v39 = vpack.c.bf16 %v677_v32, %v676_v31  ;;  %v660_v40 = vld [vmem:[#allocation13 + $0x170] sm:$0xff] }
 0x30f   :  { %5352 = vmatpush3.bf16.msra.mxu0 %v5351_v10  ;;  %v661_v41 = vld [vmem:[#allocation13 + $0x178] sm:$0xff]  ;;  %v5331_v42 = vpack.c.bf16 %v629_v35, %v628_v34  ;;  %v5365_v43 = vpack.c.bf16 %v695_v38, %v694_v37  ;;  %v678_v44 = vld [vmem:[#allocation13 + $0x200] sm:$0xff]  ;;  %v679_v45 = vld [vmem:[#allocation13 + $0x208] sm:$0xff] }
 0x310   :  { %5354 = vmatprep.subr.bf16.mxu0 %v5353_v13  ;;  %5324 = vmatpush3.bf16.msra.mxu1 %v5323_v16  ;;  %v5363_v46 = vpack.c.bf16 %v661_v41, %v660_v40  ;;  %v696_v47 = vld [vmem:[#allocation13 + $0x290] sm:$0xff]  ;;  %v697_v48 = vld [vmem:[#allocation13 + $0x298] sm:$0xff]  ;;  %v5367_v50 = vpack.c.bf16 %v679_v45, %v678_v44  ;;  %v698_v55 = vld [vmem:[#allocation13 + $0x2a0] sm:$0xff] }
 0x311   :  { %5326 = vmatprep.subr.bf16.mxu1 %v5325_v20  ;;  %v1308_v49 = vld [vmem:[#allocation5] sm:$0xff]  ;;  %v1310_v51 = vld [vmem:[#allocation5 + $0x10] sm:$0xff]  ;;  %v5369_v54 = vpack.c.bf16 %v697_v48, %v696_v47  ;;  %v1313_v57 = vld [vmem:[#allocation5 + $0x28] sm:$0xff] }
 0x312   :  { %v680_v52 = vld [vmem:[#allocation13 + $0x210] sm:$0xff]  ;;  %v681_v53 = vld [vmem:[#allocation13 + $0x218] sm:$0xff]  ;;  %v699_v56 = vld [vmem:[#allocation13 + $0x2a8] sm:$0xff] }
 0x313   :  { %5356 = vmatpush3.bf16.msra.mxu0 %v5355_v23  ;;  %v712_v58 = vld [vmem:[#allocation16 + $0x8] sm:$0xff]  ;;  %v715_v59 = vld [vmem:[#allocation16 + $0x20] sm:$0xff]  ;;  %v714_v62 = vld [vmem:[#allocation16 + $0x18] sm:$0xff]  ;;  %v5371_v3 = vpack.c.bf16 %v681_v53, %v680_v52  ;;  %v5373_v9 = vpack.c.bf16 %v699_v56, %v698_v55 }
 0x314   :  { %5358 = vmatprep.subr.bf16.mxu0 %v5357_v26  ;;  %5328 = vmatpush3.bf16.msra.mxu1 %v5327_v30  ;;  %v711_v60 = vld [vmem:[#allocation16] sm:$0xff]  ;;  %v5397_v61 = vpack.c.bf16 %v715_v59, %v712_v58  ;;  %v718_v63 = vld [vmem:[#allocation16 + $0x38] sm:$0xff]  ;;  %v721_v2 = vld [vmem:[#allocation16 + $0x50] sm:$0xff] }
 0x315   :  { %5330 = vmatprep.subr.bf16.mxu1 %v5329_v33  ;;  %v682_v4 = vld [vmem:[#allocation13 + $0x220] sm:$0xff]  ;;  %v5399_v5 = vpack.c.bf16 %v714_v62, %v711_v60  ;;  %v5401_v6 = vpack.c.bf16 %v721_v2, %v718_v63  ;;  %v717_v7 = vld [vmem:[#allocation16 + $0x30] sm:$0xff]  ;;  %v720_v8 = vld [vmem:[#allocation16 + $0x48] sm:$0xff] }
 0x316   :  { %v683_v10 = vld [vmem:[#allocation13 + $0x228] sm:$0xff]  ;;  %v700_v13 = vld [vmem:[#allocation13 + $0x2b0] sm:$0xff]  ;;  %v701_v14 = vld [vmem:[#allocation13 + $0x2b8] sm:$0xff]  ;;  %v5403_v15 = vpack.c.bf16 %v720_v8, %v717_v7 }
 0x317   :  { %5360 = vmatpush3.bf16.msra.mxu0 %v5359_v36  ;;  %v724_v11 = vld [vmem:[#allocation16 + $0x68] sm:$0xff]  ;;  %v727_v12 = vld [vmem:[#allocation16 + $0x80] sm:$0xff]  ;;  %v5375_v16 = vpack.c.bf16 %v683_v10, %v682_v4  ;;  %v726_v20 = vld [vmem:[#allocation16 + $0x78] sm:$0xff]  ;;  %v5377_v21 = vpack.c.bf16 %v701_v14, %v700_v13 }
 0x318   :  { %5362 = vmatprep.subr.bf16.mxu0 %v5361_v39  ;;  %5332 = vmatpush3.bf16.msra.mxu1 %v5331_v42  ;;  %v684_v17 = vld [vmem:[#allocation13 + $0x230] sm:$0xff]  ;;  %v5405_v18 = vpack.c.bf16 %v727_v12, %v724_v11  ;;  %v723_v19 = vld [vmem:[#allocation16 + $0x60] sm:$0xff]  ;;  %v685_v22 = vld [vmem:[#allocation13 + $0x238] sm:$0xff] }
 0x319   :  { %5366 = vmatprep.subr.bf16.mxu1 %v5365_v43  ;;  %v730_v23 = vld [vmem:[#allocation16 + $0x98] sm:$0xff]  ;;  %v733_v24 = vld [vmem:[#allocation16 + $0xb0] sm:$0xff]  ;;  %v703_v26 = vld [vmem:[#allocation13 + $0x2c8] sm:$0xff]  ;;  %v5407_v27 = vpack.c.bf16 %v726_v20, %v723_v19  ;;  %v5379_v28 = vpack.c.bf16 %v685_v22, %v684_v17 }
 0x31a   :  { %v702_v25 = vld [vmem:[#allocation13 + $0x2c0] sm:$0xff]  ;;  %v5409_v30 = vpack.c.bf16 %v733_v24, %v730_v23  ;;  %v729_v31 = vld [vmem:[#allocation16 + $0x90] sm:$0xff]  ;;  %v732_v32 = vld [vmem:[#allocation16 + $0xa8] sm:$0xff] }
 0x31b   :  { %5364 = vmatpush3.bf16.msra.mxu0 %v5363_v46  ;;  %1385 = vmatmul.mubr.f32.vlgmr.msra.gmra.mrb[0].mxu1 %v1308_v49  ;;  %v686_v29 = vld [vmem:[#allocation13 + $0x240] sm:$0xff]  ;;  %v5381_v33 = vpack.c.bf16 %v703_v26, %v702_v25  ;;  %v687_v34 = vld [vmem:[#allocation13 + $0x248] sm:$0xff]  ;;  %v704_v37 = vld [vmem:[#allocation13 + $0x2d0] sm:$0xff]  ;;  %v5411_v39 = vpack.c.bf16 %v732_v32, %v729_v31 }
 0x31c   :  { %5368 = vmatpush3.bf16.msra.mxu1 %v5367_v50  ;;  %1524 = vmatprep.mubr.f32.mxu1 %v1313_v57  ;;  %v736_v35 = vld [vmem:[#allocation16 + $0xc8] sm:$0xff]  ;;  %v739_v36 = vld [vmem:[#allocation16 + $0xe0] sm:$0xff]  ;;  %v705_v38 = vld [vmem:[#allocation13 + $0x2d8] sm:$0xff]  ;;  %v5383_v40 = vpack.c.bf16 %v687_v34, %v686_v29 }
 0x31d   :  { %5370 = vmatprep.subr.bf16.mxu1 %v5369_v54  ;;  %5398 = vmatprep.subr.bf16.mxu0 %v5397_v61  ;;  %v688_v41 = vld [vmem:[#allocation13 + $0x250] sm:$0xff]  ;;  %v5413_v42 = vpack.c.bf16 %v739_v36, %v736_v35  ;;  %v735_v43 = vld [vmem:[#allocation16 + $0xc0] sm:$0xff]  ;;  %v738_v44 = vld [vmem:[#allocation16 + $0xd8] sm:$0xff]  ;;  %v5385_v45 = vpack.c.bf16 %v705_v38, %v704_v37 }
 0x31e   :  { %1455 = vmatmul.mubr.f32.vlgmr.msra.gmra.mrb[2].mxu0 %v1310_v51  ;;  %v689_v46 = vld [vmem:[#allocation13 + $0x258] sm:$0xff]  ;;  %v706_v49 = vld [vmem:[#allocation13 + $0x2e0] sm:$0xff]  ;;  %v707_v50 = vld [vmem:[#allocation13 + $0x2e8] sm:$0xff]  ;;  %v5415_v51 = vpack.c.bf16 %v738_v44, %v735_v43 }
 0x31f   :  { %1611 = vmatprep.mubr.f32.mxu0 %v7363_v1  ;;  %5400 = vmatpush1.bf16.msra.mxu0 %v5399_v5  ;;  %v742_v47 = vld [vmem:[#allocation16 + $0xf8] sm:$0xff]  ;;  %v745_v48 = vld [vmem:[#allocation16 + $0x110] sm:$0xff]  ;;  %v5387_v52 = vpack.c.bf16 %v689_v46, %v688_v41  ;;  %v744_v56 = vld [vmem:[#allocation16 + $0x108] sm:$0xff]  ;;  %v5389_v57 = vpack.c.bf16 %v707_v50, %v706_v49 }
 0x320   :  { %5372 = vmatpush3.bf16.msra.mxu1 %v5371_v3  ;;  %5402 = vmatprep.subr.bf16.mxu0 %v5401_v6  ;;  %v690_v53 = vld [vmem:[#allocation13 + $0x260] sm:$0xff]  ;;  %v5417_v54 = vpack.c.bf16 %v745_v48, %v742_v47  ;;  %v741_v55 = vld [vmem:[#allocation16 + $0xf0] sm:$0xff]  ;;  %v691_v58 = vld [vmem:[#allocation13 + $0x268] sm:$0xff] }
 0x321   :  { %5374 = vmatprep.subr.bf16.mxu1 %v5373_v9  ;;  %v748_v59 = vld [vmem:[#allocation16 + $0x128] sm:$0xff]  ;;  %v751_v60 = vld [vmem:[#allocation16 + $0x140] sm:$0xff]  ;;  %v709_v62 = vld [vmem:[#allocation13 + $0x2f8] sm:$0xff]  ;;  %v5419_v63 = vpack.c.bf16 %v744_v56, %v741_v55  ;;  %v5391_v2 = vpack.c.bf16 %v691_v58, %v690_v53 }
 0x322   :  { %v708_v61 = vld [vmem:[#allocation13 + $0x2f0] sm:$0xff]  ;;  %v5421_v3 = vpack.c.bf16 %v751_v60, %v748_v59  ;;  %v747_v4 = vld [vmem:[#allocation16 + $0x120] sm:$0xff]  ;;  %v750_v5 = vld [vmem:[#allocation16 + $0x138] sm:$0xff] }
 0x323   :  { %5404 = vmatpush1.bf16.msra.mxu0 %v5403_v15  ;;  %v5393_v6 = vpack.c.bf16 %v709_v62, %v708_v61  ;;  %v692_v7 = vld [vmem:[#allocation13 + $0x270] sm:$0xff]  ;;  %v693_v8 = vld [vmem:[#allocation13 + $0x278] sm:$0xff]  ;;  %v5423_v9 = vpack.c.bf16 %v750_v5, %v747_v4  ;;  %v4081_v48 = vld [vmem:[#allocation14] ss:$0 sm:$0xff] }
 0x324   :  { %5376 = vmatpush3.bf16.msra.mxu1 %v5375_v16  ;;  %5406 = vmatprep.subr.bf16.mxu0 %v5405_v18  ;;  %v5395_v10 = vpack.c.bf16 %v693_v8, %v692_v7  ;;  %v1312_v11 = vld [vmem:[#allocation5 + $0x20] sm:$0xff]  ;;  %v757_v13 = vld [vmem:[#allocation16 + $0x170] sm:$0xff]  ;;  %v756_v16 = vld [vmem:[#allocation16 + $0x168] sm:$0xff] }
 0x325   :  { %5378 = vmatprep.subr.bf16.mxu1 %v5377_v21  ;;  %v754_v12 = vld [vmem:[#allocation16 + $0x158] sm:$0xff]  ;;  %v753_v15 = vld [vmem:[#allocation16 + $0x150] sm:$0xff]  ;;  %v716_v19 = vld [vmem:[#allocation16 + $0x28] sm:$0xff] }
 0x326   :  { %v5425_v14 = vpack.c.bf16 %v757_v13, %v754_v12  ;;  %v5427_v17 = vpack.c.bf16 %v756_v16, %v753_v15  ;;  %v713_v18 = vld [vmem:[#allocation16 + $0x10] sm:$0xff]  ;;  %v719_v21 = vld [vmem:[#allocation16 + $0x40] sm:$0xff]  ;;  %v722_v22 = vld [vmem:[#allocation16 + $0x58] sm:$0xff] }
 0x327   :  { %5408 = vmatpush1.bf16.msra.mxu0 %v5407_v27  ;;  %v5429_v20 = vpack.c.bf16 %v716_v19, %v713_v18  ;;  %v5433_v23 = vpack.c.bf16 %v722_v22, %v719_v21  ;;  %v725_v24 = vld [vmem:[#allocation16 + $0x70] sm:$0xff]  ;;  %v728_v25 = vld [vmem:[#allocation16 + $0x88] sm:$0xff]  ;;  %v731_v27 = vld [vmem:[#allocation16 + $0xa0] sm:$0xff] }
 0x328   :  { %5380 = vmatpush3.bf16.msra.mxu1 %v5379_v28  ;;  %5410 = vmatprep.subr.bf16.mxu0 %v5409_v30  ;;  %v5437_v26 = vpack.c.bf16 %v728_v25, %v725_v24  ;;  %v734_v28 = vld [vmem:[#allocation16 + $0xb8] sm:$0xff]  ;;  %v737_v30 = vld [vmem:[#allocation16 + $0xd0] sm:$0xff]  ;;  %v740_v31 = vld [vmem:[#allocation16 + $0xe8] sm:$0xff] }
 0x329   :  { %5382 = vmatprep.subr.bf16.mxu1 %v5381_v33  ;;  %v5441_v29 = vpack.c.bf16 %v734_v28, %v731_v27  ;;  %v5445_v32 = vpack.c.bf16 %v740_v31, %v737_v30  ;;  %v743_v33 = vld [vmem:[#allocation16 + $0x100] sm:$0xff]  ;;  %v746_v34 = vld [vmem:[#allocation16 + $0x118] sm:$0xff]  ;;  %v749_v36 = vld [vmem:[#allocation16 + $0x130] sm:$0xff] }
 0x32a   :  { %v5449_v35 = vpack.c.bf16 %v746_v34, %v743_v33  ;;  %v752_v37 = vld [vmem:[#allocation16 + $0x148] sm:$0xff]  ;;  %v580_v62 = vld [vmem:[#allocation7 + $0x8] sm:$0xff]  ;;  %v585_v8 = vld [vmem:[#allocation7 + $0x30] sm:$0xff] }
 0x32b   :  { %5412 = vmatpush1.bf16.msra.mxu0 %v5411_v39  ;;  %v5453_v38 = vpack.c.bf16 %v752_v37, %v749_v36  ;;  %v755_v39 = vld [vmem:[#allocation16 + $0x160] sm:$0xff]  ;;  %v579_v61 = vld [vmem:[#allocation7] sm:$0xff]  ;;  %v588_v12 = vld [vmem:[#allocation7 + $0x48] sm:$0xff] }
 0x32c   :  { %5384 = vmatpush3.bf16.msra.mxu1 %v5383_v40  ;;  %5414 = vmatprep.subr.bf16.mxu0 %v5413_v42  ;;  %v758_v40 = vld [vmem:[#allocation16 + $0x178] sm:$0xff]  ;;  %v583_v5 = vld [vmem:[#allocation7 + $0x20] sm:$0xff]  ;;  %v590_v15 = vld [vmem:[#allocation7 + $0x58] sm:$0xff] }
 0x32d   :  { %5386 = vmatprep.subr.bf16.mxu1 %v5385_v45  ;;  %v5457_v41 = vpack.c.bf16 %v758_v40, %v755_v39  ;;  %v4079_v42 = vld [vmem:[#allocation11] ss:$0 sm:$0xff]  ;;  %v592_v18 = vld [vmem:[#allocation7 + $0x68] sm:$0xff]  ;;  %v594_v21 = vld [vmem:[#allocation7 + $0x78] sm:$0xff] }
 0x32f   :  { %5416 = vmatpush1.bf16.msra.mxu0 %v5415_v51 }
 0x330   :  { %5388 = vmatpush3.bf16.msra.mxu1 %v5387_v52  ;;  %5418 = vmatprep.subr.bf16.mxu0 %v5417_v54 }
 0x331   :  { %5390 = vmatprep.subr.bf16.mxu1 %v5389_v57 }
 0x333   :  { %5420 = vmatpush1.bf16.msra.mxu0 %v5419_v63  ;;  %v581_v63 = vld [vmem:[#allocation7 + $0x10] sm:$0xff] }
 0x334   :  { %5392 = vmatpush3.bf16.msra.mxu1 %v5391_v2  ;;  %5422 = vmatprep.subr.bf16.mxu0 %v5421_v3  ;;  %v7754_v2 = vpack.c.bf16 %v580_v62, %v579_v61  ;;  %v582_v3 = vld [vmem:[#allocation7 + $0x18] sm:$0xff]  ;;  %v766_v61 = vld [vmem:[#allocation19 + $0x30] sm:$0xff]  ;;  %v767_v62 = vld [vmem:[#allocation19 + $0x38] sm:$0xff] }
 0x335   :  { %5394 = vmatprep.subr.bf16.mxu1 %v5393_v6  ;;  %v7756_v4 = vpack.c.bf16 %v582_v3, %v581_v63  ;;  %v584_v6 = vld [vmem:[#allocation7 + $0x28] sm:$0xff]  ;;  %v5537_v63 = vpack.c.bf16 %v767_v62, %v766_v61  ;;  %v768_v3 = vld [vmem:[#allocation19 + $0x40] sm:$0xff] }
 0x336   :  { %v7764_v7 = vpack.c.bf16 %v584_v6, %v583_v5  ;;  %v769_v5 = vld [vmem:[#allocation19 + $0x48] sm:$0xff] }
 0x337   :  { %5424 = vmatpush1.bf16.msra.mxu0 %v5423_v9  ;;  %v586_v9 = vld [vmem:[#allocation7 + $0x38] sm:$0xff]  ;;  %v5541_v6 = vpack.c.bf16 %v769_v5, %v768_v3 }
 0x338   :  { %5396 = vmatpush3.bf16.msra.mxu1 %v5395_v10  ;;  %5426 = vmatprep.subr.bf16.mxu0 %v5425_v14  ;;  %v7770_v10 = vpack.c.bf16 %v586_v9, %v585_v8  ;;  %v589_v14 = vld [vmem:[#allocation7 + $0x50] sm:$0xff]  ;;  %v770_v8 = vld [vmem:[#allocation19 + $0x50] sm:$0xff] }
 0x339   :  { %5430 = vmatprep.subr.bf16.mxu1 %v5429_v20  ;;  %v7782_v16 = vpack.c.bf16 %v590_v15, %v589_v14  ;;  %v771_v9 = vld [vmem:[#allocation19 + $0x58] sm:$0xff]  ;;  %v773_v14 = vld [vmem:[#allocation19 + $0x68] sm:$0xff] }
 0x33b   :  { %1525 = vmatmul.mubr.f32.vlgmr.msra.gmra.mrb[2].mxu1 %v1312_v11  ;;  %5428 = vmatpush1.bf16.msra.mxu0 %v5427_v17  ;;  %v587_v11 = vld [vmem:[#allocation7 + $0x40] sm:$0xff] }
 0x33c   :  { %5432 = vmatpush3.bf16.msra.mxu1 %v5429_v20  ;;  %5462 = vmatprep.subr.bf16.mxu0 %v7754_v2  ;;  %v7776_v13 = vpack.c.bf16 %v588_v12, %v587_v11  ;;  %v591_v17 = vld [vmem:[#allocation7 + $0x60] sm:$0xff]  ;;  %v593_v20 = vld [vmem:[#allocation7 + $0x70] sm:$0xff]  ;;  %v5545_v11 = vpack.c.bf16 %v771_v9, %v770_v8  ;;  %v772_v12 = vld [vmem:[#allocation19 + $0x60] sm:$0xff] }
 0x33d   :  { %5434 = vmatprep.subr.bf16.mxu1 %v5433_v23  ;;  %v7788_v19 = vpack.c.bf16 %v592_v18, %v591_v17  ;;  %v7796_v22 = vpack.c.bf16 %v594_v21, %v593_v20  ;;  %v5549_v15 = vpack.c.bf16 %v773_v14, %v772_v12  ;;  %v774_v17 = vld [vmem:[#allocation19 + $0x70] sm:$0xff]  ;;  %v775_v18 = vld [vmem:[#allocation19 + $0x78] sm:$0xff]  ;;  %v595_v21 = vld [vmem:[#allocation8] sm:$0xff] }
 0x33e   :  { %v5553_v20 = vpack.c.bf16 %v775_v18, %v774_v17 }
 0x340   :  { %5436 = vmatpush3.bf16.msra.mxu1 %v5433_v23  ;;  %v1532_v23 = vlaneseq }
 0x341   :  { %5438 = vmatprep.subr.bf16.mxu1 %v5437_v26 }
 0x342   :  { %v7802_v24 = vshrl.u32 %v1532_v23, 7  ;;  %v596_v23 = vld [vmem:[#allocation8 + $0x8] sm:$0xff] }
 0x344   :  { %5440 = vmatpush3.bf16.msra.mxu1 %v5437_v26  ;;  %v7805_v25 = vsub.s32 0, %v7802_v24  ;;  %v759_v26 = vld [vmem:[#allocation17] sm:$0x7]  ;;  %v7808_v27 = vsub.s32 1, %v7802_v24 }
 0x345   :  { %5442 = vmatprep.subr.bf16.mxu1 %v5441_v29 }
 0x346   :  { %v1535_v28 = vrot.slane %v759_v26, %v7805_v25 }
 0x348   :  { %5444 = vmatpush3.bf16.msra.mxu1 %v5441_v29  ;;  %v1539_v29 = vrot.slane %v759_v26, %v7808_v27 }
 0x349   :  { %5446 = vmatprep.subr.bf16.mxu1 %v5445_v32 }
 0x34c   :  { %5448 = vmatpush3.bf16.msra.mxu1 %v5445_v32 }
 0x34d   :  { %5450 = vmatprep.subr.bf16.mxu1 %v5449_v35 }
 0x350   :  { %5452 = vmatpush3.bf16.msra.mxu1 %v5449_v35  ;;  %v7813_v35 = vsub.s32 2, %v7802_v24 }
 0x351   :  { %5454 = vmatprep.subr.bf16.mxu1 %v5453_v38 }
 0x352   :  { %v1543_v36 = vrot.slane %v759_v26, %v7813_v35  ;;  %v597_v26 = vld [vmem:[#allocation8 + $0x10] sm:$0xff] }
 0x354   :  { %5456 = vmatpush3.bf16.msra.mxu1 %v5453_v38 }
 0x355   :  { %5458 = vmatprep.subr.bf16.mxu1 %v5457_v41 }
 0x358   :  { %5460 = vmatpush3.bf16.msra.mxu1 %v5457_v41 }
 0x359   :  { %5494 = vmatprep.subr.bf16.mxu1 %v7754_v2 }
 0x3d1   :  { %v1303_v43 = vpop.f32.mrb[0].mxu0 }
 0x3d2   :  { %v1304_v44 = vadd.f32 %v4079_v42, %v1303_v43  ;;  %v4702_v45 = vpop.f32.mrb[1].mxu0 }
 0x3d4   :  { %v7745_v46 = vmax.f32 %v1304_v44, 0.0 }
 0x3d6   :  { %1612 = vmatmul.mubr.f32.vlgmr.msra.gmra.mrb[4].mxu0 %v7745_v46  ;;  %4735 = vmatprep.mubr.f32.mxu1 %v7745_v46 }
 0x3d7   :  { %1617 = vmatprep.mubr.f32.mxu0 %v7363_v1  ;;  %5464 = vmatpush3.bf16.msra.mxu0 %v7754_v2 }
 0x3d8   :  { %5466 = vmatprep.subr.bf16.mxu0 %v7756_v4 }
 0x3db   :  { %5468 = vmatpush3.bf16.msra.mxu0 %v7756_v4 }
 0x3dc   :  { %5470 = vmatprep.subr.bf16.mxu0 %v7764_v7 }
 0x3df   :  { %5472 = vmatpush3.bf16.msra.mxu0 %v7764_v7 }
 0x3e0   :  { %5474 = vmatprep.subr.bf16.mxu0 %v7770_v10 }
 0x3e3   :  { %5476 = vmatpush3.bf16.msra.mxu0 %v7770_v10 }
 0x3e4   :  { %5478 = vmatprep.subr.bf16.mxu0 %v7776_v13 }
 0x3e7   :  { %5480 = vmatpush3.bf16.msra.mxu0 %v7776_v13 }
 0x3e8   :  { %5482 = vmatprep.subr.bf16.mxu0 %v7782_v16 }
 0x3eb   :  { %5484 = vmatpush3.bf16.msra.mxu0 %v7782_v16 }
 0x3ec   :  { %5486 = vmatprep.subr.bf16.mxu0 %v7788_v19 }
 0x3ee   :  { %v4131_v47 = vpop.f32.mrb[0].mxu1 }
 0x3ef   :  { %v4132_v49 = vpop.f32.mrb[1].mxu1  ;;  %5488 = vmatpush3.bf16.msra.mxu0 %v7788_v19 }
 0x3f0   :  { %v4133_v50 = vadd.f32 %v4132_v49, %v4131_v47  ;;  %5490 = vmatprep.subr.bf16.mxu0 %v7796_v22 }
 0x3f1   :  { %v4166_v51 = vpop.f32.mrb[2].mxu0 }
 0x3f2   :  { %v4167_v52 = vpop.f32.mrb[3].mxu0  ;;  %v1387_v53 = vadd.f32 %v4133_v50, %v4081_v48 }
 0x3f3   :  { %v4168_v54 = vadd.f32 %v4167_v52, %v4166_v51  ;;  %5492 = vmatpush3.bf16.msra.mxu0 %v7796_v22  ;;  %v760_v51 = vld [vmem:[#allocation19] sm:$0xff]  ;;  %v761_v52 = vld [vmem:[#allocation19 + $0x8] sm:$0xff] }
 0x3f5   :  { %v1457_v55 = vadd.f32 %v4168_v54, %v1387_v53  ;;  %v5525_v53 = vpack.c.bf16 %v761_v52, %v760_v51  ;;  %v762_v54 = vld [vmem:[#allocation19 + $0x10] sm:$0xff] }
 0x3f7   :  { %5526 = vmatprep.subr.bf16.mxu0 %v5525_v53 }
 0x40e   :  { %v4201_v56 = vpop.f32.mrb[2].mxu1 }
 0x40f   :  { %v4202_v57 = vpop.f32.mrb[3].mxu1 }
 0x410   :  { %v4203_v58 = vadd.f32 %v4202_v57, %v4201_v56  ;;  %v764_v57 = vld [vmem:[#allocation19 + $0x20] sm:$0xff] }
 0x412   :  { %v1527_v59 = vadd.f32 %v4203_v58, %v1457_v55  ;;  %v763_v55 = vld [vmem:[#allocation19 + $0x18] sm:$0xff]  ;;  %v765_v58 = vld [vmem:[#allocation19 + $0x28] sm:$0xff] }
 0x413   :  { %v5529_v56 = vpack.c.bf16 %v763_v55, %v762_v54 }
 0x414   :  { %v7750_v60 = vmax.f32 %v1527_v59, 0.0  ;;  %v5533_v59 = vpack.c.bf16 %v765_v58, %v764_v57 }
 0x416   :  { %1618 = vmatmul.mubr.f32.gmra.mrb[6].mxu0 %v7750_v60  ;;  %4736 = vmatmul.mubr.f32.vlgmr.msra.gmra.mrb[4].mxu1 %v7750_v60 }
 0x417   :  { %5496 = vmatpush3.bf16.msra.mxu1 %v7754_v2 }
 0x418   :  { %5498 = vmatprep.subr.bf16.mxu1 %v7756_v4 }
 0x41b   :  { %5500 = vmatpush3.bf16.msra.mxu1 %v7756_v4 }
 0x41c   :  { %5502 = vmatprep.subr.bf16.mxu1 %v7764_v7 }
 0x41f   :  { %5504 = vmatpush3.bf16.msra.mxu1 %v7764_v7 }
 0x420   :  { %5506 = vmatprep.subr.bf16.mxu1 %v7770_v10 }
 0x423   :  { %5508 = vmatpush3.bf16.msra.mxu1 %v7770_v10 }
 0x424   :  { %5510 = vmatprep.subr.bf16.mxu1 %v7776_v13 }
 0x427   :  { %5512 = vmatpush3.bf16.msra.mxu1 %v7776_v13 }
 0x428   :  { %5514 = vmatprep.subr.bf16.mxu1 %v7782_v16 }
 0x42b   :  { %5516 = vmatpush3.bf16.msra.mxu1 %v7782_v16 }
 0x42c   :  { %5518 = vmatprep.subr.bf16.mxu1 %v7788_v19 }
 0x42f   :  { %5520 = vmatpush3.bf16.msra.mxu1 %v7788_v19 }
 0x430   :  { %5522 = vmatprep.subr.bf16.mxu1 %v7796_v22 }
 0x433   :  { %5524 = vmatpush3.bf16.msra.mxu1 %v7796_v22 }
 0x4a9   :  { %v1613_v30 = vpop.f32.mrb[4].mxu0 }
 0x4aa   :  { %v1614_v31 = vadd.f32 %v1613_v30, %v1535_v28  ;;  %v1615_v32 = vpop.f32.mrb[5].mxu0 }
 0x4ab   :  { %v1616_v33 = vadd.f32 %v1615_v32, %v1539_v29  ;;  %v600_v32 = vld [vmem:[#allocation8 + $0x28] sm:$0xff] }
 0x4ad   :  { %v1699_v34 = vmul.f32 %v1616_v33, %v1614_v31 }
 0x4af   :  { %4770 = vmatprep.mubr.f32.mxu0 %v1699_v34  ;;  %v601_v34 = vld [vmem:[#allocation8 + $0x30] sm:$0xff] }
 0x4e9   :  { %v1619_v37 = vpop.f32.mrb[6].mxu0  ;;  %v4737_v38 = vpop.f32.mrb[4].mxu1 }
 0x4ea   :  { %v1620_v39 = vadd.f32 %v1619_v37, %v1535_v28  ;;  %v7816_v40 = vadd.f32 %v4737_v38, %v1543_v36  ;;  %v1621_v41 = vpop.f32.mrb[7].mxu0  ;;  %v1690_v42 = vpop.f32.mrb[5].mxu1  ;;  %v7824_v28 = vpack.c.bf16 %v596_v23, %v595_v21  ;;  %v603_v38 = vld [vmem:[#allocation8 + $0x40] sm:$0xff] }
 0x4eb   :  { %v1622_v43 = vadd.f32 %v1621_v41, %v1539_v29  ;;  %v7818_v44 = vadd.f32 %v1690_v42, %v1543_v36  ;;  %v598_v29 = vld [vmem:[#allocation8 + $0x18] sm:$0xff]  ;;  %v605_v42 = vld [vmem:[#allocation8 + $0x50] sm:$0xff] }
 0x4ec   :  { %v1777_v45 = vmul.f32 %v1620_v39, %v1616_v33  ;;  %v7826_v30 = vpack.c.bf16 %v598_v29, %v597_v26  ;;  %5558 = vmatprep.subr.bf16.mxu1 %v7824_v28  ;;  %v602_v36 = vld [vmem:[#allocation8 + $0x38] sm:$0xff] }
 0x4ed   :  { %v1700_v47 = vmul.f32 %v1622_v43, %v1620_v39  ;;  %v1776_v48 = vmul.f32 %v1622_v43, %v1614_v31  ;;  %v1873_v49 = vsub.f32 %v7818_v44, %v7816_v40  ;;  %v1874_v50 = vsub.f32 %v7816_v40, %v7818_v44  ;;  %v599_v31 = vld [vmem:[#allocation8 + $0x20] sm:$0xff]  ;;  %v604_v39 = vld [vmem:[#allocation8 + $0x48] sm:$0xff]  ;;  %v606_v43 = vld [vmem:[#allocation8 + $0x58] sm:$0xff] }
 0x4ee   :  { %v7832_v33 = vpack.c.bf16 %v600_v32, %v599_v31  ;;  %v7836_v37 = vpack.c.bf16 %v602_v36, %v601_v34  ;;  %v7840_v41 = vpack.c.bf16 %v604_v39, %v603_v38 }
 0x4ef   :  { %4771 = vmatmul.mubr.f32.vlgmr.msra.gmra.mrb[8].mxu0 %v1700_v47  ;;  %4805 = vmatprep.mubr.f32.mxu1 %v1776_v48  ;;  %v607_v47 = vld [vmem:[#allocation8 + $0x60] sm:$0xff]  ;;  %v608_v48 = vld [vmem:[#allocation8 + $0x68] sm:$0xff] }
 0x4f0   :  { %4806 = vmatmul.mubr.f32.vlgmr.msra.gmra.mrb[6].mxu1 %v1777_v45  ;;  %5528 = vmatpush3.bf16.msra.mxu0 %v5525_v53  ;;  %v7844_v45 = vpack.c.bf16 %v606_v43, %v605_v42  ;;  %v7848_v51 = vpack.c.bf16 %v608_v48, %v607_v47  ;;  %v778_v43 = vld [vmem:[#allocation22 + $0x8] sm:$0xff]  ;;  %v780_v48 = vld [vmem:[#allocation22 + $0x18] sm:$0xff] }
 0x4f1   :  { %5530 = vmatprep.subr.bf16.mxu0 %v5529_v56  ;;  %5560 = vmatpush3.bf16.msra.mxu1 %v7824_v28  ;;  %v782_v47 = vld [vmem:[#allocation22 + $0x28] sm:$0xff] }
 0x4f2   :  { %5562 = vmatprep.subr.bf16.mxu1 %v7826_v30 }
 0x4f4   :  { %5532 = vmatpush3.bf16.msra.mxu0 %v5529_v56 }
 0x4f5   :  { %5534 = vmatprep.subr.bf16.mxu0 %v5533_v59  ;;  %5564 = vmatpush3.bf16.msra.mxu1 %v7826_v30 }
 0x4f6   :  { %5566 = vmatprep.subr.bf16.mxu1 %v7832_v33 }
 0x4f8   :  { %5536 = vmatpush3.bf16.msra.mxu0 %v5533_v59 }
 0x4f9   :  { %5538 = vmatprep.subr.bf16.mxu0 %v5537_v63  ;;  %5568 = vmatpush3.bf16.msra.mxu1 %v7832_v33 }
 0x4fa   :  { %5570 = vmatprep.subr.bf16.mxu1 %v7836_v37 }
 0x4fc   :  { %5540 = vmatpush3.bf16.msra.mxu0 %v5537_v63 }
 0x4fd   :  { %5542 = vmatprep.subr.bf16.mxu0 %v5541_v6  ;;  %5572 = vmatpush3.bf16.msra.mxu1 %v7836_v37 }
 0x4fe   :  { %5574 = vmatprep.subr.bf16.mxu1 %v7840_v41 }
 0x500   :  { %5544 = vmatpush3.bf16.msra.mxu0 %v5541_v6 }
 0x501   :  { %5546 = vmatprep.subr.bf16.mxu0 %v5545_v11  ;;  %5576 = vmatpush3.bf16.msra.mxu1 %v7840_v41 }
 0x502   :  { %5578 = vmatprep.subr.bf16.mxu1 %v7844_v45 }
 0x504   :  { %5548 = vmatpush3.bf16.msra.mxu0 %v5545_v11 }
 0x505   :  { %5550 = vmatprep.subr.bf16.mxu0 %v5549_v15  ;;  %5580 = vmatpush3.bf16.msra.mxu1 %v7844_v45 }
 0x506   :  { %5582 = vmatprep.subr.bf16.mxu1 %v7848_v51 }
 0x508   :  { %5552 = vmatpush3.bf16.msra.mxu0 %v5549_v15 }
 0x509   :  { %5554 = vmatprep.subr.bf16.mxu0 %v5553_v20  ;;  %5584 = vmatpush3.bf16.msra.mxu1 %v7848_v51 }
 0x50c   :  { %5556 = vmatpush3.bf16.msra.mxu0 %v5553_v20 }
 0x50d   :  { %5590 = vmatprep.subr.bf16.mxu0 %v7824_v28 }
 0x5c2   :  { %v4772_v52 = vpop.f32.mrb[8].mxu0 }
 0x5c3   :  { %v1767_v53 = vpop.f32.mrb[9].mxu0  ;;  %v4807_v54 = vpop.f32.mrb[6].mxu1 }
 0x5c4   :  { %v1854_v55 = vmax.f32 %v4772_v52, %v4807_v54  ;;  %v1844_v56 = vpop.f32.mrb[7].mxu1 }
 0x5c5   :  { %v1853_v57 = vmax.f32 %v1767_v53, %v1844_v56 }
 0x5c6   :  { %v1856_v58 = vsub.f32 %v4772_v52, %v1854_v55  ;;  %v1862_v59 = vsub.f32 %v4807_v54, %v1854_v55  ;;  %v5621_v52 = vpack.c.bf16 %v782_v47, %v778_v43  ;;  %v777_v54 = vld [vmem:[#allocation22] sm:$0xff]  ;;  %v802_v43 = vld [vmem:[#allocation22 + $0xc8] sm:$0xff] }
 0x5c7   :  { %v1855_v61 = vsub.f32 %v1767_v53, %v1853_v57  ;;  %v1861_v62 = vsub.f32 %v1844_v56, %v1853_v57  ;;  %v784_v53 = vld [vmem:[#allocation22 + $0x38] sm:$0xff]  ;;  %v781_v55 = vld [vmem:[#allocation22 + $0x20] sm:$0xff]  ;;  %v806_v47 = vld [vmem:[#allocation22 + $0xe8] sm:$0xff] }
 0x5c8   :  { %v1859_v63 = vmul.f32 1.442695, %v1856_v58  ;;  %v1865_v3 = vmul.f32 1.442695, %v1862_v59  ;;  %v5653_v56 = vpack.c.bf16 %v784_v53, %v780_v48  ;;  %v5623_v57 = vpack.c.bf16 %v781_v55, %v777_v54  ;;  %v786_v58 = vld [vmem:[#allocation22 + $0x48] sm:$0xff]  ;;  %v804_v48 = vld [vmem:[#allocation22 + $0xd8] sm:$0xff] }
 0x5c9   :  { %v1857_v5 = vmul.f32 1.442695, %v1855_v61  ;;  %v1863_v6 = vmul.f32 1.442695, %v1861_v62  ;;  %v790_v59 = vld [vmem:[#allocation22 + $0x68] sm:$0xff]  ;;  %v789_v61 = vld [vmem:[#allocation22 + $0x60] sm:$0xff] }
 0x5ca   :  { %6433 = vpow2.f32 %v1859_v63  ;;  %v794_v63 = vld [vmem:[#allocation22 + $0x88] sm:$0xff]  ;;  %v808_v53 = vld [vmem:[#allocation22 + $0xf8] sm:$0xff]  ;;  %v801_v54 = vld [vmem:[#allocation22 + $0xc0] sm:$0xff] }
 0x5cb   :  { %6435 = vpow2.f32 %v1865_v3  ;;  %v798_v3 = vld [vmem:[#allocation22 + $0xa8] sm:$0xff]  ;;  %v805_v55 = vld [vmem:[#allocation22 + $0xe0] sm:$0xff] }
 0x5cc   :  { %6437 = vpow2.f32 %v1857_v5  ;;  %v5629_v5 = vpack.c.bf16 %v798_v3, %v794_v63  ;;  %v816_v3 = vld [vmem:[#allocation22 + $0x138] sm:$0xff] }
 0x5cd   :  { %6439 = vpow2.f32 %v1863_v6  ;;  %v793_v6 = vld [vmem:[#allocation22 + $0x80] sm:$0xff] }
 0x5d4   :  { %v6434_v8 = vpop.eup %6433 }
 0x5d5   :  { %v6436_v9 = vpop.eup %6435 }
 0x5d6   :  { %v6438_v11 = vpop.eup %6437  ;;  %v1868_v12 = vadd.f32 %v6436_v9, %v6434_v8 }
 0x5d7   :  { %v6440_v14 = vpop.eup %6439 }
 0x5d8   :  { %6441 = vrcp.f32 %v1868_v12  ;;  %v1867_v15 = vadd.f32 %v6440_v14, %v6438_v11 }
 0x5da   :  { %6443 = vrcp.f32 %v1867_v15  ;;  %v779_v15 = vld [vmem:[#allocation22 + $0x10] sm:$0xff] }
 0x5e2   :  { %v6442_v17 = vpop.eup %6441 }
 0x5e3   :  { %v1872_v18 = vmul.f32 %v6442_v17, %v6434_v8  ;;  %v797_v8 = vld [vmem:[#allocation22 + $0xa0] sm:$0xff]  ;;  %v783_v17 = vld [vmem:[#allocation22 + $0x30] sm:$0xff] }
 0x5e4   :  { %v6444_v20 = vpop.eup %6443  ;;  %v5631_v9 = vpack.c.bf16 %v797_v8, %v793_v6  ;;  %v813_v6 = vld [vmem:[#allocation22 + $0x120] sm:$0xff] }
 0x5e5   :  { %v1871_v21 = vmul.f32 %v6444_v20, %v6438_v11  ;;  %v1876_v23 = vmul.f32 %v1874_v50, %v1872_v18  ;;  %v4082_v50 = vld [vmem:[#allocation20] ss:$0 sm:$0xff] }
 0x5e6   :  { %v788_v20 = vld [vmem:[#allocation22 + $0x58] sm:$0xff] }
 0x5e7   :  { %v1875_v26 = vmul.f32 %v1873_v49, %v1871_v21  ;;  %v1878_v29 = vadd.f32 %v1876_v23, %v7818_v44  ;;  %v610_v44 = vld [vmem:[#allocation8 + $0x78] sm:$0xff] }
 0x5e8   :  { %v792_v21 = vld [vmem:[#allocation22 + $0x78] sm:$0xff] }
 0x5e9   :  { %v1877_v31 = vadd.f32 %v1875_v26, %v7816_v40  ;;  %v609_v40 = vld [vmem:[#allocation8 + $0x70] sm:$0xff]  ;;  %v5655_v26 = vpack.c.bf16 %v783_v17, %v779_v15  ;;  %v818_v15 = vld [vmem:[#allocation22 + $0x148] sm:$0xff] }
 0x5ea   :  { %v7874_v49 = vpack.c.bf16 %v610_v44, %v609_v40  ;;  %v787_v40 = vld [vmem:[#allocation22 + $0x50] sm:$0xff] }
 0x5eb   :  { %4840 = vmatprep.mubr.f32.mxu0 %v1877_v31  ;;  %v5657_v31 = vpack.c.bf16 %v792_v21, %v788_v20  ;;  %v791_v44 = vld [vmem:[#allocation22 + $0x70] sm:$0xff]  ;;  %v822_v20 = vld [vmem:[#allocation22 + $0x168] sm:$0xff]  ;;  %v820_v21 = vld [vmem:[#allocation22 + $0x158] sm:$0xff] }
 0x5ec   :  { %4841 = vmatmul.mubr.f32.vlgmr.msra.gmra.mrb[10].mxu0 %v1878_v29  ;;  %5586 = vmatprep.subr.bf16.mxu1 %v7874_v49 }
 0x5ed   :  { %5592 = vmatpush3.bf16.msra.mxu0 %v7824_v28  ;;  %5588 = vmatpush3.bf16.msra.mxu1 %v7874_v49 }
 0x5ee   :  { %5594 = vmatprep.subr.bf16.mxu0 %v7826_v30  ;;  %5622 = vmatprep.subr.bf16.mxu1 %v5621_v52  ;;  %v5633_v52 = vpack.c.bf16 %v806_v47, %v802_v43  ;;  %v832_v43 = vld [vmem:[#allocation22 + $0x1b8] sm:$0xff]  ;;  %v825_v47 = vld [vmem:[#allocation22 + $0x180] sm:$0xff] }
 0x5f1   :  { %5596 = vmatpush3.bf16.msra.mxu0 %v7826_v30 }
 0x5f2   :  { %5598 = vmatprep.subr.bf16.mxu0 %v7832_v33 }
 0x5f5   :  { %5600 = vmatpush3.bf16.msra.mxu0 %v7832_v33 }
 0x5f6   :  { %5602 = vmatprep.subr.bf16.mxu0 %v7836_v37 }
 0x5f9   :  { %5604 = vmatpush3.bf16.msra.mxu0 %v7836_v37 }
 0x5fa   :  { %5606 = vmatprep.subr.bf16.mxu0 %v7840_v41 }
 0x5fd   :  { %5608 = vmatpush3.bf16.msra.mxu0 %v7840_v41 }
 0x5fe   :  { %5610 = vmatprep.subr.bf16.mxu0 %v7844_v45 }
 0x601   :  { %5612 = vmatpush3.bf16.msra.mxu0 %v7844_v45 }
 0x602   :  { %5614 = vmatprep.subr.bf16.mxu0 %v7848_v51 }
 0x605   :  { %5616 = vmatpush3.bf16.msra.mxu0 %v7848_v51 }
 0x606   :  { %5618 = vmatprep.subr.bf16.mxu0 %v7874_v49 }
 0x609   :  { %5620 = vmatpush3.bf16.msra.mxu0 %v7874_v49 }
 0x60a   :  { %5654 = vmatprep.subr.bf16.mxu0 %v5653_v56  ;;  %v5665_v56 = vpack.c.bf16 %v808_v53, %v804_v48  ;;  %v827_v53 = vld [vmem:[#allocation22 + $0x190] sm:$0xff] }
 0x6bf   :  { %v4842_v32 = vpop.f32.mrb[10].mxu0 }
 0x6c0   :  { %v1957_v34 = vadd.f32 %v4842_v32, %v4082_v50  ;;  %v1951_v36 = vpop.f32.mrb[11].mxu0  ;;  %v800_v32 = vld [vmem:[#allocation22 + $0xb8] sm:$0xff] }
 0x6c1   :  { %v1952_v38 = vadd.f32 %v4082_v50, %v1951_v36  ;;  %v796_v50 = vld [vmem:[#allocation22 + $0x98] sm:$0xff] }
 0x6c2   :  { %v1961_v42 = vadd.f32 %v1957_v34, %v7750_v60  ;;  %v785_v60 = vld [vmem:[#allocation22 + $0x40] sm:$0xff]  ;;  %v5659_v34 = vpack.c.bf16 %v791_v44, %v787_v40  ;;  %v5661_v36 = vpack.c.bf16 %v800_v32, %v796_v50  ;;  %v819_v44 = vld [vmem:[#allocation22 + $0x150] sm:$0xff] }
 0x6c3   :  { %v1960_v39 = vadd.f32 %v1952_v38, %v7745_v46  ;;  %v5625_v46 = vpack.c.bf16 %v790_v59, %v786_v58  ;;  %v5627_v62 = vpack.c.bf16 %v789_v61, %v785_v60  ;;  %v795_v38 = vld [vmem:[#allocation22 + $0x90] sm:$0xff]  ;;  %v810_v60 = vld [vmem:[#allocation22 + $0x108] sm:$0xff]  ;;  %v821_v40 = vld [vmem:[#allocation22 + $0x160] sm:$0xff] }
 0x6c4   :  { %v803_v58 = vld [vmem:[#allocation22 + $0xd0] sm:$0xff]  ;;  %v814_v61 = vld [vmem:[#allocation22 + $0x128] sm:$0xff] }
 0x6c5   :  { %4875 = vmatprep.mubr.f32.mxu1 %v1960_v39  ;;  %v807_v59 = vld [vmem:[#allocation22 + $0xf0] sm:$0xff]  ;;  %v5637_v63 = vpack.c.bf16 %v814_v61, %v810_v60  ;;  %v840_v60 = vld [vmem:[#allocation22 + $0x1f8] sm:$0xff]  ;;  %v833_v61 = vld [vmem:[#allocation22 + $0x1c0] sm:$0xff] }
 0x6c6   :  { %4876 = vmatmul.mubr.f32.vlgmr.msra.gmra.mrb[8].mxu1 %v1961_v42  ;;  %v823_v32 = vld [vmem:[#allocation22 + $0x170] sm:$0xff] }
 0x6c7   :  { %2221 = vmatprep.mubr.f32.mxu1 %v7363_v1  ;;  %5624 = vmatpush1.bf16.msra.mxu1 %v5623_v57  ;;  %v5635_v57 = vpack.c.bf16 %v805_v55, %v801_v54  ;;  %v831_v54 = vld [vmem:[#allocation22 + $0x1b0] sm:$0xff] }
 0x6c8   :  { %5626 = vmatprep.subr.bf16.mxu1 %v5625_v46  ;;  %v5667_v46 = vpack.c.bf16 %v807_v59, %v803_v58  ;;  %v836_v58 = vld [vmem:[#allocation22 + $0x1d8] sm:$0xff]  ;;  %v5679_v59 = vpack.c.bf16 %v831_v54, %v827_v53 }
 0x6c9   :  { %v893_v53 = vld [vmem:[#allocation23 + $0x198] sm:$0xff] }
 0x6cb   :  { %5628 = vmatpush1.bf16.msra.mxu1 %v5627_v62  ;;  %v812_v62 = vld [vmem:[#allocation22 + $0x118] sm:$0xff] }
 0x6cc   :  { %5630 = vmatprep.subr.bf16.mxu1 %v5629_v5  ;;  %v809_v5 = vld [vmem:[#allocation22 + $0x100] sm:$0xff]  ;;  %v5669_v8 = vpack.c.bf16 %v816_v3, %v812_v62  ;;  %v835_v3 = vld [vmem:[#allocation22 + $0x1d0] sm:$0xff] }
 0x6cd   :  { %v837_v62 = vld [vmem:[#allocation22 + $0x1e0] sm:$0xff] }
 0x6cf   :  { %5632 = vmatpush1.bf16.msra.mxu1 %v5631_v9  ;;  %v5639_v9 = vpack.c.bf16 %v813_v6, %v809_v5  ;;  %v839_v5 = vld [vmem:[#allocation22 + $0x1f0] sm:$0xff]  ;;  %v5651_v6 = vpack.c.bf16 %v837_v62, %v833_v61  ;;  %v862_v61 = vld [vmem:[#allocation23 + $0xa0] sm:$0xff]  ;;  %v863_v62 = vld [vmem:[#allocation23 + $0xa8] sm:$0xff] }
 0x6d0   :  { %5634 = vmatprep.subr.bf16.mxu1 %v5633_v52  ;;  %v829_v52 = vld [vmem:[#allocation22 + $0x1a0] sm:$0xff] }
 0x6d1   :  { %v5647_v55 = vpack.c.bf16 %v829_v52, %v825_v47  ;;  %v892_v52 = vld [vmem:[#allocation23 + $0x190] sm:$0xff] }
 0x6d3   :  { %5636 = vmatpush1.bf16.msra.mxu1 %v5635_v57  ;;  %v838_v57 = vld [vmem:[#allocation22 + $0x1e8] sm:$0xff] }
 0x6d4   :  { %5638 = vmatprep.subr.bf16.mxu1 %v5637_v63  ;;  %v5681_v63 = vpack.c.bf16 %v840_v60, %v836_v58  ;;  %v844_v58 = vld [vmem:[#allocation23 + $0x10] sm:$0xff] }
 0x6d5   :  { %v876_v60 = vld [vmem:[#allocation23 + $0x110] sm:$0xff] }
 0x6d7   :  { %5640 = vmatpush1.bf16.msra.mxu1 %v5639_v9  ;;  %v858_v9 = vld [vmem:[#allocation23 + $0x80] sm:$0xff] }
 0x799   :  { %v4877_v11 = vpop.f32.mrb[8].mxu1 }
 0x79a   :  { %v7883_v12 = vsub.f32 %v1961_v42, %v4877_v11  ;;  %v2028_v14 = vpop.f32.mrb[9].mxu1  ;;  %v811_v11 = vld [vmem:[#allocation22 + $0x110] sm:$0xff] }
 0x79b   :  { %v7885_v18 = vsub.f32 %v1960_v39, %v2028_v14  ;;  %v799_v39 = vld [vmem:[#allocation22 + $0xb0] sm:$0xff] }
 0x79c   :  { %v2040_v29 = vmul.f32 %v7883_v12, %v7883_v12  ;;  %v5663_v42 = vpack.c.bf16 %v799_v39, %v795_v38  ;;  %v815_v14 = vld [vmem:[#allocation22 + $0x130] sm:$0xff]  ;;  %v5675_v38 = vpack.c.bf16 %v823_v32, %v819_v44  ;;  %v4083_v44 = vld [vmem:[#allocation26] ss:$0 sm:$0xff] }
 0x79d   :  { %v2039_v23 = vmul.f32 %v7885_v18, %v7885_v18  ;;  %v5671_v17 = vpack.c.bf16 %v815_v14, %v811_v11  ;;  %v859_v11 = vld [vmem:[#allocation23 + $0x88] sm:$0xff]  ;;  %v890_v14 = vld [vmem:[#allocation23 + $0x180] sm:$0xff] }
 0x79f   :  { %4910 = vmatprep.mubr.f32.mxu0 %v2039_v23  ;;  %v824_v23 = vld [vmem:[#allocation22 + $0x178] sm:$0xff] }
 0x7a0   :  { %4911 = vmatmul.mubr.f32.vlgmr.msra.gmra.mrb[12].mxu0 %v2040_v29  ;;  %v5673_v29 = vpack.c.bf16 %v824_v23, %v820_v21 }
 0x7a1   :  { %5656 = vmatpush1.bf16.msra.mxu0 %v5655_v26  ;;  %2298 = vmatprep.mubr.f32.mxu0 %v7363_v1  ;;  %v5641_v26 = vpack.c.bf16 %v822_v20, %v818_v15  ;;  %v5685_v15 = vpack.c.bf16 %v859_v11, %v858_v9  ;;  %v846_v9 = vld [vmem:[#allocation23 + $0x20] sm:$0xff]  ;;  %v847_v11 = vld [vmem:[#allocation23 + $0x28] sm:$0xff] }
 0x7a2   :  { %5658 = vmatprep.subr.bf16.mxu0 %v5657_v31  ;;  %v817_v31 = vld [vmem:[#allocation22 + $0x140] sm:$0xff] }
 0x7a3   :  { %v5643_v50 = vpack.c.bf16 %v821_v40, %v817_v31  ;;  %5642 = vmatprep.subr.bf16.mxu1 %v5641_v26 }
 0x7a5   :  { %5660 = vmatpush1.bf16.msra.mxu0 %v5659_v34  ;;  %v826_v34 = vld [vmem:[#allocation22 + $0x188] sm:$0xff]  ;;  %5644 = vmatpush1.bf16.msra.mxu1 %v5643_v50  ;;  %v4084_v50 = vld [vmem:[#allocation28] ss:$0 sm:$0xff] }
 0x7a6   :  { %5662 = vmatprep.subr.bf16.mxu0 %v5661_v36  ;;  %v830_v36 = vld [vmem:[#allocation22 + $0x1a8] sm:$0xff] }
 0x7a7   :  { %v5645_v39 = vpack.c.bf16 %v830_v36, %v826_v34  ;;  %v842_v36 = vld [vmem:[#allocation23] sm:$0xff] }
 0x7a9   :  { %5664 = vmatpush1.bf16.msra.mxu0 %v5663_v42  ;;  %v828_v42 = vld [vmem:[#allocation22 + $0x198] sm:$0xff]  ;;  %5646 = vmatprep.subr.bf16.mxu1 %v5645_v39  ;;  %v874_v39 = vld [vmem:[#allocation23 + $0x100] sm:$0xff] }
 0x7aa   :  { %5666 = vmatprep.subr.bf16.mxu0 %v5665_v56  ;;  %v5677_v48 = vpack.c.bf16 %v832_v43, %v828_v42  ;;  %v834_v56 = vld [vmem:[#allocation22 + $0x1c8] sm:$0xff]  ;;  %5648 = vmatpush1.bf16.msra.mxu1 %v5647_v55  ;;  %v860_v43 = vld [vmem:[#allocation23 + $0x90] sm:$0xff] }
 0x7ab   :  { %v875_v42 = vld [vmem:[#allocation23 + $0x108] sm:$0xff] }
 0x7ad   :  { %5668 = vmatpush1.bf16.msra.mxu0 %v5667_v46  ;;  %v5649_v46 = vpack.c.bf16 %v838_v57, %v834_v56  ;;  %v5719_v57 = vpack.c.bf16 %v875_v42, %v874_v39  ;;  %v866_v39 = vld [vmem:[#allocation23 + $0xc0] sm:$0xff]  ;;  %v867_v42 = vld [vmem:[#allocation23 + $0xc8] sm:$0xff] }
 0x7ae   :  { %5670 = vmatprep.subr.bf16.mxu0 %v5669_v8  ;;  %v5683_v8 = vpack.c.bf16 %v839_v5, %v835_v3  ;;  %v895_v3 = vld [vmem:[#allocation23 + $0x1a8] sm:$0xff] }
 0x7af   :  { %5650 = vmatprep.subr.bf16.mxu1 %v5649_v46 }
 0x7b0   :  { %5652 = vmatpush1.bf16.msra.mxu1 %v5651_v6 }
 0x7b1   :  { %5672 = vmatpush1.bf16.msra.mxu0 %v5671_v17  ;;  %v891_v17 = vld [vmem:[#allocation23 + $0x188] sm:$0xff]  ;;  %5686 = vmatprep.subr.bf16.mxu1 %v5685_v15 }
 0x7b2   :  { %5674 = vmatprep.subr.bf16.mxu0 %v5673_v29  ;;  %v5717_v20 = vpack.c.bf16 %v891_v17, %v890_v14  ;;  %v5693_v14 = vpack.c.bf16 %v863_v62, %v862_v61  ;;  %v878_v17 = vld [vmem:[#allocation23 + $0x120] sm:$0xff] }
 0x7b5   :  { %5676 = vmatpush1.bf16.msra.mxu0 %v5675_v38  ;;  %v843_v38 = vld [vmem:[#allocation23 + $0x8] sm:$0xff] }
 0x7b6   :  { %5678 = vmatprep.subr.bf16.mxu0 %v5677_v48  ;;  %v861_v48 = vld [vmem:[#allocation23 + $0x98] sm:$0xff]  ;;  %v5687_v56 = vpack.c.bf16 %v843_v38, %v842_v36  ;;  %v880_v36 = vld [vmem:[#allocation23 + $0x130] sm:$0xff] }
 0x7b7   :  { %v5689_v46 = vpack.c.bf16 %v861_v48, %v860_v43  ;;  %v881_v38 = vld [vmem:[#allocation23 + $0x138] sm:$0xff]  ;;  %v898_v43 = vld [vmem:[#allocation23 + $0x1c0] sm:$0xff] }
 0x7b9   :  { %5680 = vmatpush1.bf16.msra.mxu0 %v5679_v59  ;;  %v845_v59 = vld [vmem:[#allocation23 + $0x18] sm:$0xff] }
 0x7ba   :  { %5682 = vmatprep.subr.bf16.mxu0 %v5681_v63  ;;  %v894_v63 = vld [vmem:[#allocation23 + $0x1a0] sm:$0xff]  ;;  %v5691_v6 = vpack.c.bf16 %v845_v59, %v844_v58  ;;  %v883_v59 = vld [vmem:[#allocation23 + $0x148] sm:$0xff] }
 0x7bb   :  { %v5725_v15 = vpack.c.bf16 %v895_v3, %v894_v63  ;;  %v882_v58 = vld [vmem:[#allocation23 + $0x140] sm:$0xff]  ;;  %v852_v63 = vld [vmem:[#allocation23 + $0x50] sm:$0xff]  ;;  %v853_v3 = vld [vmem:[#allocation23 + $0x58] sm:$0xff] }
 0x7bc   :  { %v5735_v62 = vpack.c.bf16 %v883_v59, %v882_v58  ;;  %v841_v58 = vld [vmem:[%s8223_s13] sm:$0xf]  ;;  %v2151_v59 = vsub.s32 3, %v7802_v24 }
 0x7bd   :  { %5684 = vmatpush1.bf16.msra.mxu0 %v5683_v8 }
 0x7be   :  { %5718 = vmatprep.subr.bf16.mxu0 %v5717_v20  ;;  %v879_v20 = vld [vmem:[#allocation23 + $0x128] sm:$0xff] }
 0x873   :  { %v4912_v21 = vpop.f32.mrb[12].mxu0 }
 0x874   :  { %v2113_v23 = vadd.f32 1e-05, %v4912_v21  ;;  %v2107_v26 = vpop.f32.mrb[13].mxu0  ;;  %v864_v21 = vld [vmem:[#allocation23 + $0xb0] sm:$0xff] }
 0x875   :  { %v2108_v29 = vadd.f32 1e-05, %v2107_v26  ;;  %v896_v26 = vld [vmem:[#allocation23 + $0x1b0] sm:$0xff] }
 0x876   :  { %6445 = vrsqrt.f32 %v2113_v23  ;;  %v865_v23 = vld [vmem:[#allocation23 + $0xb8] sm:$0xff] }
 0x877   :  { %6447 = vrsqrt.f32 %v2108_v29  ;;  %v897_v29 = vld [vmem:[#allocation23 + $0x1b8] sm:$0xff] }
 0x880   :  { %v6446_v31 = vpop.eup %6445 }
 0x881   :  { %v6448_v40 = vpop.eup %6447  ;;  %v2119_v34 = vmul.f32 %v6446_v31, %v7883_v12  ;;  %v877_v12 = vld [vmem:[#allocation23 + $0x118] sm:$0xff]  ;;  %v5695_v31 = vpack.c.bf16 %v847_v11, %v846_v9  ;;  %v884_v9 = vld [vmem:[#allocation23 + $0x150] sm:$0xff] }
 0x882   :  { %v2118_v32 = vmul.f32 %v6448_v40, %v7885_v18  ;;  %v5721_v18 = vpack.c.bf16 %v893_v53, %v892_v52  ;;  %v5723_v8 = vpack.c.bf16 %v877_v12, %v876_v60  ;;  %v5727_v40 = vpack.c.bf16 %v879_v20, %v878_v17  ;;  %v850_v53 = vld [vmem:[#allocation23 + $0x40] sm:$0xff]  ;;  %v900_v60 = vld [vmem:[#allocation23 + $0x1d0] sm:$0xff]  ;;  %v901_v12 = vld [vmem:[#allocation23 + $0x1d8] sm:$0xff] }
 0x883   :  { %v2127_v55 = vmul.f32 %v4083_v44, %v2119_v34  ;;  %v5729_v34 = vpack.c.bf16 %v897_v29, %v896_v26  ;;  %v5731_v52 = vpack.c.bf16 %v881_v38, %v880_v36  ;;  %v885_v11 = vld [vmem:[#allocation23 + $0x158] sm:$0xff]  ;;  %v902_v17 = vld [vmem:[#allocation23 + $0x1e0] sm:$0xff]  ;;  %v903_v20 = vld [vmem:[#allocation23 + $0x1e8] sm:$0xff] }
 0x884   :  { %v2126_v47 = vmul.f32 %v4083_v44, %v2118_v32  ;;  %v848_v44 = vld [vmem:[#allocation23 + $0x30] sm:$0xff]  ;;  %v5697_v32 = vpack.c.bf16 %v865_v23, %v864_v21  ;;  %v5707_v21 = vpack.c.bf16 %v853_v3, %v852_v63  ;;  %v5739_v23 = vpack.c.bf16 %v885_v11, %v884_v9  ;;  %v873_v38 = vld [vmem:[#allocation23 + $0xf8] sm:$0xff] }
 0x885   :  { %v7900_v5 = vadd.f32 %v4084_v50, %v2127_v55  ;;  %v851_v55 = vld [vmem:[#allocation23 + $0x48] sm:$0xff]  ;;  %v5741_v29 = vpack.c.bf16 %v903_v20, %v902_v17  ;;  %v872_v36 = vld [vmem:[#allocation23 + $0xf0] sm:$0xff] }
 0x886   :  { %v7894_v54 = vadd.f32 %v4084_v50, %v2126_v47  ;;  %v849_v50 = vld [vmem:[#allocation23 + $0x38] sm:$0xff]  ;;  %v899_v47 = vld [vmem:[#allocation23 + $0x1c8] sm:$0xff]  ;;  %v5703_v61 = vpack.c.bf16 %v851_v55, %v850_v53  ;;  %v888_v55 = vld [vmem:[#allocation23 + $0x170] sm:$0xff] }
 0x887   :  { %v5699_v48 = vpack.c.bf16 %v849_v50, %v848_v44  ;;  %v886_v44 = vld [vmem:[#allocation23 + $0x160] sm:$0xff] }
 0x888   :  { %2222 = vmatmul.mubr.f32.vlgmr.msra.gmra.mrb[10].mxu1 %v7894_v54  ;;  %2299 = vmatmul.mubr.f32.vlgmr.msra.gmra.mrb[14].mxu0 %v7894_v54 }
 0x889   :  { %2227 = vmatprep.mubr.f32.mxu1 %v7363_v1  ;;  %2304 = vmatprep.mubr.f32.mxu0 %v7363_v1 }
 0x88a   :  { %5688 = vmatpush3.bf16.msra.mxu1 %v5687_v56  ;;  %5720 = vmatpush3.bf16.msra.mxu0 %v5719_v57  ;;  %v5701_v56 = vpack.c.bf16 %v867_v42, %v866_v39  ;;  %v5733_v57 = vpack.c.bf16 %v899_v47, %v898_v43  ;;  %v904_v39 = vld [vmem:[#allocation23 + $0x1f0] sm:$0xff]  ;;  %v5713_v42 = vpack.c.bf16 %v873_v38, %v872_v36  ;;  %v905_v43 = vld [vmem:[#allocation23 + $0x1f8] sm:$0xff] }
 0x88b   :  { %5690 = vmatprep.subr.bf16.mxu1 %v5689_v46  ;;  %5722 = vmatprep.subr.bf16.mxu0 %v5721_v18  ;;  %v868_v46 = vld [vmem:[#allocation23 + $0xd0] sm:$0xff]  ;;  %v869_v18 = vld [vmem:[#allocation23 + $0xd8] sm:$0xff] }
 0x88c   :  { %2228 = vmatmul.mubr.f32.gmra.mrb[12].mxu1 %v7900_v5  ;;  %2305 = vmatmul.mubr.f32.gmra.mrb[16].mxu0 %v7900_v5  ;;  %v856_v47 = vld [vmem:[#allocation23 + $0x70] sm:$0xff] }
 0x88e   :  { %5692 = vmatpush3.bf16.msra.mxu1 %v5691_v6  ;;  %5724 = vmatpush3.bf16.msra.mxu0 %v5723_v8  ;;  %v5705_v6 = vpack.c.bf16 %v869_v18, %v868_v46  ;;  %v5737_v8 = vpack.c.bf16 %v901_v12, %v900_v60  ;;  %v2140_v46 = vrot.slane %v841_v58, %v7805_v25 }
 0x88f   :  { %5694 = vmatprep.subr.bf16.mxu1 %v5693_v14  ;;  %5726 = vmatprep.subr.bf16.mxu0 %v5725_v15  ;;  %v870_v14 = vld [vmem:[#allocation23 + $0xe0] sm:$0xff]  ;;  %v871_v15 = vld [vmem:[#allocation23 + $0xe8] sm:$0xff]  ;;  %v2148_v18 = vrot.slane %v841_v58, %v7813_v35  ;;  %v2144_v60 = vrot.slane %v841_v58, %v7808_v27  ;;  %v2152_v12 = vrot.slane %v841_v58, %v2151_v59 }
 0x890   :  { %v5709_v26 = vpack.c.bf16 %v871_v15, %v870_v14 }
 0x892   :  { %5696 = vmatpush3.bf16.msra.mxu1 %v5695_v31  ;;  %5728 = vmatpush3.bf16.msra.mxu0 %v5727_v40  ;;  %v854_v31 = vld [vmem:[#allocation23 + $0x60] sm:$0xff]  ;;  %v855_v40 = vld [vmem:[#allocation23 + $0x68] sm:$0xff] }
 0x893   :  { %5698 = vmatprep.subr.bf16.mxu1 %v5697_v32  ;;  %5730 = vmatprep.subr.bf16.mxu0 %v5729_v34  ;;  %v5711_v50 = vpack.c.bf16 %v855_v40, %v854_v31  ;;  %v887_v32 = vld [vmem:[#allocation23 + $0x168] sm:$0xff] }
 0x894   :  { %v5743_v34 = vpack.c.bf16 %v887_v32, %v886_v44 }
 0x896   :  { %5700 = vmatpush3.bf16.msra.mxu1 %v5699_v48  ;;  %5732 = vmatpush3.bf16.msra.mxu0 %v5731_v52  ;;  %v857_v48 = vld [vmem:[#allocation23 + $0x78] sm:$0xff]  ;;  %v5745_v52 = vpack.c.bf16 %v905_v43, %v904_v39  ;;  %v4085_v43 = vld [vmem:[#allocation25] ss:$0 sm:$0xff] }
 0x897   :  { %5702 = vmatprep.subr.bf16.mxu1 %v5701_v56  ;;  %5734 = vmatprep.subr.bf16.mxu0 %v5733_v57  ;;  %v5715_v53 = vpack.c.bf16 %v857_v48, %v856_v47  ;;  %v889_v56 = vld [vmem:[#allocation23 + $0x178] sm:$0xff] }
 0x898   :  { %v5747_v57 = vpack.c.bf16 %v889_v56, %v888_v55 }
 0x89a   :  { %5704 = vmatpush3.bf16.msra.mxu1 %v5703_v61  ;;  %5736 = vmatpush3.bf16.msra.mxu0 %v5735_v62 }
 0x89b   :  { %5706 = vmatprep.subr.bf16.mxu1 %v5705_v6  ;;  %5738 = vmatprep.subr.bf16.mxu0 %v5737_v8 }
 0x89e   :  { %5708 = vmatpush3.bf16.msra.mxu1 %v5707_v21  ;;  %5740 = vmatpush3.bf16.msra.mxu0 %v5739_v23 }
 0x89f   :  { %5710 = vmatprep.subr.bf16.mxu1 %v5709_v26  ;;  %5742 = vmatprep.subr.bf16.mxu0 %v5741_v29 }
 0x8a2   :  { %5712 = vmatpush3.bf16.msra.mxu1 %v5711_v50  ;;  %5744 = vmatpush3.bf16.msra.mxu0 %v5743_v34 }
 0x8a3   :  { %5714 = vmatprep.subr.bf16.mxu1 %v5713_v42  ;;  %5746 = vmatprep.subr.bf16.mxu0 %v5745_v52 }
 0x8a6   :  { %5716 = vmatpush3.bf16.msra.mxu1 %v5715_v53  ;;  %5748 = vmatpush3.bf16.msra.mxu0 %v5747_v57 }
 0x8a7   :  { %5750 = vmatprep.subr.bf16.mxu1 %v7824_v28  ;;  %5782 = vmatprep.subr.bf16.mxu0 %v7824_v28 }
 0x95b   :  { %v2223_v61 = vpop.f32.mrb[10].mxu1  ;;  %v2300_v62 = vpop.f32.mrb[14].mxu0 }
 0x95c   :  { %v2224_v63 = vadd.f32 %v2223_v61, %v2140_v46  ;;  %v2301_v3 = vadd.f32 %v2300_v62, %v2148_v18  ;;  %v2225_v6 = vpop.f32.mrb[11].mxu1  ;;  %v2302_v8 = vpop.f32.mrb[15].mxu0 }
 0x95d   :  { %v2226_v9 = vadd.f32 %v2225_v6, %v2144_v60  ;;  %v2303_v11 = vadd.f32 %v2302_v8, %v2152_v12  ;;  %v912_v6 = vld [vmem:[#allocation32 + $0x8] sm:$0xff]  ;;  %v915_v8 = vld [vmem:[#allocation32 + $0x20] sm:$0xff] }
 0x95e   :  { %v2311_v21 = vmax.f32 %v2224_v63, 0.0  ;;  %v2313_v23 = vmax.f32 %v2301_v3, 0.0 }
 0x95f   :  { %v2312_v14 = vmax.f32 %v2226_v9, 0.0  ;;  %v2314_v15 = vmax.f32 %v2303_v11, 0.0  ;;  %v2229_v17 = vpop.f32.mrb[12].mxu1  ;;  %v2306_v20 = vpop.f32.mrb[16].mxu0  ;;  %v911_v9 = vld [vmem:[#allocation32] sm:$0xff]  ;;  %v5813_v11 = vpack.c.bf16 %v915_v8, %v912_v6  ;;  %v936_v8 = vld [vmem:[#allocation32 + $0xc8] sm:$0xff] }
 0x960   :  { %v2230_v26 = vadd.f32 %v2229_v17, %v2140_v46  ;;  %v2307_v29 = vadd.f32 %v2306_v20, %v2148_v18  ;;  %v2231_v31 = vpop.f32.mrb[13].mxu1  ;;  %v2308_v40 = vpop.f32.mrb[17].mxu0  ;;  %v916_v17 = vld [vmem:[#allocation32 + $0x28] sm:$0xff] }
 0x961   :  { %v2232_v44 = vadd.f32 %v2231_v31, %v2144_v60  ;;  %v2309_v50 = vadd.f32 %v2308_v40, %v2152_v12  ;;  %2389 = vmatprep.mubr.f32.mxu1 %v2312_v14  ;;  %2464 = vmatprep.mubr.f32.mxu0 %v2314_v15  ;;  %v914_v14 = vld [vmem:[#allocation32 + $0x18] sm:$0xff]  ;;  %v913_v15 = vld [vmem:[#allocation32 + $0x10] sm:$0xff]  ;;  %v920_v31 = vld [vmem:[#allocation32 + $0x48] sm:$0xff] }
 0x962   :  { %2390 = vmatmul.mubr.f32.vlgmr.msra.gmra.mrb[14].mxu1 %v2311_v21  ;;  %2465 = vmatmul.mubr.f32.vlgmr.msra.gmra.mrb[18].mxu0 %v2313_v23  ;;  %v2315_v36 = vmax.f32 %v2230_v26, 0.0  ;;  %v2317_v38 = vmax.f32 %v2307_v29, 0.0  ;;  %v5815_v20 = vpack.c.bf16 %v914_v14, %v911_v9  ;;  %v5845_v21 = vpack.c.bf16 %v916_v17, %v913_v15  ;;  %v918_v23 = vld [vmem:[#allocation32 + $0x38] sm:$0xff]  ;;  %v921_v26 = vld [vmem:[#allocation32 + $0x50] sm:$0xff]  ;;  %v924_v40 = vld [vmem:[#allocation32 + $0x68] sm:$0xff] }
 0x963   :  { %v2316_v32 = vmax.f32 %v2232_v44, 0.0  ;;  %v2318_v34 = vmax.f32 %v2309_v50, 0.0  ;;  %5752 = vmatpush3.bf16.msra.mxu1 %v7824_v28  ;;  %5784 = vmatpush3.bf16.msra.mxu0 %v7824_v28  ;;  %v917_v29 = vld [vmem:[#allocation32 + $0x30] sm:$0xff]  ;;  %v927_v44 = vld [vmem:[#allocation32 + $0x80] sm:$0xff]  ;;  %v938_v15 = vld [vmem:[#allocation32 + $0xd8] sm:$0xff] }
 0x964   :  { %5754 = vmatprep.subr.bf16.mxu1 %v7826_v30  ;;  %5786 = vmatprep.subr.bf16.mxu0 %v7826_v30  ;;  %v923_v50 = vld [vmem:[#allocation32 + $0x60] sm:$0xff]  ;;  %v937_v17 = vld [vmem:[#allocation32 + $0xd0] sm:$0xff] }
 0x965   :  { %2394 = vmatprep.mubr.f32.mxu1 %v2316_v32  ;;  %2469 = vmatprep.mubr.f32.mxu0 %v2318_v34  ;;  %v5821_v32 = vpack.c.bf16 %v927_v44, %v924_v40  ;;  %v926_v34 = vld [vmem:[#allocation32 + $0x78] sm:$0xff]  ;;  %v939_v9 = vld [vmem:[#allocation32 + $0xe0] sm:$0xff] }
 0x966   :  { %2395 = vmatmul.mubr.f32.gmra.mrb[16].mxu1 %v2315_v36  ;;  %2470 = vmatmul.mubr.f32.gmra.mrb[20].mxu0 %v2317_v38  ;;  %v5823_v36 = vpack.c.bf16 %v926_v34, %v923_v50  ;;  %v935_v14 = vld [vmem:[#allocation32 + $0xc0] sm:$0xff]  ;;  %v946_v50 = vld [vmem:[#allocation32 + $0x118] sm:$0xff] }
 0x967   :  { %5756 = vmatpush3.bf16.msra.mxu1 %v7826_v30  ;;  %5788 = vmatpush3.bf16.msra.mxu0 %v7826_v30  ;;  %v943_v40 = vld [vmem:[#allocation32 + $0x100] sm:$0xff] }
 0x968   :  { %5758 = vmatprep.subr.bf16.mxu1 %v7832_v33  ;;  %5790 = vmatprep.subr.bf16.mxu0 %v7832_v33  ;;  %v951_v34 = vld [vmem:[#allocation32 + $0x140] sm:$0xff] }
 0x96b   :  { %5760 = vmatpush3.bf16.msra.mxu1 %v7832_v33  ;;  %5792 = vmatpush3.bf16.msra.mxu0 %v7832_v33 }
 0x96c   :  { %5762 = vmatprep.subr.bf16.mxu1 %v7836_v37  ;;  %5794 = vmatprep.subr.bf16.mxu0 %v7836_v37 }
 0x96f   :  { %5764 = vmatpush3.bf16.msra.mxu1 %v7836_v37  ;;  %5796 = vmatpush3.bf16.msra.mxu0 %v7836_v37 }
 0x970   :  { %5766 = vmatprep.subr.bf16.mxu1 %v7840_v41  ;;  %5798 = vmatprep.subr.bf16.mxu0 %v7840_v41 }
 0x973   :  { %5768 = vmatpush3.bf16.msra.mxu1 %v7840_v41  ;;  %5800 = vmatpush3.bf16.msra.mxu0 %v7840_v41 }
 0x974   :  { %5770 = vmatprep.subr.bf16.mxu1 %v7844_v45  ;;  %5802 = vmatprep.subr.bf16.mxu0 %v7844_v45 }
 0x977   :  { %5772 = vmatpush3.bf16.msra.mxu1 %v7844_v45  ;;  %5804 = vmatpush3.bf16.msra.mxu0 %v7844_v45 }
 0x978   :  { %5774 = vmatprep.subr.bf16.mxu1 %v7848_v51  ;;  %5806 = vmatprep.subr.bf16.mxu0 %v7848_v51 }
 0x97b   :  { %5776 = vmatpush3.bf16.msra.mxu1 %v7848_v51  ;;  %5808 = vmatpush3.bf16.msra.mxu0 %v7848_v51 }
 0x97c   :  { %5778 = vmatprep.subr.bf16.mxu1 %v7874_v49  ;;  %5810 = vmatprep.subr.bf16.mxu0 %v7874_v49 }
 0x97f   :  { %5780 = vmatpush3.bf16.msra.mxu1 %v7874_v49  ;;  %5812 = vmatpush3.bf16.msra.mxu0 %v7874_v49 }
 0x980   :  { %5814 = vmatprep.subr.bf16.mxu1 %v5813_v11  ;;  %5846 = vmatprep.subr.bf16.mxu0 %v5845_v21  ;;  %v5829_v11 = vpack.c.bf16 %v939_v9, %v936_v8 }
 0xa35   :  { %v4344_v39 = vpop.f32.mrb[14].mxu1  ;;  %v4382_v42 = vpop.f32.mrb[18].mxu0 }
 0xa36   :  { %v4345_v47 = vpop.f32.mrb[15].mxu1  ;;  %v4383_v48 = vpop.f32.mrb[19].mxu0 }
 0xa37   :  { %v4346_v52 = vadd.f32 %v4345_v47, %v4344_v39  ;;  %v4384_v53 = vadd.f32 %v4383_v48, %v4382_v42  ;;  %v919_v47 = vld [vmem:[#allocation32 + $0x40] sm:$0xff]  ;;  %v922_v48 = vld [vmem:[#allocation32 + $0x58] sm:$0xff] }
 0xa39   :  { %v2392_v55 = vadd.f32 %v4346_v52, %v4085_v43  ;;  %v4347_v56 = vpop.f32.mrb[16].mxu1  ;;  %v4385_v57 = vpop.f32.mrb[20].mxu0 }
 0xa3a   :  { %v4348_v58 = vpop.f32.mrb[17].mxu1  ;;  %v4386_v46 = vpop.f32.mrb[21].mxu0 }
 0xa3b   :  { %v2467_v18 = vadd.f32 %v4384_v53, %v2392_v55  ;;  %v4349_v60 = vadd.f32 %v4348_v58, %v4347_v56  ;;  %v4387_v12 = vadd.f32 %v4386_v46, %v4385_v57  ;;  %v5849_v55 = vpack.c.bf16 %v922_v48, %v919_v47  ;;  %v925_v56 = vld [vmem:[#allocation32 + $0x70] sm:$0xff]  ;;  %v928_v57 = vld [vmem:[#allocation32 + $0x88] sm:$0xff]  ;;  %v930_v46 = vld [vmem:[#allocation32 + $0x98] sm:$0xff] }
 0xa3c   :  { %v5853_v58 = vpack.c.bf16 %v928_v57, %v925_v56  ;;  %v950_v47 = vld [vmem:[#allocation32 + $0x138] sm:$0xff]  ;;  %v949_v48 = vld [vmem:[#allocation32 + $0x130] sm:$0xff] }
 0xa3d   :  { %v2397_v61 = vadd.f32 %v4349_v60, %v4085_v43  ;;  %v2475_v62 = vadd.f32 %v2467_v18, %v7894_v54  ;;  %v5817_v54 = vpack.c.bf16 %v921_v26, %v918_v23  ;;  %v933_v18 = vld [vmem:[#allocation32 + $0xb0] sm:$0xff]  ;;  %v942_v23 = vld [vmem:[#allocation32 + $0xf8] sm:$0xff] }
 0xa3e   :  { %v5825_v60 = vpack.c.bf16 %v933_v18, %v930_v46  ;;  %v945_v26 = vld [vmem:[#allocation32 + $0x110] sm:$0xff]  ;;  %v958_v46 = vld [vmem:[#allocation32 + $0x178] sm:$0xff] }
 0xa3f   :  { %v2472_v63 = vadd.f32 %v4387_v12, %v2397_v61  ;;  %4945 = vmatprep.mubr.f32.mxu1 %v2475_v62  ;;  %v929_v12 = vld [vmem:[#allocation32 + $0x90] sm:$0xff]  ;;  %v932_v61 = vld [vmem:[#allocation32 + $0xa8] sm:$0xff] }
 0xa41   :  { %v2476_v3 = vadd.f32 %v2472_v63, %v7900_v5  ;;  %v5819_v5 = vpack.c.bf16 %v920_v31, %v917_v29  ;;  %v5827_v63 = vpack.c.bf16 %v932_v61, %v929_v12  ;;  %v941_v31 = vld [vmem:[#allocation32 + $0xf0] sm:$0xff]  ;;  %v956_v12 = vld [vmem:[#allocation32 + $0x168] sm:$0xff] }
 0xa43   :  { %4946 = vmatmul.mubr.f32.vlgmr.msra.gmra.mrb[18].mxu1 %v2476_v3 }
 0xa44   :  { %2731 = vmatprep.mubr.f32.mxu1 %v7363_v1  ;;  %5816 = vmatpush1.bf16.msra.mxu1 %v5815_v20  ;;  %v5831_v20 = vpack.c.bf16 %v938_v15, %v935_v14 }
 0xa45   :  { %5818 = vmatprep.subr.bf16.mxu1 %v5817_v54  ;;  %v5833_v54 = vpack.c.bf16 %v945_v26, %v942_v23 }
 0xa48   :  { %5820 = vmatpush1.bf16.msra.mxu1 %v5819_v5  ;;  %v944_v5 = vld [vmem:[#allocation32 + $0x108] sm:$0xff] }
 0xa49   :  { %5822 = vmatprep.subr.bf16.mxu1 %v5821_v32  ;;  %v5835_v44 = vpack.c.bf16 %v944_v5, %v941_v31  ;;  %v948_v32 = vld [vmem:[#allocation32 + $0x128] sm:$0xff] }
 0xa4c   :  { %5824 = vmatpush1.bf16.msra.mxu1 %v5823_v36  ;;  %v5865_v36 = vpack.c.bf16 %v946_v50, %v943_v40 }
 0xa4d   :  { %5826 = vmatprep.subr.bf16.mxu1 %v5825_v60  ;;  %v953_v60 = vld [vmem:[#allocation32 + $0x150] sm:$0xff] }
 0xa50   :  { %5828 = vmatpush1.bf16.msra.mxu1 %v5827_v63 }
 0xa51   :  { %5830 = vmatprep.subr.bf16.mxu1 %v5829_v11  ;;  %v4086_v11 = vld [vmem:[#allocation29] ss:$0 sm:$0xff] }
 0xa54   :  { %5832 = vmatpush1.bf16.msra.mxu1 %v5831_v20  ;;  %v4087_v20 = vld [vmem:[#allocation31] ss:$0 sm:$0xff] }
 0xa55   :  { %5834 = vmatprep.subr.bf16.mxu1 %v5833_v54 }
 0xa58   :  { %5836 = vmatpush1.bf16.msra.mxu1 %v5835_v44 }
 0xb16   :  { %v4947_v38 = vpop.f32.mrb[18].mxu1 }
 0xb17   :  { %v7946_v39 = vsub.f32 %v2476_v3, %v4947_v38  ;;  %v2543_v42 = vpop.f32.mrb[19].mxu1  ;;  %v934_v3 = vld [vmem:[#allocation32 + $0xb8] sm:$0xff]  ;;  %v5837_v38 = vpack.c.bf16 %v951_v34, %v948_v32 }
 0xb18   :  { %v7948_v43 = vsub.f32 %v2475_v62, %v2543_v42  ;;  %v931_v62 = vld [vmem:[#allocation32 + $0xa0] sm:$0xff] }
 0xb19   :  { %v2555_v53 = vmul.f32 %v7946_v39, %v7946_v39  ;;  %v5857_v6 = vpack.c.bf16 %v934_v3, %v931_v62  ;;  %v947_v42 = vld [vmem:[#allocation32 + $0x120] sm:$0xff]  ;;  %5838 = vmatprep.subr.bf16.mxu1 %v5837_v38  ;;  %v5843_v62 = vpack.c.bf16 %v956_v12, %v953_v60  ;;  %v966_v60 = vld [vmem:[#allocation35 + $0x30] sm:$0xff] }
 0xb1a   :  { %v2554_v52 = vmul.f32 %v7948_v43, %v7948_v43  ;;  %v5839_v57 = vpack.c.bf16 %v950_v47, %v947_v42  ;;  %v967_v12 = vld [vmem:[#allocation35 + $0x38] sm:$0xff] }
 0xb1c   :  { %4980 = vmatprep.mubr.f32.mxu0 %v2554_v52  ;;  %v952_v52 = vld [vmem:[#allocation32 + $0x148] sm:$0xff]  ;;  %5840 = vmatpush1.bf16.msra.mxu1 %v5839_v57 }
 0xb1d   :  { %4981 = vmatmul.mubr.f32.vlgmr.msra.gmra.mrb[22].mxu0 %v2555_v53  ;;  %v954_v53 = vld [vmem:[#allocation32 + $0x158] sm:$0xff]  ;;  %v5869_v56 = vpack.c.bf16 %v952_v52, %v949_v48  ;;  %v960_v48 = vld [vmem:[#allocation35] sm:$0xff]  ;;  %v961_v52 = vld [vmem:[#allocation35 + $0x8] sm:$0xff] }
 0xb1e   :  { %5848 = vmatpush3.bf16.msra.mxu0 %v5845_v21  ;;  %v940_v21 = vld [vmem:[#allocation32 + $0xe8] sm:$0xff] }
 0xb1f   :  { %5850 = vmatprep.subr.bf16.mxu0 %v5849_v55  ;;  %v5861_v29 = vpack.c.bf16 %v940_v21, %v937_v17 }
 0xb22   :  { %5852 = vmatpush3.bf16.msra.mxu0 %v5849_v55  ;;  %v957_v55 = vld [vmem:[#allocation32 + $0x170] sm:$0xff] }
 0xb23   :  { %5854 = vmatprep.subr.bf16.mxu0 %v5853_v58  ;;  %v5841_v18 = vpack.c.bf16 %v957_v55, %v954_v53  ;;  %v5941_v53 = vpack.c.bf16 %v961_v52, %v960_v48  ;;  %v962_v55 = vld [vmem:[#allocation35 + $0x10] sm:$0xff] }
 0xb25   :  { %5842 = vmatprep.subr.bf16.mxu1 %v5841_v18 }
 0xb26   :  { %5856 = vmatpush3.bf16.msra.mxu0 %v5853_v58  ;;  %v955_v58 = vld [vmem:[#allocation32 + $0x160] sm:$0xff]  ;;  %5844 = vmatpush1.bf16.msra.mxu1 %v5843_v62 }
 0xb27   :  { %5858 = vmatprep.subr.bf16.mxu0 %v5857_v6  ;;  %v5873_v61 = vpack.c.bf16 %v958_v46, %v955_v58  ;;  %5878 = vmatprep.subr.bf16.mxu1 %v7754_v2  ;;  %v964_v58 = vld [vmem:[#allocation35 + $0x20] sm:$0xff]  ;;  %v965_v46 = vld [vmem:[#allocation35 + $0x28] sm:$0xff] }
 0xb28   :  { %v5949_v18 = vpack.c.bf16 %v965_v46, %v964_v58  ;;  %v968_v62 = vld [vmem:[#allocation35 + $0x40] sm:$0xff] }
 0xb2a   :  { %5860 = vmatpush3.bf16.msra.mxu0 %v5857_v6 }
 0xb2b   :  { %5862 = vmatprep.subr.bf16.mxu0 %v5861_v29 }
 0xb2e   :  { %5864 = vmatpush3.bf16.msra.mxu0 %v5861_v29 }
 0xb2f   :  { %5866 = vmatprep.subr.bf16.mxu0 %v5865_v36 }
 0xb32   :  { %5868 = vmatpush3.bf16.msra.mxu0 %v5865_v36 }
 0xb33   :  { %5870 = vmatprep.subr.bf16.mxu0 %v5869_v56 }
 0xb36   :  { %5872 = vmatpush3.bf16.msra.mxu0 %v5869_v56  ;;  %v963_v56 = vld [vmem:[#allocation35 + $0x18] sm:$0xff] }
 0xb37   :  { %5874 = vmatprep.subr.bf16.mxu0 %v5873_v61  ;;  %v5945_v57 = vpack.c.bf16 %v963_v56, %v962_v55 }
 0xb3a   :  { %5876 = vmatpush3.bf16.msra.mxu0 %v5873_v61  ;;  %v5953_v61 = vpack.c.bf16 %v967_v12, %v966_v60 }
 0xb3b   :  { %5910 = vmatprep.subr.bf16.mxu0 %v7754_v2 }
 0xbf0   :  { %v4982_v63 = vpop.f32.mrb[22].mxu0 }
 0xbf1   :  { %v2628_v3 = vadd.f32 1e-05, %v4982_v63  ;;  %v2622_v6 = vpop.f32.mrb[23].mxu0  ;;  %v969_v63 = vld [vmem:[#allocation35 + $0x48] sm:$0xff] }
 0xbf2   :  { %v2623_v8 = vadd.f32 1e-05, %v2622_v6  ;;  %v970_v6 = vld [vmem:[#allocation35 + $0x50] sm:$0xff] }
 0xbf3   :  { %6449 = vrsqrt.f32 %v2628_v3  ;;  %v5957_v3 = vpack.c.bf16 %v969_v63, %v968_v62  ;;  %v978_v62 = vld [vmem:[#allocation38 + $0x8] sm:$0xff] }
 0xbf4   :  { %6451 = vrsqrt.f32 %v2623_v8  ;;  %v971_v8 = vld [vmem:[#allocation35 + $0x58] sm:$0xff]  ;;  %v982_v63 = vld [vmem:[#allocation38 + $0x28] sm:$0xff] }
 0xbfd   :  { %v6450_v9 = vpop.eup %6449 }
 0xbfe   :  { %v6452_v14 = vpop.eup %6451  ;;  %v2634_v15 = vmul.f32 %v6450_v9, %v7946_v39  ;;  %v5961_v9 = vpack.c.bf16 %v971_v8, %v970_v6  ;;  %v6037_v6 = vpack.c.bf16 %v982_v63, %v978_v62  ;;  %v984_v8 = vld [vmem:[#allocation38 + $0x38] sm:$0xff] }
 0xbff   :  { %v2633_v17 = vmul.f32 %v6452_v14, %v7948_v43  ;;  %v973_v14 = vld [vmem:[#allocation35 + $0x68] sm:$0xff] }
 0xc00   :  { %v2642_v21 = vmul.f32 %v4086_v11, %v2634_v15 }
 0xc01   :  { %v2641_v23 = vmul.f32 %v4086_v11, %v2633_v17  ;;  %v972_v11 = vld [vmem:[#allocation35 + $0x60] sm:$0xff]  ;;  %v974_v17 = vld [vmem:[#allocation35 + $0x70] sm:$0xff] }
 0xc02   :  { %v7960_v29 = vadd.f32 %v4087_v20, %v2642_v21  ;;  %v5965_v15 = vpack.c.bf16 %v973_v14, %v972_v11  ;;  %v981_v11 = vld [vmem:[#allocation38 + $0x20] sm:$0xff] }
 0xc03   :  { %v7958_v26 = vadd.f32 %v4087_v20, %v2641_v23  ;;  %v975_v20 = vld [vmem:[#allocation35 + $0x78] sm:$0xff] }
 0xc04   :  { %v5969_v21 = vpack.c.bf16 %v975_v20, %v974_v17  ;;  %v986_v17 = vld [vmem:[#allocation38 + $0x48] sm:$0xff] }
 0xc05   :  { %2732 = vmatmul.mubr.f32.vlgmr.msra.gmra.mrb[20].mxu1 %v7958_v26  ;;  %5015 = vmatprep.mubr.f32.mxu0 %v7958_v26  ;;  %v990_v20 = vld [vmem:[#allocation38 + $0x68] sm:$0xff] }
 0xc06   :  { %5016 = vmatmul.mubr.f32.vlgmr.msra.gmra.mrb[24].mxu0 %v7960_v29  ;;  %2737 = vmatprep.mubr.f32.mxu1 %v7363_v1 }
 0xc07   :  { %5880 = vmatpush3.bf16.msra.mxu1 %v7754_v2  ;;  %5912 = vmatpush3.bf16.msra.mxu0 %v7754_v2  ;;  %v959_v2 = vld [vmem:[#allocation34] sm:$0x7] }
 0xc08   :  { %5882 = vmatprep.subr.bf16.mxu1 %v7756_v4  ;;  %5914 = vmatprep.subr.bf16.mxu0 %v7756_v4 }
 0xc09   :  { %2738 = vmatmul.mubr.f32.gmra.mrb[22].mxu1 %v7960_v29 }
 0xc0b   :  { %5884 = vmatpush3.bf16.msra.mxu1 %v7756_v4  ;;  %5916 = vmatpush3.bf16.msra.mxu0 %v7756_v4  ;;  %v2655_v4 = vrot.slane %v959_v2, %v7805_v25 }
 0xc0c   :  { %5886 = vmatprep.subr.bf16.mxu1 %v7764_v7  ;;  %5918 = vmatprep.subr.bf16.mxu0 %v7764_v7 }
 0xc0f   :  { %5888 = vmatpush3.bf16.msra.mxu1 %v7764_v7  ;;  %5920 = vmatpush3.bf16.msra.mxu0 %v7764_v7  ;;  %v2659_v7 = vrot.slane %v959_v2, %v7808_v27 }
 0xc10   :  { %5890 = vmatprep.subr.bf16.mxu1 %v7770_v10  ;;  %5922 = vmatprep.subr.bf16.mxu0 %v7770_v10 }
 0xc13   :  { %5892 = vmatpush3.bf16.msra.mxu1 %v7770_v10  ;;  %5924 = vmatpush3.bf16.msra.mxu0 %v7770_v10  ;;  %v2663_v10 = vrot.slane %v959_v2, %v7813_v35 }
 0xc14   :  { %5894 = vmatprep.subr.bf16.mxu1 %v7776_v13  ;;  %5926 = vmatprep.subr.bf16.mxu0 %v7776_v13 }
 0xc17   :  { %5896 = vmatpush3.bf16.msra.mxu1 %v7776_v13  ;;  %5928 = vmatpush3.bf16.msra.mxu0 %v7776_v13 }
 0xc18   :  { %5898 = vmatprep.subr.bf16.mxu1 %v7782_v16  ;;  %5930 = vmatprep.subr.bf16.mxu0 %v7782_v16 }
 0xc1b   :  { %5900 = vmatpush3.bf16.msra.mxu1 %v7782_v16  ;;  %5932 = vmatpush3.bf16.msra.mxu0 %v7782_v16 }
 0xc1c   :  { %5902 = vmatprep.subr.bf16.mxu1 %v7788_v19  ;;  %5934 = vmatprep.subr.bf16.mxu0 %v7788_v19 }
 0xc1f   :  { %5904 = vmatpush3.bf16.msra.mxu1 %v7788_v19  ;;  %5936 = vmatpush3.bf16.msra.mxu0 %v7788_v19 }
 0xc20   :  { %5906 = vmatprep.subr.bf16.mxu1 %v7796_v22  ;;  %5938 = vmatprep.subr.bf16.mxu0 %v7796_v22 }
 0xc23   :  { %5908 = vmatpush3.bf16.msra.mxu1 %v7796_v22  ;;  %5940 = vmatpush3.bf16.msra.mxu0 %v7796_v22 }
 0xc24   :  { %5974 = vmatprep.subr.bf16.mxu0 %v7824_v28  ;;  %5942 = vmatprep.subr.bf16.mxu1 %v5941_v53 }
 0xcd8   :  { %v2733_v13 = vpop.f32.mrb[20].mxu1 }
 0xcd9   :  { %v2734_v16 = vadd.f32 %v2733_v13, %v2655_v4  ;;  %v2735_v19 = vpop.f32.mrb[21].mxu1  ;;  %v5017_v39 = vpop.f32.mrb[24].mxu0 }
 0xcda   :  { %v2736_v43 = vadd.f32 %v2735_v19, %v2659_v7  ;;  %v8001_v54 = vadd.f32 %v5017_v39, %v2663_v10  ;;  %v2810_v31 = vpop.f32.mrb[25].mxu0 }
 0xcdb   :  { %v8003_v5 = vadd.f32 %v2810_v31, %v2663_v10 }
 0xcdc   :  { %v2819_v22 = vmul.f32 %v2736_v43, %v2734_v16  ;;  %v2739_v40 = vpop.f32.mrb[22].mxu1 }
 0xcdd   :  { %v2993_v44 = vsub.f32 %v8003_v5, %v8001_v54  ;;  %v2994_v50 = vsub.f32 %v8001_v54, %v8003_v5  ;;  %v2740_v32 = vadd.f32 %v2739_v40, %v2655_v4  ;;  %v2741_v34 = vpop.f32.mrb[23].mxu1 }
 0xcde   :  { %v2742_v36 = vadd.f32 %v2741_v34, %v2659_v7  ;;  %5050 = vmatprep.mubr.f32.mxu1 %v2819_v22 }
 0xcdf   :  { %v2897_v38 = vmul.f32 %v2740_v32, %v2736_v43 }
 0xce0   :  { %v2820_v42 = vmul.f32 %v2742_v36, %v2740_v32  ;;  %v2896_v47 = vmul.f32 %v2742_v36, %v2734_v16 }
 0xce2   :  { %5051 = vmatmul.mubr.f32.vlgmr.msra.gmra.mrb[24].mxu1 %v2820_v42  ;;  %5085 = vmatprep.mubr.f32.mxu0 %v2896_v47 }
 0xce3   :  { %5086 = vmatmul.mubr.f32.vlgmr.msra.gmra.mrb[26].mxu0 %v2897_v38  ;;  %5944 = vmatpush3.bf16.msra.mxu1 %v5941_v53 }
 0xce4   :  { %5976 = vmatpush3.bf16.msra.mxu0 %v7824_v28  ;;  %5946 = vmatprep.subr.bf16.mxu1 %v5945_v57 }
 0xce5   :  { %5978 = vmatprep.subr.bf16.mxu0 %v7826_v30 }
 0xce7   :  { %5948 = vmatpush3.bf16.msra.mxu1 %v5945_v57 }
 0xce8   :  { %5980 = vmatpush3.bf16.msra.mxu0 %v7826_v30  ;;  %5950 = vmatprep.subr.bf16.mxu1 %v5949_v18 }
 0xce9   :  { %5982 = vmatprep.subr.bf16.mxu0 %v7832_v33 }
 0xceb   :  { %5952 = vmatpush3.bf16.msra.mxu1 %v5949_v18 }
 0xcec   :  { %5984 = vmatpush3.bf16.msra.mxu0 %v7832_v33  ;;  %5954 = vmatprep.subr.bf16.mxu1 %v5953_v61 }
 0xced   :  { %5986 = vmatprep.subr.bf16.mxu0 %v7836_v37 }
 0xcef   :  { %5956 = vmatpush3.bf16.msra.mxu1 %v5953_v61 }
 0xcf0   :  { %5988 = vmatpush3.bf16.msra.mxu0 %v7836_v37  ;;  %5958 = vmatprep.subr.bf16.mxu1 %v5957_v3 }
 0xcf1   :  { %5990 = vmatprep.subr.bf16.mxu0 %v7840_v41 }
 0xcf3   :  { %5960 = vmatpush3.bf16.msra.mxu1 %v5957_v3  ;;  %v980_v3 = vld [vmem:[#allocation38 + $0x18] sm:$0xff] }
 0xcf4   :  { %5992 = vmatpush3.bf16.msra.mxu0 %v7840_v41  ;;  %5962 = vmatprep.subr.bf16.mxu1 %v5961_v9  ;;  %v6069_v14 = vpack.c.bf16 %v984_v8, %v980_v3  ;;  %v1003_v3 = vld [vmem:[#allocation38 + $0xd0] sm:$0xff] }
 0xcf5   :  { %5994 = vmatprep.subr.bf16.mxu0 %v7844_v45 }
 0xcf7   :  { %5964 = vmatpush3.bf16.msra.mxu1 %v5961_v9  ;;  %v977_v9 = vld [vmem:[#allocation38] sm:$0xff] }
 0xcf8   :  { %5996 = vmatpush3.bf16.msra.mxu0 %v7844_v45  ;;  %5966 = vmatprep.subr.bf16.mxu1 %v5965_v15 }
 0xcf9   :  { %5998 = vmatprep.subr.bf16.mxu0 %v7848_v51 }
 0xcfb   :  { %5968 = vmatpush3.bf16.msra.mxu1 %v5965_v15  ;;  %v6039_v15 = vpack.c.bf16 %v981_v11, %v977_v9  ;;  %v1010_v9 = vld [vmem:[#allocation38 + $0x108] sm:$0xff] }
 0xcfc   :  { %6000 = vmatpush3.bf16.msra.mxu0 %v7848_v51  ;;  %5970 = vmatprep.subr.bf16.mxu1 %v5969_v21  ;;  %v1014_v11 = vld [vmem:[#allocation38 + $0x128] sm:$0xff] }
 0xcfd   :  { %6002 = vmatprep.subr.bf16.mxu0 %v7874_v49 }
 0xcff   :  { %5972 = vmatpush3.bf16.msra.mxu1 %v5969_v21  ;;  %v989_v21 = vld [vmem:[#allocation38 + $0x60] sm:$0xff] }
 0xd00   :  { %6004 = vmatpush3.bf16.msra.mxu0 %v7874_v49  ;;  %6006 = vmatprep.subr.bf16.mxu1 %v7824_v28 }
 0xd01   :  { %6038 = vmatprep.subr.bf16.mxu0 %v6037_v6  ;;  %v1007_v6 = vld [vmem:[#allocation38 + $0xf0] sm:$0xff] }
 0xd02   :  { %v6083_v8 = vpack.c.bf16 %v1007_v6, %v1003_v3  ;;  %v1035_v3 = vld [vmem:[#allocation38 + $0x1d0] sm:$0xff] }
 0xd03   :  { %v1039_v6 = vld [vmem:[#allocation38 + $0x1f0] sm:$0xff] }
 0xdb5   :  { %v5052_v23 = vpop.f32.mrb[24].mxu1 }
 0xdb6   :  { %v2887_v2 = vpop.f32.mrb[25].mxu1  ;;  %v5087_v4 = vpop.f32.mrb[26].mxu0 }
 0xdb7   :  { %v2974_v7 = vmax.f32 %v5052_v23, %v5087_v4  ;;  %v2964_v10 = vpop.f32.mrb[27].mxu0 }
 0xdb8   :  { %v2973_v13 = vmax.f32 %v2887_v2, %v2964_v10 }
 0xdb9   :  { %v2976_v16 = vsub.f32 %v5052_v23, %v2974_v7  ;;  %v2982_v19 = vsub.f32 %v5087_v4, %v2974_v7  ;;  %v998_v4 = vld [vmem:[#allocation38 + $0xa8] sm:$0xff] }
 0xdba   :  { %v2975_v39 = vsub.f32 %v2887_v2, %v2973_v13  ;;  %v2981_v43 = vsub.f32 %v2964_v10, %v2973_v13  ;;  %v994_v2 = vld [vmem:[#allocation38 + $0x88] sm:$0xff]  ;;  %v993_v10 = vld [vmem:[#allocation38 + $0x80] sm:$0xff] }
 0xdbb   :  { %v2979_v31 = vmul.f32 1.442695, %v2976_v16  ;;  %v2985_v22 = vmul.f32 1.442695, %v2982_v19  ;;  %v6045_v7 = vpack.c.bf16 %v998_v4, %v994_v2  ;;  %v997_v13 = vld [vmem:[#allocation38 + $0xa0] sm:$0xff]  ;;  %v1015_v2 = vld [vmem:[#allocation38 + $0x130] sm:$0xff] }
 0xdbc   :  { %v2977_v40 = vmul.f32 1.442695, %v2975_v39  ;;  %v2983_v32 = vmul.f32 1.442695, %v2981_v43  ;;  %v6047_v16 = vpack.c.bf16 %v997_v13, %v993_v10  ;;  %v1018_v4 = vld [vmem:[#allocation38 + $0x148] sm:$0xff]  ;;  %v1020_v13 = vld [vmem:[#allocation38 + $0x158] sm:$0xff] }
 0xdbd   :  { %6453 = vpow2.f32 %v2979_v31  ;;  %v979_v31 = vld [vmem:[#allocation38 + $0x10] sm:$0xff]  ;;  %v1022_v10 = vld [vmem:[#allocation38 + $0x168] sm:$0xff] }
 0xdbe   :  { %6455 = vpow2.f32 %v2985_v22  ;;  %v983_v22 = vld [vmem:[#allocation38 + $0x30] sm:$0xff] }
 0xdbf   :  { %6457 = vpow2.f32 %v2977_v40 }
 0xdc0   :  { %6459 = vpow2.f32 %v2983_v32  ;;  %v988_v32 = vld [vmem:[#allocation38 + $0x58] sm:$0xff] }
 0xdc7   :  { %v6454_v34 = vpop.eup %6453 }
 0xdc8   :  { %v6456_v36 = vpop.eup %6455 }
 0xdc9   :  { %v6458_v38 = vpop.eup %6457  ;;  %v2988_v42 = vadd.f32 %v6456_v36, %v6454_v34 }
 0xdca   :  { %v6460_v47 = vpop.eup %6459 }
 0xdcb   :  { %6461 = vrcp.f32 %v2988_v42  ;;  %v2987_v48 = vadd.f32 %v6460_v47, %v6458_v38 }
 0xdcd   :  { %6463 = vrcp.f32 %v2987_v48  ;;  %v987_v48 = vld [vmem:[#allocation38 + $0x50] sm:$0xff] }
 0xdd5   :  { %v6462_v52 = vpop.eup %6461 }
 0xdd6   :  { %v2992_v53 = vmul.f32 %v6462_v52, %v6454_v34  ;;  %v992_v34 = vld [vmem:[#allocation38 + $0x78] sm:$0xff]  ;;  %v991_v52 = vld [vmem:[#allocation38 + $0x70] sm:$0xff] }
 0xdd7   :  { %v6464_v55 = vpop.eup %6463  ;;  %v6073_v47 = vpack.c.bf16 %v992_v34, %v988_v32  ;;  %v1019_v32 = vld [vmem:[#allocation38 + $0x150] sm:$0xff] }
 0xdd8   :  { %v2991_v56 = vmul.f32 %v6464_v55, %v6458_v38  ;;  %v2996_v57 = vmul.f32 %v2994_v50, %v2992_v53  ;;  %v6071_v38 = vpack.c.bf16 %v983_v22, %v979_v31  ;;  %v996_v53 = vld [vmem:[#allocation38 + $0x98] sm:$0xff]  ;;  %v1017_v31 = vld [vmem:[#allocation38 + $0x140] sm:$0xff] }
 0xdd9   :  { %v1000_v55 = vld [vmem:[#allocation38 + $0xb8] sm:$0xff]  ;;  %v1021_v22 = vld [vmem:[#allocation38 + $0x160] sm:$0xff] }
 0xdda   :  { %v2995_v58 = vmul.f32 %v2993_v44, %v2991_v56  ;;  %v2998_v46 = vadd.f32 %v2996_v57, %v8003_v5  ;;  %v6075_v56 = vpack.c.bf16 %v991_v52, %v987_v48  ;;  %v6077_v57 = vpack.c.bf16 %v1000_v55, %v996_v53  ;;  %v1028_v52 = vld [vmem:[#allocation38 + $0x198] sm:$0xff]  ;;  %v1025_v55 = vld [vmem:[#allocation38 + $0x180] sm:$0xff] }
 0xddb   :  { %v6059_v34 = vpack.c.bf16 %v1021_v22, %v1017_v31  ;;  %v1032_v53 = vld [vmem:[#allocation38 + $0x1b8] sm:$0xff]  ;;  %v1043_v31 = vld [vmem:[#allocation40 + $0x8] sm:$0xff]  ;;  %v1074_v22 = vld [vmem:[#allocation40 + $0x100] sm:$0xff] }
 0xddc   :  { %v2997_v18 = vadd.f32 %v2995_v58, %v8001_v54  ;;  %v4088_v54 = vld [vmem:[#allocation37] ss:$0 sm:$0xff]  ;;  %v995_v58 = vld [vmem:[#allocation38 + $0x90] sm:$0xff] }
 0xdde   :  { %5120 = vmatprep.mubr.f32.mxu1 %v2997_v18 }
 0xddf   :  { %5121 = vmatmul.mubr.f32.vlgmr.msra.gmra.mrb[26].mxu1 %v2998_v46  ;;  %v999_v46 = vld [vmem:[#allocation38 + $0xb0] sm:$0xff] }
 0xde0   :  { %6008 = vmatpush3.bf16.msra.mxu1 %v7824_v28  ;;  %v6079_v18 = vpack.c.bf16 %v999_v46, %v995_v58  ;;  %v1027_v58 = vld [vmem:[#allocation38 + $0x190] sm:$0xff] }
 0xde1   :  { %6010 = vmatprep.subr.bf16.mxu1 %v7826_v30  ;;  %v1031_v46 = vld [vmem:[#allocation38 + $0x1b0] sm:$0xff] }
 0xde4   :  { %6012 = vmatpush3.bf16.msra.mxu1 %v7826_v30 }
 0xde5   :  { %6014 = vmatprep.subr.bf16.mxu1 %v7832_v33 }
 0xde8   :  { %6016 = vmatpush3.bf16.msra.mxu1 %v7832_v33 }
 0xde9   :  { %6018 = vmatprep.subr.bf16.mxu1 %v7836_v37 }
 0xdec   :  { %6020 = vmatpush3.bf16.msra.mxu1 %v7836_v37 }
 0xded   :  { %6022 = vmatprep.subr.bf16.mxu1 %v7840_v41 }
 0xdf0   :  { %6024 = vmatpush3.bf16.msra.mxu1 %v7840_v41 }
 0xdf1   :  { %6026 = vmatprep.subr.bf16.mxu1 %v7844_v45 }
 0xdf4   :  { %6028 = vmatpush3.bf16.msra.mxu1 %v7844_v45 }
 0xdf5   :  { %6030 = vmatprep.subr.bf16.mxu1 %v7848_v51 }
 0xdf8   :  { %6032 = vmatpush3.bf16.msra.mxu1 %v7848_v51 }
 0xdf9   :  { %6034 = vmatprep.subr.bf16.mxu1 %v7874_v49 }
 0xdfc   :  { %6036 = vmatpush3.bf16.msra.mxu1 %v7874_v49 }
 0xdfd   :  { %6070 = vmatprep.subr.bf16.mxu1 %v6069_v14  ;;  %v1012_v14 = vld [vmem:[#allocation38 + $0x118] sm:$0xff] }
 0xeb2   :  { %v5122_v5 = vpop.f32.mrb[26].mxu1 }
 0xeb3   :  { %v3077_v44 = vadd.f32 %v5122_v5, %v4088_v54  ;;  %v3071_v50 = vpop.f32.mrb[27].mxu1  ;;  %v1006_v5 = vld [vmem:[#allocation38 + $0xe8] sm:$0xff] }
 0xeb4   :  { %v3072_v60 = vadd.f32 %v4088_v54, %v3071_v50  ;;  %v1002_v54 = vld [vmem:[#allocation38 + $0xc8] sm:$0xff] }
 0xeb5   :  { %v3081_v61 = vadd.f32 %v3077_v44, %v7960_v29  ;;  %v985_v29 = vld [vmem:[#allocation38 + $0x40] sm:$0xff]  ;;  %v1004_v44 = vld [vmem:[#allocation38 + $0xd8] sm:$0xff]  ;;  %v6049_v50 = vpack.c.bf16 %v1006_v5, %v1002_v54  ;;  %v1034_v54 = vld [vmem:[#allocation38 + $0x1c8] sm:$0xff] }
 0xeb6   :  { %v3080_v12 = vadd.f32 %v3072_v60, %v7958_v26  ;;  %v6041_v26 = vpack.c.bf16 %v990_v20, %v986_v17  ;;  %v6043_v23 = vpack.c.bf16 %v989_v21, %v985_v29  ;;  %v1008_v60 = vld [vmem:[#allocation38 + $0xf8] sm:$0xff]  ;;  %v1009_v20 = vld [vmem:[#allocation38 + $0x100] sm:$0xff]  ;;  %v1038_v5 = vld [vmem:[#allocation38 + $0x1e8] sm:$0xff] }
 0xeb7   :  { %v6081_v62 = vpack.c.bf16 %v1008_v60, %v1004_v44  ;;  %v1016_v17 = vld [vmem:[#allocation38 + $0x138] sm:$0xff]  ;;  %v6065_v60 = vpack.c.bf16 %v1038_v5, %v1034_v54  ;;  %v1063_v54 = vld [vmem:[#allocation40 + $0xa8] sm:$0xff]  ;;  %v1094_v5 = vld [vmem:[#allocation40 + $0x1a0] sm:$0xff] }
 0xeb8   :  { %5155 = vmatprep.mubr.f32.mxu0 %v3080_v12  ;;  %v6085_v29 = vpack.c.bf16 %v1016_v17, %v1012_v14  ;;  %v1036_v44 = vld [vmem:[#allocation38 + $0x1d8] sm:$0xff]  ;;  %v1059_v14 = vld [vmem:[#allocation40 + $0x88] sm:$0xff] }
 0xeb9   :  { %5156 = vmatmul.mubr.f32.vlgmr.msra.gmra.mrb[28].mxu0 %v3081_v61 }
 0xeba   :  { %3341 = vmatprep.mubr.f32.mxu0 %v7363_v1  ;;  %6040 = vmatpush1.bf16.msra.mxu0 %v6039_v15  ;;  %v6053_v15 = vpack.c.bf16 %v1014_v11, %v1010_v9  ;;  %v6099_v9 = vpack.c.bf16 %v1039_v6, %v1035_v3  ;;  %v1058_v11 = vld [vmem:[#allocation40 + $0x80] sm:$0xff] }
 0xebb   :  { %6042 = vmatprep.subr.bf16.mxu0 %v6041_v26  ;;  %v1013_v26 = vld [vmem:[#allocation38 + $0x120] sm:$0xff]  ;;  %v6101_v17 = vpack.c.bf16 %v1059_v14, %v1058_v11  ;;  %v1065_v11 = vld [vmem:[#allocation40 + $0xb8] sm:$0xff]  ;;  %v1096_v14 = vld [vmem:[#allocation40 + $0x1b0] sm:$0xff] }
 0xebc   :  { %v6055_v21 = vpack.c.bf16 %v1013_v26, %v1009_v20  ;;  %v1091_v20 = vld [vmem:[#allocation40 + $0x188] sm:$0xff]  ;;  %v1078_v6 = vld [vmem:[#allocation40 + $0x120] sm:$0xff] }
 0xebe   :  { %6044 = vmatpush1.bf16.msra.mxu0 %v6043_v23  ;;  %v1011_v23 = vld [vmem:[#allocation38 + $0x110] sm:$0xff] }
 0xebf   :  { %6046 = vmatprep.subr.bf16.mxu0 %v6045_v7  ;;  %v6087_v7 = vpack.c.bf16 %v1015_v2, %v1011_v23 }
 0xec2   :  { %6048 = vmatpush1.bf16.msra.mxu0 %v6047_v16  ;;  %v1024_v16 = vld [vmem:[#allocation38 + $0x178] sm:$0xff] }
 0xec3   :  { %6050 = vmatprep.subr.bf16.mxu0 %v6049_v50  ;;  %v6095_v50 = vpack.c.bf16 %v1031_v46, %v1027_v58  ;;  %v1076_v46 = vld [vmem:[#allocation40 + $0x110] sm:$0xff] }
 0xf8c   :  { %v5157_v19 = vpop.f32.mrb[28].mxu0 }
 0xf8d   :  { %v8051_v39 = vsub.f32 %v3081_v61, %v5157_v19  ;;  %v3148_v43 = vpop.f32.mrb[29].mxu0  ;;  %v1005_v61 = vld [vmem:[#allocation38 + $0xe0] sm:$0xff]  ;;  %v6057_v19 = vpack.c.bf16 %v1022_v10, %v1018_v4 }
 0xf8e   :  { %v8053_v40 = vsub.f32 %v3080_v12, %v3148_v43  ;;  %v1001_v12 = vld [vmem:[#allocation38 + $0xc0] sm:$0xff]  ;;  %v6089_v43 = vpack.c.bf16 %v1024_v16, %v1020_v13 }
 0xf8f   :  { %v3160_v42 = vmul.f32 %v8051_v39, %v8051_v39  ;;  %v6051_v63 = vpack.c.bf16 %v1005_v61, %v1001_v12  ;;  %v1040_v12 = vld [vmem:[#allocation38 + $0x1f8] sm:$0xff]  ;;  %v1033_v61 = vld [vmem:[#allocation38 + $0x1c0] sm:$0xff] }
 0xf90   :  { %v3159_v36 = vmul.f32 %v8053_v40, %v8053_v40  ;;  %v4089_v10 = vld [vmem:[#allocation43] ss:$0 sm:$0xff]  ;;  %v4090_v13 = vld [vmem:[#allocation44] ss:$0 sm:$0xff] }
 0xf91   :  { %6052 = vmatpush1.bf16.msra.mxu0 %v6051_v63  ;;  %v6097_v63 = vpack.c.bf16 %v1040_v12, %v1036_v44  ;;  %v1095_v44 = vld [vmem:[#allocation40 + $0x1a8] sm:$0xff] }
 0xf92   :  { %5190 = vmatprep.mubr.f32.mxu1 %v3159_v36  ;;  %6054 = vmatprep.subr.bf16.mxu0 %v6053_v15  ;;  %v1023_v36 = vld [vmem:[#allocation38 + $0x170] sm:$0xff]  ;;  %v1090_v15 = vld [vmem:[#allocation40 + $0x180] sm:$0xff]  ;;  %v6141_v3 = vpack.c.bf16 %v1095_v44, %v1094_v5  ;;  %v1071_v5 = vld [vmem:[#allocation40 + $0xe8] sm:$0xff] }
 0xf93   :  { %5191 = vmatmul.mubr.f32.vlgmr.msra.gmra.mrb[28].mxu1 %v3160_v42  ;;  %v1030_v42 = vld [vmem:[#allocation38 + $0x1a8] sm:$0xff]  ;;  %v6133_v26 = vpack.c.bf16 %v1091_v20, %v1090_v15  ;;  %v1097_v15 = vld [vmem:[#allocation40 + $0x1b8] sm:$0xff]  ;;  %v1102_v44 = vld [vmem:[#allocation40 + $0x1e0] sm:$0xff] }
 0xf94   :  { %6072 = vmatpush1.bf16.msra.mxu1 %v6071_v38  ;;  %3418 = vmatprep.mubr.f32.mxu1 %v7363_v1  ;;  %v1026_v38 = vld [vmem:[#allocation38 + $0x188] sm:$0xff] }
 0xf95   :  { %6074 = vmatprep.subr.bf16.mxu1 %v6073_v47  ;;  %6056 = vmatpush1.bf16.msra.mxu0 %v6055_v21  ;;  %v6091_v47 = vpack.c.bf16 %v1023_v36, %v1019_v32  ;;  %v6061_v48 = vpack.c.bf16 %v1030_v42, %v1026_v38  ;;  %v1075_v32 = vld [vmem:[#allocation40 + $0x108] sm:$0xff]  ;;  %v1061_v38 = vld [vmem:[#allocation40 + $0x98] sm:$0xff]  ;;  %v1092_v42 = vld [vmem:[#allocation40 + $0x190] sm:$0xff] }
 0xf96   :  { %6058 = vmatprep.subr.bf16.mxu0 %v6057_v19 }
 0xf98   :  { %6076 = vmatpush1.bf16.msra.mxu1 %v6075_v56  ;;  %v6093_v56 = vpack.c.bf16 %v1032_v53, %v1028_v52 }
 0xf99   :  { %6078 = vmatprep.subr.bf16.mxu1 %v6077_v57  ;;  %v1029_v57 = vld [vmem:[#allocation38 + $0x1a0] sm:$0xff]  ;;  %6060 = vmatpush1.bf16.msra.mxu0 %v6059_v34  ;;  %v1060_v34 = vld [vmem:[#allocation40 + $0x90] sm:$0xff] }
 0xf9a   :  { %6062 = vmatprep.subr.bf16.mxu0 %v6061_v48  ;;  %v6105_v58 = vpack.c.bf16 %v1061_v38, %v1060_v34  ;;  %v1083_v38 = vld [vmem:[#allocation40 + $0x148] sm:$0xff] }
 0xf9c   :  { %6080 = vmatpush1.bf16.msra.mxu1 %v6079_v18  ;;  %v6063_v18 = vpack.c.bf16 %v1029_v57, %v1025_v55  ;;  %v6135_v55 = vpack.c.bf16 %v1075_v32, %v1074_v22  ;;  %v1045_v57 = vld [vmem:[#allocation40 + $0x18] sm:$0xff]  ;;  %v1051_v22 = vld [vmem:[#allocation40 + $0x48] sm:$0xff] }
 0xf9d   :  { %6082 = vmatprep.subr.bf16.mxu1 %v6081_v62  ;;  %v1037_v62 = vld [vmem:[#allocation38 + $0x1e0] sm:$0xff] }
 0xf9e   :  { %6064 = vmatpush1.bf16.msra.mxu0 %v6063_v18  ;;  %v1062_v18 = vld [vmem:[#allocation40 + $0xa0] sm:$0xff] }
 0xf9f   :  { %6066 = vmatprep.subr.bf16.mxu0 %v6065_v60 }
 0xfa0   :  { %6084 = vmatpush1.bf16.msra.mxu1 %v6083_v8  ;;  %v6067_v8 = vpack.c.bf16 %v1037_v62, %v1033_v61  ;;  %v1046_v61 = vld [vmem:[#allocation40 + $0x20] sm:$0xff]  ;;  %v1047_v62 = vld [vmem:[#allocation40 + $0x28] sm:$0xff] }
 0xfa1   :  { %6086 = vmatprep.subr.bf16.mxu1 %v6085_v29 }
 0xfa2   :  { %6068 = vmatpush1.bf16.msra.mxu0 %v6067_v8  ;;  %v1079_v8 = vld [vmem:[#allocation40 + $0x128] sm:$0xff] }
 0xfa3   :  { %6102 = vmatprep.subr.bf16.mxu0 %v6101_v17  ;;  %v6111_v17 = vpack.c.bf16 %v1047_v62, %v1046_v61  ;;  %v6143_v20 = vpack.c.bf16 %v1079_v8, %v1078_v6  ;;  %v1055_v6 = vld [vmem:[#allocation40 + $0x68] sm:$0xff]  ;;  %v1086_v8 = vld [vmem:[#allocation40 + $0x160] sm:$0xff] }
 0xfa4   :  { %6088 = vmatpush1.bf16.msra.mxu1 %v6087_v7 }
 0xfa5   :  { %6090 = vmatprep.subr.bf16.mxu1 %v6089_v43  ;;  %v1042_v43 = vld [vmem:[#allocation40] sm:$0xff] }
 0xfa6   :  { %v6103_v53 = vpack.c.bf16 %v1043_v31, %v1042_v43  ;;  %v1050_v31 = vld [vmem:[#allocation40 + $0x40] sm:$0xff] }
 0xfa8   :  { %6092 = vmatpush1.bf16.msra.mxu1 %v6091_v47  ;;  %v1093_v47 = vld [vmem:[#allocation40 + $0x198] sm:$0xff] }
 0xfa9   :  { %6094 = vmatprep.subr.bf16.mxu1 %v6093_v56  ;;  %v1044_v56 = vld [vmem:[#allocation40 + $0x10] sm:$0xff] }
 0xfaa   :  { %v6107_v60 = vpack.c.bf16 %v1045_v57, %v1044_v56  ;;  %v1052_v57 = vld [vmem:[#allocation40 + $0x50] sm:$0xff] }
 0xfac   :  { %6096 = vmatpush1.bf16.msra.mxu1 %v6095_v50 }
 0xfad   :  { %6098 = vmatprep.subr.bf16.mxu1 %v6097_v63  ;;  %v6109_v63 = vpack.c.bf16 %v1063_v54, %v1062_v18  ;;  %v1085_v18 = vld [vmem:[#allocation40 + $0x158] sm:$0xff]  ;;  %v1070_v54 = vld [vmem:[#allocation40 + $0xe0] sm:$0xff] }
 0xfae   :  { %v6125_v62 = vpack.c.bf16 %v1071_v5, %v1070_v54 }
 0xfb0   :  { %6100 = vmatpush1.bf16.msra.mxu1 %v6099_v9  ;;  %v1064_v9 = vld [vmem:[#allocation40 + $0xb0] sm:$0xff] }
 0xfb1   :  { %6134 = vmatprep.subr.bf16.mxu1 %v6133_v26  ;;  %v1048_v26 = vld [vmem:[#allocation40 + $0x30] sm:$0xff] }
0x1066   :  { %v5192_v29 = vpop.f32.mrb[28].mxu1 }
0x1067   :  { %v3233_v21 = vadd.f32 1e-05, %v5192_v29  ;;  %v3227_v23 = vpop.f32.mrb[29].mxu1  ;;  %v1049_v29 = vld [vmem:[#allocation40 + $0x38] sm:$0xff] }
0x1068   :  { %v3228_v2 = vadd.f32 1e-05, %v3227_v23  ;;  %v6145_v23 = vpack.c.bf16 %v1097_v15, %v1096_v14  ;;  %v1072_v15 = vld [vmem:[#allocation40 + $0xf0] sm:$0xff] }
0x1069   :  { %6465 = vrsqrt.f32 %v3233_v21  ;;  %v6113_v21 = vpack.c.bf16 %v1065_v11, %v1064_v9  ;;  %v1087_v11 = vld [vmem:[#allocation40 + $0x168] sm:$0xff] }
0x106a   :  { %6467 = vrsqrt.f32 %v3228_v2  ;;  %v1080_v2 = vld [vmem:[#allocation40 + $0x130] sm:$0xff]  ;;  %v6159_v14 = vpack.c.bf16 %v1087_v11, %v1086_v8 }
0x1073   :  { %v6466_v4 = vpop.eup %6465 }
0x1074   :  { %v6468_v7 = vpop.eup %6467  ;;  %v3239_v19 = vmul.f32 %v6466_v4, %v8051_v39  ;;  %v1077_v39 = vld [vmem:[#allocation40 + $0x118] sm:$0xff] }
0x1075   :  { %v3238_v16 = vmul.f32 %v6468_v7, %v8053_v40  ;;  %v6137_v40 = vpack.c.bf16 %v1093_v47, %v1092_v42  ;;  %v6139_v12 = vpack.c.bf16 %v1077_v39, %v1076_v46  ;;  %v1081_v4 = vld [vmem:[#allocation40 + $0x138] sm:$0xff]  ;;  %v1066_v7 = vld [vmem:[#allocation40 + $0xc0] sm:$0xff]  ;;  %v1068_v42 = vld [vmem:[#allocation40 + $0xd0] sm:$0xff] }
0x1076   :  { %v3247_v52 = vmul.f32 %v4089_v10, %v3239_v19  ;;  %v6115_v19 = vpack.c.bf16 %v1049_v29, %v1048_v26  ;;  %v6147_v43 = vpack.c.bf16 %v1081_v4, %v1080_v2  ;;  %v1069_v47 = vld [vmem:[#allocation40 + $0xd8] sm:$0xff]  ;;  %v1084_v39 = vld [vmem:[#allocation40 + $0x150] sm:$0xff] }
0x1077   :  { %v3246_v36 = vmul.f32 %v4089_v10, %v3238_v16  ;;  %v1067_v10 = vld [vmem:[#allocation40 + $0xc8] sm:$0xff]  ;;  %v6155_v61 = vpack.c.bf16 %v1085_v18, %v1084_v39  ;;  %v1105_v29 = vld [vmem:[#allocation40 + $0x1f8] sm:$0xff] }
0x1078   :  { %v8068_v50 = vadd.f32 %v4090_v13, %v3247_v52  ;;  %v1099_v16 = vld [vmem:[#allocation40 + $0x1c8] sm:$0xff]  ;;  %v6117_v32 = vpack.c.bf16 %v1067_v10, %v1066_v7  ;;  %v1100_v52 = vld [vmem:[#allocation40 + $0x1d0] sm:$0xff]  ;;  %v1089_v10 = vld [vmem:[#allocation40 + $0x178] sm:$0xff] }
0x1079   :  { %v8062_v48 = vadd.f32 %v4090_v13, %v3246_v36  ;;  %v1098_v13 = vld [vmem:[#allocation40 + $0x1c0] sm:$0xff]  ;;  %v1088_v7 = vld [vmem:[#allocation40 + $0x170] sm:$0xff] }
0x107a   :  { %v6149_v34 = vpack.c.bf16 %v1099_v16, %v1098_v13  ;;  %v1082_v36 = vld [vmem:[#allocation40 + $0x140] sm:$0xff]  ;;  %v6163_v13 = vpack.c.bf16 %v1089_v10, %v1088_v7 }
0x107b   :  { %3342 = vmatmul.mubr.f32.vlgmr.msra.gmra.mrb[30].mxu0 %v8062_v48  ;;  %3419 = vmatmul.mubr.f32.vlgmr.msra.gmra.mrb[30].mxu1 %v8062_v48  ;;  %v6151_v56 = vpack.c.bf16 %v1083_v38, %v1082_v36  ;;  %v1041_v16 = vld [vmem:[%s8224_s7] sm:$0xf] }
0x107c   :  { %3347 = vmatprep.mubr.f32.mxu0 %v7363_v1  ;;  %3424 = vmatprep.mubr.f32.mxu1 %v7363_v1 }
0x107d   :  { %6104 = vmatpush3.bf16.msra.mxu0 %v6103_v53  ;;  %6136 = vmatpush3.bf16.msra.mxu1 %v6135_v55  ;;  %v1101_v53 = vld [vmem:[#allocation40 + $0x1d8] sm:$0xff]  ;;  %v6119_v55 = vpack.c.bf16 %v1051_v22, %v1050_v31  ;;  %v3264_v31 = vrot.slane %v1041_v16, %v7808_v27  ;;  %v3272_v22 = vrot.slane %v1041_v16, %v2151_v59 }
0x107e   :  { %6106 = vmatprep.subr.bf16.mxu0 %v6105_v58  ;;  %6138 = vmatprep.subr.bf16.mxu1 %v6137_v40  ;;  %v1053_v58 = vld [vmem:[#allocation40 + $0x58] sm:$0xff]  ;;  %v6121_v40 = vpack.c.bf16 %v1069_v47, %v1068_v42  ;;  %v6153_v46 = vpack.c.bf16 %v1101_v53, %v1100_v52 }
0x107f   :  { %3348 = vmatmul.mubr.f32.gmra.mrb[32].mxu0 %v8068_v50  ;;  %3425 = vmatmul.mubr.f32.gmra.mrb[32].mxu1 %v8068_v50 }
0x1081   :  { %6108 = vmatpush3.bf16.msra.mxu0 %v6107_v60  ;;  %6140 = vmatpush3.bf16.msra.mxu1 %v6139_v12  ;;  %v1103_v60 = vld [vmem:[#allocation40 + $0x1e8] sm:$0xff]  ;;  %v6123_v12 = vpack.c.bf16 %v1053_v58, %v1052_v57 }
0x1082   :  { %6110 = vmatprep.subr.bf16.mxu0 %v6109_v63  ;;  %6142 = vmatprep.subr.bf16.mxu1 %v6141_v3  ;;  %v6157_v63 = vpack.c.bf16 %v1103_v60, %v1102_v44  ;;  %v1054_v3 = vld [vmem:[#allocation40 + $0x60] sm:$0xff] }
0x1083   :  { %v6127_v9 = vpack.c.bf16 %v1055_v6, %v1054_v3 }
0x1085   :  { %6112 = vmatpush3.bf16.msra.mxu0 %v6111_v17  ;;  %6144 = vmatpush3.bf16.msra.mxu1 %v6143_v20  ;;  %v1073_v17 = vld [vmem:[#allocation40 + $0xf8] sm:$0xff]  ;;  %v1104_v20 = vld [vmem:[#allocation40 + $0x1f0] sm:$0xff] }
0x1086   :  { %6114 = vmatprep.subr.bf16.mxu0 %v6113_v21  ;;  %6146 = vmatprep.subr.bf16.mxu1 %v6145_v23  ;;  %v6129_v26 = vpack.c.bf16 %v1073_v17, %v1072_v15  ;;  %v1056_v21 = vld [vmem:[#allocation40 + $0x70] sm:$0xff]  ;;  %v1057_v23 = vld [vmem:[#allocation40 + $0x78] sm:$0xff]  ;;  %v6161_v2 = vpack.c.bf16 %v1105_v29, %v1104_v20 }
0x1087   :  { %v6131_v4 = vpack.c.bf16 %v1057_v23, %v1056_v21  ;;  %v1112_v20 = vld [vmem:[#allocation49 + $0x8] sm:$0xff]  ;;  %v1111_v29 = vld [vmem:[#allocation49] sm:$0xff]  ;;  %v1113_v23 = vld [vmem:[#allocation49 + $0x10] sm:$0xff] }
0x1088   :  { %v6231_v7 = vpack.c.bf16 %v1113_v23, %v1111_v29  ;;  %v1154_v29 = vld [vmem:[#allocation49 + $0x158] sm:$0xff] }
0x1089   :  { %6116 = vmatpush3.bf16.msra.mxu0 %v6115_v19  ;;  %6148 = vmatpush3.bf16.msra.mxu1 %v6147_v43  ;;  %v3260_v19 = vrot.slane %v1041_v16, %v7805_v25  ;;  %v3268_v43 = vrot.slane %v1041_v16, %v7813_v35  ;;  %v1120_v16 = vld [vmem:[#allocation49 + $0x48] sm:$0xff] }
0x108a   :  { %6118 = vmatprep.subr.bf16.mxu0 %v6117_v32  ;;  %6150 = vmatprep.subr.bf16.mxu1 %v6149_v34 }
0x108d   :  { %6120 = vmatpush3.bf16.msra.mxu0 %v6119_v55  ;;  %6152 = vmatpush3.bf16.msra.mxu1 %v6151_v56 }
0x108e   :  { %6122 = vmatprep.subr.bf16.mxu0 %v6121_v40  ;;  %6154 = vmatprep.subr.bf16.mxu1 %v6153_v46 }
0x1091   :  { %6124 = vmatpush3.bf16.msra.mxu0 %v6123_v12  ;;  %6156 = vmatpush3.bf16.msra.mxu1 %v6155_v61 }
0x1092   :  { %6126 = vmatprep.subr.bf16.mxu0 %v6125_v62  ;;  %6158 = vmatprep.subr.bf16.mxu1 %v6157_v63 }
0x1095   :  { %6128 = vmatpush3.bf16.msra.mxu0 %v6127_v9  ;;  %6160 = vmatpush3.bf16.msra.mxu1 %v6159_v14 }
0x1096   :  { %6130 = vmatprep.subr.bf16.mxu0 %v6129_v26  ;;  %6162 = vmatprep.subr.bf16.mxu1 %v6161_v2  ;;  %v1114_v26 = vld [vmem:[#allocation49 + $0x18] sm:$0xff]  ;;  %v1116_v2 = vld [vmem:[#allocation49 + $0x28] sm:$0xff] }
0x1097   :  { %v6229_v21 = vpack.c.bf16 %v1114_v26, %v1112_v20  ;;  %v1149_v20 = vld [vmem:[#allocation49 + $0x130] sm:$0xff]  ;;  %v1152_v26 = vld [vmem:[#allocation49 + $0x148] sm:$0xff] }
0x1098   :  { %v6269_v23 = vpack.c.bf16 %v1154_v29, %v1152_v26  ;;  %v1198_v26 = vld [vmem:[#allocation52 + $0xb0] sm:$0xff]  ;;  %v1199_v29 = vld [vmem:[#allocation52 + $0xb8] sm:$0xff] }
0x1099   :  { %6132 = vmatpush3.bf16.msra.mxu0 %v6131_v4  ;;  %6164 = vmatpush3.bf16.msra.mxu1 %v6163_v13  ;;  %v1118_v4 = vld [vmem:[#allocation49 + $0x38] sm:$0xff]  ;;  %v1115_v13 = vld [vmem:[#allocation49 + $0x20] sm:$0xff] }
0x109a   :  { %6166 = vmatprep.subr.bf16.mxu0 %v7824_v28  ;;  %6198 = vmatprep.subr.bf16.mxu1 %v7824_v28  ;;  %v6233_v10 = vpack.c.bf16 %v1118_v4, %v1116_v2  ;;  %v1151_v2 = vld [vmem:[#allocation49 + $0x140] sm:$0xff]  ;;  %v1153_v4 = vld [vmem:[#allocation49 + $0x150] sm:$0xff] }
0x114e   :  { %v3343_v32 = vpop.f32.mrb[30].mxu0  ;;  %v3420_v34 = vpop.f32.mrb[30].mxu1 }
0x114f   :  { %v3344_v36 = vadd.f32 %v3343_v32, %v3260_v19  ;;  %v3421_v38 = vadd.f32 %v3420_v34, %v3268_v43  ;;  %v3345_v42 = vpop.f32.mrb[31].mxu0  ;;  %v3422_v47 = vpop.f32.mrb[31].mxu1  ;;  %v1124_v32 = vld [vmem:[#allocation49 + $0x68] sm:$0xff]  ;;  %v1126_v34 = vld [vmem:[#allocation49 + $0x78] sm:$0xff] }
0x1150   :  { %v3346_v52 = vadd.f32 %v3345_v42, %v3264_v31  ;;  %v3423_v53 = vadd.f32 %v3422_v47, %v3272_v22  ;;  %v1123_v42 = vld [vmem:[#allocation49 + $0x60] sm:$0xff]  ;;  %v1125_v47 = vld [vmem:[#allocation49 + $0x70] sm:$0xff] }
0x1151   :  { %v3431_v40 = vmax.f32 %v3344_v36, 0.0  ;;  %v3433_v46 = vmax.f32 %v3421_v38, 0.0  ;;  %v6241_v38 = vpack.c.bf16 %v1126_v34, %v1124_v32  ;;  %v1155_v32 = vld [vmem:[#allocation49 + $0x160] sm:$0xff]  ;;  %v1157_v34 = vld [vmem:[#allocation49 + $0x170] sm:$0xff] }
0x1152   :  { %v3432_v55 = vmax.f32 %v3346_v52, 0.0  ;;  %v3434_v56 = vmax.f32 %v3423_v53, 0.0  ;;  %v3349_v57 = vpop.f32.mrb[32].mxu0  ;;  %v3426_v58 = vpop.f32.mrb[32].mxu1  ;;  %v1128_v52 = vld [vmem:[#allocation49 + $0x88] sm:$0xff]  ;;  %v1130_v53 = vld [vmem:[#allocation49 + $0x98] sm:$0xff] }
0x1153   :  { %v3350_v35 = vadd.f32 %v3349_v57, %v3260_v19  ;;  %v3427_v39 = vadd.f32 %v3426_v58, %v3268_v43  ;;  %v3351_v18 = vpop.f32.mrb[33].mxu0  ;;  %v3428_v54 = vpop.f32.mrb[33].mxu1  ;;  %v1122_v19 = vld [vmem:[#allocation49 + $0x58] sm:$0xff]  ;;  %v1127_v57 = vld [vmem:[#allocation49 + $0x80] sm:$0xff]  ;;  %v1129_v58 = vld [vmem:[#allocation49 + $0x90] sm:$0xff] }
0x1154   :  { %v3352_v24 = vadd.f32 %v3351_v18, %v3264_v31  ;;  %v3429_v59 = vadd.f32 %v3428_v54, %v3272_v22  ;;  %3509 = vmatprep.mubr.f32.mxu0 %v3432_v55  ;;  %3584 = vmatprep.mubr.f32.mxu1 %v3434_v56  ;;  %v1119_v31 = vld [vmem:[#allocation49 + $0x40] sm:$0xff]  ;;  %v1121_v22 = vld [vmem:[#allocation49 + $0x50] sm:$0xff]  ;;  %v6243_v55 = vpack.c.bf16 %v1125_v47, %v1123_v42 }
0x1155   :  { %3510 = vmatmul.mubr.f32.vlgmr.msra.gmra.mrb[34].mxu0 %v3431_v40  ;;  %3585 = vmatmul.mubr.f32.vlgmr.msra.gmra.mrb[34].mxu1 %v3433_v46  ;;  %v3435_v60 = vmax.f32 %v3350_v35, 0.0  ;;  %v3437_v12 = vmax.f32 %v3427_v39, 0.0  ;;  %v6239_v36 = vpack.c.bf16 %v1121_v22, %v1119_v31  ;;  %v6245_v56 = vpack.c.bf16 %v1130_v53, %v1128_v52  ;;  %v1132_v40 = vld [vmem:[#allocation49 + $0xa8] sm:$0xff]  ;;  %v1134_v46 = vld [vmem:[#allocation49 + $0xb8] sm:$0xff]  ;;  %v1131_v18 = vld [vmem:[#allocation49 + $0xa0] sm:$0xff] }
0x1156   :  { %v3436_v5 = vmax.f32 %v3352_v24, 0.0  ;;  %v3438_v44 = vmax.f32 %v3429_v59, 0.0  ;;  %6168 = vmatpush3.bf16.msra.mxu0 %v7824_v28  ;;  %6200 = vmatpush3.bf16.msra.mxu1 %v7824_v28  ;;  %v6247_v35 = vpack.c.bf16 %v1129_v58, %v1127_v57  ;;  %v6249_v39 = vpack.c.bf16 %v1134_v46, %v1132_v40  ;;  %v1133_v54 = vld [vmem:[#allocation49 + $0xb0] sm:$0xff]  ;;  %v1136_v24 = vld [vmem:[#allocation49 + $0xc8] sm:$0xff]  ;;  %v1138_v59 = vld [vmem:[#allocation49 + $0xd8] sm:$0xff] }
0x1157   :  { %6170 = vmatprep.subr.bf16.mxu0 %v7826_v30  ;;  %6202 = vmatprep.subr.bf16.mxu1 %v7826_v30  ;;  %v1158_v31 = vld [vmem:[#allocation49 + $0x178] sm:$0xff]  ;;  %v1159_v42 = vld [vmem:[#allocation49 + $0x180] sm:$0xff]  ;;  %v1161_v47 = vld [vmem:[#allocation49 + $0x190] sm:$0xff] }
0x1158   :  { %3514 = vmatprep.mubr.f32.mxu0 %v3436_v5  ;;  %3589 = vmatprep.mubr.f32.mxu1 %v3438_v44  ;;  %v6251_v5 = vpack.c.bf16 %v1133_v54, %v1131_v18  ;;  %v6253_v44 = vpack.c.bf16 %v1138_v59, %v1136_v24  ;;  %v6279_v52 = vpack.c.bf16 %v1161_v47, %v1159_v42  ;;  %v1164_v53 = vld [vmem:[#allocation49 + $0x1a8] sm:$0xff]  ;;  %v1165_v58 = vld [vmem:[#allocation49 + $0x1b0] sm:$0xff]  ;;  %v1170_v46 = vld [vmem:[#allocation49 + $0x1d8] sm:$0xff] }
0x1159   :  { %3515 = vmatmul.mubr.f32.gmra.mrb[36].mxu0 %v3435_v60  ;;  %3590 = vmatmul.mubr.f32.gmra.mrb[36].mxu1 %v3437_v12  ;;  %v1135_v60 = vld [vmem:[#allocation49 + $0xc0] sm:$0xff]  ;;  %v1137_v12 = vld [vmem:[#allocation49 + $0xd0] sm:$0xff]  ;;  %v1168_v40 = vld [vmem:[#allocation49 + $0x1c8] sm:$0xff] }
0x115a   :  { %6172 = vmatpush3.bf16.msra.mxu0 %v7826_v30  ;;  %6204 = vmatpush3.bf16.msra.mxu1 %v7826_v30  ;;  %v1167_v18 = vld [vmem:[#allocation49 + $0x1c0] sm:$0xff]  ;;  %v1169_v54 = vld [vmem:[#allocation49 + $0x1d0] sm:$0xff]  ;;  %v1172_v24 = vld [vmem:[#allocation49 + $0x1e8] sm:$0xff] }
0x115b   :  { %6174 = vmatprep.subr.bf16.mxu0 %v7832_v33  ;;  %6206 = vmatprep.subr.bf16.mxu1 %v7832_v33  ;;  %v1174_v59 = vld [vmem:[#allocation49 + $0x1f8] sm:$0xff] }
0x115e   :  { %6176 = vmatpush3.bf16.msra.mxu0 %v7832_v33  ;;  %6208 = vmatpush3.bf16.msra.mxu1 %v7832_v33  ;;  %v4091_v33 = vld [vmem:[#allocation41] ss:$0 sm:$0xff] }
0x115f   :  { %6178 = vmatprep.subr.bf16.mxu0 %v7836_v37  ;;  %6210 = vmatprep.subr.bf16.mxu1 %v7836_v37 }
0x1162   :  { %6180 = vmatpush3.bf16.msra.mxu0 %v7836_v37  ;;  %6212 = vmatpush3.bf16.msra.mxu1 %v7836_v37 }
0x1163   :  { %6182 = vmatprep.subr.bf16.mxu0 %v7840_v41  ;;  %6214 = vmatprep.subr.bf16.mxu1 %v7840_v41 }
0x1166   :  { %6184 = vmatpush3.bf16.msra.mxu0 %v7840_v41  ;;  %6216 = vmatpush3.bf16.msra.mxu1 %v7840_v41 }
0x1167   :  { %6186 = vmatprep.subr.bf16.mxu0 %v7844_v45  ;;  %6218 = vmatprep.subr.bf16.mxu1 %v7844_v45 }
0x116a   :  { %6188 = vmatpush3.bf16.msra.mxu0 %v7844_v45  ;;  %6220 = vmatpush3.bf16.msra.mxu1 %v7844_v45 }
0x116b   :  { %6190 = vmatprep.subr.bf16.mxu0 %v7848_v51  ;;  %6222 = vmatprep.subr.bf16.mxu1 %v7848_v51 }
0x116e   :  { %6192 = vmatpush3.bf16.msra.mxu0 %v7848_v51  ;;  %6224 = vmatpush3.bf16.msra.mxu1 %v7848_v51 }
0x116f   :  { %6194 = vmatprep.subr.bf16.mxu0 %v7874_v49  ;;  %6226 = vmatprep.subr.bf16.mxu1 %v7874_v49 }
0x1172   :  { %6196 = vmatpush3.bf16.msra.mxu0 %v7874_v49  ;;  %6228 = vmatpush3.bf16.msra.mxu1 %v7874_v49 }
0x1173   :  { %6230 = vmatprep.subr.bf16.mxu0 %v6229_v21 }
0x1228   :  { %v4564_v28 = vpop.f32.mrb[34].mxu0  ;;  %v4602_v30 = vpop.f32.mrb[34].mxu1 }
0x1229   :  { %v4565_v37 = vpop.f32.mrb[35].mxu0  ;;  %v4603_v41 = vpop.f32.mrb[35].mxu1 }
0x122a   :  { %v4566_v45 = vadd.f32 %v4565_v37, %v4564_v28  ;;  %v4604_v61 = vadd.f32 %v4603_v41, %v4602_v30  ;;  %v1140_v28 = vld [vmem:[#allocation49 + $0xe8] sm:$0xff]  ;;  %v1142_v30 = vld [vmem:[#allocation49 + $0xf8] sm:$0xff]  ;;  %v1139_v41 = vld [vmem:[#allocation49 + $0xe0] sm:$0xff] }
0x122b   :  { %v6257_v37 = vpack.c.bf16 %v1142_v30, %v1140_v28  ;;  %v1192_v30 = vld [vmem:[#allocation52 + $0x80] sm:$0xff] }
0x122c   :  { %v3512_v62 = vadd.f32 %v4566_v45, %v4091_v33  ;;  %v4567_v63 = vpop.f32.mrb[36].mxu0  ;;  %v4605_v3 = vpop.f32.mrb[36].mxu1  ;;  %v1141_v45 = vld [vmem:[#allocation49 + $0xf0] sm:$0xff] }
0x122d   :  { %v4568_v6 = vpop.f32.mrb[37].mxu0  ;;  %v4606_v51 = vpop.f32.mrb[37].mxu1 }
0x122e   :  { %v3587_v8 = vadd.f32 %v4604_v61, %v3512_v62  ;;  %v4569_v9 = vadd.f32 %v4568_v6, %v4567_v63  ;;  %v4607_v11 = vadd.f32 %v4606_v51, %v4605_v3  ;;  %v1144_v61 = vld [vmem:[#allocation49 + $0x108] sm:$0xff]  ;;  %v1146_v62 = vld [vmem:[#allocation49 + $0x118] sm:$0xff]  ;;  %v6259_v63 = vpack.c.bf16 %v1141_v45, %v1139_v41  ;;  %v1143_v6 = vld [vmem:[#allocation49 + $0x100] sm:$0xff] }
0x122f   :  { %v6261_v3 = vpack.c.bf16 %v1146_v62, %v1144_v61  ;;  %v1145_v51 = vld [vmem:[#allocation49 + $0x110] sm:$0xff]  ;;  %v1195_v62 = vld [vmem:[#allocation52 + $0x98] sm:$0xff] }
0x1230   :  { %v3517_v14 = vadd.f32 %v4569_v9, %v4091_v33  ;;  %v8111_v15 = vadd.f32 %v3587_v8, %v8062_v48  ;;  %v1117_v48 = vld [vmem:[#allocation49 + $0x30] sm:$0xff]  ;;  %v6255_v33 = vpack.c.bf16 %v1137_v12, %v1135_v60  ;;  %v1148_v8 = vld [vmem:[#allocation49 + $0x128] sm:$0xff]  ;;  %v1150_v9 = vld [vmem:[#allocation49 + $0x138] sm:$0xff] }
0x1231   :  { %v6235_v43 = vpack.c.bf16 %v1117_v48, %v1115_v13  ;;  %v1171_v60 = vld [vmem:[#allocation49 + $0x1e0] sm:$0xff]  ;;  %v1173_v12 = vld [vmem:[#allocation49 + $0x1f0] sm:$0xff] }
0x1232   :  { %v3592_v49 = vadd.f32 %v4607_v11, %v3517_v14  ;;  %5225 = vmatprep.mubr.f32.mxu0 %v8111_v15  ;;  %v6263_v11 = vpack.c.bf16 %v1145_v51, %v1143_v6  ;;  %v6265_v14 = vpack.c.bf16 %v1150_v9, %v1148_v8  ;;  %v6291_v28 = vpack.c.bf16 %v1173_v12, %v1171_v60  ;;  %v1177_v45 = vld [vmem:[#allocation52 + $0x8] sm:$0xff]  ;;  %v1194_v61 = vld [vmem:[#allocation52 + $0x90] sm:$0xff]  ;;  %v1179_v51 = vld [vmem:[#allocation52 + $0x18] sm:$0xff] }
0x1233   :  { %v1178_v6 = vld [vmem:[#allocation52 + $0x10] sm:$0xff]  ;;  %v1196_v8 = vld [vmem:[#allocation52 + $0xa0] sm:$0xff]  ;;  %v1197_v9 = vld [vmem:[#allocation52 + $0xa8] sm:$0xff] }
0x1234   :  { %v8115_v17 = vadd.f32 %v3592_v49, %v8068_v50  ;;  %v6237_v50 = vpack.c.bf16 %v1122_v19, %v1120_v16  ;;  %v1147_v49 = vld [vmem:[#allocation49 + $0x120] sm:$0xff]  ;;  %v1206_v12 = vld [vmem:[#allocation52 + $0xf0] sm:$0xff] }
0x1235   :  { %v6267_v21 = vpack.c.bf16 %v1149_v20, %v1147_v49  ;;  %v1180_v49 = vld [vmem:[#allocation52 + $0x20] sm:$0xff]  ;;  %v1181_v20 = vld [vmem:[#allocation52 + $0x28] sm:$0xff] }
0x1236   :  { %5226 = vmatmul.mubr.f32.vlgmr.msra.gmra.mrb[38].mxu0 %v8115_v17 }
0x1237   :  { %6232 = vmatpush1.bf16.msra.mxu0 %v6231_v7  ;;  %v6271_v7 = vpack.c.bf16 %v1153_v4, %v1151_v2  ;;  %v1182_v2 = vld [vmem:[#allocation52 + $0x30] sm:$0xff]  ;;  %v1183_v4 = vld [vmem:[#allocation52 + $0x38] sm:$0xff] }
0x1238   :  { %6234 = vmatprep.subr.bf16.mxu0 %v6233_v10 }
0x123b   :  { %6236 = vmatpush1.bf16.msra.mxu0 %v6235_v43 }
0x123c   :  { %6238 = vmatprep.subr.bf16.mxu0 %v6237_v50  ;;  %v1156_v50 = vld [vmem:[#allocation49 + $0x168] sm:$0xff] }
0x123d   :  { %v6273_v22 = vpack.c.bf16 %v1158_v31, %v1156_v50  ;;  %v1185_v50 = vld [vmem:[#allocation52 + $0x48] sm:$0xff]  ;;  %v1202_v31 = vld [vmem:[#allocation52 + $0xd0] sm:$0xff] }
0x123f   :  { %6240 = vmatpush1.bf16.msra.mxu0 %v6239_v36  ;;  %v6275_v36 = vpack.c.bf16 %v1157_v34, %v1155_v32 }
0x1240   :  { %6242 = vmatprep.subr.bf16.mxu0 %v6241_v38  ;;  %v1162_v38 = vld [vmem:[#allocation49 + $0x198] sm:$0xff] }
0x1243   :  { %6244 = vmatpush1.bf16.msra.mxu0 %v6243_v55  ;;  %v1166_v55 = vld [vmem:[#allocation49 + $0x1b8] sm:$0xff] }
0x1244   :  { %6246 = vmatprep.subr.bf16.mxu0 %v6245_v56  ;;  %v1163_v56 = vld [vmem:[#allocation49 + $0x1a0] sm:$0xff]  ;;  %v6281_v57 = vpack.c.bf16 %v1166_v55, %v1164_v53 }
0x1247   :  { %6248 = vmatpush1.bf16.msra.mxu0 %v6247_v35  ;;  %v6283_v35 = vpack.c.bf16 %v1165_v58, %v1163_v56  ;;  %v4092_v58 = vld [vmem:[#allocation46] ss:$0 sm:$0xff] }
0x1248   :  { %6250 = vmatprep.subr.bf16.mxu0 %v6249_v39  ;;  %v6285_v39 = vpack.c.bf16 %v1170_v46, %v1168_v40 }
0x124b   :  { %6252 = vmatpush1.bf16.msra.mxu0 %v6251_v5  ;;  %v6287_v5 = vpack.c.bf16 %v1169_v54, %v1167_v18 }
0x124c   :  { %6254 = vmatprep.subr.bf16.mxu0 %v6253_v44  ;;  %v6289_v44 = vpack.c.bf16 %v1174_v59, %v1172_v24 }
0x124f   :  { %6256 = vmatpush1.bf16.msra.mxu0 %v6255_v33  ;;  %v1193_v33 = vld [vmem:[#allocation52 + $0x88] sm:$0xff] }
0x1250   :  { %6258 = vmatprep.subr.bf16.mxu0 %v6257_v37  ;;  %v1176_v37 = vld [vmem:[#allocation52] sm:$0xff]  ;;  %v6293_v41 = vpack.c.bf16 %v1193_v33, %v1192_v30  ;;  %v1190_v33 = vld [vmem:[#allocation52 + $0x70] sm:$0xff] }
0x1252   :  { %6294 = vmatprep.subr.bf16.mxu1 %v6293_v41 }
0x1253   :  { %6260 = vmatpush1.bf16.msra.mxu0 %v6259_v63  ;;  %v6295_v63 = vpack.c.bf16 %v1177_v45, %v1176_v37 }
0x1254   :  { %6262 = vmatprep.subr.bf16.mxu0 %v6261_v3  ;;  %v6297_v3 = vpack.c.bf16 %v1195_v62, %v1194_v61 }
0x1257   :  { %6264 = vmatpush1.bf16.msra.mxu0 %v6263_v11  ;;  %v6299_v11 = vpack.c.bf16 %v1179_v51, %v1178_v6  ;;  %v1210_v6 = vld [vmem:[%s7553_s21 + $0x8] sm:$0xff] }
0x1258   :  { %6266 = vmatprep.subr.bf16.mxu0 %v6265_v14  ;;  %v6301_v14 = vpack.c.bf16 %v1197_v9, %v1196_v8 }
0x125b   :  { %6268 = vmatpush1.bf16.msra.mxu0 %v6267_v21  ;;  %v6303_v21 = vpack.c.bf16 %v1181_v20, %v1180_v49  ;;  %v1212_v49 = vld [vmem:[%s7553_s21 + $0x18] sm:$0xff]  ;;  %v1214_v20 = vld [vmem:[%s7553_s21 + $0x28] sm:$0xff] }
0x125c   :  { %6270 = vmatprep.subr.bf16.mxu0 %v6269_v23  ;;  %v6305_v23 = vpack.c.bf16 %v1199_v29, %v1198_v26  ;;  %v1215_v29 = vld [vmem:[%s7553_s21 + $0x30] sm:$0xff] }
0x125f   :  { %6272 = vmatpush1.bf16.msra.mxu0 %v6271_v7  ;;  %v1200_v7 = vld [vmem:[#allocation52 + $0xc0] sm:$0xff] }
0x1260   :  { %6274 = vmatprep.subr.bf16.mxu0 %v6273_v22  ;;  %v1203_v22 = vld [vmem:[#allocation52 + $0xd8] sm:$0xff] }
0x1261   :  { %v6313_v34 = vpack.c.bf16 %v1203_v22, %v1202_v31  ;;  %v1223_v31 = vld [vmem:[%s7553_s21 + $0x70] sm:$0xff]  ;;  %v1224_v22 = vld [vmem:[%s7553_s21 + $0x78] sm:$0xff] }
0x1263   :  { %6276 = vmatpush1.bf16.msra.mxu0 %v6275_v36  ;;  %v1186_v36 = vld [vmem:[#allocation52 + $0x50] sm:$0xff] }
0x1309   :  { %v5227_v10 = vpop.f32.mrb[38].mxu0 }
0x130a   :  { %v8119_v13 = vsub.f32 %v8115_v17, %v5227_v10  ;;  %v3663_v48 = vpop.f32.mrb[39].mxu0  ;;  %v1160_v17 = vld [vmem:[#allocation49 + $0x188] sm:$0xff] }
0x130b   :  { %v8122_v16 = vsub.f32 %v8111_v15, %v3663_v48  ;;  %v6277_v15 = vpack.c.bf16 %v1162_v38, %v1160_v17  ;;  %v1201_v10 = vld [vmem:[#allocation52 + $0xc8] sm:$0xff]  ;;  %v6307_v48 = vpack.c.bf16 %v1183_v4, %v1182_v2  ;;  %v1187_v17 = vld [vmem:[#allocation52 + $0x58] sm:$0xff]  ;;  %v1204_v38 = vld [vmem:[#allocation52 + $0xe0] sm:$0xff] }
0x130c   :  { %v3675_v43 = vmul.f32 %v8119_v13, %v8119_v13  ;;  %v6315_v42 = vpack.c.bf16 %v1187_v17, %v1186_v36  ;;  %v1217_v2 = vld [vmem:[%s7553_s21 + $0x40] sm:$0xff]  ;;  %v4094_v36 = vld [vmem:[#allocation53] ss:$0 sm:$0xff] }
0x130d   :  { %v3674_v19 = vmul.f32 %v8122_v16, %v8122_v16  ;;  %6278 = vmatprep.subr.bf16.mxu0 %v6277_v15  ;;  %v1205_v15 = vld [vmem:[#allocation52 + $0xe8] sm:$0xff] }
0x130e   :  { %6280 = vmatpush1.bf16.msra.mxu0 %v6279_v52  ;;  %v6317_v47 = vpack.c.bf16 %v1205_v15, %v1204_v38 }
0x130f   :  { %5260 = vmatprep.mubr.f32.mxu1 %v3674_v19  ;;  %6282 = vmatprep.subr.bf16.mxu0 %v6281_v57  ;;  %v6309_v19 = vpack.c.bf16 %v1201_v10, %v1200_v7  ;;  %v1219_v7 = vld [vmem:[%s7553_s21 + $0x50] sm:$0xff]  ;;  %v1220_v10 = vld [vmem:[%s7553_s21 + $0x58] sm:$0xff] }
0x1310   :  { %5261 = vmatmul.mubr.f32.vlgmr.msra.gmra.mrb[38].mxu1 %v3675_v43  ;;  %v1184_v43 = vld [vmem:[#allocation52 + $0x40] sm:$0xff] }
0x1311   :  { %6296 = vmatpush3.bf16.msra.mxu1 %v6295_v63  ;;  %v6311_v32 = vpack.c.bf16 %v1185_v50, %v1184_v43  ;;  %v1222_v43 = vld [vmem:[%s7553_s21 + $0x68] sm:$0xff] }
0x1312   :  { %6284 = vmatpush1.bf16.msra.mxu0 %v6283_v35  ;;  %6298 = vmatprep.subr.bf16.mxu1 %v6297_v3  ;;  %v4093_v35 = vld [vmem:[#allocation47] ss:$0 sm:$0xff]  ;;  %v1209_v3 = vld [vmem:[%s7553_s21] sm:$0xff] }
0x1313   :  { %6286 = vmatprep.subr.bf16.mxu0 %v6285_v39  ;;  %v6326_v9 = vpack.c.bf16 %v1210_v6, %v1209_v3 }
0x1315   :  { %6300 = vmatpush3.bf16.msra.mxu1 %v6299_v11 }
0x1316   :  { %6288 = vmatpush1.bf16.msra.mxu0 %v6287_v5  ;;  %6302 = vmatprep.subr.bf16.mxu1 %v6301_v14  ;;  %v1188_v5 = vld [vmem:[#allocation52 + $0x60] sm:$0xff] }
0x1317   :  { %6290 = vmatprep.subr.bf16.mxu0 %v6289_v44  ;;  %v1189_v44 = vld [vmem:[#allocation52 + $0x68] sm:$0xff] }
0x1318   :  { %v6319_v60 = vpack.c.bf16 %v1189_v44, %v1188_v5  ;;  %v1211_v14 = vld [vmem:[%s7553_s21 + $0x10] sm:$0xff] }
0x1319   :  { %6304 = vmatpush3.bf16.msra.mxu1 %v6303_v21  ;;  %v1216_v21 = vld [vmem:[%s7553_s21 + $0x38] sm:$0xff] }
0x131a   :  { %6292 = vmatpush1.bf16.msra.mxu0 %v6291_v28  ;;  %6306 = vmatprep.subr.bf16.mxu1 %v6305_v23  ;;  %v1207_v28 = vld [vmem:[#allocation52 + $0xf8] sm:$0xff]  ;;  %v6335_v23 = vpack.c.bf16 %v1216_v21, %v1215_v29 }
0x131b   :  { %v6321_v30 = vpack.c.bf16 %v1207_v28, %v1206_v12 }
0x131d   :  { %6308 = vmatpush3.bf16.msra.mxu1 %v6307_v48  ;;  %v6341_v48 = vpack.c.bf16 %v1220_v10, %v1219_v7 }
0x131e   :  { %6310 = vmatprep.subr.bf16.mxu1 %v6309_v19  ;;  %v1221_v19 = vld [vmem:[%s7553_s21 + $0x60] sm:$0xff] }
0x131f   :  { %v6344_v50 = vpack.c.bf16 %v1222_v43, %v1221_v19 }
0x1321   :  { %6312 = vmatpush3.bf16.msra.mxu1 %v6311_v32  ;;  %v6347_v32 = vpack.c.bf16 %v1224_v22, %v1223_v31 }
0x1322   :  { %6314 = vmatprep.subr.bf16.mxu1 %v6313_v34 }
0x1325   :  { %6316 = vmatpush3.bf16.msra.mxu1 %v6315_v42 }
0x1326   :  { %6318 = vmatprep.subr.bf16.mxu1 %v6317_v47  ;;  %v4095_v47 = vld [vmem:[%s7558_s5] ss:$0 sm:$0xff] }
0x1329   :  { %6320 = vmatpush3.bf16.msra.mxu1 %v6319_v60 }
0x132a   :  { %6322 = vmatprep.subr.bf16.mxu1 %v6321_v30 }
0x13e3   :  { %v5262_v52 = vpop.f32.mrb[38].mxu1 }
0x13e4   :  { %v3748_v53 = vadd.f32 1e-05, %v5262_v52  ;;  %v3742_v55 = vpop.f32.mrb[39].mxu1 }
0x13e5   :  { %v3743_v56 = vadd.f32 1e-05, %v3742_v55 }
0x13e6   :  { %6469 = vrsqrt.f32 %v3748_v53 }
0x13e7   :  { %6471 = vrsqrt.f32 %v3743_v56 }
0x13f0   :  { %v6470_v57 = vpop.eup %6469 }
0x13f1   :  { %v6472_v40 = vpop.eup %6471  ;;  %v3754_v46 = vmul.f32 %v6470_v57, %v8119_v13  ;;  %v1191_v13 = vld [vmem:[#allocation52 + $0x78] sm:$0xff] }
0x13f2   :  { %v3753_v39 = vmul.f32 %v6472_v40, %v8122_v16  ;;  %v6323_v37 = vpack.c.bf16 %v1191_v13, %v1190_v33  ;;  %v1175_v16 = vld [vmem:[#allocation50] sm:$0x3] }
0x13f3   :  { %v3762_v18 = vmul.f32 %v4092_v58, %v3754_v46  ;;  %v3775_v41 = vrot.slane %v1175_v16, %v7805_v25  ;;  %v3779_v45 = vrot.slane %v1175_v16, %v7808_v27  ;;  %v6329_v25 = vpack.c.bf16 %v1212_v49, %v1211_v14  ;;  %v1213_v27 = vld [vmem:[%s7553_s21 + $0x20] sm:$0xff] }
0x13f4   :  { %v3761_v54 = vmul.f32 %v4092_v58, %v3753_v39  ;;  %6324 = vmatpush3.bf16.msra.mxu1 %v6323_v37  ;;  %v6332_v26 = vpack.c.bf16 %v1214_v20, %v1213_v27 }
0x13f5   :  { %v3770_v24 = vadd.f32 %v4093_v35, %v3762_v18  ;;  %6325 = vmatprep.subr.bf16.mxu1 %v7361_v0 }
0x13f6   :  { %v3769_v59 = vadd.f32 %v4093_v35, %v3761_v54 }
0x13f7   :  { %3846 = vmatprep.mubr.f32.mxu0 %v3770_v24 }
0x13f8   :  { %3847 = vmatmul.mubr.f32.vlgmr.msra.gmra.mrb[40].mxu0 %v3769_v59 }
0x14cb   :  { %v3848_v61 = vpop.f32.mrb[40].mxu0 }
0x14cc   :  { %v3849_v62 = vadd.f32 %v3848_v61, %v3775_v41  ;;  %v3850_v63 = vpop.f32.mrb[41].mxu0 }
0x14cd   :  { %v3851_v51 = vadd.f32 %v3850_v63, %v3779_v45 }
0x14ce   :  { %v3853_v11 = vmax.f32 %v3849_v62, 0.0 }
0x14cf   :  { %v3854_v8 = vmax.f32 %v3851_v51, 0.0 }
0x14d1   :  { %3925 = vmatprep.mubr.f32.mxu1 %v3854_v8 }
0x14d2   :  { %3926 = vmatmul.mubr.f32.vlgmr.msra.gmra.mrb[40].mxu1 %v3853_v11 }
0x14d3   :  { %6327 = vmatpush3.bf16.msra.mxu1 %v6326_v9  ;;  %5295 = vmatprep.mubr.msk.f32.mxu1 %vm7362_vm0, %v7363_v1  ;;  %v1218_v1 = vld [vmem:[%s7553_s21 + $0x48] sm:$0xff] }
0x14d4   :  { %6328 = vmatprep.subr.bf16.mxu1 %v7361_v0  ;;  %v6338_v4 = vpack.c.bf16 %v1218_v1, %v1217_v2 }
0x14d7   :  { %6330 = vmatpush3.bf16.msra.mxu1 %v6329_v25 }
0x14d8   :  { %6331 = vmatprep.subr.bf16.mxu1 %v7361_v0 }
0x14db   :  { %6333 = vmatpush3.bf16.msra.mxu1 %v6332_v26 }
0x14dc   :  { %6334 = vmatprep.subr.bf16.mxu1 %v7361_v0 }
0x14df   :  { %6336 = vmatpush3.bf16.msra.mxu1 %v6335_v23 }
0x14e0   :  { %6337 = vmatprep.subr.bf16.mxu1 %v7361_v0 }
0x14e3   :  { %6339 = vmatpush3.bf16.msra.mxu1 %v6338_v4 }
0x14e4   :  { %6340 = vmatprep.subr.bf16.mxu1 %v7361_v0 }
0x14e7   :  { %6342 = vmatpush3.bf16.msra.mxu1 %v6341_v48 }
0x14e8   :  { %6343 = vmatprep.subr.bf16.mxu1 %v7361_v0 }
0x14eb   :  { %6345 = vmatpush3.bf16.msra.mxu1 %v6344_v50 }
0x14ec   :  { %6346 = vmatprep.subr.bf16.mxu1 %v7361_v0 }
0x14ef   :  { %6348 = vmatpush3.bf16.msra.mxu1 %v6347_v32 }
0x15a5   :  { %v4676_v34 = vpop.f32.mrb[40].mxu1 }
0x15a6   :  { %v4677_v17 = vpop.f32.mrb[41].mxu1 }
0x15a7   :  { %v4678_v38 = vadd.f32 %v4677_v17, %v4676_v34 }
0x15a9   :  { %v3928_v15 = vadd.f32 %v4678_v38, %v4094_v36 }
0x15ab   :  { %v3931_v42 = vmax.f32 %v3928_v15, 0.0 }
0x15ad   :  { %5296 = vmatmul.mubr.f32.vlgmr.msra.gmra.mrb[42].mxu1 %v3931_v42 }
0x1680   :  { %v4004_v52 = vpop.f32.mrb[42].mxu1 }
0x1681   :  { %v4005_v53 = vadd.f32 %v4095_v47, %v4004_v52  ;;  %v5297_v55 = vpop.f32.mrb[43].mxu1 }
0x1683   :  { %4008 = vst [vmem:[#allocation55] sm:$0xff] %v4005_v53 }
0x1684   :  { %7232 = shalt.err (!%p7229_p10)
}
0x1685   :  { %s7233_s21 = scalar_lea.hbm %s7563_s29, 128 }
0x1686   :  { %p7234_p11 = scmp.ne.s32.totalorder %s7563_s29, %s7233_s21  ;;  %p7237_p12 = scmp.lt.u32.totalorder %s7233_s21, %s7563_s29 }
0x1688   :  { %p7239_p13 = pnand %p7237_p12, %p7234_p11 }
0x168a   :  { %7242 = shalt.err (!%p7239_p13)
}
0x168b   :  { %4018 = dma.vmem_to_hbm [thread:$0]  %s4016_s12, 128, %s7563_s29, [#allocation4]  }
0x168c   :  { %7279 = dma.done.wait [#allocation4], 128  }
0x168d   :  { %7280 = vsyncadd [#allocation4], 4294967168 }
0x168e   :  { %4022 = vsyncpa [#allocation3], 1 }
0x168f   :  { %4023 = vsyncpa [#allocation6], 1 }
0x1690   :  { %4024 = vsyncpa [#allocation9], 1 }
0x1691   :  { %4025 = vsyncpa [#allocation12], 1 }
0x1692   :  { %4026 = vsyncpa [#allocation15], 1 }
0x1693   :  { %4027 = vsyncpa [#allocation18], 1 }
0x1694   :  { %4028 = vsyncpa [#allocation21], 1 }
0x1695   :  { %4029 = vsyncpa [#allocation24], 1 }
0x1696   :  { %4030 = vsyncpa [#allocation27], 1 }
0x1697   :  { %4031 = vsyncpa [#allocation30], 1 }
0x1698   :  { %4032 = vsyncpa [#allocation33], 1 }
0x1699   :  { %4033 = vsyncpa [#allocation36], 1 }
0x169a   :  { %4034 = vsyncpa [#allocation39], 1 }
0x169b   :  { %4035 = vsyncpa [#allocation42], 1 }
0x169c   :  { %4036 = vsyncpa [#allocation45], 1 }
0x169d   :  { %4037 = vsyncpa [#allocation48], 1 }
0x169e   :  { %4038 = vsyncpa [#allocation51], 1 }
0x169f   :  { %4039 = vsyncpa [#allocation54], 1 }
0x16a0   :  { %4040 = vsyncpa [#allocation4], 1 }

</bundles_post_ra>
